<compile_context>
chip_gen: v6e
topology: v6e:2x2x1
jax: 0.10.0
libtpu: 0.0.40
codegen_flags: <defaults>
</compile_context>

<pallas_src>
import functools

import jax
import jax.numpy as jnp
from jax.experimental import pallas as pl
from jax.experimental.pallas import tpu as pltpu

BN_EPS = 1e-5


# ----------------------------- Pallas kernels ------------------------------

def _gemm_bn_kernel(a_ref, b_ref, scale_ref, bias_ref, o_ref, *, relu):
    # bf16 x bf16 -> f32 accumulate on the MXU; f32 epilogue on the VPU.
    acc = jnp.dot(a_ref[...], b_ref[...], preferred_element_type=jnp.float32)
    y = acc * scale_ref[...] + bias_ref[...]
    if relu:
        y = jnp.maximum(y, 0.0)
    o_ref[...] = y.astype(o_ref.dtype)


def _gemm_bn_res_kernel(a_ref, b_ref, scale_ref, bias_ref, res_ref, o_ref, *, relu):
    acc = jnp.dot(a_ref[...], b_ref[...], preferred_element_type=jnp.float32)
    y = acc * scale_ref[...] + bias_ref[...] + res_ref[...]
    if relu:
        y = jnp.maximum(y, 0.0)
    o_ref[...] = y.astype(o_ref.dtype)


def _maxpool_kernel(x_ref, o_ref):
    # x_ref block: (K*K, TM, C) -> elementwise max chain over the leading tap axis (VPU only).
    acc = x_ref[0]
    for t in range(1, x_ref.shape[0]):
        acc = jnp.maximum(acc, x_ref[t])
    o_ref[...] = acc


# ----------------------------- kernel wrappers ------------------------------

def _pick_tm(m):
    for tm in (256, 128, 64, 32, 16, 8):
        if m % tm == 0:
            return tm
    return m


def _pick_tn(n):
    # Tile wide outputs so the weight block stays small and the grid gets a >=2 parallel axis.
    for tn in (256, 128):
        if n > tn and n % tn == 0:
            return tn
    return n


def gemm_bn(a, b, scale, bias, residual=None, relu=True):
    """out = relu?(a @ b * scale + bias [+ residual]).

    a:(M,K) bf16, b:(K,N) bf16, scale/bias:(1,N) f32, residual:(M,N) f32, out:(M,N) f32.
    Grid is (M/tm, N/tn), both axes "parallel" (megacore / v7x friendly).
    """
    m, k = a.shape
    _, n = b.shape
    tm = _pick_tm(m)
    tn = _pick_tn(n)

    a_spec = pl.BlockSpec((tm, k), lambda i, j: (i, 0))
    b_spec = pl.BlockSpec((k, tn), lambda i, j: (0, j))
    s_spec = pl.BlockSpec((1, tn), lambda i, j: (0, j))
    o_spec = pl.BlockSpec((tm, tn), lambda i, j: (i, j))

    if residual is None:
        kernel = functools.partial(_gemm_bn_kernel, relu=relu)
        in_specs = [a_spec, b_spec, s_spec, s_spec]
        args = (a, b, scale, bias)
    else:
        kernel = functools.partial(_gemm_bn_res_kernel, relu=relu)
        in_specs = [a_spec, b_spec, s_spec, s_spec, o_spec]
        args = (a, b, scale, bias, residual)

    return pl.pallas_call(
        kernel,
        grid=(m // tm, n // tn),
        in_specs=in_specs,
        out_specs=o_spec,
        out_shape=jax.ShapeDtypeStruct((m, n), jnp.float32),
        compiler_params=pltpu.CompilerParams(
            dimension_semantics=("parallel", "parallel")),
    )(*args)


def _im2col(x, kh, kw, stride, pad):
    """x: (N,H,W,C) NHWC -> patches (N*OH*OW, KH*KW*C) in (kh, kw, cin) order."""
    n, h, w, c = x.shape
    xp = jnp.pad(x, ((0, 0), (pad, pad), (pad, pad), (0, 0)))
    oh = (h + 2 * pad - kh) // stride + 1
    ow = (w + 2 * pad - kw) // stride + 1
    cols = []
    for i in range(kh):
        for j in range(kw):
            cols.append(xp[:, i:i + stride * oh:stride, j:j + stride * ow:stride, :])
    patches = jnp.stack(cols, axis=3)          # (N, OH, OW, KH*KW, C)
    return patches.reshape(n * oh * ow, kh * kw * c), (n, oh, ow)


def conv_bn(x, weight, bn, stride=1, pad=0, relu=True, residual=None):
    """Conv2d (no bias) + eval-mode BN (+ residual) (+ ReLU).

    x: (N,H,W,Cin) NHWC f32; weight: PyTorch layout (Cout, Cin, KH, KW) f32.
    Matmul operands are cast to bf16; BN fold / epilogue stay in f32.
    """
    cout, cin, kh, kw = weight.shape
    # Cast before im2col so the materialized patch tensor is half the bytes.
    a, (n, oh, ow) = _im2col(x.astype(jnp.bfloat16), kh, kw, stride, pad)
    w2 = jnp.transpose(weight, (2, 3, 1, 0)).reshape(kh * kw * cin, cout)
    w2 = w2.astype(jnp.bfloat16)
    gamma, beta, mean, var = bn
    inv_std = gamma / jnp.sqrt(var + BN_EPS)
    scale = inv_std.reshape(1, cout).astype(jnp.float32)
    bias = (beta - mean * inv_std).reshape(1, cout).astype(jnp.float32)
    res = None
    if residual is not None:
        res = residual.reshape(n * oh * ow, cout).astype(jnp.float32)
    out = gemm_bn(a, w2, scale, bias, residual=res, relu=relu)
    return out.reshape(n, oh, ow, cout)


def maxpool_3x3_s2(x):
    """MaxPool2d(kernel_size=3, stride=2, padding=1) on NHWC input, via a Pallas VPU max chain."""
    n, h, w, c = x.shape
    k, stride, pad = 3, 2, 1
    neg = jnp.finfo(x.dtype).min
    xp = jnp.pad(x, ((0, 0), (pad, pad), (pad, pad), (0, 0)), constant_values=neg)
    oh = (h + 2 * pad - k) // stride + 1
    ow = (w + 2 * pad - k) // stride + 1
    cols = []
    for i in range(k):
        for j in range(k):
            cols.append(xp[:, i:i + stride * oh:stride, j:j + stride * ow:stride, :])
    # Taps on the leading axis -> kernel reduces with elementwise max over (tm, C) tiles.
    taps = jnp.stack(cols, axis=0).reshape(k * k, n * oh * ow, c)
    m = n * oh * ow
    tm = _pick_tm(m)
    out = pl.pallas_call(
        _maxpool_kernel,
        grid=(m // tm,),
        in_specs=[pl.BlockSpec((k * k, tm, c), lambda i: (0, i, 0))],
        out_specs=pl.BlockSpec((tm, c), lambda i: (i, 0)),
        out_shape=jax.ShapeDtypeStruct((m, c), x.dtype),
        compiler_params=pltpu.CompilerParams(dimension_semantics=("parallel",)),
    )(taps)
    return out.reshape(n, oh, ow, c)


# ----------------------------- parameters -----------------------------------

def make_params(key):
    keys = iter(jax.random.split(key, 256))

    def conv_w(cout, cin, k):
        fan_in = cin * k * k
        return jax.random.normal(next(keys), (cout, cin, k, k), jnp.float32) * (fan_in ** -0.5)

    def bn_p(c):
        g = 1.0 + 0.1 * jax.random.normal(next(keys), (c,), jnp.float32)
        b = 0.1 * jax.random.normal(next(keys), (c,), jnp.float32)
        m = 0.1 * jax.random.normal(next(keys), (c,), jnp.float32)
        v = jax.random.uniform(next(keys), (c,), jnp.float32, minval=0.5, maxval=1.5)
        return (g, b, m, v)

    def block(cin, cout, stride):
        blk = {
            "conv1_w": conv_w(cout, cin, 3), "bn1": bn_p(cout),
            "conv2_w": conv_w(cout, cout, 3), "bn2": bn_p(cout),
        }
        if stride != 1 or cin != cout:
            blk["down_w"] = conv_w(cout, cin, 1)
            blk["down_bn"] = bn_p(cout)
        return blk

    p = {
        "conv1_w": conv_w(64, 2, 7),           # PyTorch: resnet18.conv1 weights sliced to 2 ch
        "bn1": bn_p(64),
        "layer1": [block(64, 64, 1), block(64, 64, 1)],
        "layer2": [block(64, 128, 2), block(128, 128, 1)],
        "layer3": [block(128, 256, 2), block(256, 256, 1)],
        "layer4_w": conv_w(1024, 256, 3),
        "layer4_bn": bn_p(1024),
    }
    return p


# ----------------------------- forward ---------------------------------------

def _basic_block(x, blk, stride):
    if "down_w" in blk:
        identity = conv_bn(x, blk["down_w"], blk["down_bn"], stride=stride, pad=0, relu=False)
    else:
        identity = x
    h = conv_bn(x, blk["conv1_w"], blk["bn1"], stride=stride, pad=1, relu=True)
    return conv_bn(h, blk["conv2_w"], blk["bn2"], stride=1, pad=1, relu=True, residual=identity)


def sound_enc_forward(params, x_nchw):
    x = jnp.transpose(x_nchw, (0, 2, 3, 1))                       # NCHW -> NHWC
    x = conv_bn(x, params["conv1_w"], params["bn1"], stride=2, pad=3, relu=True)
    x = maxpool_3x3_s2(x)
    x = _basic_block(x, params["layer1"][0], 1)
    x = _basic_block(x, params["layer1"][1], 1)
    x = _basic_block(x, params["layer2"][0], 2)
    x = _basic_block(x, params["layer2"][1], 1)
    x = _basic_block(x, params["layer3"][0], 2)
    x = _basic_block(x, params["layer3"][1], 1)
    x = conv_bn(x, params["layer4_w"], params["layer4_bn"], stride=1, pad=1, relu=True)
    return jnp.transpose(x, (0, 3, 1, 2))                         # NHWC -> NCHW


# ----------------------------- main ------------------------------------------

if __name__ == "__main__":
    root = jax.random.PRNGKey(0)
    k_params, k_x = jax.random.split(root)
    params = make_params(k_params)

    # Small input consistent with the module: 2-channel "spectrogram", batch=2, 32x32 spatial.
    x = jax.random.normal(k_x, (2, 2, 32, 32), jnp.float32)

    fwd = jax.jit(sound_enc_forward)
    out = fwd(params, x)
    out = jax.block_until_ready(out)

    assert out.shape == (2, 1024, 2, 2), out.shape
    assert jnp.all(jnp.isfinite(out))
    print("KERNEL_OK")
</pallas_src>

<mosaic_0001>
module attributes {stable_mosaic.version = 11 : i64} {
  func.func @_gemm_bn_kernel(%arg0: i32, %arg1: i32, %arg2: memref<256x98xbf16, #tpu.memory_space<vmem>>, %arg3: memref<98x64xbf16, #tpu.memory_space<vmem>>, %arg4: memref<1x64xf32, #tpu.memory_space<vmem>>, %arg5: memref<1x64xf32, #tpu.memory_space<vmem>>, %arg6: memref<256x64xf32, #tpu.memory_space<vmem>>) attributes {dimension_semantics = [#tpu.dimension_semantics<parallel>, #tpu.dimension_semantics<parallel>], iteration_bounds = array<i64: 2, 1>, scalar_prefetch = 0 : i64, scratch_operands = 0 : i64, tpu.core_type = #tpu.core_type<tc>, window_params = [{transform_indices = @transform_0, window_bounds = array<i64: 256, 98>}, {transform_indices = @transform_1, window_bounds = array<i64: 98, 64>}, {transform_indices = @transform_2, window_bounds = array<i64: 1, 64>}, {transform_indices = @transform_3, window_bounds = array<i64: 1, 64>}, {transform_indices = @transform_4, window_bounds = array<i64: 256, 64>}]} {
    %c0 = arith.constant 0 : index
    %c0_0 = arith.constant 0 : index
    %0 = vector.load %arg2[%c0, %c0_0] : memref<256x98xbf16, #tpu.memory_space<vmem>>, vector<256x98xbf16>
    %c0_1 = arith.constant 0 : index
    %c0_2 = arith.constant 0 : index
    %1 = vector.load %arg3[%c0_1, %c0_2] : memref<98x64xbf16, #tpu.memory_space<vmem>>, vector<98x64xbf16>
    %cst = arith.constant dense<0.000000e+00> : vector<256x64xf32>
    %2 = tpu.matmul %0, %1, %cst {dimension_numbers = #tpu.dot_dimension_numbers<[1], [0], [0], [1], [0, 0, 1, 1], [], []>} : vector<256x98xbf16>, vector<98x64xbf16>, vector<256x64xf32> -> vector<256x64xf32>
    %c0_3 = arith.constant 0 : index
    %c0_4 = arith.constant 0 : index
    %3 = vector.load %arg4[%c0_3, %c0_4] : memref<1x64xf32, #tpu.memory_space<vmem>>, vector<1x64xf32>
    %4 = vector.broadcast %3 : vector<1x64xf32> to vector<256x64xf32>
    %5 = arith.mulf %2, %4 : vector<256x64xf32>
    %c0_5 = arith.constant 0 : index
    %c0_6 = arith.constant 0 : index
    %6 = vector.load %arg5[%c0_5, %c0_6] : memref<1x64xf32, #tpu.memory_space<vmem>>, vector<1x64xf32>
    %7 = vector.broadcast %6 : vector<1x64xf32> to vector<256x64xf32>
    %8 = arith.addf %5, %7 : vector<256x64xf32>
    %cst_7 = arith.constant 0.000000e+00 : f32
    %9 = vector.broadcast %cst_7 : f32 to vector<256x64xf32>
    %10 = arith.maximumf %8, %9 : vector<256x64xf32>
    %c0_8 = arith.constant 0 : index
    %c0_9 = arith.constant 0 : index
    %11 = vector.load %arg6[%c0_8, %c0_9] : memref<256x64xf32, #tpu.memory_space<vmem>>, vector<256x64xf32>
    tpu.vector_store %arg6[%c0_8, %c0_9], %10 {strides = array<i32>} : memref<256x64xf32, #tpu.memory_space<vmem>>, vector<256x64xf32>,
    return
  }
  func.func @transform_0(%arg0: i32, %arg1: i32) -> (i32, i32) {
    %c0_i32 = arith.constant 0 : i32
    %c0_i32_0 = arith.constant 0 : i32
    return %arg0, %c0_i32 : i32, i32
  }
  func.func @transform_1(%arg0: i32, %arg1: i32) -> (i32, i32) {
    %c0_i32 = arith.constant 0 : i32
    %c0_i32_0 = arith.constant 0 : i32
    return %c0_i32, %arg1 : i32, i32
  }
  func.func @transform_2(%arg0: i32, %arg1: i32) -> (i32, i32) {
    %c0_i32 = arith.constant 0 : i32
    %c0_i32_0 = arith.constant 0 : i32
    return %c0_i32, %arg1 : i32, i32
  }
  func.func @transform_3(%arg0: i32, %arg1: i32) -> (i32, i32) {
    %c0_i32 = arith.constant 0 : i32
    %c0_i32_0 = arith.constant 0 : i32
    return %c0_i32, %arg1 : i32, i32
  }
  func.func @transform_4(%arg0: i32, %arg1: i32) -> (i32, i32) {
    %c0_i32 = arith.constant 0 : i32
    return %arg0, %arg1 : i32, i32
  }
}

module attributes {stable_mosaic.version = 11 : i64} {
  func.func @_maxpool_kernel(%arg0: i32, %arg1: memref<9x128x64xf32, #tpu.memory_space<vmem>>, %arg2: memref<128x64xf32, #tpu.memory_space<vmem>>) attributes {dimension_semantics = [#tpu.dimension_semantics<parallel>], iteration_bounds = array<i64: 1>, scalar_prefetch = 0 : i64, scratch_operands = 0 : i64, tpu.core_type = #tpu.core_type<tc>, window_params = [{transform_indices = @transform_0, window_bounds = array<i64: 9, 128, 64>}, {transform_indices = @transform_1, window_bounds = array<i64: 128, 64>}]} {
    %c0 = arith.constant 0 : index
    %c0_0 = arith.constant 0 : index
    %c0_1 = arith.constant 0 : index
    %0 = vector.load %arg1[%c0, %c0_0, %c0_1] : memref<9x128x64xf32, #tpu.memory_space<vmem>>, vector<1x128x64xf32>
    %1 = vector.shape_cast %0 : vector<1x128x64xf32> to vector<128x64xf32>
    %c1 = arith.constant 1 : index
    %c0_2 = arith.constant 0 : index
    %c0_3 = arith.constant 0 : index
    %2 = vector.load %arg1[%c1, %c0_2, %c0_3] : memref<9x128x64xf32, #tpu.memory_space<vmem>>, vector<1x128x64xf32>
    %3 = vector.shape_cast %2 : vector<1x128x64xf32> to vector<128x64xf32>
    %4 = arith.maximumf %1, %3 : vector<128x64xf32>
    %c2 = arith.constant 2 : index
    %c0_4 = arith.constant 0 : index
    %c0_5 = arith.constant 0 : index
    %5 = vector.load %arg1[%c2, %c0_4, %c0_5] : memref<9x128x64xf32, #tpu.memory_space<vmem>>, vector<1x128x64xf32>
    %6 = vector.shape_cast %5 : vector<1x128x64xf32> to vector<128x64xf32>
    %7 = arith.maximumf %4, %6 : vector<128x64xf32>
    %c3 = arith.constant 3 : index
    %c0_6 = arith.constant 0 : index
    %c0_7 = arith.constant 0 : index
    %8 = vector.load %arg1[%c3, %c0_6, %c0_7] : memref<9x128x64xf32, #tpu.memory_space<vmem>>, vector<1x128x64xf32>
    %9 = vector.shape_cast %8 : vector<1x128x64xf32> to vector<128x64xf32>
    %10 = arith.maximumf %7, %9 : vector<128x64xf32>
    %c4 = arith.constant 4 : index
    %c0_8 = arith.constant 0 : index
    %c0_9 = arith.constant 0 : index
    %11 = vector.load %arg1[%c4, %c0_8, %c0_9] : memref<9x128x64xf32, #tpu.memory_space<vmem>>, vector<1x128x64xf32>
    %12 = vector.shape_cast %11 : vector<1x128x64xf32> to vector<128x64xf32>
    %13 = arith.maximumf %10, %12 : vector<128x64xf32>
    %c5 = arith.constant 5 : index
    %c0_10 = arith.constant 0 : index
    %c0_11 = arith.constant 0 : index
    %14 = vector.load %arg1[%c5, %c0_10, %c0_11] : memref<9x128x64xf32, #tpu.memory_space<vmem>>, vector<1x128x64xf32>
    %15 = vector.shape_cast %14 : vector<1x128x64xf32> to vector<128x64xf32>
    %16 = arith.maximumf %13, %15 : vector<128x64xf32>
    %c6 = arith.constant 6 : index
    %c0_12 = arith.constant 0 : index
    %c0_13 = arith.constant 0 : index
    %17 = vector.load %arg1[%c6, %c0_12, %c0_13] : memref<9x128x64xf32, #tpu.memory_space<vmem>>, vector<1x128x64xf32>
    %18 = vector.shape_cast %17 : vector<1x128x64xf32> to vector<128x64xf32>
    %19 = arith.maximumf %16, %18 : vector<128x64xf32>
    %c7 = arith.constant 7 : index
    %c0_14 = arith.constant 0 : index
    %c0_15 = arith.constant 0 : index
    %20 = vector.load %arg1[%c7, %c0_14, %c0_15] : memref<9x128x64xf32, #tpu.memory_space<vmem>>, vector<1x128x64xf32>
    %21 = vector.shape_cast %20 : vector<1x128x64xf32> to vector<128x64xf32>
    %22 = arith.maximumf %19, %21 : vector<128x64xf32>
    %c8 = arith.constant 8 : index
    %c0_16 = arith.constant 0 : index
    %c0_17 = arith.constant 0 : index
    %23 = vector.load %arg1[%c8, %c0_16, %c0_17] : memref<9x128x64xf32, #tpu.memory_space<vmem>>, vector<1x128x64xf32>
    %24 = vector.shape_cast %23 : vector<1x128x64xf32> to vector<128x64xf32>
    %25 = arith.maximumf %22, %24 : vector<128x64xf32>
    %c0_18 = arith.constant 0 : index
    %c0_19 = arith.constant 0 : index
    %26 = vector.load %arg2[%c0_18, %c0_19] : memref<128x64xf32, #tpu.memory_space<vmem>>, vector<128x64xf32>
    tpu.vector_store %arg2[%c0_18, %c0_19], %25 {strides = array<i32>} : memref<128x64xf32, #tpu.memory_space<vmem>>, vector<128x64xf32>,
    return
  }
  func.func @transform_0(%arg0: i32) -> (i32, i32, i32) {
    %c0_i32 = arith.constant 0 : i32
    %c0_i32_0 = arith.constant 0 : i32
    %c0_i32_1 = arith.constant 0 : i32
    return %c0_i32, %arg0, %c0_i32_0 : i32, i32, i32
  }
  func.func @transform_1(%arg0: i32) -> (i32, i32) {
    %c0_i32 = arith.constant 0 : i32
    %c0_i32_0 = arith.constant 0 : i32
    return %arg0, %c0_i32 : i32, i32
  }
}

module attributes {stable_mosaic.version = 11 : i64} {
  func.func @_gemm_bn_kernel(%arg0: i32, %arg1: i32, %arg2: memref<128x576xbf16, #tpu.memory_space<vmem>>, %arg3: memref<576x64xbf16, #tpu.memory_space<vmem>>, %arg4: memref<1x64xf32, #tpu.memory_space<vmem>>, %arg5: memref<1x64xf32, #tpu.memory_space<vmem>>, %arg6: memref<128x64xf32, #tpu.memory_space<vmem>>) attributes {dimension_semantics = [#tpu.dimension_semantics<parallel>, #tpu.dimension_semantics<parallel>], iteration_bounds = array<i64: 1, 1>, scalar_prefetch = 0 : i64, scratch_operands = 0 : i64, tpu.core_type = #tpu.core_type<tc>, window_params = [{transform_indices = @transform_0, window_bounds = array<i64: 128, 576>}, {transform_indices = @transform_1, window_bounds = array<i64: 576, 64>}, {transform_indices = @transform_2, window_bounds = array<i64: 1, 64>}, {transform_indices = @transform_3, window_bounds = array<i64: 1, 64>}, {transform_indices = @transform_4, window_bounds = array<i64: 128, 64>}]} {
    %c0 = arith.constant 0 : index
    %c0_0 = arith.constant 0 : index
    %0 = vector.load %arg2[%c0, %c0_0] : memref<128x576xbf16, #tpu.memory_space<vmem>>, vector<128x576xbf16>
    %c0_1 = arith.constant 0 : index
    %c0_2 = arith.constant 0 : index
    %1 = vector.load %arg3[%c0_1, %c0_2] : memref<576x64xbf16, #tpu.memory_space<vmem>>, vector<576x64xbf16>
    %cst = arith.constant dense<0.000000e+00> : vector<128x64xf32>
    %2 = tpu.matmul %0, %1, %cst {dimension_numbers = #tpu.dot_dimension_numbers<[1], [0], [0], [1], [0, 0, 1, 1], [], []>} : vector<128x576xbf16>, vector<576x64xbf16>, vector<128x64xf32> -> vector<128x64xf32>
    %c0_3 = arith.constant 0 : index
    %c0_4 = arith.constant 0 : index
    %3 = vector.load %arg4[%c0_3, %c0_4] : memref<1x64xf32, #tpu.memory_space<vmem>>, vector<1x64xf32>
    %4 = vector.broadcast %3 : vector<1x64xf32> to vector<128x64xf32>
    %5 = arith.mulf %2, %4 : vector<128x64xf32>
    %c0_5 = arith.constant 0 : index
    %c0_6 = arith.constant 0 : index
    %6 = vector.load %arg5[%c0_5, %c0_6] : memref<1x64xf32, #tpu.memory_space<vmem>>, vector<1x64xf32>
    %7 = vector.broadcast %6 : vector<1x64xf32> to vector<128x64xf32>
    %8 = arith.addf %5, %7 : vector<128x64xf32>
    %cst_7 = arith.constant 0.000000e+00 : f32
    %9 = vector.broadcast %cst_7 : f32 to vector<128x64xf32>
    %10 = arith.maximumf %8, %9 : vector<128x64xf32>
    %c0_8 = arith.constant 0 : index
    %c0_9 = arith.constant 0 : index
    %11 = vector.load %arg6[%c0_8, %c0_9] : memref<128x64xf32, #tpu.memory_space<vmem>>, vector<128x64xf32>
    tpu.vector_store %arg6[%c0_8, %c0_9], %10 {strides = array<i32>} : memref<128x64xf32, #tpu.memory_space<vmem>>, vector<128x64xf32>,
    return
  }
  func.func @transform_0(%arg0: i32, %arg1: i32) -> (i32, i32) {
    %c0_i32 = arith.constant 0 : i32
    %c0_i32_0 = arith.constant 0 : i32
    return %arg0, %c0_i32 : i32, i32
  }
  func.func @transform_1(%arg0: i32, %arg1: i32) -> (i32, i32) {
    %c0_i32 = arith.constant 0 : i32
    %c0_i32_0 = arith.constant 0 : i32
    return %c0_i32, %arg1 : i32, i32
  }
  func.func @transform_2(%arg0: i32, %arg1: i32) -> (i32, i32) {
    %c0_i32 = arith.constant 0 : i32
    %c0_i32_0 = arith.constant 0 : i32
    return %c0_i32, %arg1 : i32, i32
  }
  func.func @transform_3(%arg0: i32, %arg1: i32) -> (i32, i32) {
    %c0_i32 = arith.constant 0 : i32
    %c0_i32_0 = arith.constant 0 : i32
    return %c0_i32, %arg1 : i32, i32
  }
  func.func @transform_4(%arg0: i32, %arg1: i32) -> (i32, i32) {
    %c0_i32 = arith.constant 0 : i32
    return %arg0, %arg1 : i32, i32
  }
}

module attributes {stable_mosaic.version = 11 : i64} {
  func.func @_gemm_bn_res_kernel(%arg0: i32, %arg1: i32, %arg2: memref<128x576xbf16, #tpu.memory_space<vmem>>, %arg3: memref<576x64xbf16, #tpu.memory_space<vmem>>, %arg4: memref<1x64xf32, #tpu.memory_space<vmem>>, %arg5: memref<1x64xf32, #tpu.memory_space<vmem>>, %arg6: memref<128x64xf32, #tpu.memory_space<vmem>>, %arg7: memref<128x64xf32, #tpu.memory_space<vmem>>) attributes {dimension_semantics = [#tpu.dimension_semantics<parallel>, #tpu.dimension_semantics<parallel>], iteration_bounds = array<i64: 1, 1>, scalar_prefetch = 0 : i64, scratch_operands = 0 : i64, tpu.core_type = #tpu.core_type<tc>, window_params = [{transform_indices = @transform_0, window_bounds = array<i64: 128, 576>}, {transform_indices = @transform_1, window_bounds = array<i64: 576, 64>}, {transform_indices = @transform_2, window_bounds = array<i64: 1, 64>}, {transform_indices = @transform_3, window_bounds = array<i64: 1, 64>}, {transform_indices = @transform_4, window_bounds = array<i64: 128, 64>}, {transform_indices = @transform_5, window_bounds = array<i64: 128, 64>}]} {
    %c0 = arith.constant 0 : index
    %c0_0 = arith.constant 0 : index
    %0 = vector.load %arg2[%c0, %c0_0] : memref<128x576xbf16, #tpu.memory_space<vmem>>, vector<128x576xbf16>
    %c0_1 = arith.constant 0 : index
    %c0_2 = arith.constant 0 : index
    %1 = vector.load %arg3[%c0_1, %c0_2] : memref<576x64xbf16, #tpu.memory_space<vmem>>, vector<576x64xbf16>
    %cst = arith.constant dense<0.000000e+00> : vector<128x64xf32>
    %2 = tpu.matmul %0, %1, %cst {dimension_numbers = #tpu.dot_dimension_numbers<[1], [0], [0], [1], [0, 0, 1, 1], [], []>} : vector<128x576xbf16>, vector<576x64xbf16>, vector<128x64xf32> -> vector<128x64xf32>
    %c0_3 = arith.constant 0 : index
    %c0_4 = arith.constant 0 : index
    %3 = vector.load %arg4[%c0_3, %c0_4] : memref<1x64xf32, #tpu.memory_space<vmem>>, vector<1x64xf32>
    %4 = vector.broadcast %3 : vector<1x64xf32> to vector<128x64xf32>
    %5 = arith.mulf %2, %4 : vector<128x64xf32>
    %c0_5 = arith.constant 0 : index
    %c0_6 = arith.constant 0 : index
    %6 = vector.load %arg5[%c0_5, %c0_6] : memref<1x64xf32, #tpu.memory_space<vmem>>, vector<1x64xf32>
    %7 = vector.broadcast %6 : vector<1x64xf32> to vector<128x64xf32>
    %8 = arith.addf %5, %7 : vector<128x64xf32>
    %c0_7 = arith.constant 0 : index
    %c0_8 = arith.constant 0 : index
    %9 = vector.load %arg6[%c0_7, %c0_8] : memref<128x64xf32, #tpu.memory_space<vmem>>, vector<128x64xf32>
    %10 = arith.addf %8, %9 : vector<128x64xf32>
    %cst_9 = arith.constant 0.000000e+00 : f32
    %11 = vector.broadcast %cst_9 : f32 to vector<128x64xf32>
    %12 = arith.maximumf %10, %11 : vector<128x64xf32>
    %c0_10 = arith.constant 0 : index
    %c0_11 = arith.constant 0 : index
    %13 = vector.load %arg7[%c0_10, %c0_11] : memref<128x64xf32, #tpu.memory_space<vmem>>, vector<128x64xf32>
    tpu.vector_store %arg7[%c0_10, %c0_11], %12 {strides = array<i32>} : memref<128x64xf32, #tpu.memory_space<vmem>>, vector<128x64xf32>,
    return
  }
  func.func @transform_0(%arg0: i32, %arg1: i32) -> (i32, i32) {
    %c0_i32 = arith.constant 0 : i32
    %c0_i32_0 = arith.constant 0 : i32
    return %arg0, %c0_i32 : i32, i32
  }
  func.func @transform_1(%arg0: i32, %arg1: i32) -> (i32, i32) {
    %c0_i32 = arith.constant 0 : i32
    %c0_i32_0 = arith.constant 0 : i32
    return %c0_i32, %arg1 : i32, i32
  }
  func.func @transform_2(%arg0: i32, %arg1: i32) -> (i32, i32) {
    %c0_i32 = arith.constant 0 : i32
    %c0_i32_0 = arith.constant 0 : i32
    return %c0_i32, %arg1 : i32, i32
  }
  func.func @transform_3(%arg0: i32, %arg1: i32) -> (i32, i32) {
    %c0_i32 = arith.constant 0 : i32
    %c0_i32_0 = arith.constant 0 : i32
    return %c0_i32, %arg1 : i32, i32
  }
  func.func @transform_4(%arg0: i32, %arg1: i32) -> (i32, i32) {
    %c0_i32 = arith.constant 0 : i32
    return %arg0, %arg1 : i32, i32
  }
  func.func @transform_5(%arg0: i32, %arg1: i32) -> (i32, i32) {
    %c0_i32 = arith.constant 0 : i32
    return %arg0, %arg1 : i32, i32
  }
}

module attributes {stable_mosaic.version = 11 : i64} {
  func.func @_gemm_bn_kernel(%arg0: i32, %arg1: i32, %arg2: memref<32x576xbf16, #tpu.memory_space<vmem>>, %arg3: memref<576x128xbf16, #tpu.memory_space<vmem>>, %arg4: memref<1x128xf32, #tpu.memory_space<vmem>>, %arg5: memref<1x128xf32, #tpu.memory_space<vmem>>, %arg6: memref<32x128xf32, #tpu.memory_space<vmem>>) attributes {dimension_semantics = [#tpu.dimension_semantics<parallel>, #tpu.dimension_semantics<parallel>], iteration_bounds = array<i64: 1, 1>, scalar_prefetch = 0 : i64, scratch_operands = 0 : i64, tpu.core_type = #tpu.core_type<tc>, window_params = [{transform_indices = @transform_0, window_bounds = array<i64: 32, 576>}, {transform_indices = @transform_1, window_bounds = array<i64: 576, 128>}, {transform_indices = @transform_2, window_bounds = array<i64: 1, 128>}, {transform_indices = @transform_3, window_bounds = array<i64: 1, 128>}, {transform_indices = @transform_4, window_bounds = array<i64: 32, 128>}]} {
    %c0 = arith.constant 0 : index
    %c0_0 = arith.constant 0 : index
    %0 = vector.load %arg2[%c0, %c0_0] : memref<32x576xbf16, #tpu.memory_space<vmem>>, vector<32x576xbf16>
    %c0_1 = arith.constant 0 : index
    %c0_2 = arith.constant 0 : index
    %1 = vector.load %arg3[%c0_1, %c0_2] : memref<576x128xbf16, #tpu.memory_space<vmem>>, vector<576x128xbf16>
    %cst = arith.constant dense<0.000000e+00> : vector<32x128xf32>
    %2 = tpu.matmul %0, %1, %cst {dimension_numbers = #tpu.dot_dimension_numbers<[1], [0], [0], [1], [0, 0, 1, 1], [], []>} : vector<32x576xbf16>, vector<576x128xbf16>, vector<32x128xf32> -> vector<32x128xf32>
    %c0_3 = arith.constant 0 : index
    %c0_4 = arith.constant 0 : index
    %3 = vector.load %arg4[%c0_3, %c0_4] : memref<1x128xf32, #tpu.memory_space<vmem>>, vector<1x128xf32>
    %4 = vector.broadcast %3 : vector<1x128xf32> to vector<32x128xf32>
    %5 = arith.mulf %2, %4 : vector<32x128xf32>
    %c0_5 = arith.constant 0 : index
    %c0_6 = arith.constant 0 : index
    %6 = vector.load %arg5[%c0_5, %c0_6] : memref<1x128xf32, #tpu.memory_space<vmem>>, vector<1x128xf32>
    %7 = vector.broadcast %6 : vector<1x128xf32> to vector<32x128xf32>
    %8 = arith.addf %5, %7 : vector<32x128xf32>
    %cst_7 = arith.constant 0.000000e+00 : f32
    %9 = vector.broadcast %cst_7 : f32 to vector<32x128xf32>
    %10 = arith.maximumf %8, %9 : vector<32x128xf32>
    %c0_8 = arith.constant 0 : index
    %c0_9 = arith.constant 0 : index
    %11 = vector.load %arg6[%c0_8, %c0_9] : memref<32x128xf32, #tpu.memory_space<vmem>>, vector<32x128xf32>
    tpu.vector_store %arg6[%c0_8, %c0_9], %10 {strides = array<i32>} : memref<32x128xf32, #tpu.memory_space<vmem>>, vector<32x128xf32>,
    return
  }
  func.func @transform_0(%arg0: i32, %arg1: i32) -> (i32, i32) {
    %c0_i32 = arith.constant 0 : i32
    %c0_i32_0 = arith.constant 0 : i32
    return %arg0, %c0_i32 : i32, i32
  }
  func.func @transform_1(%arg0: i32, %arg1: i32) -> (i32, i32) {
    %c0_i32 = arith.constant 0 : i32
    %c0_i32_0 = arith.constant 0 : i32
    return %c0_i32, %arg1 : i32, i32
  }
  func.func @transform_2(%arg0: i32, %arg1: i32) -> (i32, i32) {
    %c0_i32 = arith.constant 0 : i32
    %c0_i32_0 = arith.constant 0 : i32
    return %c0_i32, %arg1 : i32, i32
  }
  func.func @transform_3(%arg0: i32, %arg1: i32) -> (i32, i32) {
    %c0_i32 = arith.constant 0 : i32
    %c0_i32_0 = arith.constant 0 : i32
    return %c0_i32, %arg1 : i32, i32
  }
  func.func @transform_4(%arg0: i32, %arg1: i32) -> (i32, i32) {
    %c0_i32 = arith.constant 0 : i32
    return %arg0, %arg1 : i32, i32
  }
}

module attributes {stable_mosaic.version = 11 : i64} {
  func.func @_gemm_bn_kernel(%arg0: i32, %arg1: i32, %arg2: memref<32x64xbf16, #tpu.memory_space<vmem>>, %arg3: memref<64x128xbf16, #tpu.memory_space<vmem>>, %arg4: memref<1x128xf32, #tpu.memory_space<vmem>>, %arg5: memref<1x128xf32, #tpu.memory_space<vmem>>, %arg6: memref<32x128xf32, #tpu.memory_space<vmem>>) attributes {dimension_semantics = [#tpu.dimension_semantics<parallel>, #tpu.dimension_semantics<parallel>], iteration_bounds = array<i64: 1, 1>, scalar_prefetch = 0 : i64, scratch_operands = 0 : i64, tpu.core_type = #tpu.core_type<tc>, window_params = [{transform_indices = @transform_0, window_bounds = array<i64: 32, 64>}, {transform_indices = @transform_1, window_bounds = array<i64: 64, 128>}, {transform_indices = @transform_2, window_bounds = array<i64: 1, 128>}, {transform_indices = @transform_3, window_bounds = array<i64: 1, 128>}, {transform_indices = @transform_4, window_bounds = array<i64: 32, 128>}]} {
    %c0 = arith.constant 0 : index
    %c0_0 = arith.constant 0 : index
    %0 = vector.load %arg2[%c0, %c0_0] : memref<32x64xbf16, #tpu.memory_space<vmem>>, vector<32x64xbf16>
    %c0_1 = arith.constant 0 : index
    %c0_2 = arith.constant 0 : index
    %1 = vector.load %arg3[%c0_1, %c0_2] : memref<64x128xbf16, #tpu.memory_space<vmem>>, vector<64x128xbf16>
    %cst = arith.constant dense<0.000000e+00> : vector<32x128xf32>
    %2 = tpu.matmul %0, %1, %cst {dimension_numbers = #tpu.dot_dimension_numbers<[1], [0], [0], [1], [0, 0, 1, 1], [], []>} : vector<32x64xbf16>, vector<64x128xbf16>, vector<32x128xf32> -> vector<32x128xf32>
    %c0_3 = arith.constant 0 : index
    %c0_4 = arith.constant 0 : index
    %3 = vector.load %arg4[%c0_3, %c0_4] : memref<1x128xf32, #tpu.memory_space<vmem>>, vector<1x128xf32>
    %4 = vector.broadcast %3 : vector<1x128xf32> to vector<32x128xf32>
    %5 = arith.mulf %2, %4 : vector<32x128xf32>
    %c0_5 = arith.constant 0 : index
    %c0_6 = arith.constant 0 : index
    %6 = vector.load %arg5[%c0_5, %c0_6] : memref<1x128xf32, #tpu.memory_space<vmem>>, vector<1x128xf32>
    %7 = vector.broadcast %6 : vector<1x128xf32> to vector<32x128xf32>
    %8 = arith.addf %5, %7 : vector<32x128xf32>
    %c0_7 = arith.constant 0 : index
    %c0_8 = arith.constant 0 : index
    %9 = vector.load %arg6[%c0_7, %c0_8] : memref<32x128xf32, #tpu.memory_space<vmem>>, vector<32x128xf32>
    tpu.vector_store %arg6[%c0_7, %c0_8], %8 {strides = array<i32>} : memref<32x128xf32, #tpu.memory_space<vmem>>, vector<32x128xf32>,
    return
  }
  func.func @transform_0(%arg0: i32, %arg1: i32) -> (i32, i32) {
    %c0_i32 = arith.constant 0 : i32
    %c0_i32_0 = arith.constant 0 : i32
    return %arg0, %c0_i32 : i32, i32
  }
  func.func @transform_1(%arg0: i32, %arg1: i32) -> (i32, i32) {
    %c0_i32 = arith.constant 0 : i32
    %c0_i32_0 = arith.constant 0 : i32
    return %c0_i32, %arg1 : i32, i32
  }
  func.func @transform_2(%arg0: i32, %arg1: i32) -> (i32, i32) {
    %c0_i32 = arith.constant 0 : i32
    %c0_i32_0 = arith.constant 0 : i32
    return %c0_i32, %arg1 : i32, i32
  }
  func.func @transform_3(%arg0: i32, %arg1: i32) -> (i32, i32) {
    %c0_i32 = arith.constant 0 : i32
    %c0_i32_0 = arith.constant 0 : i32
    return %c0_i32, %arg1 : i32, i32
  }
  func.func @transform_4(%arg0: i32, %arg1: i32) -> (i32, i32) {
    %c0_i32 = arith.constant 0 : i32
    return %arg0, %arg1 : i32, i32
  }
}

module attributes {stable_mosaic.version = 11 : i64} {
  func.func @_gemm_bn_res_kernel(%arg0: i32, %arg1: i32, %arg2: memref<32x1152xbf16, #tpu.memory_space<vmem>>, %arg3: memref<1152x128xbf16, #tpu.memory_space<vmem>>, %arg4: memref<1x128xf32, #tpu.memory_space<vmem>>, %arg5: memref<1x128xf32, #tpu.memory_space<vmem>>, %arg6: memref<32x128xf32, #tpu.memory_space<vmem>>, %arg7: memref<32x128xf32, #tpu.memory_space<vmem>>) attributes {dimension_semantics = [#tpu.dimension_semantics<parallel>, #tpu.dimension_semantics<parallel>], iteration_bounds = array<i64: 1, 1>, scalar_prefetch = 0 : i64, scratch_operands = 0 : i64, tpu.core_type = #tpu.core_type<tc>, window_params = [{transform_indices = @transform_0, window_bounds = array<i64: 32, 1152>}, {transform_indices = @transform_1, window_bounds = array<i64: 1152, 128>}, {transform_indices = @transform_2, window_bounds = array<i64: 1, 128>}, {transform_indices = @transform_3, window_bounds = array<i64: 1, 128>}, {transform_indices = @transform_4, window_bounds = array<i64: 32, 128>}, {transform_indices = @transform_5, window_bounds = array<i64: 32, 128>}]} {
    %c0 = arith.constant 0 : index
    %c0_0 = arith.constant 0 : index
    %0 = vector.load %arg2[%c0, %c0_0] : memref<32x1152xbf16, #tpu.memory_space<vmem>>, vector<32x1152xbf16>
    %c0_1 = arith.constant 0 : index
    %c0_2 = arith.constant 0 : index
    %1 = vector.load %arg3[%c0_1, %c0_2] : memref<1152x128xbf16, #tpu.memory_space<vmem>>, vector<1152x128xbf16>
    %cst = arith.constant dense<0.000000e+00> : vector<32x128xf32>
    %2 = tpu.matmul %0, %1, %cst {dimension_numbers = #tpu.dot_dimension_numbers<[1], [0], [0], [1], [0, 0, 1, 1], [], []>} : vector<32x1152xbf16>, vector<1152x128xbf16>, vector<32x128xf32> -> vector<32x128xf32>
    %c0_3 = arith.constant 0 : index
    %c0_4 = arith.constant 0 : index
    %3 = vector.load %arg4[%c0_3, %c0_4] : memref<1x128xf32, #tpu.memory_space<vmem>>, vector<1x128xf32>
    %4 = vector.broadcast %3 : vector<1x128xf32> to vector<32x128xf32>
    %5 = arith.mulf %2, %4 : vector<32x128xf32>
    %c0_5 = arith.constant 0 : index
    %c0_6 = arith.constant 0 : index
    %6 = vector.load %arg5[%c0_5, %c0_6] : memref<1x128xf32, #tpu.memory_space<vmem>>, vector<1x128xf32>
    %7 = vector.broadcast %6 : vector<1x128xf32> to vector<32x128xf32>
    %8 = arith.addf %5, %7 : vector<32x128xf32>
    %c0_7 = arith.constant 0 : index
    %c0_8 = arith.constant 0 : index
    %9 = vector.load %arg6[%c0_7, %c0_8] : memref<32x128xf32, #tpu.memory_space<vmem>>, vector<32x128xf32>
    %10 = arith.addf %8, %9 : vector<32x128xf32>
    %cst_9 = arith.constant 0.000000e+00 : f32
    %11 = vector.broadcast %cst_9 : f32 to vector<32x128xf32>
    %12 = arith.maximumf %10, %11 : vector<32x128xf32>
    %c0_10 = arith.constant 0 : index
    %c0_11 = arith.constant 0 : index
    %13 = vector.load %arg7[%c0_10, %c0_11] : memref<32x128xf32, #tpu.memory_space<vmem>>, vector<32x128xf32>
    tpu.vector_store %arg7[%c0_10, %c0_11], %12 {strides = array<i32>} : memref<32x128xf32, #tpu.memory_space<vmem>>, vector<32x128xf32>,
    return
  }
  func.func @transform_0(%arg0: i32, %arg1: i32) -> (i32, i32) {
    %c0_i32 = arith.constant 0 : i32
    %c0_i32_0 = arith.constant 0 : i32
    return %arg0, %c0_i32 : i32, i32
  }
  func.func @transform_1(%arg0: i32, %arg1: i32) -> (i32, i32) {
    %c0_i32 = arith.constant 0 : i32
    %c0_i32_0 = arith.constant 0 : i32
    return %c0_i32, %arg1 : i32, i32
  }
  func.func @transform_2(%arg0: i32, %arg1: i32) -> (i32, i32) {
    %c0_i32 = arith.constant 0 : i32
    %c0_i32_0 = arith.constant 0 : i32
    return %c0_i32, %arg1 : i32, i32
  }
  func.func @transform_3(%arg0: i32, %arg1: i32) -> (i32, i32) {
    %c0_i32 = arith.constant 0 : i32
    %c0_i32_0 = arith.constant 0 : i32
    return %c0_i32, %arg1 : i32, i32
  }
  func.func @transform_4(%arg0: i32, %arg1: i32) -> (i32, i32) {
    %c0_i32 = arith.constant 0 : i32
    return %arg0, %arg1 : i32, i32
  }
  func.func @transform_5(%arg0: i32, %arg1: i32) -> (i32, i32) {
    %c0_i32 = arith.constant 0 : i32
    return %arg0, %arg1 : i32, i32
  }
}

module attributes {stable_mosaic.version = 11 : i64} {
  func.func @_gemm_bn_kernel(%arg0: i32, %arg1: i32, %arg2: memref<32x1152xbf16, #tpu.memory_space<vmem>>, %arg3: memref<1152x128xbf16, #tpu.memory_space<vmem>>, %arg4: memref<1x128xf32, #tpu.memory_space<vmem>>, %arg5: memref<1x128xf32, #tpu.memory_space<vmem>>, %arg6: memref<32x128xf32, #tpu.memory_space<vmem>>) attributes {dimension_semantics = [#tpu.dimension_semantics<parallel>, #tpu.dimension_semantics<parallel>], iteration_bounds = array<i64: 1, 1>, scalar_prefetch = 0 : i64, scratch_operands = 0 : i64, tpu.core_type = #tpu.core_type<tc>, window_params = [{transform_indices = @transform_0, window_bounds = array<i64: 32, 1152>}, {transform_indices = @transform_1, window_bounds = array<i64: 1152, 128>}, {transform_indices = @transform_2, window_bounds = array<i64: 1, 128>}, {transform_indices = @transform_3, window_bounds = array<i64: 1, 128>}, {transform_indices = @transform_4, window_bounds = array<i64: 32, 128>}]} {
    %c0 = arith.constant 0 : index
    %c0_0 = arith.constant 0 : index
    %0 = vector.load %arg2[%c0, %c0_0] : memref<32x1152xbf16, #tpu.memory_space<vmem>>, vector<32x1152xbf16>
    %c0_1 = arith.constant 0 : index
    %c0_2 = arith.constant 0 : index
    %1 = vector.load %arg3[%c0_1, %c0_2] : memref<1152x128xbf16, #tpu.memory_space<vmem>>, vector<1152x128xbf16>
    %cst = arith.constant dense<0.000000e+00> : vector<32x128xf32>
    %2 = tpu.matmul %0, %1, %cst {dimension_numbers = #tpu.dot_dimension_numbers<[1], [0], [0], [1], [0, 0, 1, 1], [], []>} : vector<32x1152xbf16>, vector<1152x128xbf16>, vector<32x128xf32> -> vector<32x128xf32>
    %c0_3 = arith.constant 0 : index
    %c0_4 = arith.constant 0 : index
    %3 = vector.load %arg4[%c0_3, %c0_4] : memref<1x128xf32, #tpu.memory_space<vmem>>, vector<1x128xf32>
    %4 = vector.broadcast %3 : vector<1x128xf32> to vector<32x128xf32>
    %5 = arith.mulf %2, %4 : vector<32x128xf32>
    %c0_5 = arith.constant 0 : index
    %c0_6 = arith.constant 0 : index
    %6 = vector.load %arg5[%c0_5, %c0_6] : memref<1x128xf32, #tpu.memory_space<vmem>>, vector<1x128xf32>
    %7 = vector.broadcast %6 : vector<1x128xf32> to vector<32x128xf32>
    %8 = arith.addf %5, %7 : vector<32x128xf32>
    %cst_7 = arith.constant 0.000000e+00 : f32
    %9 = vector.broadcast %cst_7 : f32 to vector<32x128xf32>
    %10 = arith.maximumf %8, %9 : vector<32x128xf32>
    %c0_8 = arith.constant 0 : index
    %c0_9 = arith.constant 0 : index
    %11 = vector.load %arg6[%c0_8, %c0_9] : memref<32x128xf32, #tpu.memory_space<vmem>>, vector<32x128xf32>
    tpu.vector_store %arg6[%c0_8, %c0_9], %10 {strides = array<i32>} : memref<32x128xf32, #tpu.memory_space<vmem>>, vector<32x128xf32>,
    return
  }
  func.func @transform_0(%arg0: i32, %arg1: i32) -> (i32, i32) {
    %c0_i32 = arith.constant 0 : i32
    %c0_i32_0 = arith.constant 0 : i32
    return %arg0, %c0_i32 : i32, i32
  }
  func.func @transform_1(%arg0: i32, %arg1: i32) -> (i32, i32) {
    %c0_i32 = arith.constant 0 : i32
    %c0_i32_0 = arith.constant 0 : i32
    return %c0_i32, %arg1 : i32, i32
  }
  func.func @transform_2(%arg0: i32, %arg1: i32) -> (i32, i32) {
    %c0_i32 = arith.constant 0 : i32
    %c0_i32_0 = arith.constant 0 : i32
    return %c0_i32, %arg1 : i32, i32
  }
  func.func @transform_3(%arg0: i32, %arg1: i32) -> (i32, i32) {
    %c0_i32 = arith.constant 0 : i32
    %c0_i32_0 = arith.constant 0 : i32
    return %c0_i32, %arg1 : i32, i32
  }
  func.func @transform_4(%arg0: i32, %arg1: i32) -> (i32, i32) {
    %c0_i32 = arith.constant 0 : i32
    return %arg0, %arg1 : i32, i32
  }
}

module attributes {stable_mosaic.version = 11 : i64} {
  func.func @_gemm_bn_kernel(%arg0: i32, %arg1: i32, %arg2: memref<8x1152xbf16, #tpu.memory_space<vmem>>, %arg3: memref<1152x128xbf16, #tpu.memory_space<vmem>>, %arg4: memref<1x128xf32, #tpu.memory_space<vmem>>, %arg5: memref<1x128xf32, #tpu.memory_space<vmem>>, %arg6: memref<8x128xf32, #tpu.memory_space<vmem>>) attributes {dimension_semantics = [#tpu.dimension_semantics<parallel>, #tpu.dimension_semantics<parallel>], iteration_bounds = array<i64: 1, 2>, scalar_prefetch = 0 : i64, scratch_operands = 0 : i64, tpu.core_type = #tpu.core_type<tc>, window_params = [{transform_indices = @transform_0, window_bounds = array<i64: 8, 1152>}, {transform_indices = @transform_1, window_bounds = array<i64: 1152, 128>}, {transform_indices = @transform_2, window_bounds = array<i64: 1, 128>}, {transform_indices = @transform_3, window_bounds = array<i64: 1, 128>}, {transform_indices = @transform_4, window_bounds = array<i64: 8, 128>}]} {
    %c0 = arith.constant 0 : index
    %c0_0 = arith.constant 0 : index
    %0 = vector.load %arg2[%c0, %c0_0] : memref<8x1152xbf16, #tpu.memory_space<vmem>>, vector<8x1152xbf16>
    %c0_1 = arith.constant 0 : index
    %c0_2 = arith.constant 0 : index
    %1 = vector.load %arg3[%c0_1, %c0_2] : memref<1152x128xbf16, #tpu.memory_space<vmem>>, vector<1152x128xbf16>
    %cst = arith.constant dense<0.000000e+00> : vector<8x128xf32>
    %2 = tpu.matmul %0, %1, %cst {dimension_numbers = #tpu.dot_dimension_numbers<[1], [0], [0], [1], [0, 0, 1, 1], [], []>} : vector<8x1152xbf16>, vector<1152x128xbf16>, vector<8x128xf32> -> vector<8x128xf32>
    %c0_3 = arith.constant 0 : index
    %c0_4 = arith.constant 0 : index
    %3 = vector.load %arg4[%c0_3, %c0_4] : memref<1x128xf32, #tpu.memory_space<vmem>>, vector<1x128xf32>
    %4 = vector.broadcast %3 : vector<1x128xf32> to vector<8x128xf32>
    %5 = arith.mulf %2, %4 : vector<8x128xf32>
    %c0_5 = arith.constant 0 : index
    %c0_6 = arith.constant 0 : index
    %6 = vector.load %arg5[%c0_5, %c0_6] : memref<1x128xf32, #tpu.memory_space<vmem>>, vector<1x128xf32>
    %7 = vector.broadcast %6 : vector<1x128xf32> to vector<8x128xf32>
    %8 = arith.addf %5, %7 : vector<8x128xf32>
    %cst_7 = arith.constant 0.000000e+00 : f32
    %9 = vector.broadcast %cst_7 : f32 to vector<8x128xf32>
    %10 = arith.maximumf %8, %9 : vector<8x128xf32>
    %c0_8 = arith.constant 0 : index
    %c0_9 = arith.constant 0 : index
    %11 = vector.load %arg6[%c0_8, %c0_9] : memref<8x128xf32, #tpu.memory_space<vmem>>, vector<8x128xf32>
    tpu.vector_store %arg6[%c0_8, %c0_9], %10 {strides = array<i32>} : memref<8x128xf32, #tpu.memory_space<vmem>>, vector<8x128xf32>,
    return
  }
  func.func @transform_0(%arg0: i32, %arg1: i32) -> (i32, i32) {
    %c0_i32 = arith.constant 0 : i32
    %c0_i32_0 = arith.constant 0 : i32
    return %arg0, %c0_i32 : i32, i32
  }
  func.func @transform_1(%arg0: i32, %arg1: i32) -> (i32, i32) {
    %c0_i32 = arith.constant 0 : i32
    %c0_i32_0 = arith.constant 0 : i32
    return %c0_i32, %arg1 : i32, i32
  }
  func.func @transform_2(%arg0: i32, %arg1: i32) -> (i32, i32) {
    %c0_i32 = arith.constant 0 : i32
    %c0_i32_0 = arith.constant 0 : i32
    return %c0_i32, %arg1 : i32, i32
  }
  func.func @transform_3(%arg0: i32, %arg1: i32) -> (i32, i32) {
    %c0_i32 = arith.constant 0 : i32
    %c0_i32_0 = arith.constant 0 : i32
    return %c0_i32, %arg1 : i32, i32
  }
  func.func @transform_4(%arg0: i32, %arg1: i32) -> (i32, i32) {
    %c0_i32 = arith.constant 0 : i32
    return %arg0, %arg1 : i32, i32
  }
}

module attributes {stable_mosaic.version = 11 : i64} {
  func.func @_gemm_bn_kernel(%arg0: i32, %arg1: i32, %arg2: memref<8x128xbf16, #tpu.memory_space<vmem>>, %arg3: memref<128x128xbf16, #tpu.memory_space<vmem>>, %arg4: memref<1x128xf32, #tpu.memory_space<vmem>>, %arg5: memref<1x128xf32, #tpu.memory_space<vmem>>, %arg6: memref<8x128xf32, #tpu.memory_space<vmem>>) attributes {dimension_semantics = [#tpu.dimension_semantics<parallel>, #tpu.dimension_semantics<parallel>], iteration_bounds = array<i64: 1, 2>, scalar_prefetch = 0 : i64, scratch_operands = 0 : i64, tpu.core_type = #tpu.core_type<tc>, window_params = [{transform_indices = @transform_0, window_bounds = array<i64: 8, 128>}, {transform_indices = @transform_1, window_bounds = array<i64: 128, 128>}, {transform_indices = @transform_2, window_bounds = array<i64: 1, 128>}, {transform_indices = @transform_3, window_bounds = array<i64: 1, 128>}, {transform_indices = @transform_4, window_bounds = array<i64: 8, 128>}]} {
    %c0 = arith.constant 0 : index
    %c0_0 = arith.constant 0 : index
    %0 = vector.load %arg2[%c0, %c0_0] : memref<8x128xbf16, #tpu.memory_space<vmem>>, vector<8x128xbf16>
    %c0_1 = arith.constant 0 : index
    %c0_2 = arith.constant 0 : index
    %1 = vector.load %arg3[%c0_1, %c0_2] : memref<128x128xbf16, #tpu.memory_space<vmem>>, vector<128x128xbf16>
    %cst = arith.constant dense<0.000000e+00> : vector<8x128xf32>
    %2 = tpu.matmul %0, %1, %cst {dimension_numbers = #tpu.dot_dimension_numbers<[1], [0], [0], [1], [0, 0, 1, 1], [], []>} : vector<8x128xbf16>, vector<128x128xbf16>, vector<8x128xf32> -> vector<8x128xf32>
    %c0_3 = arith.constant 0 : index
    %c0_4 = arith.constant 0 : index
    %3 = vector.load %arg4[%c0_3, %c0_4] : memref<1x128xf32, #tpu.memory_space<vmem>>, vector<1x128xf32>
    %4 = vector.broadcast %3 : vector<1x128xf32> to vector<8x128xf32>
    %5 = arith.mulf %2, %4 : vector<8x128xf32>
    %c0_5 = arith.constant 0 : index
    %c0_6 = arith.constant 0 : index
    %6 = vector.load %arg5[%c0_5, %c0_6] : memref<1x128xf32, #tpu.memory_space<vmem>>, vector<1x128xf32>
    %7 = vector.broadcast %6 : vector<1x128xf32> to vector<8x128xf32>
    %8 = arith.addf %5, %7 : vector<8x128xf32>
    %c0_7 = arith.constant 0 : index
    %c0_8 = arith.constant 0 : index
    %9 = vector.load %arg6[%c0_7, %c0_8] : memref<8x128xf32, #tpu.memory_space<vmem>>, vector<8x128xf32>
    tpu.vector_store %arg6[%c0_7, %c0_8], %8 {strides = array<i32>} : memref<8x128xf32, #tpu.memory_space<vmem>>, vector<8x128xf32>,
    return
  }
  func.func @transform_0(%arg0: i32, %arg1: i32) -> (i32, i32) {
    %c0_i32 = arith.constant 0 : i32
    %c0_i32_0 = arith.constant 0 : i32
    return %arg0, %c0_i32 : i32, i32
  }
  func.func @transform_1(%arg0: i32, %arg1: i32) -> (i32, i32) {
    %c0_i32 = arith.constant 0 : i32
    %c0_i32_0 = arith.constant 0 : i32
    return %c0_i32, %arg1 : i32, i32
  }
  func.func @transform_2(%arg0: i32, %arg1: i32) -> (i32, i32) {
    %c0_i32 = arith.constant 0 : i32
    %c0_i32_0 = arith.constant 0 : i32
    return %c0_i32, %arg1 : i32, i32
  }
  func.func @transform_3(%arg0: i32, %arg1: i32) -> (i32, i32) {
    %c0_i32 = arith.constant 0 : i32
    %c0_i32_0 = arith.constant 0 : i32
    return %c0_i32, %arg1 : i32, i32
  }
  func.func @transform_4(%arg0: i32, %arg1: i32) -> (i32, i32) {
    %c0_i32 = arith.constant 0 : i32
    return %arg0, %arg1 : i32, i32
  }
}

module attributes {stable_mosaic.version = 11 : i64} {
  func.func @_gemm_bn_res_kernel(%arg0: i32, %arg1: i32, %arg2: memref<8x2304xbf16, #tpu.memory_space<vmem>>, %arg3: memref<2304x128xbf16, #tpu.memory_space<vmem>>, %arg4: memref<1x128xf32, #tpu.memory_space<vmem>>, %arg5: memref<1x128xf32, #tpu.memory_space<vmem>>, %arg6: memref<8x128xf32, #tpu.memory_space<vmem>>, %arg7: memref<8x128xf32, #tpu.memory_space<vmem>>) attributes {dimension_semantics = [#tpu.dimension_semantics<parallel>, #tpu.dimension_semantics<parallel>], iteration_bounds = array<i64: 1, 2>, scalar_prefetch = 0 : i64, scratch_operands = 0 : i64, tpu.core_type = #tpu.core_type<tc>, window_params = [{transform_indices = @transform_0, window_bounds = array<i64: 8, 2304>}, {transform_indices = @transform_1, window_bounds = array<i64: 2304, 128>}, {transform_indices = @transform_2, window_bounds = array<i64: 1, 128>}, {transform_indices = @transform_3, window_bounds = array<i64: 1, 128>}, {transform_indices = @transform_4, window_bounds = array<i64: 8, 128>}, {transform_indices = @transform_5, window_bounds = array<i64: 8, 128>}]} {
    %c0 = arith.constant 0 : index
    %c0_0 = arith.constant 0 : index
    %0 = vector.load %arg2[%c0, %c0_0] : memref<8x2304xbf16, #tpu.memory_space<vmem>>, vector<8x2304xbf16>
    %c0_1 = arith.constant 0 : index
    %c0_2 = arith.constant 0 : index
    %1 = vector.load %arg3[%c0_1, %c0_2] : memref<2304x128xbf16, #tpu.memory_space<vmem>>, vector<2304x128xbf16>
    %cst = arith.constant dense<0.000000e+00> : vector<8x128xf32>
    %2 = tpu.matmul %0, %1, %cst {dimension_numbers = #tpu.dot_dimension_numbers<[1], [0], [0], [1], [0, 0, 1, 1], [], []>} : vector<8x2304xbf16>, vector<2304x128xbf16>, vector<8x128xf32> -> vector<8x128xf32>
    %c0_3 = arith.constant 0 : index
    %c0_4 = arith.constant 0 : index
    %3 = vector.load %arg4[%c0_3, %c0_4] : memref<1x128xf32, #tpu.memory_space<vmem>>, vector<1x128xf32>
    %4 = vector.broadcast %3 : vector<1x128xf32> to vector<8x128xf32>
    %5 = arith.mulf %2, %4 : vector<8x128xf32>
    %c0_5 = arith.constant 0 : index
    %c0_6 = arith.constant 0 : index
    %6 = vector.load %arg5[%c0_5, %c0_6] : memref<1x128xf32, #tpu.memory_space<vmem>>, vector<1x128xf32>
    %7 = vector.broadcast %6 : vector<1x128xf32> to vector<8x128xf32>
    %8 = arith.addf %5, %7 : vector<8x128xf32>
    %c0_7 = arith.constant 0 : index
    %c0_8 = arith.constant 0 : index
    %9 = vector.load %arg6[%c0_7, %c0_8] : memref<8x128xf32, #tpu.memory_space<vmem>>, vector<8x128xf32>
    %10 = arith.addf %8, %9 : vector<8x128xf32>
    %cst_9 = arith.constant 0.000000e+00 : f32
    %11 = vector.broadcast %cst_9 : f32 to vector<8x128xf32>
    %12 = arith.maximumf %10, %11 : vector<8x128xf32>
    %c0_10 = arith.constant 0 : index
    %c0_11 = arith.constant 0 : index
    %13 = vector.load %arg7[%c0_10, %c0_11] : memref<8x128xf32, #tpu.memory_space<vmem>>, vector<8x128xf32>
    tpu.vector_store %arg7[%c0_10, %c0_11], %12 {strides = array<i32>} : memref<8x128xf32, #tpu.memory_space<vmem>>, vector<8x128xf32>,
    return
  }
  func.func @transform_0(%arg0: i32, %arg1: i32) -> (i32, i32) {
    %c0_i32 = arith.constant 0 : i32
    %c0_i32_0 = arith.constant 0 : i32
    return %arg0, %c0_i32 : i32, i32
  }
  func.func @transform_1(%arg0: i32, %arg1: i32) -> (i32, i32) {
    %c0_i32 = arith.constant 0 : i32
    %c0_i32_0 = arith.constant 0 : i32
    return %c0_i32, %arg1 : i32, i32
  }
  func.func @transform_2(%arg0: i32, %arg1: i32) -> (i32, i32) {
    %c0_i32 = arith.constant 0 : i32
    %c0_i32_0 = arith.constant 0 : i32
    return %c0_i32, %arg1 : i32, i32
  }
  func.func @transform_3(%arg0: i32, %arg1: i32) -> (i32, i32) {
    %c0_i32 = arith.constant 0 : i32
    %c0_i32_0 = arith.constant 0 : i32
    return %c0_i32, %arg1 : i32, i32
  }
  func.func @transform_4(%arg0: i32, %arg1: i32) -> (i32, i32) {
    %c0_i32 = arith.constant 0 : i32
    return %arg0, %arg1 : i32, i32
  }
  func.func @transform_5(%arg0: i32, %arg1: i32) -> (i32, i32) {
    %c0_i32 = arith.constant 0 : i32
    return %arg0, %arg1 : i32, i32
  }
}

module attributes {stable_mosaic.version = 11 : i64} {
  func.func @_gemm_bn_kernel(%arg0: i32, %arg1: i32, %arg2: memref<8x2304xbf16, #tpu.memory_space<vmem>>, %arg3: memref<2304x128xbf16, #tpu.memory_space<vmem>>, %arg4: memref<1x128xf32, #tpu.memory_space<vmem>>, %arg5: memref<1x128xf32, #tpu.memory_space<vmem>>, %arg6: memref<8x128xf32, #tpu.memory_space<vmem>>) attributes {dimension_semantics = [#tpu.dimension_semantics<parallel>, #tpu.dimension_semantics<parallel>], iteration_bounds = array<i64: 1, 2>, scalar_prefetch = 0 : i64, scratch_operands = 0 : i64, tpu.core_type = #tpu.core_type<tc>, window_params = [{transform_indices = @transform_0, window_bounds = array<i64: 8, 2304>}, {transform_indices = @transform_1, window_bounds = array<i64: 2304, 128>}, {transform_indices = @transform_2, window_bounds = array<i64: 1, 128>}, {transform_indices = @transform_3, window_bounds = array<i64: 1, 128>}, {transform_indices = @transform_4, window_bounds = array<i64: 8, 128>}]} {
    %c0 = arith.constant 0 : index
    %c0_0 = arith.constant 0 : index
    %0 = vector.load %arg2[%c0, %c0_0] : memref<8x2304xbf16, #tpu.memory_space<vmem>>, vector<8x2304xbf16>
    %c0_1 = arith.constant 0 : index
    %c0_2 = arith.constant 0 : index
    %1 = vector.load %arg3[%c0_1, %c0_2] : memref<2304x128xbf16, #tpu.memory_space<vmem>>, vector<2304x128xbf16>
    %cst = arith.constant dense<0.000000e+00> : vector<8x128xf32>
    %2 = tpu.matmul %0, %1, %cst {dimension_numbers = #tpu.dot_dimension_numbers<[1], [0], [0], [1], [0, 0, 1, 1], [], []>} : vector<8x2304xbf16>, vector<2304x128xbf16>, vector<8x128xf32> -> vector<8x128xf32>
    %c0_3 = arith.constant 0 : index
    %c0_4 = arith.constant 0 : index
    %3 = vector.load %arg4[%c0_3, %c0_4] : memref<1x128xf32, #tpu.memory_space<vmem>>, vector<1x128xf32>
    %4 = vector.broadcast %3 : vector<1x128xf32> to vector<8x128xf32>
    %5 = arith.mulf %2, %4 : vector<8x128xf32>
    %c0_5 = arith.constant 0 : index
    %c0_6 = arith.constant 0 : index
    %6 = vector.load %arg5[%c0_5, %c0_6] : memref<1x128xf32, #tpu.memory_space<vmem>>, vector<1x128xf32>
    %7 = vector.broadcast %6 : vector<1x128xf32> to vector<8x128xf32>
    %8 = arith.addf %5, %7 : vector<8x128xf32>
    %cst_7 = arith.constant 0.000000e+00 : f32
    %9 = vector.broadcast %cst_7 : f32 to vector<8x128xf32>
    %10 = arith.maximumf %8, %9 : vector<8x128xf32>
    %c0_8 = arith.constant 0 : index
    %c0_9 = arith.constant 0 : index
    %11 = vector.load %arg6[%c0_8, %c0_9] : memref<8x128xf32, #tpu.memory_space<vmem>>, vector<8x128xf32>
    tpu.vector_store %arg6[%c0_8, %c0_9], %10 {strides = array<i32>} : memref<8x128xf32, #tpu.memory_space<vmem>>, vector<8x128xf32>,
    return
  }
  func.func @transform_0(%arg0: i32, %arg1: i32) -> (i32, i32) {
    %c0_i32 = arith.constant 0 : i32
    %c0_i32_0 = arith.constant 0 : i32
    return %arg0, %c0_i32 : i32, i32
  }
  func.func @transform_1(%arg0: i32, %arg1: i32) -> (i32, i32) {
    %c0_i32 = arith.constant 0 : i32
    %c0_i32_0 = arith.constant 0 : i32
    return %c0_i32, %arg1 : i32, i32
  }
  func.func @transform_2(%arg0: i32, %arg1: i32) -> (i32, i32) {
    %c0_i32 = arith.constant 0 : i32
    %c0_i32_0 = arith.constant 0 : i32
    return %c0_i32, %arg1 : i32, i32
  }
  func.func @transform_3(%arg0: i32, %arg1: i32) -> (i32, i32) {
    %c0_i32 = arith.constant 0 : i32
    %c0_i32_0 = arith.constant 0 : i32
    return %c0_i32, %arg1 : i32, i32
  }
  func.func @transform_4(%arg0: i32, %arg1: i32) -> (i32, i32) {
    %c0_i32 = arith.constant 0 : i32
    return %arg0, %arg1 : i32, i32
  }
}

module attributes {stable_mosaic.version = 11 : i64} {
  func.func @_gemm_bn_kernel(%arg0: i32, %arg1: i32, %arg2: memref<8x2304xbf16, #tpu.memory_space<vmem>>, %arg3: memref<2304x256xbf16, #tpu.memory_space<vmem>>, %arg4: memref<1x256xf32, #tpu.memory_space<vmem>>, %arg5: memref<1x256xf32, #tpu.memory_space<vmem>>, %arg6: memref<8x256xf32, #tpu.memory_space<vmem>>) attributes {dimension_semantics = [#tpu.dimension_semantics<parallel>, #tpu.dimension_semantics<parallel>], iteration_bounds = array<i64: 1, 4>, scalar_prefetch = 0 : i64, scratch_operands = 0 : i64, tpu.core_type = #tpu.core_type<tc>, window_params = [{transform_indices = @transform_0, window_bounds = array<i64: 8, 2304>}, {transform_indices = @transform_1, window_bounds = array<i64: 2304, 256>}, {transform_indices = @transform_2, window_bounds = array<i64: 1, 256>}, {transform_indices = @transform_3, window_bounds = array<i64: 1, 256>}, {transform_indices = @transform_4, window_bounds = array<i64: 8, 256>}]} {
    %c0 = arith.constant 0 : index
    %c0_0 = arith.constant 0 : index
    %0 = vector.load %arg2[%c0, %c0_0] : memref<8x2304xbf16, #tpu.memory_space<vmem>>, vector<8x2304xbf16>
    %c0_1 = arith.constant 0 : index
    %c0_2 = arith.constant 0 : index
    %1 = vector.load %arg3[%c0_1, %c0_2] : memref<2304x256xbf16, #tpu.memory_space<vmem>>, vector<2304x256xbf16>
    %cst = arith.constant dense<0.000000e+00> : vector<8x256xf32>
    %2 = tpu.matmul %0, %1, %cst {dimension_numbers = #tpu.dot_dimension_numbers<[1], [0], [0], [1], [0, 0, 1, 1], [], []>} : vector<8x2304xbf16>, vector<2304x256xbf16>, vector<8x256xf32> -> vector<8x256xf32>
    %c0_3 = arith.constant 0 : index
    %c0_4 = arith.constant 0 : index
    %3 = vector.load %arg4[%c0_3, %c0_4] : memref<1x256xf32, #tpu.memory_space<vmem>>, vector<1x256xf32>
    %4 = vector.broadcast %3 : vector<1x256xf32> to vector<8x256xf32>
    %5 = arith.mulf %2, %4 : vector<8x256xf32>
    %c0_5 = arith.constant 0 : index
    %c0_6 = arith.constant 0 : index
    %6 = vector.load %arg5[%c0_5, %c0_6] : memref<1x256xf32, #tpu.memory_space<vmem>>, vector<1x256xf32>
    %7 = vector.broadcast %6 : vector<1x256xf32> to vector<8x256xf32>
    %8 = arith.addf %5, %7 : vector<8x256xf32>
    %cst_7 = arith.constant 0.000000e+00 : f32
    %9 = vector.broadcast %cst_7 : f32 to vector<8x256xf32>
    %10 = arith.maximumf %8, %9 : vector<8x256xf32>
    %c0_8 = arith.constant 0 : index
    %c0_9 = arith.constant 0 : index
    %11 = vector.load %arg6[%c0_8, %c0_9] : memref<8x256xf32, #tpu.memory_space<vmem>>, vector<8x256xf32>
    tpu.vector_store %arg6[%c0_8, %c0_9], %10 {strides = array<i32>} : memref<8x256xf32, #tpu.memory_space<vmem>>, vector<8x256xf32>,
    return
  }
  func.func @transform_0(%arg0: i32, %arg1: i32) -> (i32, i32) {
    %c0_i32 = arith.constant 0 : i32
    %c0_i32_0 = arith.constant 0 : i32
    return %arg0, %c0_i32 : i32, i32
  }
  func.func @transform_1(%arg0: i32, %arg1: i32) -> (i32, i32) {
    %c0_i32 = arith.constant 0 : i32
    %c0_i32_0 = arith.constant 0 : i32
    return %c0_i32, %arg1 : i32, i32
  }
  func.func @transform_2(%arg0: i32, %arg1: i32) -> (i32, i32) {
    %c0_i32 = arith.constant 0 : i32
    %c0_i32_0 = arith.constant 0 : i32
    return %c0_i32, %arg1 : i32, i32
  }
  func.func @transform_3(%arg0: i32, %arg1: i32) -> (i32, i32) {
    %c0_i32 = arith.constant 0 : i32
    %c0_i32_0 = arith.constant 0 : i32
    return %c0_i32, %arg1 : i32, i32
  }
  func.func @transform_4(%arg0: i32, %arg1: i32) -> (i32, i32) {
    %c0_i32 = arith.constant 0 : i32
    return %arg0, %arg1 : i32, i32
  }
}

</mosaic_0001>

<bundles_post_ra>
// kernel: sound_enc_forward.17
= control target key start
LH: loop header
LB: loop body
LE: loop exit
PB: predicated region body
PF: predicated region fallthrough
CT: control target
= control target key end

     0   :  { %s1138_s15 = smov 0   ;;  %s1140_s16 = smov 0   ;;  %s1370_s0 = inlined_call_operand.vmem [shape: bf16[512,98], index: 0, kind: input, shape index: {}]   ;;  %s1371_s1 = inlined_call_operand.vmem [shape: bf16[98,64], index: 1, kind: input, shape index: {}]   ;;  %s1372_s2 = inlined_call_operand.vmem [shape: f32[1,64], index: 2, kind: input, shape index: {}]   ;;  %s1373_s3 = inlined_call_operand.vmem [shape: f32[1,64], index: 3, kind: input, shape index: {}]   ;;  %s1374_s4 = inlined_call_operand.vmem [shape: f32[512,64], index: 4, kind: output, shape index: {}]  }
   0x1   :  { %s1142_s17 = smov 0  }
   0x2 LB: > { %s26_s18 = sadd.s32 1, %s1107_s16  ;;  %p909_p0 = scmp.ge.s32.totalorder %s1111_s17, 1  ;;  %s1111_s17 = sphi %s1142_s17, %s14_s17   ;;  %s1107_s16 = sphi %s1140_s16, %s1376_s16   ;;  %s1103_s15 = sphi %s1138_s15, %s1375_s15  }
   0x3   : > { %p28_p1 = scmp.ge.s32.totalorder %s26_s18, 2  ;;  %p202_p2 = scmp.lt.s32.totalorder %s1111_s17, 3 }
   0x5   : > { %s1378_s18 = smov (%p28_p1, %s26_s18), 0  ;;  %p203_p3 = pnand %p909_p0, %p202_p2 }
   0x6   : > { %s910_s23 = sshll.u32 (!%p203_p3), %s1103_s15, 5 }
   0x7   : > { %206 = sbr.rel (%p203_p3) target bundleno = 271 (0x10f), region = 36  ;;  %p242_p4 = scmp.lt.s32.totalorder (!%p203_p3), %s910_s23, 63 }
   0xc   : > { %v1066_v0 = vld [vmem:[%s1371_s1 + $0x30] ss:$0 sps:$4 sm:$0x11]   ;;  %vm480_vm0 = vcmask 1040384   ;;  %v1067_v1 = vld [vmem:[%s1371_s1 + $0x28] sm:$0xff]   ;;  %v1068_v3 = vld [vmem:[%s1371_s1 + $0x20] sm:$0xff]  }
   0xd   : > { %1040 = vmatprep.subr.msk.bf16.mxu0 %vm480_vm0, %v1066_v0  ;;  %1041 = vmatprep.subr.msk.bf16.mxu1 %vm480_vm0, %v1066_v0  ;;  %v482_v2 = vsel %vm480_vm0, %v1066_v0, 0  ;;  %s1380_s23 = smov (!%p242_p4, %s910_s23), 63  ;;  %v1069_v4 = vld [vmem:[%s1371_s1 + $0x18] sm:$0xff]   ;;  %vm431_vm1 = vcmask 801792   ;;  %v1070_v7 = vld [vmem:[%s1371_s1 + $0x10] sm:$0xff]   ;;  %v1071_v8 = vld [vmem:[%s1371_s1 + $0x8] sm:$0xff]  }
   0xe   : > { %981 = vmatpush3.bf16.msra.mxu0 %v482_v2  ;;  %1033 = vmatpush3.bf16.msra.mxu1 %v482_v2  ;;  %s911_s26 = sshll.u32 %s1380_s23, 2  ;;  %v1072_v9 = vld [vmem:[%s1371_s1] sm:$0xff]   ;;  %s913_s19 = sshll.u32 %s1380_s23, 3  ;;  %vm755_vm2 = vcmask 523264  }
   0xf   : > { %982 = vmatprep.subr.bf16.mxu0 %v1067_v1  ;;  %1027 = vmatprep.subr.bf16.mxu1 %v1067_v1  ;;  %s1174_s5 = scalar_lea.vmem %s1370_s0, %s911_s26  ;;  %v1220_v24 = vld [vmem:[%s1372_s2] ss:$0 sm:$0xff]  ;;  %s1237_s22 = scalar_lea.vmem %s1374_s4, %s913_s19 }
  0x10   : > { %v1073_v5 = vld [vmem:[%s1174_s5] sm:$0xff]   ;;  %v1075_v10 = vld [vmem:[%s1174_s5 + $0x8] sm:$0xff]   ;;  %v1077_v12 = vld [vmem:[%s1174_s5 + $0x10] sm:$0xff]  }
  0x11   : > { %v1074_v6 = vld [vmem:[%s1174_s5 + $0x40] sm:$0xff]   ;;  %994 = vmatprep.mubr.msk.bf16.mxu0 %vm431_vm1, %v1073_v5  ;;  %v1076_v11 = vld [vmem:[%s1174_s5 + $0x48] sm:$0xff]   ;;  %v1078_v13 = vld [vmem:[%s1174_s5 + $0x50] sm:$0xff]  }
  0x12   : > { %983 = vmatpush3.bf16.msra.mxu0 %v1067_v1  ;;  %1034 = vmatpush3.bf16.msra.mxu1 %v1067_v1  ;;  %v1079_v14 = vld [vmem:[%s1174_s5 + $0x18] sm:$0xff]   ;;  %v1081_v16 = vld [vmem:[%s1174_s5 + $0x20] sm:$0xff]   ;;  %v1083_v18 = vld [vmem:[%s1174_s5 + $0x28] sm:$0xff]  }
  0x13   : > { %984 = vmatprep.subr.bf16.mxu0 %v1068_v3  ;;  %1028 = vmatprep.subr.bf16.mxu1 %v1068_v3  ;;  %v1080_v15 = vld [vmem:[%s1174_s5 + $0x58] sm:$0xff]   ;;  %v1082_v17 = vld [vmem:[%s1174_s5 + $0x60] sm:$0xff]   ;;  %v1084_v19 = vld [vmem:[%s1174_s5 + $0x68] sm:$0xff]  }
  0x14   : > { %1010 = vmatprep.mubr.msk.bf16.mxu1 %vm431_vm1, %v1074_v6  ;;  %v1085_v20 = vld [vmem:[%s1174_s5 + $0x30] sm:$0xff]   ;;  %v1087_v22 = vld [vmem:[%s1174_s5 + $0x38] sm:$0xff]   ;;  %v1225_v26 = vld [vmem:[%s1373_s3] ss:$0 sm:$0xff] }
  0x15   : > { %v1086_v21 = vld [vmem:[%s1174_s5 + $0x70] sm:$0xff]   ;;  %v1088_v23 = vld [vmem:[%s1174_s5 + $0x78] sm:$0xff]  }
  0x16   : > { %985 = vmatpush3.bf16.msra.mxu0 %v1068_v3  ;;  %1035 = vmatpush3.bf16.msra.mxu1 %v1068_v3 }
  0x17   : > { %986 = vmatprep.subr.bf16.mxu0 %v1069_v4  ;;  %1029 = vmatprep.subr.bf16.mxu1 %v1069_v4 }
  0x1a   : > { %987 = vmatpush3.bf16.msra.mxu0 %v1069_v4  ;;  %1036 = vmatpush3.bf16.msra.mxu1 %v1069_v4 }
  0x1b   : > { %988 = vmatprep.subr.bf16.mxu0 %v1070_v7  ;;  %1030 = vmatprep.subr.bf16.mxu1 %v1070_v7 }
  0x1e   : > { %989 = vmatpush3.bf16.msra.mxu0 %v1070_v7  ;;  %1037 = vmatpush3.bf16.msra.mxu1 %v1070_v7 }
  0x1f   : > { %990 = vmatprep.subr.bf16.mxu0 %v1071_v8  ;;  %1031 = vmatprep.subr.bf16.mxu1 %v1071_v8 }
  0x22   : > { %991 = vmatpush3.bf16.msra.mxu0 %v1071_v8  ;;  %1038 = vmatpush3.bf16.msra.mxu1 %v1071_v8 }
  0x23   : > { %992 = vmatprep.subr.bf16.mxu0 %v1072_v9  ;;  %1032 = vmatprep.subr.bf16.mxu1 %v1072_v9 }
  0x26   : > { %993 = vmatpush3.bf16.msra.mxu0 %v1072_v9  ;;  %1039 = vmatpush3.bf16.msra.mxu1 %v1072_v9 }
  0x29   : > { %995 = vmatmul.mubr.msk.bf16.vlgmr.msra.gmra.mxu0 %vm431_vm1, %v1075_v10  ;;  %1011 = vmatmul.mubr.msk.bf16.vlgmr.msra.gmra.mxu1 %vm431_vm1, %v1076_v11 }
  0x2a   : > { %998 = vmatprep.mubr.msk.bf16.mxu0 %vm431_vm1, %v1077_v12  ;;  %1014 = vmatprep.mubr.msk.bf16.mxu1 %vm431_vm1, %v1078_v13 }
  0x31   : > { %999 = vmatmul.mubr.msk.bf16.gmra.mxu0 %vm431_vm1, %v1079_v14  ;;  %1015 = vmatmul.mubr.msk.bf16.gmra.mxu1 %vm431_vm1, %v1080_v15 }
  0x32   : > { %1002 = vmatprep.mubr.msk.bf16.mxu0 %vm431_vm1, %v1081_v16  ;;  %1018 = vmatprep.mubr.msk.bf16.mxu1 %vm431_vm1, %v1082_v17 }
  0x39   : > { %1003 = vmatmul.mubr.msk.bf16.gmra.mxu0 %vm431_vm1, %v1083_v18  ;;  %1019 = vmatmul.mubr.msk.bf16.gmra.mxu1 %vm431_vm1, %v1084_v19 }
  0x3a   : > { %1006 = vmatprep.mubr.msk.bf16.mxu0 %vm431_vm1, %v1085_v20  ;;  %1022 = vmatprep.mubr.msk.bf16.mxu1 %vm431_vm1, %v1086_v21 }
  0x41   : > { %1007 = vmatmul.mubr.msk.bf16.gmra.mxu0 %vm431_vm1, %v1087_v22  ;;  %1023 = vmatmul.mubr.msk.bf16.gmra.mxu1 %vm431_vm1, %v1088_v23 }
  0xe9   : > { %v996_v25 = vpop.f32.mrf.mxu0  ;;  %v1012_v27 = vpop.f32.mrf.mxu1 }
  0xea   : > { %v654_v28 = vmul.f32 %v996_v25, %v1220_v24  ;;  %v670_v29 = vmul.f32 %v1012_v27, %v1220_v24 }
  0xeb   : > { %v518_v30 = vpop.f32.mrf.mxu0  ;;  %v582_v31 = vpop.f32.mrf.mxu1 }
  0xec   : > { %v693_v32 = vadd.f32 %v1225_v26, %v654_v28  ;;  %v709_v33 = vadd.f32 %v1225_v26, %v670_v29  ;;  %v652_v34 = vmul.f32 %v1220_v24, %v518_v30  ;;  %v668_v35 = vmul.f32 %v1220_v24, %v582_v31 }
  0xed   : > { %v997_v36 = vpop.f32.mrf.mxu0  ;;  %v1013_v37 = vpop.f32.mrf.mxu1 }
  0xee   : > { %v725_v38 = vmax.f32 %v693_v32, 0.0  ;;  %v741_v39 = vmax.f32 %v709_v33, 0.0  ;;  %v691_v40 = vadd.f32 %v1225_v26, %v652_v34  ;;  %v707_v41 = vadd.f32 %v1225_v26, %v668_v35 }
  0xef   : > { %v655_v42 = vmul.f32 %v997_v36, %v1220_v24  ;;  %v671_v43 = vmul.f32 %v1013_v37, %v1220_v24  ;;  %v521_v44 = vpop.f32.mrf.mxu0  ;;  %v585_v45 = vpop.f32.mrf.mxu1 }
  0xf0   : > { %758 = vst.msk [vmem:[%s1237_s22 + $0x10] sm:$0xff] %vm755_vm2, %v725_v38  ;;  %774 = vst.msk [vmem:[%s1237_s22 + $0x90] sm:$0xff] %vm755_vm2, %v741_v39  ;;  %v723_v46 = vmax.f32 %v691_v40, 0.0  ;;  %v739_v47 = vmax.f32 %v707_v41, 0.0  ;;  %v653_v48 = vmul.f32 %v1220_v24, %v521_v44  ;;  %v669_v49 = vmul.f32 %v1220_v24, %v585_v45 }
  0xf1   : > { %v694_v50 = vadd.f32 %v1225_v26, %v655_v42  ;;  %v710_v51 = vadd.f32 %v1225_v26, %v671_v43  ;;  %v1000_v52 = vpop.f32.mrf.mxu0  ;;  %v1016_v53 = vpop.f32.mrf.mxu1 }
  0xf2   : > { %756 = vst.msk [vmem:[%s1237_s22] sm:$0xff] %vm755_vm2, %v723_v46  ;;  %772 = vst.msk [vmem:[%s1237_s22 + $0x80] sm:$0xff] %vm755_vm2, %v739_v47  ;;  %v692_v54 = vadd.f32 %v1225_v26, %v653_v48  ;;  %v708_v55 = vadd.f32 %v1225_v26, %v669_v49  ;;  %v658_v56 = vmul.f32 %v1000_v52, %v1220_v24 }
  0xf3   : > { %v674_v57 = vmul.f32 %v1016_v53, %v1220_v24  ;;  %v726_v58 = vmax.f32 %v694_v50, 0.0  ;;  %v742_v59 = vmax.f32 %v710_v51, 0.0  ;;  %v534_v60 = vpop.f32.mrf.mxu0  ;;  %v598_v61 = vpop.f32.mrf.mxu1 }
  0xf4   : > { %v724_v62 = vmax.f32 %v692_v54, 0.0  ;;  %v740_v63 = vmax.f32 %v708_v55, 0.0  ;;  %v697_v0 = vadd.f32 %v1225_v26, %v658_v56  ;;  %v656_v2 = vmul.f32 %v1220_v24, %v534_v60 }
  0xf5   : > { %v713_v1 = vadd.f32 %v1225_v26, %v674_v57  ;;  %759 = vst.msk [vmem:[%s1237_s22 + $0x18] sm:$0xff] %vm755_vm2, %v726_v58  ;;  %775 = vst.msk [vmem:[%s1237_s22 + $0x98] sm:$0xff] %vm755_vm2, %v742_v59  ;;  %v672_v3 = vmul.f32 %v1220_v24, %v598_v61  ;;  %v1001_v4 = vpop.f32.mrf.mxu0  ;;  %v1017_v5 = vpop.f32.mrf.mxu1 }
  0xf6   : > { %757 = vst.msk [vmem:[%s1237_s22 + $0x8] sm:$0xff] %vm755_vm2, %v724_v62  ;;  %773 = vst.msk [vmem:[%s1237_s22 + $0x88] sm:$0xff] %vm755_vm2, %v740_v63  ;;  %v729_v6 = vmax.f32 %v697_v0, 0.0  ;;  %v659_v8 = vmul.f32 %v1001_v4, %v1220_v24  ;;  %v675_v9 = vmul.f32 %v1017_v5, %v1220_v24  ;;  %v695_v10 = vadd.f32 %v1225_v26, %v656_v2 }
  0xf7   : > { %v745_v7 = vmax.f32 %v713_v1, 0.0  ;;  %v711_v11 = vadd.f32 %v1225_v26, %v672_v3  ;;  %v537_v12 = vpop.f32.mrf.mxu0  ;;  %v601_v13 = vpop.f32.mrf.mxu1 }
  0xf8   : > { %762 = vst.msk [vmem:[%s1237_s22 + $0x30] sm:$0xff] %vm755_vm2, %v729_v6  ;;  %v698_v14 = vadd.f32 %v1225_v26, %v659_v8  ;;  %v714_v15 = vadd.f32 %v1225_v26, %v675_v9  ;;  %v657_v16 = vmul.f32 %v1220_v24, %v537_v12  ;;  %v673_v17 = vmul.f32 %v1220_v24, %v601_v13 }
  0xf9   : > { %778 = vst.msk [vmem:[%s1237_s22 + $0xb0] sm:$0xff] %vm755_vm2, %v745_v7  ;;  %v727_v18 = vmax.f32 %v695_v10, 0.0  ;;  %v743_v19 = vmax.f32 %v711_v11, 0.0  ;;  %v1004_v20 = vpop.f32.mrf.mxu0  ;;  %v1020_v21 = vpop.f32.mrf.mxu1 }
  0xfa   : > { %v730_v22 = vmax.f32 %v698_v14, 0.0  ;;  %v746_v23 = vmax.f32 %v714_v15, 0.0  ;;  %v696_v25 = vadd.f32 %v1225_v26, %v657_v16  ;;  %v712_v27 = vadd.f32 %v1225_v26, %v673_v17 }
  0xfb   : > { %760 = vst.msk [vmem:[%s1237_s22 + $0x20] sm:$0xff] %vm755_vm2, %v727_v18  ;;  %776 = vst.msk [vmem:[%s1237_s22 + $0xa0] sm:$0xff] %vm755_vm2, %v743_v19  ;;  %v662_v28 = vmul.f32 %v1004_v20, %v1220_v24  ;;  %v678_v29 = vmul.f32 %v1020_v21, %v1220_v24  ;;  %v550_v30 = vpop.f32.mrf.mxu0  ;;  %v614_v31 = vpop.f32.mrf.mxu1 }
  0xfc   : > { %763 = vst.msk [vmem:[%s1237_s22 + $0x38] sm:$0xff] %vm755_vm2, %v730_v22  ;;  %779 = vst.msk [vmem:[%s1237_s22 + $0xb8] sm:$0xff] %vm755_vm2, %v746_v23  ;;  %v728_v32 = vmax.f32 %v696_v25, 0.0  ;;  %v744_v33 = vmax.f32 %v712_v27, 0.0  ;;  %v660_v34 = vmul.f32 %v1220_v24, %v550_v30  ;;  %v676_v35 = vmul.f32 %v1220_v24, %v614_v31 }
  0xfd   : > { %v701_v36 = vadd.f32 %v1225_v26, %v662_v28  ;;  %v717_v37 = vadd.f32 %v1225_v26, %v678_v29  ;;  %v1005_v38 = vpop.f32.mrf.mxu0  ;;  %v1021_v39 = vpop.f32.mrf.mxu1 }
  0xfe   : > { %761 = vst.msk [vmem:[%s1237_s22 + $0x28] sm:$0xff] %vm755_vm2, %v728_v32  ;;  %777 = vst.msk [vmem:[%s1237_s22 + $0xa8] sm:$0xff] %vm755_vm2, %v744_v33  ;;  %v699_v40 = vadd.f32 %v1225_v26, %v660_v34  ;;  %v715_v41 = vadd.f32 %v1225_v26, %v676_v35  ;;  %v663_v42 = vmul.f32 %v1005_v38, %v1220_v24 }
  0xff   : > { %v679_v43 = vmul.f32 %v1021_v39, %v1220_v24  ;;  %v733_v44 = vmax.f32 %v701_v36, 0.0  ;;  %v749_v45 = vmax.f32 %v717_v37, 0.0  ;;  %v553_v46 = vpop.f32.mrf.mxu0  ;;  %v617_v47 = vpop.f32.mrf.mxu1 }
 0x100   : > { %v731_v48 = vmax.f32 %v699_v40, 0.0  ;;  %v747_v49 = vmax.f32 %v715_v41, 0.0  ;;  %v702_v50 = vadd.f32 %v1225_v26, %v663_v42  ;;  %v661_v52 = vmul.f32 %v1220_v24, %v553_v46 }
 0x101   : > { %v718_v51 = vadd.f32 %v1225_v26, %v679_v43  ;;  %766 = vst.msk [vmem:[%s1237_s22 + $0x50] sm:$0xff] %vm755_vm2, %v733_v44  ;;  %782 = vst.msk [vmem:[%s1237_s22 + $0xd0] sm:$0xff] %vm755_vm2, %v749_v45  ;;  %v677_v53 = vmul.f32 %v1220_v24, %v617_v47  ;;  %v1008_v54 = vpop.f32.mrf.mxu0  ;;  %v1024_v55 = vpop.f32.mrf.mxu1 }
 0x102   : > { %764 = vst.msk [vmem:[%s1237_s22 + $0x40] sm:$0xff] %vm755_vm2, %v731_v48  ;;  %780 = vst.msk [vmem:[%s1237_s22 + $0xc0] sm:$0xff] %vm755_vm2, %v747_v49  ;;  %v734_v56 = vmax.f32 %v702_v50, 0.0  ;;  %v666_v58 = vmul.f32 %v1008_v54, %v1220_v24  ;;  %v682_v59 = vmul.f32 %v1024_v55, %v1220_v24  ;;  %v700_v60 = vadd.f32 %v1225_v26, %v661_v52 }
 0x103   : > { %v750_v57 = vmax.f32 %v718_v51, 0.0  ;;  %v716_v61 = vadd.f32 %v1225_v26, %v677_v53  ;;  %v566_v62 = vpop.f32.mrf.mxu0  ;;  %v630_v63 = vpop.f32.mrf.mxu1 }
 0x104   : > { %767 = vst.msk [vmem:[%s1237_s22 + $0x58] sm:$0xff] %vm755_vm2, %v734_v56  ;;  %v705_v0 = vadd.f32 %v1225_v26, %v666_v58  ;;  %v721_v1 = vadd.f32 %v1225_v26, %v682_v59  ;;  %v664_v2 = vmul.f32 %v1220_v24, %v566_v62  ;;  %v680_v3 = vmul.f32 %v1220_v24, %v630_v63 }
 0x105   : > { %783 = vst.msk [vmem:[%s1237_s22 + $0xd8] sm:$0xff] %vm755_vm2, %v750_v57  ;;  %v732_v4 = vmax.f32 %v700_v60, 0.0  ;;  %v748_v5 = vmax.f32 %v716_v61, 0.0  ;;  %v1009_v6 = vpop.f32.mrf.mxu0  ;;  %v1025_v7 = vpop.f32.mrf.mxu1 }
 0x106   : > { %v737_v8 = vmax.f32 %v705_v0, 0.0  ;;  %v753_v9 = vmax.f32 %v721_v1, 0.0  ;;  %v703_v10 = vadd.f32 %v1225_v26, %v664_v2  ;;  %v719_v11 = vadd.f32 %v1225_v26, %v680_v3 }
 0x107   : > { %765 = vst.msk [vmem:[%s1237_s22 + $0x48] sm:$0xff] %vm755_vm2, %v732_v4  ;;  %781 = vst.msk [vmem:[%s1237_s22 + $0xc8] sm:$0xff] %vm755_vm2, %v748_v5  ;;  %v667_v12 = vmul.f32 %v1009_v6, %v1220_v24  ;;  %v683_v13 = vmul.f32 %v1025_v7, %v1220_v24  ;;  %v569_v14 = vpop.f32.mrf.mxu0  ;;  %v633_v15 = vpop.f32.mrf.mxu1 }
 0x108   : > { %770 = vst.msk [vmem:[%s1237_s22 + $0x70] sm:$0xff] %vm755_vm2, %v737_v8  ;;  %786 = vst.msk [vmem:[%s1237_s22 + $0xf0] sm:$0xff] %vm755_vm2, %v753_v9  ;;  %v735_v16 = vmax.f32 %v703_v10, 0.0  ;;  %v751_v17 = vmax.f32 %v719_v11, 0.0  ;;  %v665_v18 = vmul.f32 %v1220_v24, %v569_v14  ;;  %v681_v19 = vmul.f32 %v1220_v24, %v633_v15 }
 0x109   : > { %v706_v20 = vadd.f32 %v1225_v26, %v667_v12  ;;  %v722_v21 = vadd.f32 %v1225_v26, %v683_v13 }
 0x10a   : > { %768 = vst.msk [vmem:[%s1237_s22 + $0x60] sm:$0xff] %vm755_vm2, %v735_v16  ;;  %784 = vst.msk [vmem:[%s1237_s22 + $0xe0] sm:$0xff] %vm755_vm2, %v751_v17  ;;  %v704_v22 = vadd.f32 %v1225_v26, %v665_v18  ;;  %v720_v23 = vadd.f32 %v1225_v26, %v681_v19 }
 0x10b   : > { %v738_v25 = vmax.f32 %v706_v20, 0.0  ;;  %v754_v27 = vmax.f32 %v722_v21, 0.0 }
 0x10c   : > { %v736_v28 = vmax.f32 %v704_v22, 0.0  ;;  %v752_v29 = vmax.f32 %v720_v23, 0.0 }
 0x10d   : > { %771 = vst.msk [vmem:[%s1237_s22 + $0x78] sm:$0xff] %vm755_vm2, %v738_v25  ;;  %787 = vst.msk [vmem:[%s1237_s22 + $0xf8] sm:$0xff] %vm755_vm2, %v754_v27 }
 0x10e   : > { %769 = vst.msk [vmem:[%s1237_s22 + $0x68] sm:$0xff] %vm755_vm2, %v736_v28  ;;  %785 = vst.msk [vmem:[%s1237_s22 + $0xe8] sm:$0xff] %vm755_vm2, %v752_v29 }
 0x10f PF: > { %s14_s17 = sadd.s32 1, %s1111_s17   ;;  %s1375_s15 = smov %s1107_s16 }
 0x110   : > { %p11_p5 = scmp.ge.s32.totalorder %s14_s17, 4   ;;  %s1376_s16 = smov %s1378_s18 }
 0x112   :  { %13 = sbr.rel (!%p11_p5) target bundleno = 2 (0x2), region = 75 }

// kernel: sound_enc_forward.18
= control target key start
LH: loop header
LB: loop body
LE: loop exit
PB: predicated region body
PF: predicated region fallthrough
CT: control target
= control target key end

     0   :  { %vm288_vm0 = vcmask 523264   ;;  %s943_s0 = inlined_call_operand.vmem [shape: f32[9,128,64], index: 0, kind: input, shape index: {}]   ;;  %s944_s1 = inlined_call_operand.vmem [shape: f32[128,64], index: 1, kind: output, shape index: {}]  }
   0x1   :  { %v8_v0 = vld [vmem:[%s943_s0] sm:$0xff]  ;;  %v9_v6 = vld [vmem:[%s943_s0 + $0x8] sm:$0xff]  ;;  %v10_v15 = vld [vmem:[%s943_s0 + $0x10] sm:$0xff] }
   0x2   :  { %v309_v1 = vld [vmem:[%s943_s0 + $0x80] sm:$0xff]  ;;  %v310_v7 = vld [vmem:[%s943_s0 + $0x88] sm:$0xff]  ;;  %v311_v16 = vld [vmem:[%s943_s0 + $0x90] sm:$0xff] }
   0x3   :  { %v325_v2 = vld [vmem:[%s943_s0 + $0x100] sm:$0xff]  ;;  %v41_v3 = vmax.f32 %v8_v0, %v309_v1  ;;  %v326_v8 = vld [vmem:[%s943_s0 + $0x108] sm:$0xff]  ;;  %v42_v10 = vmax.f32 %v9_v6, %v310_v7  ;;  %v327_v17 = vld [vmem:[%s943_s0 + $0x110] sm:$0xff]  ;;  %v43_v20 = vmax.f32 %v10_v15, %v311_v16 }
   0x4   :  { %v341_v4 = vld [vmem:[%s943_s0 + $0x180] sm:$0xff]  ;;  %v342_v13 = vld [vmem:[%s943_s0 + $0x188] sm:$0xff]  ;;  %v343_v24 = vld [vmem:[%s943_s0 + $0x190] sm:$0xff] }
   0x5   :  { %v74_v5 = vmax.f32 %v41_v3, %v325_v2  ;;  %v357_v9 = vld [vmem:[%s943_s0 + $0x200] sm:$0xff]  ;;  %v75_v14 = vmax.f32 %v42_v10, %v326_v8  ;;  %v358_v19 = vld [vmem:[%s943_s0 + $0x208] sm:$0xff]  ;;  %v76_v26 = vmax.f32 %v43_v20, %v327_v17  ;;  %v11_v27 = vld [vmem:[%s943_s0 + $0x18] sm:$0xff] }
   0x6   :  { %v373_v12 = vld [vmem:[%s943_s0 + $0x280] sm:$0xff]  ;;  %v374_v23 = vld [vmem:[%s943_s0 + $0x288] sm:$0xff]  ;;  %v312_v28 = vld [vmem:[%s943_s0 + $0x98] sm:$0xff] }
   0x7   :  { %v107_v11 = vmax.f32 %v74_v5, %v341_v4  ;;  %v389_v21 = vld [vmem:[%s943_s0 + $0x300] sm:$0xff]  ;;  %v108_v22 = vmax.f32 %v75_v14, %v342_v13  ;;  %v328_v29 = vld [vmem:[%s943_s0 + $0x118] sm:$0xff]  ;;  %v359_v33 = vld [vmem:[%s943_s0 + $0x210] sm:$0xff]  ;;  %v44_v34 = vmax.f32 %v11_v27, %v312_v28  ;;  %v109_v37 = vmax.f32 %v76_v26, %v343_v24 }
   0x8   :  { %v405_v30 = vld [vmem:[%s943_s0 + $0x380] sm:$0xff]  ;;  %v390_v36 = vld [vmem:[%s943_s0 + $0x308] sm:$0xff]  ;;  %v375_v38 = vld [vmem:[%s943_s0 + $0x290] sm:$0xff] }
   0x9   :  { %v140_v18 = vmax.f32 %v107_v11, %v357_v9  ;;  %v421_v31 = vld [vmem:[%s943_s0 + $0x400] sm:$0xff]  ;;  %v141_v32 = vmax.f32 %v108_v22, %v358_v19  ;;  %v344_v39 = vld [vmem:[%s943_s0 + $0x198] sm:$0xff]  ;;  %v77_v41 = vmax.f32 %v44_v34, %v328_v29  ;;  %v406_v46 = vld [vmem:[%s943_s0 + $0x388] sm:$0xff]  ;;  %v142_v48 = vmax.f32 %v109_v37, %v359_v33 }
   0xa   :  { %v12_v42 = vld [vmem:[%s943_s0 + $0x20] sm:$0xff]  ;;  %v422_v47 = vld [vmem:[%s943_s0 + $0x408] sm:$0xff]  ;;  %v360_v49 = vld [vmem:[%s943_s0 + $0x218] sm:$0xff] }
   0xb   :  { %v173_v25 = vmax.f32 %v140_v18, %v373_v12  ;;  %v174_v40 = vmax.f32 %v141_v32, %v374_v23  ;;  %v313_v43 = vld [vmem:[%s943_s0 + $0xa0] sm:$0xff]  ;;  %v391_v52 = vld [vmem:[%s943_s0 + $0x310] sm:$0xff]  ;;  %v110_v53 = vmax.f32 %v77_v41, %v344_v39  ;;  %v376_v54 = vld [vmem:[%s943_s0 + $0x298] sm:$0xff]  ;;  %v175_v57 = vmax.f32 %v142_v48, %v375_v38 }
   0xc   :  { %v329_v44 = vld [vmem:[%s943_s0 + $0x120] sm:$0xff]  ;;  %v45_v50 = vmax.f32 %v12_v42, %v313_v43  ;;  %v13_v59 = vld [vmem:[%s943_s0 + $0x28] sm:$0xff]  ;;  %v407_v63 = vld [vmem:[%s943_s0 + $0x390] sm:$0xff] }
   0xd   :  { %v206_v35 = vmax.f32 %v173_v25, %v389_v21  ;;  %v207_v51 = vmax.f32 %v174_v40, %v390_v36  ;;  %v345_v55 = vld [vmem:[%s943_s0 + $0x1a0] sm:$0xff]  ;;  %v314_v60 = vld [vmem:[%s943_s0 + $0xa8] sm:$0xff]  ;;  %v423_v0 = vld [vmem:[%s943_s0 + $0x410] sm:$0xff]  ;;  %v143_v1 = vmax.f32 %v110_v53, %v360_v49  ;;  %v208_v4 = vmax.f32 %v175_v57, %v391_v52 }
   0xe   :  { %v78_v58 = vmax.f32 %v45_v50, %v329_v44  ;;  %v330_v61 = vld [vmem:[%s943_s0 + $0x128] sm:$0xff]  ;;  %v361_v2 = vld [vmem:[%s943_s0 + $0x220] sm:$0xff]  ;;  %v46_v3 = vmax.f32 %v13_v59, %v314_v60  ;;  %v392_v5 = vld [vmem:[%s943_s0 + $0x318] sm:$0xff] }
   0xf   :  { %v239_v45 = vmax.f32 %v206_v35, %v405_v30  ;;  %v240_v62 = vmax.f32 %v207_v51, %v406_v46  ;;  %v377_v7 = vld [vmem:[%s943_s0 + $0x2a0] sm:$0xff]  ;;  %v346_v8 = vld [vmem:[%s943_s0 + $0x1a8] sm:$0xff]  ;;  %v176_v10 = vmax.f32 %v143_v1, %v376_v54  ;;  %v14_v12 = vld [vmem:[%s943_s0 + $0x30] sm:$0xff]  ;;  %v241_v15 = vmax.f32 %v208_v4, %v407_v63 }
  0x10   :  { %v111_v6 = vmax.f32 %v78_v58, %v345_v55  ;;  %v79_v11 = vmax.f32 %v46_v3, %v330_v61  ;;  %v315_v13 = vld [vmem:[%s943_s0 + $0xb0] sm:$0xff]  ;;  %v408_v16 = vld [vmem:[%s943_s0 + $0x398] sm:$0xff]  ;;  %v362_v19 = vld [vmem:[%s943_s0 + $0x228] sm:$0xff] }
  0x11   :  { %v272_v56 = vmax.f32 %v239_v45, %v421_v31  ;;  %v273_v9 = vmax.f32 %v240_v62, %v422_v47  ;;  %v331_v14 = vld [vmem:[%s943_s0 + $0x130] sm:$0xff]  ;;  %v424_v17 = vld [vmem:[%s943_s0 + $0x418] sm:$0xff]  ;;  %v47_v20 = vmax.f32 %v14_v12, %v315_v13  ;;  %v209_v21 = vmax.f32 %v176_v10, %v392_v5  ;;  %v393_v22 = vld [vmem:[%s943_s0 + $0x320] sm:$0xff] }
  0x12   :  { %v144_v18 = vmax.f32 %v111_v6, %v361_v2  ;;  %v112_v23 = vmax.f32 %v79_v11, %v346_v8  ;;  %v378_v24 = vld [vmem:[%s943_s0 + $0x2a8] sm:$0xff]  ;;  %v347_v25 = vld [vmem:[%s943_s0 + $0x1b0] sm:$0xff]  ;;  %v274_v26 = vmax.f32 %v241_v15, %v423_v0  ;;  %v15_v29 = vld [vmem:[%s943_s0 + $0x38] sm:$0xff] }
  0x13   :  { %289 = vst.msk [vmem:[%s944_s1] sm:$0xff] %vm288_vm0, %v272_v56  ;;  %290 = vst.msk [vmem:[%s944_s1 + $0x8] sm:$0xff] %vm288_vm0, %v273_v9  ;;  %v80_v28 = vmax.f32 %v47_v20, %v331_v14  ;;  %v316_v30 = vld [vmem:[%s943_s0 + $0xb8] sm:$0xff]  ;;  %v242_v32 = vmax.f32 %v209_v21, %v408_v16  ;;  %v409_v33 = vld [vmem:[%s943_s0 + $0x3a0] sm:$0xff] }
  0x14   :  { %v177_v27 = vmax.f32 %v144_v18, %v377_v7  ;;  %v332_v31 = vld [vmem:[%s943_s0 + $0x138] sm:$0xff]  ;;  %v425_v34 = vld [vmem:[%s943_s0 + $0x420] sm:$0xff]  ;;  %v145_v35 = vmax.f32 %v112_v23, %v362_v19  ;;  %v363_v36 = vld [vmem:[%s943_s0 + $0x230] sm:$0xff]  ;;  %v48_v37 = vmax.f32 %v15_v29, %v316_v30  ;;  %291 = vst.msk [vmem:[%s944_s1 + $0x10] sm:$0xff] %vm288_vm0, %v274_v26 }
  0x15   :  { %v394_v39 = vld [vmem:[%s943_s0 + $0x328] sm:$0xff]  ;;  %v113_v40 = vmax.f32 %v80_v28, %v347_v25  ;;  %v379_v41 = vld [vmem:[%s943_s0 + $0x2b0] sm:$0xff]  ;;  %v348_v42 = vld [vmem:[%s943_s0 + $0x1b8] sm:$0xff]  ;;  %v275_v43 = vmax.f32 %v242_v32, %v424_v17 }
  0x16   :  { %v210_v38 = vmax.f32 %v177_v27, %v393_v22  ;;  %v178_v44 = vmax.f32 %v145_v35, %v378_v24  ;;  %v81_v45 = vmax.f32 %v48_v37, %v332_v31  ;;  %v16_v46 = vld [vmem:[%s943_s0 + $0x40] sm:$0xff]  ;;  %v410_v50 = vld [vmem:[%s943_s0 + $0x3a8] sm:$0xff]  ;;  %v364_v53 = vld [vmem:[%s943_s0 + $0x238] sm:$0xff] }
  0x17   :  { %v317_v47 = vld [vmem:[%s943_s0 + $0xc0] sm:$0xff]  ;;  %v426_v51 = vld [vmem:[%s943_s0 + $0x428] sm:$0xff]  ;;  %v146_v52 = vmax.f32 %v113_v40, %v363_v36  ;;  %292 = vst.msk [vmem:[%s944_s1 + $0x18] sm:$0xff] %vm288_vm0, %v275_v43  ;;  %v395_v56 = vld [vmem:[%s943_s0 + $0x330] sm:$0xff] }
  0x18   :  { %v333_v48 = vld [vmem:[%s943_s0 + $0x140] sm:$0xff]  ;;  %v243_v49 = vmax.f32 %v210_v38, %v409_v33  ;;  %v49_v54 = vmax.f32 %v16_v46, %v317_v47  ;;  %v211_v55 = vmax.f32 %v178_v44, %v394_v39  ;;  %v114_v57 = vmax.f32 %v81_v45, %v348_v42  ;;  %v380_v58 = vld [vmem:[%s943_s0 + $0x2b8] sm:$0xff]  ;;  %v17_v63 = vld [vmem:[%s943_s0 + $0x48] sm:$0xff] }
  0x19   :  { %v349_v59 = vld [vmem:[%s943_s0 + $0x1c0] sm:$0xff]  ;;  %v179_v61 = vmax.f32 %v146_v52, %v379_v41  ;;  %v318_v0 = vld [vmem:[%s943_s0 + $0xc8] sm:$0xff]  ;;  %v411_v3 = vld [vmem:[%s943_s0 + $0x3b0] sm:$0xff] }
  0x1a   :  { %v276_v60 = vmax.f32 %v243_v49, %v425_v34  ;;  %v82_v62 = vmax.f32 %v49_v54, %v333_v48  ;;  %v334_v1 = vld [vmem:[%s943_s0 + $0x148] sm:$0xff]  ;;  %v244_v2 = vmax.f32 %v211_v55, %v410_v50  ;;  %v427_v4 = vld [vmem:[%s943_s0 + $0x430] sm:$0xff]  ;;  %v147_v5 = vmax.f32 %v114_v57, %v364_v53  ;;  %v365_v6 = vld [vmem:[%s943_s0 + $0x240] sm:$0xff] }
  0x1b   :  { %v50_v7 = vmax.f32 %v17_v63, %v318_v0  ;;  %v212_v8 = vmax.f32 %v179_v61, %v395_v56  ;;  %v396_v9 = vld [vmem:[%s943_s0 + $0x338] sm:$0xff]  ;;  %v381_v11 = vld [vmem:[%s943_s0 + $0x2c0] sm:$0xff]  ;;  %v350_v12 = vld [vmem:[%s943_s0 + $0x1c8] sm:$0xff] }
  0x1c   :  { %293 = vst.msk [vmem:[%s944_s1 + $0x20] sm:$0xff] %vm288_vm0, %v276_v60  ;;  %v115_v10 = vmax.f32 %v82_v62, %v349_v59  ;;  %v277_v13 = vmax.f32 %v244_v2, %v426_v51  ;;  %v180_v14 = vmax.f32 %v147_v5, %v380_v58  ;;  %v18_v16 = vld [vmem:[%s943_s0 + $0x50] sm:$0xff]  ;;  %v412_v20 = vld [vmem:[%s943_s0 + $0x3b8] sm:$0xff]  ;;  %v366_v23 = vld [vmem:[%s943_s0 + $0x248] sm:$0xff] }
  0x1d   :  { %v83_v15 = vmax.f32 %v50_v7, %v334_v1  ;;  %v319_v17 = vld [vmem:[%s943_s0 + $0xd0] sm:$0xff]  ;;  %v245_v19 = vmax.f32 %v212_v8, %v411_v3  ;;  %v428_v21 = vld [vmem:[%s943_s0 + $0x438] sm:$0xff]  ;;  %v397_v26 = vld [vmem:[%s943_s0 + $0x340] sm:$0xff] }
  0x1e   :  { %v335_v18 = vld [vmem:[%s943_s0 + $0x150] sm:$0xff]  ;;  %v148_v22 = vmax.f32 %v115_v10, %v365_v6  ;;  %v51_v24 = vmax.f32 %v18_v16, %v319_v17  ;;  %294 = vst.msk [vmem:[%s944_s1 + $0x28] sm:$0xff] %vm288_vm0, %v277_v13  ;;  %v213_v25 = vmax.f32 %v180_v14, %v396_v9  ;;  %v382_v28 = vld [vmem:[%s943_s0 + $0x2c8] sm:$0xff]  ;;  %v19_v33 = vld [vmem:[%s943_s0 + $0x58] sm:$0xff] }
  0x1f   :  { %v116_v27 = vmax.f32 %v83_v15, %v350_v12  ;;  %v351_v29 = vld [vmem:[%s943_s0 + $0x1d0] sm:$0xff]  ;;  %v278_v30 = vmax.f32 %v245_v19, %v427_v4  ;;  %v320_v34 = vld [vmem:[%s943_s0 + $0xd8] sm:$0xff]  ;;  %v413_v37 = vld [vmem:[%s943_s0 + $0x3c0] sm:$0xff] }
  0x20   :  { %v181_v31 = vmax.f32 %v148_v22, %v381_v11  ;;  %v84_v32 = vmax.f32 %v51_v24, %v335_v18  ;;  %v336_v35 = vld [vmem:[%s943_s0 + $0x158] sm:$0xff]  ;;  %v246_v36 = vmax.f32 %v213_v25, %v412_v20  ;;  %v429_v38 = vld [vmem:[%s943_s0 + $0x440] sm:$0xff]  ;;  %v367_v40 = vld [vmem:[%s943_s0 + $0x250] sm:$0xff]  ;;  %v52_v41 = vmax.f32 %v19_v33, %v320_v34 }
  0x21   :  { %v149_v39 = vmax.f32 %v116_v27, %v366_v23  ;;  %295 = vst.msk [vmem:[%s944_s1 + $0x30] sm:$0xff] %vm288_vm0, %v278_v30  ;;  %v398_v43 = vld [vmem:[%s943_s0 + $0x348] sm:$0xff]  ;;  %v383_v45 = vld [vmem:[%s943_s0 + $0x2d0] sm:$0xff]  ;;  %v352_v46 = vld [vmem:[%s943_s0 + $0x1d8] sm:$0xff] }
  0x22   :  { %v214_v42 = vmax.f32 %v181_v31, %v397_v26  ;;  %v117_v44 = vmax.f32 %v84_v32, %v351_v29  ;;  %v279_v47 = vmax.f32 %v246_v36, %v428_v21  ;;  %v85_v49 = vmax.f32 %v52_v41, %v336_v35  ;;  %v20_v50 = vld [vmem:[%s943_s0 + $0x60] sm:$0xff]  ;;  %v414_v54 = vld [vmem:[%s943_s0 + $0x3c8] sm:$0xff]  ;;  %v368_v57 = vld [vmem:[%s943_s0 + $0x258] sm:$0xff] }
  0x23   :  { %v182_v48 = vmax.f32 %v149_v39, %v382_v28  ;;  %v321_v51 = vld [vmem:[%s943_s0 + $0xe0] sm:$0xff]  ;;  %v430_v55 = vld [vmem:[%s943_s0 + $0x448] sm:$0xff]  ;;  %v399_v60 = vld [vmem:[%s943_s0 + $0x350] sm:$0xff] }
  0x24   :  { %v337_v52 = vld [vmem:[%s943_s0 + $0x160] sm:$0xff]  ;;  %v247_v53 = vmax.f32 %v214_v42, %v413_v37  ;;  %v150_v56 = vmax.f32 %v117_v44, %v367_v40  ;;  %v53_v58 = vmax.f32 %v20_v50, %v321_v51  ;;  %296 = vst.msk [vmem:[%s944_s1 + $0x38] sm:$0xff] %vm288_vm0, %v279_v47  ;;  %v118_v61 = vmax.f32 %v85_v49, %v352_v46  ;;  %v384_v62 = vld [vmem:[%s943_s0 + $0x2d8] sm:$0xff]  ;;  %v21_v3 = vld [vmem:[%s943_s0 + $0x68] sm:$0xff] }
  0x25   :  { %v215_v59 = vmax.f32 %v182_v48, %v398_v43  ;;  %v353_v63 = vld [vmem:[%s943_s0 + $0x1e0] sm:$0xff]  ;;  %v322_v4 = vld [vmem:[%s943_s0 + $0xe8] sm:$0xff]  ;;  %v415_v7 = vld [vmem:[%s943_s0 + $0x3d0] sm:$0xff] }
  0x26   :  { %v280_v0 = vmax.f32 %v247_v53, %v429_v38  ;;  %v183_v1 = vmax.f32 %v150_v56, %v383_v45  ;;  %v86_v2 = vmax.f32 %v53_v58, %v337_v52  ;;  %v338_v5 = vld [vmem:[%s943_s0 + $0x168] sm:$0xff]  ;;  %v431_v8 = vld [vmem:[%s943_s0 + $0x450] sm:$0xff]  ;;  %v151_v9 = vmax.f32 %v118_v61, %v368_v57  ;;  %v369_v10 = vld [vmem:[%s943_s0 + $0x260] sm:$0xff] }
  0x27   :  { %v248_v6 = vmax.f32 %v215_v59, %v414_v54  ;;  %v54_v11 = vmax.f32 %v21_v3, %v322_v4  ;;  %v400_v13 = vld [vmem:[%s943_s0 + $0x358] sm:$0xff]  ;;  %v385_v15 = vld [vmem:[%s943_s0 + $0x2e0] sm:$0xff]  ;;  %v354_v16 = vld [vmem:[%s943_s0 + $0x1e8] sm:$0xff] }
  0x28   :  { %297 = vst.msk [vmem:[%s944_s1 + $0x40] sm:$0xff] %vm288_vm0, %v280_v0  ;;  %v216_v12 = vmax.f32 %v183_v1, %v399_v60  ;;  %v119_v14 = vmax.f32 %v86_v2, %v353_v63  ;;  %v184_v18 = vmax.f32 %v151_v9, %v384_v62  ;;  %v22_v20 = vld [vmem:[%s943_s0 + $0x70] sm:$0xff]  ;;  %v416_v24 = vld [vmem:[%s943_s0 + $0x3d8] sm:$0xff]  ;;  %v370_v27 = vld [vmem:[%s943_s0 + $0x268] sm:$0xff] }
  0x29   :  { %v281_v17 = vmax.f32 %v248_v6, %v430_v55  ;;  %v87_v19 = vmax.f32 %v54_v11, %v338_v5  ;;  %v323_v21 = vld [vmem:[%s943_s0 + $0xf0] sm:$0xff]  ;;  %v432_v25 = vld [vmem:[%s943_s0 + $0x458] sm:$0xff]  ;;  %v401_v30 = vld [vmem:[%s943_s0 + $0x360] sm:$0xff] }
  0x2a   :  { %v339_v22 = vld [vmem:[%s943_s0 + $0x170] sm:$0xff]  ;;  %v249_v23 = vmax.f32 %v216_v12, %v415_v7  ;;  %v152_v26 = vmax.f32 %v119_v14, %v369_v10  ;;  %v55_v28 = vmax.f32 %v22_v20, %v323_v21  ;;  %v217_v29 = vmax.f32 %v184_v18, %v400_v13  ;;  %v386_v32 = vld [vmem:[%s943_s0 + $0x2e8] sm:$0xff]  ;;  %v23_v37 = vld [vmem:[%s943_s0 + $0x78] sm:$0xff] }
  0x2b   :  { %298 = vst.msk [vmem:[%s944_s1 + $0x48] sm:$0xff] %vm288_vm0, %v281_v17  ;;  %v120_v31 = vmax.f32 %v87_v19, %v354_v16  ;;  %v355_v33 = vld [vmem:[%s943_s0 + $0x1f0] sm:$0xff]  ;;  %v324_v38 = vld [vmem:[%s943_s0 + $0xf8] sm:$0xff]  ;;  %v417_v41 = vld [vmem:[%s943_s0 + $0x3e0] sm:$0xff] }
  0x2c   :  { %v282_v34 = vmax.f32 %v249_v23, %v431_v8  ;;  %v185_v35 = vmax.f32 %v152_v26, %v385_v15  ;;  %v88_v36 = vmax.f32 %v55_v28, %v339_v22  ;;  %v340_v39 = vld [vmem:[%s943_s0 + $0x178] sm:$0xff]  ;;  %v250_v40 = vmax.f32 %v217_v29, %v416_v24  ;;  %v371_v43 = vld [vmem:[%s943_s0 + $0x270] sm:$0xff]  ;;  %v402_v46 = vld [vmem:[%s943_s0 + $0x368] sm:$0xff] }
  0x2d   :  { %v153_v42 = vmax.f32 %v120_v31, %v370_v27  ;;  %v56_v44 = vmax.f32 %v23_v37, %v324_v38  ;;  %v356_v48 = vld [vmem:[%s943_s0 + $0x1f8] sm:$0xff]  ;;  %v433_v50 = vld [vmem:[%s943_s0 + $0x460] sm:$0xff]  ;;  %v387_v52 = vld [vmem:[%s943_s0 + $0x2f0] sm:$0xff] }
  0x2e   :  { %299 = vst.msk [vmem:[%s944_s1 + $0x50] sm:$0xff] %vm288_vm0, %v282_v34  ;;  %v218_v45 = vmax.f32 %v185_v35, %v401_v30  ;;  %v121_v47 = vmax.f32 %v88_v36, %v355_v33  ;;  %v283_v49 = vmax.f32 %v250_v40, %v432_v25  ;;  %v418_v55 = vld [vmem:[%s943_s0 + $0x3e8] sm:$0xff]  ;;  %v372_v57 = vld [vmem:[%s943_s0 + $0x278] sm:$0xff]  ;;  %v403_v59 = vld [vmem:[%s943_s0 + $0x370] sm:$0xff] }
  0x2f   :  { %v186_v51 = vmax.f32 %v153_v42, %v386_v32  ;;  %v89_v53 = vmax.f32 %v56_v44, %v340_v39  ;;  %v434_v62 = vld [vmem:[%s943_s0 + $0x468] sm:$0xff]  ;;  %v388_v0 = vld [vmem:[%s943_s0 + $0x2f8] sm:$0xff]  ;;  %v419_v2 = vld [vmem:[%s943_s0 + $0x3f0] sm:$0xff] }
  0x30   :  { %v251_v54 = vmax.f32 %v218_v45, %v417_v41  ;;  %v154_v56 = vmax.f32 %v121_v47, %v371_v43  ;;  %300 = vst.msk [vmem:[%s944_s1 + $0x58] sm:$0xff] %vm288_vm0, %v283_v49  ;;  %v404_v5 = vld [vmem:[%s943_s0 + $0x378] sm:$0xff]  ;;  %v435_v7 = vld [vmem:[%s943_s0 + $0x470] sm:$0xff] }
  0x31   :  { %v219_v58 = vmax.f32 %v186_v51, %v402_v46  ;;  %v122_v60 = vmax.f32 %v89_v53, %v356_v48  ;;  %v420_v10 = vld [vmem:[%s943_s0 + $0x3f8] sm:$0xff] }
  0x32   :  { %v284_v61 = vmax.f32 %v251_v54, %v433_v50  ;;  %v187_v63 = vmax.f32 %v154_v56, %v387_v52  ;;  %v436_v13 = vld [vmem:[%s943_s0 + $0x478] sm:$0xff] }
  0x33   :  { %v252_v1 = vmax.f32 %v219_v58, %v418_v55  ;;  %v155_v3 = vmax.f32 %v122_v60, %v372_v57 }
  0x34   :  { %301 = vst.msk [vmem:[%s944_s1 + $0x60] sm:$0xff] %vm288_vm0, %v284_v61  ;;  %v220_v4 = vmax.f32 %v187_v63, %v403_v59 }
  0x35   :  { %v285_v6 = vmax.f32 %v252_v1, %v434_v62  ;;  %v188_v8 = vmax.f32 %v155_v3, %v388_v0 }
  0x36   :  { %v253_v9 = vmax.f32 %v220_v4, %v419_v2 }
  0x37   :  { %302 = vst.msk [vmem:[%s944_s1 + $0x68] sm:$0xff] %vm288_vm0, %v285_v6  ;;  %v221_v11 = vmax.f32 %v188_v8, %v404_v5 }
  0x38   :  { %v286_v12 = vmax.f32 %v253_v9, %v435_v7 }
  0x39   :  { %v254_v14 = vmax.f32 %v221_v11, %v420_v10 }
  0x3a   :  { %303 = vst.msk [vmem:[%s944_s1 + $0x70] sm:$0xff] %vm288_vm0, %v286_v12 }
  0x3b   :  { %v287_v15 = vmax.f32 %v254_v14, %v436_v13 }
  0x3d   :  { %304 = vst.msk [vmem:[%s944_s1 + $0x78] sm:$0xff] %vm288_vm0, %v287_v15 }

// kernel: sound_enc_forward.19
= control target key start
LH: loop header
LB: loop body
LE: loop exit
PB: predicated region body
PF: predicated region fallthrough
CT: control target
= control target key end

     0   :  { %vm554_vm0 = vcmask 523264   ;;  %s1681_s1 = inlined_call_operand.vmem [shape: bf16[576,64], index: 1, kind: input, shape index: {}]   ;;  %s1682_s0 = inlined_call_operand.vmem [shape: bf16[128,576], index: 0, kind: input, shape index: {}]   ;;  %s1683_s2 = inlined_call_operand.vmem [shape: f32[1,64], index: 2, kind: input, shape index: {}]   ;;  %s1684_s3 = inlined_call_operand.vmem [shape: f32[1,64], index: 3, kind: input, shape index: {}]   ;;  %s1685_s4 = inlined_call_operand.vmem [shape: f32[128,64], index: 4, kind: output, shape index: {}]  }
   0x1   :  { %v1210_v0 = vld [vmem:[%s1681_s1 + $0x78] sm:$0xff]   ;;  %v1214_v4 = vld [vmem:[%s1681_s1 + $0x70] sm:$0xff]   ;;  %v1218_v8 = vld [vmem:[%s1681_s1 + $0x68] sm:$0xff]  }
   0x2   :  { %v1211_v1 = vld [vmem:[%s1681_s1 + $0xf8] sm:$0xff]   ;;  %1038 = vmatprep.subr.bf16.mxu0 %v1210_v0  ;;  %v1215_v5 = vld [vmem:[%s1681_s1 + $0xf0] sm:$0xff]   ;;  %v1219_v9 = vld [vmem:[%s1681_s1 + $0xe8] sm:$0xff]  }
   0x3   :  { %v1212_v2 = vld [vmem:[%s1681_s1 + $0x38] sm:$0xff]   ;;  %1102 = vmatprep.subr.bf16.mxu1 %v1211_v1  ;;  %v1216_v6 = vld [vmem:[%s1681_s1 + $0x30] sm:$0xff]   ;;  %v1220_v10 = vld [vmem:[%s1681_s1 + $0x28] sm:$0xff]  }
   0x4   :  { %v1213_v3 = vld [vmem:[%s1681_s1 + $0xb8] sm:$0xff]   ;;  %1039 = vmatpush3.bf16.msra.mxu0 %v1212_v2  ;;  %v1217_v7 = vld [vmem:[%s1681_s1 + $0xb0] sm:$0xff]   ;;  %v1221_v11 = vld [vmem:[%s1681_s1 + $0xa8] sm:$0xff]  }
   0x5   :  { %1103 = vmatpush3.bf16.msra.mxu1 %v1213_v3  ;;  %1040 = vmatprep.subr.bf16.mxu0 %v1214_v4  ;;  %v1222_v12 = vld [vmem:[%s1681_s1 + $0x60] sm:$0xff]   ;;  %v1226_v16 = vld [vmem:[%s1681_s1 + $0x58] sm:$0xff]   ;;  %v1230_v20 = vld [vmem:[%s1681_s1 + $0x50] sm:$0xff]  }
   0x6   :  { %1104 = vmatprep.subr.bf16.mxu1 %v1215_v5  ;;  %v1223_v13 = vld [vmem:[%s1681_s1 + $0xe0] sm:$0xff]   ;;  %v1227_v17 = vld [vmem:[%s1681_s1 + $0xd8] sm:$0xff]   ;;  %v1231_v21 = vld [vmem:[%s1681_s1 + $0xd0] sm:$0xff]  }
   0x7   :  { %v1224_v14 = vld [vmem:[%s1681_s1 + $0x20] sm:$0xff]   ;;  %v1228_v18 = vld [vmem:[%s1681_s1 + $0x18] sm:$0xff]   ;;  %v1232_v22 = vld [vmem:[%s1681_s1 + $0x10] sm:$0xff]  }
   0x8   :  { %1041 = vmatpush3.bf16.msra.mxu0 %v1216_v6  ;;  %v1225_v15 = vld [vmem:[%s1681_s1 + $0xa0] sm:$0xff]   ;;  %v1229_v19 = vld [vmem:[%s1681_s1 + $0x98] sm:$0xff]   ;;  %v1233_v23 = vld [vmem:[%s1681_s1 + $0x90] sm:$0xff]  }
   0x9   :  { %1105 = vmatpush3.bf16.msra.mxu1 %v1217_v7  ;;  %1042 = vmatprep.subr.bf16.mxu0 %v1218_v8  ;;  %v1234_v24 = vld [vmem:[%s1681_s1 + $0x48] sm:$0xff]   ;;  %v1238_v28 = vld [vmem:[%s1681_s1 + $0x40] sm:$0xff]   ;;  %v1248_v36 = vld [vmem:[%s1681_s1 + $0x118] sm:$0xff]  }
   0xa   :  { %1106 = vmatprep.subr.bf16.mxu1 %v1219_v9  ;;  %v1235_v25 = vld [vmem:[%s1681_s1 + $0xc8] sm:$0xff]   ;;  %v1239_v29 = vld [vmem:[%s1681_s1 + $0xc0] sm:$0xff]   ;;  %v1261_v42 = vld [vmem:[%s1681_s1 + $0x110] sm:$0xff]  }
   0xb   :  { %v1236_v26 = vld [vmem:[%s1681_s1 + $0x8] sm:$0xff]   ;;  %v1240_v30 = vld [vmem:[%s1681_s1] sm:$0xff]   ;;  %v1257_v43 = vld [vmem:[%s1682_s0 + $0x5c] ss:$20 sps:$4 sm:$0xff]  }
   0xc   :  { %1043 = vmatpush3.bf16.msra.mxu0 %v1220_v10  ;;  %v1237_v27 = vld [vmem:[%s1681_s1 + $0x88] sm:$0xff]   ;;  %v1241_v31 = vld [vmem:[%s1681_s1 + $0x80] sm:$0xff]   ;;  %v1262_v47 = vld [vmem:[%s1682_s0 + $0x7c] ss:$20 sps:$4 sm:$0xff]  }
   0xd   :  { %1107 = vmatpush3.bf16.msra.mxu1 %v1221_v11  ;;  %1044 = vmatprep.subr.bf16.mxu0 %v1222_v12  ;;  %v1242_v32 = vld [vmem:[%s1682_s0] ss:$20 sps:$4 sm:$0xff]   ;;  %v1244_v33 = vld [vmem:[%s1682_s0 + $0x4] ss:$20 sps:$4 sm:$0xff]   ;;  %v1245_v34 = vld [vmem:[%s1682_s0 + $0x8] ss:$20 sps:$4 sm:$0xff]  }
   0xe   :  { %1108 = vmatprep.subr.bf16.mxu1 %v1223_v13  ;;  %v1247_v35 = vld [vmem:[%s1682_s0 + $0xc] ss:$20 sps:$4 sm:$0xff]   ;;  %611 = vmatprep.mubr.bf16.mxu0 %v1244_v33  ;;  %v1251_v38 = vld [vmem:[%s1682_s0 + $0x34] ss:$20 sps:$4 sm:$0xff]   ;;  %v1254_v40 = vld [vmem:[%s1682_s0 + $0x30] ss:$20 sps:$4 sm:$0xff]  }
   0xf   :  { %708 = vmatprep.mubr.bf16.mxu1 %v1247_v35  ;;  %v1249_v37 = vld [vmem:[%s1682_s0 + $0x2c] ss:$20 sps:$4 sm:$0xff]   ;;  %v1253_v39 = vld [vmem:[%s1682_s0 + $0x28] ss:$20 sps:$4 sm:$0xff]   ;;  %v1259_v44 = vld [vmem:[%s1682_s0 + $0x50] ss:$20 sps:$4 sm:$0xff]  }
  0x10   :  { %1045 = vmatpush3.bf16.msra.mxu0 %v1224_v14  ;;  %v1255_v41 = vld [vmem:[%s1682_s0 + $0x54] ss:$20 sps:$4 sm:$0xff]   ;;  %v1260_v45 = vld [vmem:[%s1682_s0 + $0x58] ss:$20 sps:$4 sm:$0xff]   ;;  %v1287_v49 = vld [vmem:[%s1681_s1 + $0x100] sm:$0xff]  }
  0x11   :  { %1109 = vmatpush3.bf16.msra.mxu1 %v1225_v15  ;;  %1046 = vmatprep.subr.bf16.mxu0 %v1226_v16  ;;  %v1274_v46 = vld [vmem:[%s1681_s1 + $0x108] sm:$0xff]   ;;  %v1264_v48 = vld [vmem:[%s1682_s0 + $0x84] ss:$20 sps:$4 sm:$0xff]   ;;  %v1267_v51 = vld [vmem:[%s1682_s0 + $0x80] ss:$20 sps:$4 sm:$0xff]  }
  0x12   :  { %1110 = vmatprep.subr.bf16.mxu1 %v1227_v17  ;;  %v1266_v50 = vld [vmem:[%s1682_s0 + $0x78] ss:$20 sps:$4 sm:$0xff]   ;;  %v1272_v54 = vld [vmem:[%s1682_s0 + $0xa0] ss:$20 sps:$4 sm:$0xff]   ;;  %v1273_v55 = vld [vmem:[%s1682_s0 + $0xa8] ss:$20 sps:$4 sm:$0xff]  }
  0x13   :  { %v1268_v52 = vld [vmem:[%s1682_s0 + $0xa4] ss:$20 sps:$4 sm:$0xff]   ;;  %v1270_v53 = vld [vmem:[%s1682_s0 + $0xac] ss:$20 sps:$4 sm:$0xff]   ;;  %v1277_v57 = vld [vmem:[%s1682_s0 + $0xd4] ss:$20 sps:$4 sm:$0xff]  }
  0x14   :  { %1047 = vmatpush3.bf16.msra.mxu0 %v1228_v18  ;;  %v1275_v56 = vld [vmem:[%s1682_s0 + $0xcc] ss:$20 sps:$4 sm:$0xff]   ;;  %v1279_v58 = vld [vmem:[%s1682_s0 + $0xc8] ss:$20 sps:$4 sm:$0xff]   ;;  %v1280_v59 = vld [vmem:[%s1682_s0 + $0xd0] ss:$20 sps:$4 sm:$0xff]  }
  0x15   :  { %1111 = vmatpush3.bf16.msra.mxu1 %v1229_v19  ;;  %1048 = vmatprep.subr.bf16.mxu0 %v1230_v20  ;;  %v1281_v60 = vld [vmem:[%s1682_s0 + $0xf4] ss:$20 sps:$4 sm:$0xff]   ;;  %v1283_v61 = vld [vmem:[%s1682_s0 + $0xfc] ss:$20 sps:$4 sm:$0xff]   ;;  %v1286_v63 = vld [vmem:[%s1682_s0 + $0xf8] ss:$20 sps:$4 sm:$0xff]  }
  0x16   :  { %1112 = vmatprep.subr.bf16.mxu1 %v1231_v21  ;;  %v1285_v62 = vld [vmem:[%s1682_s0 + $0xf0] ss:$20 sps:$4 sm:$0xff]   ;;  %v1292_v2 = vld [vmem:[%s1682_s0 + $0x118] ss:$20 sps:$4 sm:$0xff]   ;;  %v1293_v3 = vld [vmem:[%s1682_s0 + $0x120] ss:$20 sps:$4 sm:$0xff]  }
  0x17   :  { %v1288_v0 = vld [vmem:[%s1682_s0 + $0x11c] ss:$20 sps:$4 sm:$0xff]   ;;  %v1290_v1 = vld [vmem:[%s1682_s0 + $0x124] ss:$20 sps:$4 sm:$0xff]   ;;  %v1298_v8 = vld [vmem:[%s1682_s0 + $0x60] ss:$20 sps:$4 sm:$0xff]  }
  0x18   :  { %1049 = vmatpush3.bf16.msra.mxu0 %v1232_v22  ;;  %v1294_v4 = vld [vmem:[%s1682_s0 + $0x10] ss:$20 sps:$4 sm:$0xff]   ;;  %v1296_v6 = vld [vmem:[%s1682_s0 + $0x38] ss:$20 sps:$4 sm:$0xff]   ;;  %v1299_v9 = vld [vmem:[%s1682_s0 + $0x100] ss:$20 sps:$4 sm:$0xff]  }
  0x19   :  { %1113 = vmatpush3.bf16.msra.mxu1 %v1233_v23  ;;  %1050 = vmatprep.subr.bf16.mxu0 %v1234_v24  ;;  %v1295_v5 = vld [vmem:[%s1682_s0 + $0xb0] ss:$20 sps:$4 sm:$0xff]   ;;  %v1297_v7 = vld [vmem:[%s1682_s0 + $0xd8] ss:$20 sps:$4 sm:$0xff]   ;;  %v1300_v10 = vld [vmem:[%s1682_s0 + $0x88] ss:$20 sps:$4 sm:$0xff]  }
  0x1a   :  { %1114 = vmatprep.subr.bf16.mxu1 %v1235_v25  ;;  %v1301_v11 = vld [vmem:[%s1682_s0 + $0x128] ss:$20 sps:$4 sm:$0xff]  }
  0x1c   :  { %1051 = vmatpush3.bf16.msra.mxu0 %v1236_v26 }
  0x1d   :  { %1115 = vmatpush3.bf16.msra.mxu1 %v1237_v27  ;;  %1052 = vmatprep.subr.bf16.mxu0 %v1238_v28 }
  0x1e   :  { %1116 = vmatprep.subr.bf16.mxu1 %v1239_v29 }
  0x20   :  { %1053 = vmatpush3.bf16.msra.mxu0 %v1240_v30 }
  0x21   :  { %1117 = vmatpush3.bf16.msra.mxu1 %v1241_v31  ;;  %1178 = vmatprep.subr.bf16.mxu0 %v1248_v36 }
  0x22   :  { %1202 = vmatprep.subr.bf16.mxu1 %v1248_v36 }
  0x23   :  { %612 = vmatmul.mubr.bf16.vlgmr.msra.gmra.mxu0 %v1242_v32 }
  0x24   :  { %709 = vmatmul.mubr.bf16.vlgmr.msra.gmra.mxu1 %v1245_v34  ;;  %1179 = vmatpush3.bf16.msra.mxu0 %v1248_v36 }
  0x25   :  { %1206 = vmatpush3.bf16.msra.mxu1 %v1248_v36  ;;  %619 = vmatprep.mubr.bf16.mxu0 %v1249_v37 }
  0x26   :  { %716 = vmatprep.mubr.bf16.mxu1 %v1251_v38  ;;  %1180 = vmatprep.subr.bf16.mxu0 %v1261_v42 }
  0x27   :  { %1203 = vmatprep.subr.bf16.mxu1 %v1261_v42 }
  0x28   :  { %1181 = vmatpush3.bf16.msra.mxu0 %v1261_v42 }
  0x29   :  { %1207 = vmatpush3.bf16.msra.mxu1 %v1261_v42  ;;  %1182 = vmatprep.subr.bf16.mxu0 %v1274_v46 }
  0x2a   :  { %1204 = vmatprep.subr.bf16.mxu1 %v1274_v46 }
  0x2b   :  { %620 = vmatmul.mubr.bf16.gmra.mxu0 %v1253_v39 }
  0x2c   :  { %717 = vmatmul.mubr.bf16.gmra.mxu1 %v1254_v40  ;;  %627 = vmatprep.mubr.bf16.mxu0 %v1255_v41 }
  0x2d   :  { %724 = vmatprep.mubr.bf16.mxu1 %v1257_v43  ;;  %1183 = vmatpush3.bf16.msra.mxu0 %v1274_v46 }
  0x2e   :  { %1208 = vmatpush3.bf16.msra.mxu1 %v1274_v46  ;;  %1184 = vmatprep.subr.bf16.mxu0 %v1287_v49 }
  0x2f   :  { %1205 = vmatprep.subr.bf16.mxu1 %v1287_v49 }
  0x31   :  { %1185 = vmatpush3.bf16.msra.mxu0 %v1287_v49 }
  0x32   :  { %1209 = vmatpush3.bf16.msra.mxu1 %v1287_v49 }
  0x33   :  { %628 = vmatmul.mubr.bf16.gmra.mxu0 %v1259_v44 }
  0x34   :  { %725 = vmatmul.mubr.bf16.gmra.mxu1 %v1260_v45  ;;  %635 = vmatprep.mubr.bf16.mxu0 %v1262_v47 }
  0x35   :  { %732 = vmatprep.mubr.bf16.mxu1 %v1264_v48 }
  0x3b   :  { %636 = vmatmul.mubr.bf16.gmra.mxu0 %v1266_v50 }
  0x3c   :  { %733 = vmatmul.mubr.bf16.gmra.mxu1 %v1267_v51  ;;  %643 = vmatprep.mubr.bf16.mxu0 %v1268_v52 }
  0x3d   :  { %740 = vmatprep.mubr.bf16.mxu1 %v1270_v53 }
  0x43   :  { %644 = vmatmul.mubr.bf16.gmra.mxu0 %v1272_v54 }
  0x44   :  { %741 = vmatmul.mubr.bf16.gmra.mxu1 %v1273_v55  ;;  %651 = vmatprep.mubr.bf16.mxu0 %v1275_v56 }
  0x45   :  { %748 = vmatprep.mubr.bf16.mxu1 %v1277_v57 }
  0x4b   :  { %652 = vmatmul.mubr.bf16.gmra.mxu0 %v1279_v58 }
  0x4c   :  { %749 = vmatmul.mubr.bf16.gmra.mxu1 %v1280_v59  ;;  %659 = vmatprep.mubr.bf16.mxu0 %v1281_v60 }
  0x4d   :  { %756 = vmatprep.mubr.bf16.mxu1 %v1283_v61 }
  0x53   :  { %660 = vmatmul.mubr.bf16.gmra.mxu0 %v1285_v62 }
  0x54   :  { %757 = vmatmul.mubr.bf16.gmra.mxu1 %v1286_v63  ;;  %667 = vmatprep.mubr.bf16.mxu0 %v1288_v0 }
  0x55   :  { %764 = vmatprep.mubr.bf16.mxu1 %v1290_v1 }
  0x5b   :  { %668 = vmatmul.mubr.bf16.gmra.mxu0 %v1292_v2 }
  0x5c   :  { %765 = vmatmul.mubr.bf16.gmra.mxu1 %v1293_v3  ;;  %1186 = vmatprep.mubr.msk.bf16.mxu0 %vm554_vm0, %v1294_v4 }
  0x5d   :  { %1194 = vmatprep.mubr.msk.bf16.mxu1 %vm554_vm0, %v1295_v5 }
  0x63   :  { %1187 = vmatmul.mubr.msk.bf16.vlgmr.msra.gmra.mxu0 %vm554_vm0, %v1296_v6 }
  0x64   :  { %1195 = vmatmul.mubr.msk.bf16.vlgmr.msra.gmra.mxu1 %vm554_vm0, %v1297_v7  ;;  %1190 = vmatprep.mubr.msk.bf16.mxu0 %vm554_vm0, %v1298_v8 }
  0x65   :  { %1198 = vmatprep.mubr.msk.bf16.mxu1 %vm554_vm0, %v1299_v9 }
  0x6b   :  { %1191 = vmatmul.mubr.msk.bf16.gmra.mxu0 %vm554_vm0, %v1300_v10 }
  0x6c   :  { %1199 = vmatmul.mubr.msk.bf16.gmra.mxu1 %vm554_vm0, %v1301_v11 }
  0xe3   :  { %v1054_v12 = vpop.f32.mrf.mxu0 }
  0xe4   :  { %v1118_v13 = vpop.f32.mrf.mxu1 }
  0xe5   :  { %v1055_v14 = vpop.f32.mrf.mxu0 }
  0xe6   :  { %v1119_v15 = vpop.f32.mrf.mxu1  ;;  %v1056_v3 = vadd.f32 %v1055_v14, %v1054_v12 }
  0xe7   :  { %v1057_v16 = vpop.f32.mrf.mxu0  ;;  %v1120_v4 = vadd.f32 %v1119_v15, %v1118_v13 }
  0xe8   :  { %v1121_v17 = vpop.f32.mrf.mxu1 }
  0xe9   :  { %v1058_v18 = vpop.f32.mrf.mxu0 }
  0xea   :  { %v1122_v19 = vpop.f32.mrf.mxu1  ;;  %v1059_v5 = vadd.f32 %v1058_v18, %v1057_v16 }
  0xeb   :  { %v1060_v20 = vpop.f32.mrf.mxu0  ;;  %v1123_v6 = vadd.f32 %v1122_v19, %v1121_v17 }
  0xec   :  { %v1124_v21 = vpop.f32.mrf.mxu1 }
  0xed   :  { %v1061_v22 = vpop.f32.mrf.mxu0 }
  0xee   :  { %v1125_v23 = vpop.f32.mrf.mxu1  ;;  %v1062_v8 = vadd.f32 %v1061_v22, %v1060_v20 }
  0xef   :  { %v1063_v24 = vpop.f32.mrf.mxu0  ;;  %v1126_v9 = vadd.f32 %v1125_v23, %v1124_v21 }
  0xf0   :  { %v1127_v25 = vpop.f32.mrf.mxu1 }
  0xf1   :  { %v1064_v26 = vpop.f32.mrf.mxu0 }
  0xf2   :  { %v1128_v27 = vpop.f32.mrf.mxu1  ;;  %v1065_v10 = vadd.f32 %v1064_v26, %v1063_v24  ;;  %v719_v26 = vadd.f32 %v1126_v9, %v1062_v8 }
  0xf3   :  { %v1066_v28 = vpop.f32.mrf.mxu0  ;;  %v1129_v11 = vadd.f32 %v1128_v27, %v1127_v25  ;;  %v711_v25 = vadd.f32 %v1120_v4, %v1056_v3 }
  0xf4   :  { %v1130_v29 = vpop.f32.mrf.mxu1 }
  0xf5   :  { %v1067_v30 = vpop.f32.mrf.mxu0  ;;  %v722_v27 = vadd.f32 %v1129_v11, %v1065_v10 }
  0xf6   :  { %v1131_v31 = vpop.f32.mrf.mxu1  ;;  %v1068_v14 = vadd.f32 %v1067_v30, %v1066_v28  ;;  %v714_v28 = vadd.f32 %v1123_v6, %v1059_v5 }
  0xf7   :  { %v1069_v32 = vpop.f32.mrf.mxu0  ;;  %v1132_v13 = vadd.f32 %v1131_v31, %v1130_v29 }
  0xf8   :  { %v1133_v33 = vpop.f32.mrf.mxu1 }
  0xf9   :  { %v1070_v34 = vpop.f32.mrf.mxu0 }
  0xfa   :  { %v1134_v35 = vpop.f32.mrf.mxu1  ;;  %v1071_v15 = vadd.f32 %v1070_v34, %v1069_v32  ;;  %v1563_v32 = vadd.f32 %v1132_v13, %v1068_v14 }
  0xfb   :  { %v1072_v36 = vpop.f32.mrf.mxu0  ;;  %v1135_v16 = vadd.f32 %v1134_v35, %v1133_v33 }
  0xfc   :  { %v1136_v37 = vpop.f32.mrf.mxu1 }
  0xfd   :  { %v1073_v38 = vpop.f32.mrf.mxu0  ;;  %v1565_v34 = vadd.f32 %v1135_v16, %v1071_v15 }
  0xfe   :  { %v1137_v39 = vpop.f32.mrf.mxu1  ;;  %v1074_v17 = vadd.f32 %v1073_v38, %v1072_v36 }
  0xff   :  { %v1075_v40 = vpop.f32.mrf.mxu0  ;;  %v1138_v19 = vadd.f32 %v1137_v39, %v1136_v37 }
 0x100   :  { %v1139_v41 = vpop.f32.mrf.mxu1 }
 0x101   :  { %v1076_v42 = vpop.f32.mrf.mxu0  ;;  %v735_v38 = vadd.f32 %v1138_v19, %v1074_v17 }
 0x102   :  { %v1140_v43 = vpop.f32.mrf.mxu1  ;;  %v1077_v30 = vadd.f32 %v1076_v42, %v1075_v40  ;;  %v1570_v42 = vld [vmem:[%s1683_s2] ss:$0 sm:$0xff] }
 0x103   :  { %v1078_v44 = vpop.f32.mrf.mxu0  ;;  %v1141_v29 = vadd.f32 %v1140_v43, %v1139_v41 }
 0x104   :  { %v1142_v45 = vpop.f32.mrf.mxu1 }
 0x105   :  { %v1079_v46 = vpop.f32.mrf.mxu0 }
 0x106   :  { %v1143_v47 = vpop.f32.mrf.mxu1  ;;  %v1080_v33 = vadd.f32 %v1079_v46, %v1078_v44 }
 0x107   :  { %v1081_v48 = vpop.f32.mrf.mxu0  ;;  %v1144_v35 = vadd.f32 %v1143_v47, %v1142_v45  ;;  %v1572_v47 = vadd.f32 %v1141_v29, %v1077_v30 }
 0x108   :  { %v1145_v49 = vpop.f32.mrf.mxu1 }
 0x109   :  { %v1082_v50 = vpop.f32.mrf.mxu0 }
 0x10a   :  { %v1146_v51 = vpop.f32.mrf.mxu1  ;;  %v1083_v36 = vadd.f32 %v1082_v50, %v1081_v48  ;;  %v1577_v50 = vld [vmem:[%s1684_s3] ss:$0 sm:$0xff] }
 0x10b   :  { %v1084_v52 = vpop.f32.mrf.mxu0  ;;  %v1147_v39 = vadd.f32 %v1146_v51, %v1145_v49 }
 0x10c   :  { %v1148_v53 = vpop.f32.mrf.mxu1 }
 0x10d   :  { %v1085_v54 = vpop.f32.mrf.mxu0 }
 0x10e   :  { %v1149_v55 = vpop.f32.mrf.mxu1  ;;  %v1086_v22 = vadd.f32 %v1085_v54, %v1084_v52 }
 0x10f   :  { %v1087_v56 = vpop.f32.mrf.mxu0  ;;  %v1150_v21 = vadd.f32 %v1149_v55, %v1148_v53 }
 0x110   :  { %v1151_v57 = vpop.f32.mrf.mxu1 }
 0x111   :  { %v1088_v58 = vpop.f32.mrf.mxu0  ;;  %v751_v55 = vadd.f32 %v1150_v21, %v1086_v22 }
 0x112   :  { %v1152_v59 = vpop.f32.mrf.mxu1  ;;  %v1089_v52 = vadd.f32 %v1088_v58, %v1087_v56 }
 0x113   :  { %v1090_v60 = vpop.f32.mrf.mxu0  ;;  %v1153_v53 = vadd.f32 %v1152_v59, %v1151_v57  ;;  %v743_v57 = vadd.f32 %v1144_v35, %v1080_v33 }
 0x114   :  { %v1154_v61 = vpop.f32.mrf.mxu1 }
 0x115   :  { %v1091_v62 = vpop.f32.mrf.mxu0 }
 0x116   :  { %v1155_v63 = vpop.f32.mrf.mxu1  ;;  %v1092_v3 = vadd.f32 %v1091_v62, %v1090_v60  ;;  %v746_v62 = vadd.f32 %v1147_v39, %v1083_v36 }
 0x117   :  { %v1093_v0 = vpop.f32.mrf.mxu0  ;;  %v1156_v4 = vadd.f32 %v1155_v63, %v1154_v61  ;;  %v754_v61 = vadd.f32 %v1153_v53, %v1089_v52 }
 0x118   :  { %v1157_v1 = vpop.f32.mrf.mxu1 }
 0x119   :  { %v1094_v2 = vpop.f32.mrf.mxu0 }
 0x11a   :  { %v1158_v7 = vpop.f32.mrf.mxu1  ;;  %v1095_v5 = vadd.f32 %v1094_v2, %v1093_v0  ;;  %v759_v2 = vadd.f32 %v1156_v4, %v1092_v3 }
 0x11b   :  { %v1096_v12 = vpop.f32.mrf.mxu0  ;;  %v1159_v40 = vadd.f32 %v1158_v7, %v1157_v1 }
 0x11c   :  { %v1160_v18 = vpop.f32.mrf.mxu1 }
 0x11d   :  { %v1097_v20 = vpop.f32.mrf.mxu0  ;;  %v1581_v6 = vadd.f32 %v1159_v40, %v1095_v5 }
 0x11e   :  { %v1161_v23 = vpop.f32.mrf.mxu1  ;;  %v1098_v43 = vadd.f32 %v1097_v20, %v1096_v12 }
 0x11f   :  { %v1099_v24 = vpop.f32.mrf.mxu0  ;;  %v1162_v44 = vadd.f32 %v1161_v23, %v1160_v18 }
 0x120   :  { %v1163_v31 = vpop.f32.mrf.mxu1 }
 0x121   :  { %v1100_v37 = vpop.f32.mrf.mxu0  ;;  %v767_v11 = vadd.f32 %v1162_v44, %v1098_v43 }
 0x122   :  { %v1164_v54 = vpop.f32.mrf.mxu1  ;;  %v1101_v48 = vadd.f32 %v1100_v37, %v1099_v24 }
 0x123   :  { %v1188_v41 = vpop.f32.mrf.mxu0  ;;  %v1165_v49 = vadd.f32 %v1164_v54, %v1163_v31 }
 0x124   :  { %v816_v45 = vadd.f32 %v1188_v41, %v719_v26  ;;  %v1196_v46 = vpop.f32.mrf.mxu1 }
 0x125   :  { %v848_v51 = vadd.f32 %v1196_v46, %v751_v55  ;;  %v807_v56 = vpop.f32.mrf.mxu0  ;;  %v770_v16 = vadd.f32 %v1165_v49, %v1101_v48 }
 0x126   :  { %v879_v58 = vmul.f32 %v1570_v42, %v816_v45  ;;  %v808_v59 = vadd.f32 %v807_v56, %v711_v25  ;;  %v839_v60 = vpop.f32.mrf.mxu1 }
 0x127   :  { %v887_v63 = vmul.f32 %v1570_v42, %v848_v51  ;;  %v840_v0 = vadd.f32 %v839_v60, %v743_v57  ;;  %v1189_v1 = vpop.f32.mrf.mxu0 }
 0x128   :  { %v902_v7 = vadd.f32 %v1577_v50, %v879_v58  ;;  %v877_v8 = vmul.f32 %v1570_v42, %v808_v59  ;;  %v819_v9 = vadd.f32 %v1189_v1, %v722_v27  ;;  %v1197_v10 = vpop.f32.mrf.mxu1 }
 0x129   :  { %v910_v12 = vadd.f32 %v1577_v50, %v887_v63  ;;  %v885_v14 = vmul.f32 %v1570_v42, %v840_v0  ;;  %v851_v13 = vadd.f32 %v1197_v10, %v754_v61  ;;  %v810_v15 = vpop.f32.mrf.mxu0 }
 0x12a   :  { %v918_v18 = vmax.f32 %v902_v7, 0.0  ;;  %v900_v17 = vadd.f32 %v1577_v50, %v877_v8  ;;  %v880_v19 = vmul.f32 %v1570_v42, %v819_v9  ;;  %v811_v20 = vadd.f32 %v810_v15, %v714_v28  ;;  %v842_v22 = vpop.f32.mrf.mxu1 }
 0x12b   :  { %v926_v21 = vmax.f32 %v910_v12, 0.0  ;;  %v908_v23 = vadd.f32 %v1577_v50, %v885_v14  ;;  %v888_v24 = vmul.f32 %v1570_v42, %v851_v13  ;;  %v843_v26 = vadd.f32 %v842_v22, %v746_v62  ;;  %v1192_v25 = vpop.f32.mrf.mxu0 }
 0x12c   :  { %934 = vst.msk [vmem:[%s1685_s4 + $0x10] sm:$0xff] %vm554_vm0, %v918_v18  ;;  %v916_v27 = vmax.f32 %v900_v17, 0.0  ;;  %v903_v30 = vadd.f32 %v1577_v50, %v880_v19  ;;  %v878_v29 = vmul.f32 %v1570_v42, %v811_v20  ;;  %v832_v31 = vadd.f32 %v1192_v25, %v735_v38  ;;  %v1200_v28 = vpop.f32.mrf.mxu1 }
 0x12d   :  { %942 = vst.msk [vmem:[%s1685_s4 + $0x50] sm:$0xff] %vm554_vm0, %v926_v21  ;;  %v924_v33 = vmax.f32 %v908_v23, 0.0  ;;  %v911_v35 = vadd.f32 %v1577_v50, %v888_v24  ;;  %v886_v36 = vmul.f32 %v1570_v42, %v843_v26  ;;  %v864_v37 = vadd.f32 %v1200_v28, %v767_v11  ;;  %v823_v39 = vpop.f32.mrf.mxu0 }
 0x12e   :  { %932 = vst.msk [vmem:[%s1685_s4] sm:$0xff] %vm554_vm0, %v916_v27  ;;  %v919_v52 = vmax.f32 %v903_v30, 0.0  ;;  %v901_v38 = vadd.f32 %v1577_v50, %v878_v29  ;;  %v883_v53 = vmul.f32 %v1570_v42, %v832_v31  ;;  %v824_v54 = vadd.f32 %v823_v39, %v1563_v32  ;;  %v855_v55 = vpop.f32.mrf.mxu1 }
 0x12f   :  { %940 = vst.msk [vmem:[%s1685_s4 + $0x40] sm:$0xff] %vm554_vm0, %v924_v33  ;;  %v927_v3 = vmax.f32 %v911_v35, 0.0  ;;  %v909_v4 = vadd.f32 %v1577_v50, %v886_v36  ;;  %v891_v5 = vmul.f32 %v1570_v42, %v864_v37  ;;  %v856_v40 = vadd.f32 %v855_v55, %v759_v2  ;;  %v1193_v41 = vpop.f32.mrf.mxu0 }
 0x130   :  { %935 = vst.msk [vmem:[%s1685_s4 + $0x18] sm:$0xff] %vm554_vm0, %v919_v52  ;;  %v917_v43 = vmax.f32 %v901_v38, 0.0  ;;  %v906_v32 = vadd.f32 %v1577_v50, %v883_v53  ;;  %v881_v44 = vmul.f32 %v1570_v42, %v824_v54  ;;  %v835_v45 = vadd.f32 %v1193_v41, %v1572_v47  ;;  %v1201_v46 = vpop.f32.mrf.mxu1 }
 0x131   :  { %943 = vst.msk [vmem:[%s1685_s4 + $0x58] sm:$0xff] %vm554_vm0, %v927_v3  ;;  %v925_v48 = vmax.f32 %v909_v4, 0.0  ;;  %v914_v49 = vadd.f32 %v1577_v50, %v891_v5  ;;  %v889_v51 = vmul.f32 %v1570_v42, %v856_v40  ;;  %v867_v56 = vadd.f32 %v1201_v46, %v770_v16  ;;  %v826_v57 = vpop.f32.mrf.mxu0 }
 0x132   :  { %933 = vst.msk [vmem:[%s1685_s4 + $0x8] sm:$0xff] %vm554_vm0, %v917_v43  ;;  %v922_v58 = vmax.f32 %v906_v32, 0.0  ;;  %v904_v47 = vadd.f32 %v1577_v50, %v881_v44  ;;  %v884_v59 = vmul.f32 %v1570_v42, %v835_v45  ;;  %v827_v60 = vadd.f32 %v826_v57, %v1565_v34  ;;  %v858_v61 = vpop.f32.mrf.mxu1 }
 0x133   :  { %941 = vst.msk [vmem:[%s1685_s4 + $0x48] sm:$0xff] %vm554_vm0, %v925_v48  ;;  %v930_v62 = vmax.f32 %v914_v49, 0.0  ;;  %v912_v63 = vadd.f32 %v1577_v50, %v889_v51  ;;  %v892_v0 = vmul.f32 %v1570_v42, %v867_v56  ;;  %v859_v1 = vadd.f32 %v858_v61, %v1581_v6 }
 0x134   :  { %938 = vst.msk [vmem:[%s1685_s4 + $0x30] sm:$0xff] %vm554_vm0, %v922_v58  ;;  %v920_v2 = vmax.f32 %v904_v47, 0.0  ;;  %v907_v34 = vadd.f32 %v1577_v50, %v884_v59  ;;  %v882_v7 = vmul.f32 %v1570_v42, %v827_v60 }
 0x135   :  { %946 = vst.msk [vmem:[%s1685_s4 + $0x70] sm:$0xff] %vm554_vm0, %v930_v62  ;;  %v928_v8 = vmax.f32 %v912_v63, 0.0  ;;  %v915_v9 = vadd.f32 %v1577_v50, %v892_v0  ;;  %v890_v6 = vmul.f32 %v1570_v42, %v859_v1 }
 0x136   :  { %936 = vst.msk [vmem:[%s1685_s4 + $0x20] sm:$0xff] %vm554_vm0, %v920_v2  ;;  %v923_v10 = vmax.f32 %v907_v34, 0.0  ;;  %v905_v11 = vadd.f32 %v1577_v50, %v882_v7 }
 0x137   :  { %944 = vst.msk [vmem:[%s1685_s4 + $0x60] sm:$0xff] %vm554_vm0, %v928_v8  ;;  %v931_v12 = vmax.f32 %v915_v9, 0.0  ;;  %v913_v14 = vadd.f32 %v1577_v50, %v890_v6 }
 0x138   :  { %939 = vst.msk [vmem:[%s1685_s4 + $0x38] sm:$0xff] %vm554_vm0, %v923_v10  ;;  %v921_v42 = vmax.f32 %v905_v11, 0.0 }
 0x139   :  { %947 = vst.msk [vmem:[%s1685_s4 + $0x78] sm:$0xff] %vm554_vm0, %v931_v12  ;;  %v929_v13 = vmax.f32 %v913_v14, 0.0 }
 0x13a   :  { %937 = vst.msk [vmem:[%s1685_s4 + $0x28] sm:$0xff] %vm554_vm0, %v921_v42 }
 0x13b   :  { %945 = vst.msk [vmem:[%s1685_s4 + $0x68] sm:$0xff] %vm554_vm0, %v929_v13 }

// kernel: sound_enc_forward.20
= control target key start
LH: loop header
LB: loop body
LE: loop exit
PB: predicated region body
PF: predicated region fallthrough
CT: control target
= control target key end

     0   :  { %vm557_vm0 = vcmask 523264   ;;  %s1781_s1 = inlined_call_operand.vmem [shape: bf16[576,64], index: 1, kind: input, shape index: {}]   ;;  %s1782_s0 = inlined_call_operand.vmem [shape: bf16[128,576], index: 0, kind: input, shape index: {}]   ;;  %s1783_s2 = inlined_call_operand.vmem [shape: f32[1,64], index: 2, kind: input, shape index: {}]   ;;  %s1784_s3 = inlined_call_operand.vmem [shape: f32[1,64], index: 3, kind: input, shape index: {}]   ;;  %s1785_s4 = inlined_call_operand.vmem [shape: f32[128,64], index: 4, kind: input, shape index: {}]   ;;  %s1786_s5 = inlined_call_operand.vmem [shape: f32[128,64], index: 5, kind: output, shape index: {}]  }
   0x1   :  { %v1245_v0 = vld [vmem:[%s1781_s1 + $0x78] sm:$0xff]   ;;  %v1249_v4 = vld [vmem:[%s1781_s1 + $0x70] sm:$0xff]   ;;  %v1253_v8 = vld [vmem:[%s1781_s1 + $0x68] sm:$0xff]  }
   0x2   :  { %v1246_v1 = vld [vmem:[%s1781_s1 + $0xf8] sm:$0xff]   ;;  %1073 = vmatprep.subr.bf16.mxu0 %v1245_v0  ;;  %v1250_v5 = vld [vmem:[%s1781_s1 + $0xf0] sm:$0xff]   ;;  %v1254_v9 = vld [vmem:[%s1781_s1 + $0xe8] sm:$0xff]  }
   0x3   :  { %v1247_v2 = vld [vmem:[%s1781_s1 + $0x38] sm:$0xff]   ;;  %1137 = vmatprep.subr.bf16.mxu1 %v1246_v1  ;;  %v1251_v6 = vld [vmem:[%s1781_s1 + $0x30] sm:$0xff]   ;;  %v1255_v10 = vld [vmem:[%s1781_s1 + $0x28] sm:$0xff]  }
   0x4   :  { %v1248_v3 = vld [vmem:[%s1781_s1 + $0xb8] sm:$0xff]   ;;  %1074 = vmatpush3.bf16.msra.mxu0 %v1247_v2  ;;  %v1252_v7 = vld [vmem:[%s1781_s1 + $0xb0] sm:$0xff]   ;;  %v1256_v11 = vld [vmem:[%s1781_s1 + $0xa8] sm:$0xff]  }
   0x5   :  { %1138 = vmatpush3.bf16.msra.mxu1 %v1248_v3  ;;  %1075 = vmatprep.subr.bf16.mxu0 %v1249_v4  ;;  %v1257_v12 = vld [vmem:[%s1781_s1 + $0x60] sm:$0xff]   ;;  %v1261_v16 = vld [vmem:[%s1781_s1 + $0x58] sm:$0xff]   ;;  %v1265_v20 = vld [vmem:[%s1781_s1 + $0x50] sm:$0xff]  }
   0x6   :  { %1139 = vmatprep.subr.bf16.mxu1 %v1250_v5  ;;  %v1258_v13 = vld [vmem:[%s1781_s1 + $0xe0] sm:$0xff]   ;;  %v1262_v17 = vld [vmem:[%s1781_s1 + $0xd8] sm:$0xff]   ;;  %v1266_v21 = vld [vmem:[%s1781_s1 + $0xd0] sm:$0xff]  }
   0x7   :  { %v1259_v14 = vld [vmem:[%s1781_s1 + $0x20] sm:$0xff]   ;;  %v1263_v18 = vld [vmem:[%s1781_s1 + $0x18] sm:$0xff]   ;;  %v1267_v22 = vld [vmem:[%s1781_s1 + $0x10] sm:$0xff]  }
   0x8   :  { %1076 = vmatpush3.bf16.msra.mxu0 %v1251_v6  ;;  %v1260_v15 = vld [vmem:[%s1781_s1 + $0xa0] sm:$0xff]   ;;  %v1264_v19 = vld [vmem:[%s1781_s1 + $0x98] sm:$0xff]   ;;  %v1268_v23 = vld [vmem:[%s1781_s1 + $0x90] sm:$0xff]  }
   0x9   :  { %1140 = vmatpush3.bf16.msra.mxu1 %v1252_v7  ;;  %1077 = vmatprep.subr.bf16.mxu0 %v1253_v8  ;;  %v1269_v24 = vld [vmem:[%s1781_s1 + $0x48] sm:$0xff]   ;;  %v1273_v28 = vld [vmem:[%s1781_s1 + $0x40] sm:$0xff]   ;;  %v1283_v36 = vld [vmem:[%s1781_s1 + $0x118] sm:$0xff]  }
   0xa   :  { %1141 = vmatprep.subr.bf16.mxu1 %v1254_v9  ;;  %v1270_v25 = vld [vmem:[%s1781_s1 + $0xc8] sm:$0xff]   ;;  %v1274_v29 = vld [vmem:[%s1781_s1 + $0xc0] sm:$0xff]   ;;  %v1296_v42 = vld [vmem:[%s1781_s1 + $0x110] sm:$0xff]  }
   0xb   :  { %v1271_v26 = vld [vmem:[%s1781_s1 + $0x8] sm:$0xff]   ;;  %v1275_v30 = vld [vmem:[%s1781_s1] sm:$0xff]   ;;  %v1292_v43 = vld [vmem:[%s1782_s0 + $0x5c] ss:$20 sps:$4 sm:$0xff]  }
   0xc   :  { %1078 = vmatpush3.bf16.msra.mxu0 %v1255_v10  ;;  %v1272_v27 = vld [vmem:[%s1781_s1 + $0x88] sm:$0xff]   ;;  %v1276_v31 = vld [vmem:[%s1781_s1 + $0x80] sm:$0xff]   ;;  %v1297_v47 = vld [vmem:[%s1782_s0 + $0x7c] ss:$20 sps:$4 sm:$0xff]  }
   0xd   :  { %1142 = vmatpush3.bf16.msra.mxu1 %v1256_v11  ;;  %1079 = vmatprep.subr.bf16.mxu0 %v1257_v12  ;;  %v1277_v32 = vld [vmem:[%s1782_s0] ss:$20 sps:$4 sm:$0xff]   ;;  %v1279_v33 = vld [vmem:[%s1782_s0 + $0x4] ss:$20 sps:$4 sm:$0xff]   ;;  %v1280_v34 = vld [vmem:[%s1782_s0 + $0x8] ss:$20 sps:$4 sm:$0xff]  }
   0xe   :  { %1143 = vmatprep.subr.bf16.mxu1 %v1258_v13  ;;  %v1282_v35 = vld [vmem:[%s1782_s0 + $0xc] ss:$20 sps:$4 sm:$0xff]   ;;  %614 = vmatprep.mubr.bf16.mxu0 %v1279_v33  ;;  %v1286_v38 = vld [vmem:[%s1782_s0 + $0x34] ss:$20 sps:$4 sm:$0xff]   ;;  %v1289_v40 = vld [vmem:[%s1782_s0 + $0x30] ss:$20 sps:$4 sm:$0xff]  }
   0xf   :  { %711 = vmatprep.mubr.bf16.mxu1 %v1282_v35  ;;  %v1284_v37 = vld [vmem:[%s1782_s0 + $0x2c] ss:$20 sps:$4 sm:$0xff]   ;;  %v1288_v39 = vld [vmem:[%s1782_s0 + $0x28] ss:$20 sps:$4 sm:$0xff]   ;;  %v1294_v44 = vld [vmem:[%s1782_s0 + $0x50] ss:$20 sps:$4 sm:$0xff]  }
  0x10   :  { %1080 = vmatpush3.bf16.msra.mxu0 %v1259_v14  ;;  %v1290_v41 = vld [vmem:[%s1782_s0 + $0x54] ss:$20 sps:$4 sm:$0xff]   ;;  %v1295_v45 = vld [vmem:[%s1782_s0 + $0x58] ss:$20 sps:$4 sm:$0xff]   ;;  %v1322_v49 = vld [vmem:[%s1781_s1 + $0x100] sm:$0xff]  }
  0x11   :  { %1144 = vmatpush3.bf16.msra.mxu1 %v1260_v15  ;;  %1081 = vmatprep.subr.bf16.mxu0 %v1261_v16  ;;  %v1309_v46 = vld [vmem:[%s1781_s1 + $0x108] sm:$0xff]   ;;  %v1299_v48 = vld [vmem:[%s1782_s0 + $0x84] ss:$20 sps:$4 sm:$0xff]   ;;  %v1302_v51 = vld [vmem:[%s1782_s0 + $0x80] ss:$20 sps:$4 sm:$0xff]  }
  0x12   :  { %1145 = vmatprep.subr.bf16.mxu1 %v1262_v17  ;;  %v1301_v50 = vld [vmem:[%s1782_s0 + $0x78] ss:$20 sps:$4 sm:$0xff]   ;;  %v1307_v54 = vld [vmem:[%s1782_s0 + $0xa0] ss:$20 sps:$4 sm:$0xff]   ;;  %v1308_v55 = vld [vmem:[%s1782_s0 + $0xa8] ss:$20 sps:$4 sm:$0xff]  }
  0x13   :  { %v1303_v52 = vld [vmem:[%s1782_s0 + $0xa4] ss:$20 sps:$4 sm:$0xff]   ;;  %v1305_v53 = vld [vmem:[%s1782_s0 + $0xac] ss:$20 sps:$4 sm:$0xff]   ;;  %v1312_v57 = vld [vmem:[%s1782_s0 + $0xd4] ss:$20 sps:$4 sm:$0xff]  }
  0x14   :  { %1082 = vmatpush3.bf16.msra.mxu0 %v1263_v18  ;;  %v1310_v56 = vld [vmem:[%s1782_s0 + $0xcc] ss:$20 sps:$4 sm:$0xff]   ;;  %v1314_v58 = vld [vmem:[%s1782_s0 + $0xc8] ss:$20 sps:$4 sm:$0xff]   ;;  %v1315_v59 = vld [vmem:[%s1782_s0 + $0xd0] ss:$20 sps:$4 sm:$0xff]  }
  0x15   :  { %1146 = vmatpush3.bf16.msra.mxu1 %v1264_v19  ;;  %1083 = vmatprep.subr.bf16.mxu0 %v1265_v20  ;;  %v1316_v60 = vld [vmem:[%s1782_s0 + $0xf4] ss:$20 sps:$4 sm:$0xff]   ;;  %v1318_v61 = vld [vmem:[%s1782_s0 + $0xfc] ss:$20 sps:$4 sm:$0xff]   ;;  %v1321_v63 = vld [vmem:[%s1782_s0 + $0xf8] ss:$20 sps:$4 sm:$0xff]  }
  0x16   :  { %1147 = vmatprep.subr.bf16.mxu1 %v1266_v21  ;;  %v1320_v62 = vld [vmem:[%s1782_s0 + $0xf0] ss:$20 sps:$4 sm:$0xff]   ;;  %v1327_v2 = vld [vmem:[%s1782_s0 + $0x118] ss:$20 sps:$4 sm:$0xff]   ;;  %v1328_v3 = vld [vmem:[%s1782_s0 + $0x120] ss:$20 sps:$4 sm:$0xff]  }
  0x17   :  { %v1323_v0 = vld [vmem:[%s1782_s0 + $0x11c] ss:$20 sps:$4 sm:$0xff]   ;;  %v1325_v1 = vld [vmem:[%s1782_s0 + $0x124] ss:$20 sps:$4 sm:$0xff]   ;;  %v1333_v8 = vld [vmem:[%s1782_s0 + $0x60] ss:$20 sps:$4 sm:$0xff]  }
  0x18   :  { %1084 = vmatpush3.bf16.msra.mxu0 %v1267_v22  ;;  %v1329_v4 = vld [vmem:[%s1782_s0 + $0x10] ss:$20 sps:$4 sm:$0xff]   ;;  %v1331_v6 = vld [vmem:[%s1782_s0 + $0x38] ss:$20 sps:$4 sm:$0xff]   ;;  %v1334_v9 = vld [vmem:[%s1782_s0 + $0x100] ss:$20 sps:$4 sm:$0xff]  }
  0x19   :  { %1148 = vmatpush3.bf16.msra.mxu1 %v1268_v23  ;;  %1085 = vmatprep.subr.bf16.mxu0 %v1269_v24  ;;  %v1330_v5 = vld [vmem:[%s1782_s0 + $0xb0] ss:$20 sps:$4 sm:$0xff]   ;;  %v1332_v7 = vld [vmem:[%s1782_s0 + $0xd8] ss:$20 sps:$4 sm:$0xff]   ;;  %v1335_v10 = vld [vmem:[%s1782_s0 + $0x88] ss:$20 sps:$4 sm:$0xff]  }
  0x1a   :  { %1149 = vmatprep.subr.bf16.mxu1 %v1270_v25  ;;  %v1336_v11 = vld [vmem:[%s1782_s0 + $0x128] ss:$20 sps:$4 sm:$0xff]  }
  0x1c   :  { %1086 = vmatpush3.bf16.msra.mxu0 %v1271_v26 }
  0x1d   :  { %1150 = vmatpush3.bf16.msra.mxu1 %v1272_v27  ;;  %1087 = vmatprep.subr.bf16.mxu0 %v1273_v28 }
  0x1e   :  { %1151 = vmatprep.subr.bf16.mxu1 %v1274_v29 }
  0x20   :  { %1088 = vmatpush3.bf16.msra.mxu0 %v1275_v30 }
  0x21   :  { %1152 = vmatpush3.bf16.msra.mxu1 %v1276_v31  ;;  %1213 = vmatprep.subr.bf16.mxu0 %v1283_v36 }
  0x22   :  { %1237 = vmatprep.subr.bf16.mxu1 %v1283_v36 }
  0x23   :  { %615 = vmatmul.mubr.bf16.vlgmr.msra.gmra.mxu0 %v1277_v32 }
  0x24   :  { %712 = vmatmul.mubr.bf16.vlgmr.msra.gmra.mxu1 %v1280_v34  ;;  %1214 = vmatpush3.bf16.msra.mxu0 %v1283_v36 }
  0x25   :  { %1241 = vmatpush3.bf16.msra.mxu1 %v1283_v36  ;;  %622 = vmatprep.mubr.bf16.mxu0 %v1284_v37 }
  0x26   :  { %719 = vmatprep.mubr.bf16.mxu1 %v1286_v38  ;;  %1215 = vmatprep.subr.bf16.mxu0 %v1296_v42 }
  0x27   :  { %1238 = vmatprep.subr.bf16.mxu1 %v1296_v42 }
  0x28   :  { %1216 = vmatpush3.bf16.msra.mxu0 %v1296_v42 }
  0x29   :  { %1242 = vmatpush3.bf16.msra.mxu1 %v1296_v42  ;;  %1217 = vmatprep.subr.bf16.mxu0 %v1309_v46 }
  0x2a   :  { %1239 = vmatprep.subr.bf16.mxu1 %v1309_v46 }
  0x2b   :  { %623 = vmatmul.mubr.bf16.gmra.mxu0 %v1288_v39 }
  0x2c   :  { %720 = vmatmul.mubr.bf16.gmra.mxu1 %v1289_v40  ;;  %630 = vmatprep.mubr.bf16.mxu0 %v1290_v41 }
  0x2d   :  { %727 = vmatprep.mubr.bf16.mxu1 %v1292_v43  ;;  %1218 = vmatpush3.bf16.msra.mxu0 %v1309_v46 }
  0x2e   :  { %1243 = vmatpush3.bf16.msra.mxu1 %v1309_v46  ;;  %1219 = vmatprep.subr.bf16.mxu0 %v1322_v49 }
  0x2f   :  { %1240 = vmatprep.subr.bf16.mxu1 %v1322_v49 }
  0x31   :  { %1220 = vmatpush3.bf16.msra.mxu0 %v1322_v49 }
  0x32   :  { %1244 = vmatpush3.bf16.msra.mxu1 %v1322_v49 }
  0x33   :  { %631 = vmatmul.mubr.bf16.gmra.mxu0 %v1294_v44 }
  0x34   :  { %728 = vmatmul.mubr.bf16.gmra.mxu1 %v1295_v45  ;;  %638 = vmatprep.mubr.bf16.mxu0 %v1297_v47 }
  0x35   :  { %735 = vmatprep.mubr.bf16.mxu1 %v1299_v48 }
  0x3b   :  { %639 = vmatmul.mubr.bf16.gmra.mxu0 %v1301_v50 }
  0x3c   :  { %736 = vmatmul.mubr.bf16.gmra.mxu1 %v1302_v51  ;;  %646 = vmatprep.mubr.bf16.mxu0 %v1303_v52 }
  0x3d   :  { %743 = vmatprep.mubr.bf16.mxu1 %v1305_v53 }
  0x43   :  { %647 = vmatmul.mubr.bf16.gmra.mxu0 %v1307_v54 }
  0x44   :  { %744 = vmatmul.mubr.bf16.gmra.mxu1 %v1308_v55  ;;  %654 = vmatprep.mubr.bf16.mxu0 %v1310_v56 }
  0x45   :  { %751 = vmatprep.mubr.bf16.mxu1 %v1312_v57 }
  0x4b   :  { %655 = vmatmul.mubr.bf16.gmra.mxu0 %v1314_v58 }
  0x4c   :  { %752 = vmatmul.mubr.bf16.gmra.mxu1 %v1315_v59  ;;  %662 = vmatprep.mubr.bf16.mxu0 %v1316_v60 }
  0x4d   :  { %759 = vmatprep.mubr.bf16.mxu1 %v1318_v61 }
  0x53   :  { %663 = vmatmul.mubr.bf16.gmra.mxu0 %v1320_v62 }
  0x54   :  { %760 = vmatmul.mubr.bf16.gmra.mxu1 %v1321_v63  ;;  %670 = vmatprep.mubr.bf16.mxu0 %v1323_v0 }
  0x55   :  { %767 = vmatprep.mubr.bf16.mxu1 %v1325_v1 }
  0x5b   :  { %671 = vmatmul.mubr.bf16.gmra.mxu0 %v1327_v2 }
  0x5c   :  { %768 = vmatmul.mubr.bf16.gmra.mxu1 %v1328_v3  ;;  %1221 = vmatprep.mubr.msk.bf16.mxu0 %vm557_vm0, %v1329_v4 }
  0x5d   :  { %1229 = vmatprep.mubr.msk.bf16.mxu1 %vm557_vm0, %v1330_v5 }
  0x63   :  { %1222 = vmatmul.mubr.msk.bf16.vlgmr.msra.gmra.mxu0 %vm557_vm0, %v1331_v6 }
  0x64   :  { %1230 = vmatmul.mubr.msk.bf16.vlgmr.msra.gmra.mxu1 %vm557_vm0, %v1332_v7  ;;  %1225 = vmatprep.mubr.msk.bf16.mxu0 %vm557_vm0, %v1333_v8 }
  0x65   :  { %1233 = vmatprep.mubr.msk.bf16.mxu1 %vm557_vm0, %v1334_v9 }
  0x6b   :  { %1226 = vmatmul.mubr.msk.bf16.gmra.mxu0 %vm557_vm0, %v1335_v10 }
  0x6c   :  { %1234 = vmatmul.mubr.msk.bf16.gmra.mxu1 %vm557_vm0, %v1336_v11 }
  0xe3   :  { %v1089_v12 = vpop.f32.mrf.mxu0 }
  0xe4   :  { %v1153_v13 = vpop.f32.mrf.mxu1 }
  0xe5   :  { %v1090_v14 = vpop.f32.mrf.mxu0 }
  0xe6   :  { %v1154_v15 = vpop.f32.mrf.mxu1  ;;  %v1091_v3 = vadd.f32 %v1090_v14, %v1089_v12 }
  0xe7   :  { %v1092_v16 = vpop.f32.mrf.mxu0  ;;  %v1155_v4 = vadd.f32 %v1154_v15, %v1153_v13 }
  0xe8   :  { %v1156_v17 = vpop.f32.mrf.mxu1 }
  0xe9   :  { %v1093_v18 = vpop.f32.mrf.mxu0 }
  0xea   :  { %v1157_v19 = vpop.f32.mrf.mxu1  ;;  %v1094_v5 = vadd.f32 %v1093_v18, %v1092_v16 }
  0xeb   :  { %v1095_v20 = vpop.f32.mrf.mxu0  ;;  %v1158_v6 = vadd.f32 %v1157_v19, %v1156_v17 }
  0xec   :  { %v1159_v21 = vpop.f32.mrf.mxu1 }
  0xed   :  { %v1096_v22 = vpop.f32.mrf.mxu0 }
  0xee   :  { %v1160_v23 = vpop.f32.mrf.mxu1  ;;  %v1097_v8 = vadd.f32 %v1096_v22, %v1095_v20 }
  0xef   :  { %v1098_v24 = vpop.f32.mrf.mxu0  ;;  %v1161_v9 = vadd.f32 %v1160_v23, %v1159_v21 }
  0xf0   :  { %v1162_v25 = vpop.f32.mrf.mxu1 }
  0xf1   :  { %v1099_v26 = vpop.f32.mrf.mxu0 }
  0xf2   :  { %v1163_v27 = vpop.f32.mrf.mxu1  ;;  %v1100_v10 = vadd.f32 %v1099_v26, %v1098_v24  ;;  %v722_v26 = vadd.f32 %v1161_v9, %v1097_v8  ;;  %v929_v9 = vld [vmem:[%s1785_s4 + $0x50] sm:$0xff] }
  0xf3   :  { %v1101_v28 = vpop.f32.mrf.mxu0  ;;  %v1164_v11 = vadd.f32 %v1163_v27, %v1162_v25  ;;  %v714_v25 = vadd.f32 %v1155_v4, %v1091_v3 }
  0xf4   :  { %v1165_v29 = vpop.f32.mrf.mxu1 }
  0xf5   :  { %v1102_v30 = vpop.f32.mrf.mxu0  ;;  %v725_v27 = vadd.f32 %v1164_v11, %v1100_v10 }
  0xf6   :  { %v1166_v31 = vpop.f32.mrf.mxu1  ;;  %v1103_v14 = vadd.f32 %v1102_v30, %v1101_v28  ;;  %v1603_v28 = vadd.f32 %v1158_v6, %v1094_v5 }
  0xf7   :  { %v1104_v32 = vpop.f32.mrf.mxu0  ;;  %v1167_v13 = vadd.f32 %v1166_v31, %v1165_v29 }
  0xf8   :  { %v1168_v33 = vpop.f32.mrf.mxu1 }
  0xf9   :  { %v1105_v34 = vpop.f32.mrf.mxu0 }
  0xfa   :  { %v1169_v35 = vpop.f32.mrf.mxu1  ;;  %v1106_v15 = vadd.f32 %v1105_v34, %v1104_v32  ;;  %v1605_v32 = vadd.f32 %v1167_v13, %v1103_v14 }
  0xfb   :  { %v1107_v36 = vpop.f32.mrf.mxu0  ;;  %v1170_v16 = vadd.f32 %v1169_v35, %v1168_v33 }
  0xfc   :  { %v1171_v37 = vpop.f32.mrf.mxu1 }
  0xfd   :  { %v1108_v38 = vpop.f32.mrf.mxu0  ;;  %v1607_v34 = vadd.f32 %v1170_v16, %v1106_v15  ;;  %v919_v15 = vld [vmem:[%s1785_s4] sm:$0xff] }
  0xfe   :  { %v1172_v39 = vpop.f32.mrf.mxu1  ;;  %v1109_v17 = vadd.f32 %v1108_v38, %v1107_v36 }
  0xff   :  { %v1110_v40 = vpop.f32.mrf.mxu0  ;;  %v1173_v19 = vadd.f32 %v1172_v39, %v1171_v37 }
 0x100   :  { %v1174_v41 = vpop.f32.mrf.mxu1 }
 0x101   :  { %v1111_v42 = vpop.f32.mrf.mxu0  ;;  %v1609_v38 = vadd.f32 %v1173_v19, %v1109_v17 }
 0x102   :  { %v1175_v43 = vpop.f32.mrf.mxu1  ;;  %v1112_v30 = vadd.f32 %v1111_v42, %v1110_v40 }
 0x103   :  { %v1113_v44 = vpop.f32.mrf.mxu0  ;;  %v1176_v29 = vadd.f32 %v1175_v43, %v1174_v41  ;;  %v1614_v43 = vld [vmem:[%s1783_s2] ss:$0 sm:$0xff] }
 0x104   :  { %v1177_v45 = vpop.f32.mrf.mxu1 }
 0x105   :  { %v1114_v46 = vpop.f32.mrf.mxu0 }
 0x106   :  { %v1178_v47 = vpop.f32.mrf.mxu1  ;;  %v1115_v33 = vadd.f32 %v1114_v46, %v1113_v44 }
 0x107   :  { %v1116_v48 = vpop.f32.mrf.mxu0  ;;  %v1179_v35 = vadd.f32 %v1178_v47, %v1177_v45 }
 0x108   :  { %v1180_v49 = vpop.f32.mrf.mxu1 }
 0x109   :  { %v1117_v50 = vpop.f32.mrf.mxu0 }
 0x10a   :  { %v1181_v51 = vpop.f32.mrf.mxu1  ;;  %v1118_v36 = vadd.f32 %v1117_v50, %v1116_v48  ;;  %v1616_v48 = vadd.f32 %v1176_v29, %v1112_v30  ;;  %v922_v30 = vld [vmem:[%s1785_s4 + $0x18] sm:$0xff] }
 0x10b   :  { %v1119_v52 = vpop.f32.mrf.mxu0  ;;  %v1182_v39 = vadd.f32 %v1181_v51, %v1180_v49  ;;  %v1621_v51 = vld [vmem:[%s1784_s3] ss:$0 sm:$0xff] }
 0x10c   :  { %v1183_v53 = vpop.f32.mrf.mxu1 }
 0x10d   :  { %v1120_v54 = vpop.f32.mrf.mxu0 }
 0x10e   :  { %v1184_v55 = vpop.f32.mrf.mxu1  ;;  %v1121_v22 = vadd.f32 %v1120_v54, %v1119_v52 }
 0x10f   :  { %v1122_v56 = vpop.f32.mrf.mxu0  ;;  %v1185_v21 = vadd.f32 %v1184_v55, %v1183_v53 }
 0x110   :  { %v1186_v57 = vpop.f32.mrf.mxu1 }
 0x111   :  { %v1123_v58 = vpop.f32.mrf.mxu0  ;;  %v754_v55 = vadd.f32 %v1185_v21, %v1121_v22  ;;  %v927_v21 = vld [vmem:[%s1785_s4 + $0x40] sm:$0xff] }
 0x112   :  { %v1187_v59 = vpop.f32.mrf.mxu1  ;;  %v1124_v52 = vadd.f32 %v1123_v58, %v1122_v56  ;;  %v746_v58 = vadd.f32 %v1179_v35, %v1115_v33 }
 0x113   :  { %v1125_v60 = vpop.f32.mrf.mxu0  ;;  %v1188_v53 = vadd.f32 %v1187_v59, %v1186_v57 }
 0x114   :  { %v1189_v61 = vpop.f32.mrf.mxu1 }
 0x115   :  { %v1126_v62 = vpop.f32.mrf.mxu0 }
 0x116   :  { %v1190_v63 = vpop.f32.mrf.mxu1  ;;  %v1127_v3 = vadd.f32 %v1126_v62, %v1125_v60  ;;  %v757_v62 = vadd.f32 %v1188_v53, %v1124_v52 }
 0x117   :  { %v1128_v0 = vpop.f32.mrf.mxu0  ;;  %v1191_v4 = vadd.f32 %v1190_v63, %v1189_v61  ;;  %v749_v63 = vadd.f32 %v1182_v39, %v1118_v36 }
 0x118   :  { %v1192_v1 = vpop.f32.mrf.mxu1 }
 0x119   :  { %v1129_v2 = vpop.f32.mrf.mxu0  ;;  %v1628_v6 = vadd.f32 %v1191_v4, %v1127_v3  ;;  %v920_v3 = vld [vmem:[%s1785_s4 + $0x8] sm:$0xff] }
 0x11a   :  { %v1193_v7 = vpop.f32.mrf.mxu1  ;;  %v1130_v40 = vadd.f32 %v1129_v2, %v1128_v0  ;;  %v921_v0 = vld [vmem:[%s1785_s4 + $0x10] sm:$0xff] }
 0x11b   :  { %v1131_v12 = vpop.f32.mrf.mxu0  ;;  %v1194_v41 = vadd.f32 %v1193_v7, %v1192_v1 }
 0x11c   :  { %v1195_v18 = vpop.f32.mrf.mxu1 }
 0x11d   :  { %v1132_v20 = vpop.f32.mrf.mxu0  ;;  %v1630_v7 = vadd.f32 %v1194_v41, %v1130_v40 }
 0x11e   :  { %v1196_v23 = vpop.f32.mrf.mxu1  ;;  %v1133_v44 = vadd.f32 %v1132_v20, %v1131_v12 }
 0x11f   :  { %v1134_v24 = vpop.f32.mrf.mxu0  ;;  %v1197_v45 = vadd.f32 %v1196_v23, %v1195_v18 }
 0x120   :  { %v1198_v31 = vpop.f32.mrf.mxu1 }
 0x121   :  { %v1135_v37 = vpop.f32.mrf.mxu0  ;;  %v770_v14 = vadd.f32 %v1197_v45, %v1133_v44  ;;  %v928_v45 = vld [vmem:[%s1785_s4 + $0x48] sm:$0xff] }
 0x122   :  { %v1199_v54 = vpop.f32.mrf.mxu1  ;;  %v1136_v49 = vadd.f32 %v1135_v37, %v1134_v24 }
 0x123   :  { %v1223_v42 = vpop.f32.mrf.mxu0  ;;  %v1200_v50 = vadd.f32 %v1199_v54, %v1198_v31 }
 0x124   :  { %v819_v46 = vadd.f32 %v1223_v42, %v722_v26  ;;  %v1231_v47 = vpop.f32.mrf.mxu1 }
 0x125   :  { %v851_v56 = vadd.f32 %v1231_v47, %v754_v55  ;;  %v810_v57 = vpop.f32.mrf.mxu0  ;;  %v1642_v19 = vadd.f32 %v1200_v50, %v1136_v49 }
 0x126   :  { %v882_v59 = vmul.f32 %v1614_v43, %v819_v46  ;;  %v811_v60 = vadd.f32 %v810_v57, %v714_v25  ;;  %v842_v61 = vpop.f32.mrf.mxu1 }
 0x127   :  { %v890_v1 = vmul.f32 %v1614_v43, %v851_v56  ;;  %v843_v2 = vadd.f32 %v842_v61, %v746_v58  ;;  %v1224_v5 = vpop.f32.mrf.mxu0 }
 0x128   :  { %v905_v8 = vadd.f32 %v1621_v51, %v882_v59  ;;  %v880_v10 = vmul.f32 %v1614_v43, %v811_v60  ;;  %v822_v11 = vadd.f32 %v1224_v5, %v725_v27  ;;  %v1232_v12 = vpop.f32.mrf.mxu1 }
 0x129   :  { %v913_v13 = vadd.f32 %v1621_v51, %v890_v1  ;;  %v888_v16 = vmul.f32 %v1614_v43, %v843_v2  ;;  %v854_v18 = vadd.f32 %v1232_v12, %v757_v62  ;;  %v813_v17 = vpop.f32.mrf.mxu0  ;;  %v925_v1 = vld [vmem:[%s1785_s4 + $0x30] sm:$0xff] }
 0x12a   :  { %v937_v20 = vadd.f32 %v921_v0, %v905_v8  ;;  %v903_v22 = vadd.f32 %v1621_v51, %v880_v10  ;;  %v883_v23 = vmul.f32 %v1614_v43, %v822_v11  ;;  %v814_v24 = vadd.f32 %v813_v17, %v1603_v28  ;;  %v845_v26 = vpop.f32.mrf.mxu1  ;;  %v930_v28 = vld [vmem:[%s1785_s4 + $0x58] sm:$0xff]  ;;  %v933_v10 = vld [vmem:[%s1785_s4 + $0x70] sm:$0xff] }
 0x12b   :  { %v945_v25 = vadd.f32 %v929_v9, %v913_v13  ;;  %v911_v27 = vadd.f32 %v1621_v51, %v888_v16  ;;  %v891_v29 = vmul.f32 %v1614_v43, %v854_v18  ;;  %v846_v31 = vadd.f32 %v845_v26, %v749_v63  ;;  %v1227_v33 = vpop.f32.mrf.mxu0 }
 0x12c   :  { %v953_v35 = vmax.f32 %v937_v20, 0.0  ;;  %v935_v36 = vadd.f32 %v919_v15, %v903_v22  ;;  %v906_v37 = vadd.f32 %v1621_v51, %v883_v23  ;;  %v881_v39 = vmul.f32 %v1614_v43, %v814_v24  ;;  %v1235_v52 = vpop.f32.mrf.mxu1  ;;  %v923_v15 = vld [vmem:[%s1785_s4 + $0x20] sm:$0xff]  ;;  %v926_v24 = vld [vmem:[%s1785_s4 + $0x38] sm:$0xff] }
 0x12d   :  { %v961_v53 = vmax.f32 %v945_v25, 0.0  ;;  %v943_v54 = vadd.f32 %v927_v21, %v911_v27  ;;  %v914_v55 = vadd.f32 %v1621_v51, %v891_v29  ;;  %v889_v4 = vmul.f32 %v1614_v43, %v846_v31  ;;  %v826_v40 = vpop.f32.mrf.mxu0  ;;  %v931_v20 = vld [vmem:[%s1785_s4 + $0x60] sm:$0xff]  ;;  %v934_v29 = vld [vmem:[%s1785_s4 + $0x78] sm:$0xff] }
 0x12e   :  { %969 = vst.msk [vmem:[%s1786_s5 + $0x10] sm:$0xff] %vm557_vm0, %v953_v35  ;;  %v951_v41 = vmax.f32 %v935_v36, 0.0  ;;  %v938_v42 = vadd.f32 %v922_v30, %v906_v37  ;;  %v904_v44 = vadd.f32 %v1621_v51, %v881_v39  ;;  %v835_v46 = vadd.f32 %v1227_v33, %v1609_v38  ;;  %v858_v47 = vpop.f32.mrf.mxu1  ;;  %v924_v37 = vld [vmem:[%s1785_s4 + $0x28] sm:$0xff] }
 0x12f   :  { %977 = vst.msk [vmem:[%s1786_s5 + $0x50] sm:$0xff] %vm557_vm0, %v961_v53  ;;  %v959_v49 = vmax.f32 %v943_v54, 0.0  ;;  %v946_v50 = vadd.f32 %v930_v28, %v914_v55  ;;  %v912_v56 = vadd.f32 %v1621_v51, %v889_v4  ;;  %v867_v57 = vadd.f32 %v1235_v52, %v770_v14  ;;  %v1228_v58 = vpop.f32.mrf.mxu0  ;;  %v932_v53 = vld [vmem:[%s1785_s4 + $0x68] sm:$0xff] }
 0x130   :  { %967 = vst.msk [vmem:[%s1786_s5] sm:$0xff] %vm557_vm0, %v951_v41  ;;  %v954_v59 = vmax.f32 %v938_v42, 0.0  ;;  %v936_v60 = vadd.f32 %v920_v3, %v904_v44  ;;  %v886_v38 = vmul.f32 %v1614_v43, %v835_v46  ;;  %v827_v61 = vadd.f32 %v826_v40, %v1605_v32  ;;  %v1236_v62 = vpop.f32.mrf.mxu1 }
 0x131   :  { %975 = vst.msk [vmem:[%s1786_s5 + $0x40] sm:$0xff] %vm557_vm0, %v959_v49  ;;  %v962_v63 = vmax.f32 %v946_v50, 0.0  ;;  %v944_v0 = vadd.f32 %v928_v45, %v912_v56  ;;  %v894_v2 = vmul.f32 %v1614_v43, %v867_v57  ;;  %v859_v5 = vadd.f32 %v858_v47, %v1628_v6  ;;  %v829_v8 = vpop.f32.mrf.mxu0 }
 0x132   :  { %970 = vst.msk [vmem:[%s1786_s5 + $0x18] sm:$0xff] %vm557_vm0, %v954_v59  ;;  %v952_v32 = vmax.f32 %v936_v60, 0.0  ;;  %v909_v9 = vadd.f32 %v1621_v51, %v886_v38  ;;  %v884_v11 = vmul.f32 %v1614_v43, %v827_v61  ;;  %v838_v12 = vadd.f32 %v1228_v58, %v1616_v48  ;;  %v861_v14 = vpop.f32.mrf.mxu1 }
 0x133   :  { %978 = vst.msk [vmem:[%s1786_s5 + $0x58] sm:$0xff] %vm557_vm0, %v962_v63  ;;  %v960_v6 = vmax.f32 %v944_v0, 0.0  ;;  %v917_v13 = vadd.f32 %v1621_v51, %v894_v2  ;;  %v892_v16 = vmul.f32 %v1614_v43, %v859_v5  ;;  %v870_v18 = vadd.f32 %v1236_v62, %v1642_v19 }
 0x134   :  { %968 = vst.msk [vmem:[%s1786_s5 + $0x8] sm:$0xff] %vm557_vm0, %v952_v32  ;;  %v941_v48 = vadd.f32 %v925_v1, %v909_v9  ;;  %v907_v17 = vadd.f32 %v1621_v51, %v884_v11  ;;  %v887_v22 = vmul.f32 %v1614_v43, %v838_v12  ;;  %v830_v21 = vadd.f32 %v829_v8, %v1607_v34 }
 0x135   :  { %976 = vst.msk [vmem:[%s1786_s5 + $0x48] sm:$0xff] %vm557_vm0, %v960_v6  ;;  %v949_v19 = vadd.f32 %v933_v10, %v917_v13  ;;  %v915_v23 = vadd.f32 %v1621_v51, %v892_v16  ;;  %v895_v26 = vmul.f32 %v1614_v43, %v870_v18  ;;  %v862_v25 = vadd.f32 %v861_v14, %v1630_v7 }
 0x136   :  { %v957_v27 = vmax.f32 %v941_v48, 0.0  ;;  %v939_v30 = vadd.f32 %v923_v15, %v907_v17  ;;  %v910_v34 = vadd.f32 %v1621_v51, %v887_v22  ;;  %v885_v31 = vmul.f32 %v1614_v43, %v830_v21 }
 0x137   :  { %v965_v33 = vmax.f32 %v949_v19, 0.0  ;;  %v947_v35 = vadd.f32 %v931_v20, %v915_v23  ;;  %v918_v36 = vadd.f32 %v1621_v51, %v895_v26  ;;  %v893_v7 = vmul.f32 %v1614_v43, %v862_v25 }
 0x138   :  { %973 = vst.msk [vmem:[%s1786_s5 + $0x30] sm:$0xff] %vm557_vm0, %v957_v27  ;;  %v955_v28 = vmax.f32 %v939_v30, 0.0  ;;  %v942_v39 = vadd.f32 %v926_v24, %v910_v34  ;;  %v908_v52 = vadd.f32 %v1621_v51, %v885_v31 }
 0x139   :  { %981 = vst.msk [vmem:[%s1786_s5 + $0x70] sm:$0xff] %vm557_vm0, %v965_v33  ;;  %v963_v54 = vmax.f32 %v947_v35, 0.0  ;;  %v950_v43 = vadd.f32 %v934_v29, %v918_v36  ;;  %v916_v55 = vadd.f32 %v1621_v51, %v893_v7 }
 0x13a   :  { %971 = vst.msk [vmem:[%s1786_s5 + $0x20] sm:$0xff] %vm557_vm0, %v955_v28  ;;  %v958_v3 = vmax.f32 %v942_v39, 0.0  ;;  %v940_v4 = vadd.f32 %v924_v37, %v908_v52 }
 0x13b   :  { %979 = vst.msk [vmem:[%s1786_s5 + $0x60] sm:$0xff] %vm557_vm0, %v963_v54  ;;  %v966_v40 = vmax.f32 %v950_v43, 0.0  ;;  %v948_v41 = vadd.f32 %v932_v53, %v916_v55 }
 0x13c   :  { %974 = vst.msk [vmem:[%s1786_s5 + $0x38] sm:$0xff] %vm557_vm0, %v958_v3  ;;  %v956_v51 = vmax.f32 %v940_v4, 0.0 }
 0x13d   :  { %982 = vst.msk [vmem:[%s1786_s5 + $0x78] sm:$0xff] %vm557_vm0, %v966_v40  ;;  %v964_v42 = vmax.f32 %v948_v41, 0.0 }
 0x13e   :  { %972 = vst.msk [vmem:[%s1786_s5 + $0x28] sm:$0xff] %vm557_vm0, %v956_v51 }
 0x13f   :  { %980 = vst.msk [vmem:[%s1786_s5 + $0x68] sm:$0xff] %vm557_vm0, %v964_v42 }

// kernel: sound_enc_forward.24
= control target key start
LH: loop header
LB: loop body
LE: loop exit
PB: predicated region body
PF: predicated region fallthrough
CT: control target
= control target key end

     0   :  { %vm368_vm0 = vcmask 523264   ;;  %s911_s1 = inlined_call_operand.vmem [shape: bf16[576,128], index: 1, kind: input, shape index: {}]   ;;  %s912_s0 = inlined_call_operand.vmem [shape: bf16[32,576], index: 0, kind: input, shape index: {}]   ;;  %s913_s2 = inlined_call_operand.vmem [shape: f32[1,128], index: 2, kind: input, shape index: {}]   ;;  %s914_s3 = inlined_call_operand.vmem [shape: f32[1,128], index: 3, kind: input, shape index: {}]   ;;  %s915_s4 = inlined_call_operand.vmem [shape: f32[32,128], index: 4, kind: output, shape index: {}]  }
   0x1   :  { %v680_v0 = vld [vmem:[%s911_s1 + $0x78] sm:$0xff]   ;;  %v684_v4 = vld [vmem:[%s911_s1 + $0x70] sm:$0xff]   ;;  %v688_v8 = vld [vmem:[%s911_s1 + $0x68] sm:$0xff]  }
   0x2   :  { %v681_v1 = vld [vmem:[%s911_s1 + $0xf8] sm:$0xff]   ;;  %606 = vmatprep.subr.bf16.mxu0 %v680_v0  ;;  %v685_v5 = vld [vmem:[%s911_s1 + $0xf0] sm:$0xff]   ;;  %v689_v9 = vld [vmem:[%s911_s1 + $0xe8] sm:$0xff]  }
   0x3   :  { %v682_v2 = vld [vmem:[%s911_s1 + $0x38] sm:$0xff]   ;;  %634 = vmatprep.subr.bf16.mxu1 %v681_v1  ;;  %v686_v6 = vld [vmem:[%s911_s1 + $0x30] sm:$0xff]   ;;  %v690_v10 = vld [vmem:[%s911_s1 + $0x28] sm:$0xff]  }
   0x4   :  { %v683_v3 = vld [vmem:[%s911_s1 + $0xb8] sm:$0xff]   ;;  %607 = vmatpush3.bf16.msra.mxu0 %v682_v2  ;;  %v687_v7 = vld [vmem:[%s911_s1 + $0xb0] sm:$0xff]   ;;  %v691_v11 = vld [vmem:[%s911_s1 + $0xa8] sm:$0xff]  }
   0x5   :  { %635 = vmatpush3.bf16.msra.mxu1 %v683_v3  ;;  %608 = vmatprep.subr.bf16.mxu0 %v684_v4  ;;  %v692_v12 = vld [vmem:[%s911_s1 + $0x60] sm:$0xff]   ;;  %v696_v16 = vld [vmem:[%s911_s1 + $0x58] sm:$0xff]   ;;  %v700_v20 = vld [vmem:[%s911_s1 + $0x50] sm:$0xff]  }
   0x6   :  { %636 = vmatprep.subr.bf16.mxu1 %v685_v5  ;;  %v693_v13 = vld [vmem:[%s911_s1 + $0xe0] sm:$0xff]   ;;  %v697_v17 = vld [vmem:[%s911_s1 + $0xd8] sm:$0xff]   ;;  %v701_v21 = vld [vmem:[%s911_s1 + $0xd0] sm:$0xff]  }
   0x7   :  { %v694_v14 = vld [vmem:[%s911_s1 + $0x20] sm:$0xff]   ;;  %v698_v18 = vld [vmem:[%s911_s1 + $0x18] sm:$0xff]   ;;  %v702_v22 = vld [vmem:[%s911_s1 + $0x10] sm:$0xff]  }
   0x8   :  { %609 = vmatpush3.bf16.msra.mxu0 %v686_v6  ;;  %v695_v15 = vld [vmem:[%s911_s1 + $0xa0] sm:$0xff]   ;;  %v699_v19 = vld [vmem:[%s911_s1 + $0x98] sm:$0xff]   ;;  %v703_v23 = vld [vmem:[%s911_s1 + $0x90] sm:$0xff]  }
   0x9   :  { %637 = vmatpush3.bf16.msra.mxu1 %v687_v7  ;;  %610 = vmatprep.subr.bf16.mxu0 %v688_v8  ;;  %v704_v24 = vld [vmem:[%s911_s1 + $0x48] sm:$0xff]   ;;  %v708_v28 = vld [vmem:[%s911_s1 + $0x40] sm:$0xff]   ;;  %v718_v36 = vld [vmem:[%s911_s1 + $0x118] sm:$0xff]  }
   0xa   :  { %638 = vmatprep.subr.bf16.mxu1 %v689_v9  ;;  %v705_v25 = vld [vmem:[%s911_s1 + $0xc8] sm:$0xff]   ;;  %v709_v29 = vld [vmem:[%s911_s1 + $0xc0] sm:$0xff]   ;;  %v719_v37 = vld [vmem:[%s911_s1 + $0x110] sm:$0xff]  }
   0xb   :  { %v706_v26 = vld [vmem:[%s911_s1 + $0x8] sm:$0xff]   ;;  %v710_v30 = vld [vmem:[%s911_s1] sm:$0xff]  }
   0xc   :  { %611 = vmatpush3.bf16.msra.mxu0 %v690_v10  ;;  %v707_v27 = vld [vmem:[%s911_s1 + $0x88] sm:$0xff]   ;;  %v711_v31 = vld [vmem:[%s911_s1 + $0x80] sm:$0xff]  }
   0xd   :  { %639 = vmatpush3.bf16.msra.mxu1 %v691_v11  ;;  %612 = vmatprep.subr.bf16.mxu0 %v692_v12  ;;  %v712_v32 = vld [vmem:[%s912_s0] ss:$20 sps:$4 sm:$0xff]   ;;  %v714_v33 = vld [vmem:[%s912_s0 + $0x4] ss:$20 sps:$4 sm:$0xff]   ;;  %v715_v34 = vld [vmem:[%s912_s0 + $0x8] ss:$20 sps:$4 sm:$0xff]  }
   0xe   :  { %640 = vmatprep.subr.bf16.mxu1 %v693_v13  ;;  %v717_v35 = vld [vmem:[%s912_s0 + $0xc] ss:$20 sps:$4 sm:$0xff]   ;;  %407 = vmatprep.mubr.bf16.mxu0 %v714_v33  ;;  %v722_v39 = vld [vmem:[%s912_s0 + $0x34] ss:$20 sps:$4 sm:$0xff]   ;;  %v725_v42 = vld [vmem:[%s912_s0 + $0x30] ss:$20 sps:$4 sm:$0xff]  }
   0xf   :  { %456 = vmatprep.mubr.bf16.mxu1 %v717_v35  ;;  %v720_v38 = vld [vmem:[%s912_s0 + $0x2c] ss:$20 sps:$4 sm:$0xff]   ;;  %v724_v40 = vld [vmem:[%s912_s0 + $0x28] ss:$20 sps:$4 sm:$0xff]   ;;  %v728_v43 = vld [vmem:[%s912_s0 + $0x10] ss:$20 sps:$4 sm:$0xff]  }
  0x10   :  { %613 = vmatpush3.bf16.msra.mxu0 %v694_v14  ;;  %v726_v41 = vld [vmem:[%s911_s1 + $0x108] sm:$0xff]   ;;  %v727_v44 = vld [vmem:[%s911_s1 + $0x100] sm:$0xff]  }
  0x11   :  { %641 = vmatpush3.bf16.msra.mxu1 %v695_v15  ;;  %614 = vmatprep.subr.bf16.mxu0 %v696_v16  ;;  %v729_v45 = vld [vmem:[%s912_s0 + $0x38] ss:$20 sps:$4 sm:$0xff]   ;;  %v604_v6 = vld [vmem:[%s913_s2] ss:$0 sm:$0xff] }
  0x12   :  { %642 = vmatprep.subr.bf16.mxu1 %v697_v17  ;;  %v605_v11 = vld [vmem:[%s914_s3] ss:$0 sm:$0xff] }
  0x14   :  { %615 = vmatpush3.bf16.msra.mxu0 %v698_v18 }
  0x15   :  { %643 = vmatpush3.bf16.msra.mxu1 %v699_v19  ;;  %616 = vmatprep.subr.bf16.mxu0 %v700_v20 }
  0x16   :  { %644 = vmatprep.subr.bf16.mxu1 %v701_v21 }
  0x18   :  { %617 = vmatpush3.bf16.msra.mxu0 %v702_v22 }
  0x19   :  { %645 = vmatpush3.bf16.msra.mxu1 %v703_v23  ;;  %618 = vmatprep.subr.bf16.mxu0 %v704_v24 }
  0x1a   :  { %646 = vmatprep.subr.bf16.mxu1 %v705_v25 }
  0x1c   :  { %619 = vmatpush3.bf16.msra.mxu0 %v706_v26 }
  0x1d   :  { %647 = vmatpush3.bf16.msra.mxu1 %v707_v27  ;;  %620 = vmatprep.subr.bf16.mxu0 %v708_v28 }
  0x1e   :  { %648 = vmatprep.subr.bf16.mxu1 %v709_v29 }
  0x20   :  { %621 = vmatpush3.bf16.msra.mxu0 %v710_v30 }
  0x21   :  { %649 = vmatpush3.bf16.msra.mxu1 %v711_v31  ;;  %668 = vmatprep.subr.bf16.mxu0 %v718_v36 }
  0x23   :  { %408 = vmatmul.mubr.bf16.vlgmr.msra.gmra.mxu0 %v712_v32 }
  0x24   :  { %457 = vmatmul.mubr.bf16.vlgmr.msra.gmra.mxu1 %v715_v34  ;;  %669 = vmatpush3.bf16.msra.mxu0 %v718_v36 }
  0x25   :  { %670 = vmatprep.subr.bf16.mxu0 %v719_v37  ;;  %415 = vmatprep.mubr.bf16.mxu0 %v720_v38 }
  0x26   :  { %464 = vmatprep.mubr.bf16.mxu1 %v722_v39 }
  0x28   :  { %671 = vmatpush3.bf16.msra.mxu0 %v719_v37 }
  0x29   :  { %672 = vmatprep.subr.bf16.mxu0 %v726_v41 }
  0x2b   :  { %416 = vmatmul.mubr.bf16.gmra.mxu0 %v724_v40 }
  0x2c   :  { %465 = vmatmul.mubr.bf16.gmra.mxu1 %v725_v42  ;;  %676 = vmatprep.mubr.msk.bf16.mxu0 %vm368_vm0, %v728_v43 }
  0x2d   :  { %673 = vmatpush3.bf16.msra.mxu0 %v726_v41 }
  0x2e   :  { %674 = vmatprep.subr.bf16.mxu0 %v727_v44 }
  0x31   :  { %675 = vmatpush3.bf16.msra.mxu0 %v727_v44 }
  0x34   :  { %677 = vmatmul.mubr.msk.bf16.vlgmr.msra.gmra.mxu0 %vm368_vm0, %v729_v45 }
  0xe3   :  { %v622_v46 = vpop.f32.mrf.mxu0 }
  0xe4   :  { %v650_v47 = vpop.f32.mrf.mxu1 }
  0xe5   :  { %v623_v48 = vpop.f32.mrf.mxu0 }
  0xe6   :  { %v651_v49 = vpop.f32.mrf.mxu1  ;;  %v624_v62 = vadd.f32 %v623_v48, %v622_v46 }
  0xe7   :  { %v625_v50 = vpop.f32.mrf.mxu0  ;;  %v652_v63 = vadd.f32 %v651_v49, %v650_v47 }
  0xe8   :  { %v653_v51 = vpop.f32.mrf.mxu1 }
  0xe9   :  { %v626_v52 = vpop.f32.mrf.mxu0  ;;  %v459_v10 = vadd.f32 %v652_v63, %v624_v62 }
  0xea   :  { %v654_v53 = vpop.f32.mrf.mxu1  ;;  %v627_v7 = vadd.f32 %v626_v52, %v625_v50 }
  0xeb   :  { %v628_v54 = vpop.f32.mrf.mxu0  ;;  %v655_v8 = vadd.f32 %v654_v53, %v653_v51 }
  0xec   :  { %v656_v55 = vpop.f32.mrf.mxu1 }
  0xed   :  { %v629_v56 = vpop.f32.mrf.mxu0  ;;  %v462_v20 = vadd.f32 %v655_v8, %v627_v7 }
  0xee   :  { %v657_v57 = vpop.f32.mrf.mxu1  ;;  %v630_v58 = vadd.f32 %v629_v56, %v628_v54 }
  0xef   :  { %v658_v59 = vadd.f32 %v657_v57, %v656_v55  ;;  %v631_v60 = vpop.f32.mrf.mxu0 }
  0xf0   :  { %v659_v61 = vpop.f32.mrf.mxu1 }
  0xf1   :  { %v632_v0 = vpop.f32.mrf.mxu0  ;;  %v467_v4 = vadd.f32 %v658_v59, %v630_v58 }
  0xf2   :  { %v660_v1 = vpop.f32.mrf.mxu1  ;;  %v633_v2 = vadd.f32 %v632_v0, %v631_v60 }
  0xf3   :  { %v661_v3 = vadd.f32 %v660_v1, %v659_v61 }
  0xf4   :  { %v678_v5 = vpop.f32.mrf.mxu0 }
  0xf5   :  { %v516_v9 = vadd.f32 %v678_v5, %v467_v4  ;;  %v470_v15 = vadd.f32 %v661_v3, %v633_v2 }
  0xf6   :  { %v507_v12 = vpop.f32.mrf.mxu0 }
  0xf7   :  { %v531_v13 = vmul.f32 %v604_v6, %v516_v9  ;;  %v508_v14 = vadd.f32 %v507_v12, %v459_v10 }
  0xf8   :  { %v679_v16 = vpop.f32.mrf.mxu0 }
  0xf9   :  { %v542_v17 = vadd.f32 %v605_v11, %v531_v13  ;;  %v529_v18 = vmul.f32 %v604_v6, %v508_v14  ;;  %v519_v19 = vadd.f32 %v679_v16, %v470_v15 }
  0xfa   :  { %v510_v21 = vpop.f32.mrf.mxu0 }
  0xfb   :  { %v546_v22 = vmax.f32 %v542_v17, 0.0  ;;  %v540_v23 = vadd.f32 %v605_v11, %v529_v18  ;;  %v532_v24 = vmul.f32 %v604_v6, %v519_v19  ;;  %v511_v25 = vadd.f32 %v510_v21, %v462_v20 }
  0xfd   :  { %550 = vst [vmem:[%s915_s4 + $0x10] sm:$0xff] %v546_v22  ;;  %v544_v26 = vmax.f32 %v540_v23, 0.0  ;;  %v543_v27 = vadd.f32 %v605_v11, %v532_v24  ;;  %v530_v28 = vmul.f32 %v604_v6, %v511_v25 }
  0xff   :  { %548 = vst [vmem:[%s915_s4] sm:$0xff] %v544_v26  ;;  %v547_v29 = vmax.f32 %v543_v27, 0.0  ;;  %v541_v30 = vadd.f32 %v605_v11, %v530_v28 }
 0x101   :  { %551 = vst [vmem:[%s915_s4 + $0x18] sm:$0xff] %v547_v29  ;;  %v545_v31 = vmax.f32 %v541_v30, 0.0 }
 0x103   :  { %549 = vst [vmem:[%s915_s4 + $0x8] sm:$0xff] %v545_v31 }

// kernel: sound_enc_forward.23
= control target key start
LH: loop header
LB: loop body
LE: loop exit
PB: predicated region body
PF: predicated region fallthrough
CT: control target
= control target key end

     0   :  { %vm64_vm0 = vcmask 523264   ;;  %s245_s1 = inlined_call_operand.vmem [shape: bf16[64,128], index: 1, kind: input, shape index: {}]   ;;  %s246_s0 = inlined_call_operand.vmem [shape: bf16[32,64], index: 0, kind: input, shape index: {}]   ;;  %s247_s2 = inlined_call_operand.vmem [shape: f32[1,128], index: 2, kind: input, shape index: {}]   ;;  %s248_s3 = inlined_call_operand.vmem [shape: f32[1,128], index: 3, kind: input, shape index: {}]   ;;  %s249_s4 = inlined_call_operand.vmem [shape: f32[32,128], index: 4, kind: output, shape index: {}]  }
   0x1   :  { %v178_v0 = vld [vmem:[%s245_s1 + $0x18] sm:$0xff]   ;;  %v179_v1 = vld [vmem:[%s245_s1 + $0x10] sm:$0xff]   ;;  %v180_v2 = vld [vmem:[%s245_s1 + $0x8] sm:$0xff]  }
   0x2   :  { %166 = vmatprep.subr.bf16.mxu0 %v178_v0  ;;  %v182_v3 = vld [vmem:[%s246_s0] sm:$0xff]   ;;  %v183_v5 = vld [vmem:[%s246_s0 + $0x8] sm:$0xff]  }
   0x3   :  { %167 = vmatpush3.bf16.msra.mxu0 %v178_v0  ;;  %174 = vmatprep.mubr.msk.bf16.mxu0 %vm64_vm0, %v182_v3  ;;  %v181_v4 = vld [vmem:[%s245_s1] sm:$0xff]  }
   0x4   :  { %168 = vmatprep.subr.bf16.mxu0 %v179_v1  ;;  %v158_v6 = vld [vmem:[%s247_s2] ss:$0 sm:$0xff] }
   0x5   :  { %v159_v8 = vld [vmem:[%s248_s3] ss:$0 sm:$0xff] }
   0x7   :  { %169 = vmatpush3.bf16.msra.mxu0 %v179_v1 }
   0x8   :  { %170 = vmatprep.subr.bf16.mxu0 %v180_v2 }
   0xb   :  { %171 = vmatpush3.bf16.msra.mxu0 %v180_v2 }
   0xc   :  { %172 = vmatprep.subr.bf16.mxu0 %v181_v4 }
   0xf   :  { %173 = vmatpush3.bf16.msra.mxu0 %v181_v4 }
  0x12   :  { %175 = vmatmul.mubr.msk.bf16.vlgmr.msra.gmra.mxu0 %vm64_vm0, %v183_v5 }
  0xd2   :  { %v176_v7 = vpop.f32.mrf.mxu0 }
  0xd3   :  { %v129_v9 = vmul.f32 %v176_v7, %v158_v6 }
  0xd4   :  { %v105_v10 = vpop.f32.mrf.mxu0 }
  0xd5   :  { %v140_v11 = vadd.f32 %v159_v8, %v129_v9  ;;  %v127_v12 = vmul.f32 %v158_v6, %v105_v10 }
  0xd6   :  { %v177_v13 = vpop.f32.mrf.mxu0 }
  0xd7   :  { %144 = vst [vmem:[%s249_s4 + $0x10] sm:$0xff] %v140_v11  ;;  %v138_v14 = vadd.f32 %v159_v8, %v127_v12  ;;  %v130_v15 = vmul.f32 %v177_v13, %v158_v6 }
  0xd8   :  { %v108_v16 = vpop.f32.mrf.mxu0 }
  0xd9   :  { %142 = vst [vmem:[%s249_s4] sm:$0xff] %v138_v14  ;;  %v141_v17 = vadd.f32 %v159_v8, %v130_v15  ;;  %v128_v18 = vmul.f32 %v158_v6, %v108_v16 }
  0xdb   :  { %145 = vst [vmem:[%s249_s4 + $0x18] sm:$0xff] %v141_v17  ;;  %v139_v19 = vadd.f32 %v159_v8, %v128_v18 }
  0xdd   :  { %143 = vst [vmem:[%s249_s4 + $0x8] sm:$0xff] %v139_v19 }

// kernel: sound_enc_forward.25
= control target key start
LH: loop header
LB: loop body
LE: loop exit
PB: predicated region body
PF: predicated region fallthrough
CT: control target
= control target key end

     0   :  { %s1658_s1 = inlined_call_operand.vmem [shape: bf16[1152,128], index: 1, kind: input, shape index: {}]   ;;  %s1659_s0 = inlined_call_operand.vmem [shape: bf16[32,1152], index: 0, kind: input, shape index: {}]   ;;  %s1660_s2 = inlined_call_operand.vmem [shape: f32[1,128], index: 2, kind: input, shape index: {}]   ;;  %s1661_s3 = inlined_call_operand.vmem [shape: f32[1,128], index: 3, kind: input, shape index: {}]   ;;  %s1662_s4 = inlined_call_operand.vmem [shape: f32[32,128], index: 4, kind: input, shape index: {}]   ;;  %s1663_s5 = inlined_call_operand.vmem [shape: f32[32,128], index: 5, kind: output, shape index: {}]  }
   0x1   :  { %v1230_v0 = vld [vmem:[%s1658_s1 + $0x78] sm:$0xff]   ;;  %v1234_v4 = vld [vmem:[%s1658_s1 + $0x70] sm:$0xff]   ;;  %v1238_v8 = vld [vmem:[%s1658_s1 + $0x68] sm:$0xff]  }
   0x2   :  { %v1231_v1 = vld [vmem:[%s1658_s1 + $0xf8] sm:$0xff]   ;;  %1088 = vmatprep.subr.bf16.mxu0 %v1230_v0  ;;  %v1235_v5 = vld [vmem:[%s1658_s1 + $0xf0] sm:$0xff]   ;;  %v1239_v9 = vld [vmem:[%s1658_s1 + $0xe8] sm:$0xff]  }
   0x3   :  { %v1232_v2 = vld [vmem:[%s1658_s1 + $0x38] sm:$0xff]   ;;  %1116 = vmatprep.subr.bf16.mxu1 %v1231_v1  ;;  %v1236_v6 = vld [vmem:[%s1658_s1 + $0x30] sm:$0xff]   ;;  %v1240_v10 = vld [vmem:[%s1658_s1 + $0x28] sm:$0xff]  }
   0x4   :  { %v1233_v3 = vld [vmem:[%s1658_s1 + $0xb8] sm:$0xff]   ;;  %1089 = vmatpush3.bf16.msra.mxu0 %v1232_v2  ;;  %v1237_v7 = vld [vmem:[%s1658_s1 + $0xb0] sm:$0xff]   ;;  %v1241_v11 = vld [vmem:[%s1658_s1 + $0xa8] sm:$0xff]  }
   0x5   :  { %1117 = vmatpush3.bf16.msra.mxu1 %v1233_v3  ;;  %1090 = vmatprep.subr.bf16.mxu0 %v1234_v4  ;;  %v1242_v12 = vld [vmem:[%s1658_s1 + $0x60] sm:$0xff]   ;;  %v1246_v16 = vld [vmem:[%s1658_s1 + $0x58] sm:$0xff]   ;;  %v1250_v20 = vld [vmem:[%s1658_s1 + $0x50] sm:$0xff]  }
   0x6   :  { %1118 = vmatprep.subr.bf16.mxu1 %v1235_v5  ;;  %v1243_v13 = vld [vmem:[%s1658_s1 + $0xe0] sm:$0xff]   ;;  %v1247_v17 = vld [vmem:[%s1658_s1 + $0xd8] sm:$0xff]   ;;  %v1251_v21 = vld [vmem:[%s1658_s1 + $0xd0] sm:$0xff]  }
   0x7   :  { %v1244_v14 = vld [vmem:[%s1658_s1 + $0x20] sm:$0xff]   ;;  %v1248_v18 = vld [vmem:[%s1658_s1 + $0x18] sm:$0xff]   ;;  %v1252_v22 = vld [vmem:[%s1658_s1 + $0x10] sm:$0xff]  }
   0x8   :  { %1091 = vmatpush3.bf16.msra.mxu0 %v1236_v6  ;;  %v1245_v15 = vld [vmem:[%s1658_s1 + $0xa0] sm:$0xff]   ;;  %v1249_v19 = vld [vmem:[%s1658_s1 + $0x98] sm:$0xff]   ;;  %v1253_v23 = vld [vmem:[%s1658_s1 + $0x90] sm:$0xff]  }
   0x9   :  { %1119 = vmatpush3.bf16.msra.mxu1 %v1237_v7  ;;  %1092 = vmatprep.subr.bf16.mxu0 %v1238_v8  ;;  %v1254_v24 = vld [vmem:[%s1658_s1 + $0x48] sm:$0xff]   ;;  %v1258_v28 = vld [vmem:[%s1658_s1 + $0x40] sm:$0xff]   ;;  %v1268_v36 = vld [vmem:[%s1658_s1 + $0x178] sm:$0xff]  }
   0xa   :  { %1120 = vmatprep.subr.bf16.mxu1 %v1239_v9  ;;  %v1255_v25 = vld [vmem:[%s1658_s1 + $0xc8] sm:$0xff]   ;;  %v1259_v29 = vld [vmem:[%s1658_s1 + $0xc0] sm:$0xff]   ;;  %v1269_v37 = vld [vmem:[%s1658_s1 + $0x138] sm:$0xff]  }
   0xb   :  { %v1256_v26 = vld [vmem:[%s1658_s1 + $0x8] sm:$0xff]   ;;  %v1260_v30 = vld [vmem:[%s1658_s1] sm:$0xff]   ;;  %v1270_v38 = vld [vmem:[%s1658_s1 + $0x1f8] sm:$0xff]  }
   0xc   :  { %1093 = vmatpush3.bf16.msra.mxu0 %v1240_v10  ;;  %v1257_v27 = vld [vmem:[%s1658_s1 + $0x88] sm:$0xff]   ;;  %v1261_v31 = vld [vmem:[%s1658_s1 + $0x80] sm:$0xff]   ;;  %v1271_v39 = vld [vmem:[%s1658_s1 + $0x1b8] sm:$0xff]  }
   0xd   :  { %1121 = vmatpush3.bf16.msra.mxu1 %v1241_v11  ;;  %1094 = vmatprep.subr.bf16.mxu0 %v1242_v12  ;;  %v1262_v32 = vld [vmem:[%s1659_s0] ss:$36 sps:$4 sm:$0xff]   ;;  %v1265_v34 = vld [vmem:[%s1659_s0 + $0x8] ss:$36 sps:$4 sm:$0xff]   ;;  %v1272_v40 = vld [vmem:[%s1658_s1 + $0x170] sm:$0xff]  }
   0xe   :  { %1122 = vmatprep.subr.bf16.mxu1 %v1243_v13  ;;  %v1264_v33 = vld [vmem:[%s1659_s0 + $0x4] ss:$36 sps:$4 sm:$0xff]   ;;  %v1267_v35 = vld [vmem:[%s1659_s0 + $0xc] ss:$36 sps:$4 sm:$0xff]   ;;  %v1284_v52 = vld [vmem:[%s1658_s1 + $0x158] sm:$0xff]  }
   0xf   :  { %741 = vmatprep.mubr.bf16.mxu0 %v1264_v33  ;;  %790 = vmatprep.mubr.bf16.mxu1 %v1267_v35  ;;  %v1273_v41 = vld [vmem:[%s1658_s1 + $0x130] sm:$0xff]   ;;  %v1276_v44 = vld [vmem:[%s1658_s1 + $0x168] sm:$0xff]   ;;  %v1280_v48 = vld [vmem:[%s1658_s1 + $0x160] sm:$0xff]  }
  0x10   :  { %1095 = vmatpush3.bf16.msra.mxu0 %v1244_v14  ;;  %v1274_v42 = vld [vmem:[%s1658_s1 + $0x1f0] sm:$0xff]   ;;  %v1277_v45 = vld [vmem:[%s1658_s1 + $0x128] sm:$0xff]   ;;  %v1281_v49 = vld [vmem:[%s1658_s1 + $0x120] sm:$0xff]  }
  0x11   :  { %1123 = vmatpush3.bf16.msra.mxu1 %v1245_v15  ;;  %1096 = vmatprep.subr.bf16.mxu0 %v1246_v16  ;;  %v1275_v43 = vld [vmem:[%s1658_s1 + $0x1b0] sm:$0xff]   ;;  %v1278_v46 = vld [vmem:[%s1658_s1 + $0x1e8] sm:$0xff]   ;;  %v1282_v50 = vld [vmem:[%s1658_s1 + $0x1e0] sm:$0xff]  }
  0x12   :  { %1124 = vmatprep.subr.bf16.mxu1 %v1247_v17  ;;  %v1279_v47 = vld [vmem:[%s1658_s1 + $0x1a8] sm:$0xff]   ;;  %v1283_v51 = vld [vmem:[%s1658_s1 + $0x1a0] sm:$0xff]   ;;  %v1285_v53 = vld [vmem:[%s1658_s1 + $0x118] sm:$0xff]  }
  0x13   :  { %v1286_v54 = vld [vmem:[%s1659_s0 + $0x4c] ss:$36 sps:$4 sm:$0xff]   ;;  %v1288_v55 = vld [vmem:[%s1659_s0 + $0x54] ss:$36 sps:$4 sm:$0xff]   ;;  %v1302_v4 = vld [vmem:[%s1658_s1 + $0x140] sm:$0xff]  }
  0x14   :  { %1097 = vmatpush3.bf16.msra.mxu0 %v1248_v18  ;;  %v1290_v56 = vld [vmem:[%s1658_s1 + $0x1d8] sm:$0xff]   ;;  %v1291_v57 = vld [vmem:[%s1659_s0 + $0x48] ss:$36 sps:$4 sm:$0xff]   ;;  %v1292_v58 = vld [vmem:[%s1659_s0 + $0x50] ss:$36 sps:$4 sm:$0xff]  }
  0x15   :  { %1125 = vmatpush3.bf16.msra.mxu1 %v1249_v19  ;;  %1098 = vmatprep.subr.bf16.mxu0 %v1250_v20  ;;  %v1293_v59 = vld [vmem:[%s1658_s1 + $0x198] sm:$0xff]   ;;  %v1294_v60 = vld [vmem:[%s1658_s1 + $0x150] sm:$0xff]   ;;  %v1298_v0 = vld [vmem:[%s1658_s1 + $0x148] sm:$0xff]  }
  0x16   :  { %1126 = vmatprep.subr.bf16.mxu1 %v1251_v21  ;;  %v1295_v61 = vld [vmem:[%s1658_s1 + $0x110] sm:$0xff]   ;;  %v1299_v1 = vld [vmem:[%s1658_s1 + $0x108] sm:$0xff]   ;;  %v1303_v5 = vld [vmem:[%s1658_s1 + $0x100] sm:$0xff]  }
  0x17   :  { %v1296_v62 = vld [vmem:[%s1658_s1 + $0x1d0] sm:$0xff]   ;;  %v1300_v2 = vld [vmem:[%s1658_s1 + $0x1c8] sm:$0xff]   ;;  %v1304_v6 = vld [vmem:[%s1658_s1 + $0x1c0] sm:$0xff]  }
  0x18   :  { %1099 = vmatpush3.bf16.msra.mxu0 %v1252_v22  ;;  %v1297_v63 = vld [vmem:[%s1658_s1 + $0x190] sm:$0xff]   ;;  %v1301_v3 = vld [vmem:[%s1658_s1 + $0x188] sm:$0xff]   ;;  %v1308_v9 = vld [vmem:[%s1658_s1 + $0x180] sm:$0xff]  }
  0x19   :  { %1127 = vmatpush3.bf16.msra.mxu1 %v1253_v23  ;;  %1100 = vmatprep.subr.bf16.mxu0 %v1254_v24  ;;  %v1305_v7 = vld [vmem:[%s1659_s0 + $0x10] ss:$36 sps:$4 sm:$0xff]   ;;  %v1309_v10 = vld [vmem:[%s1658_s1 + $0x238] sm:$0xff]   ;;  %v1317_v16 = vld [vmem:[%s1658_s1 + $0x228] sm:$0xff]  }
  0x1a   :  { %1128 = vmatprep.subr.bf16.mxu1 %v1255_v25  ;;  %v1307_v8 = vld [vmem:[%s1659_s0 + $0x14] ss:$36 sps:$4 sm:$0xff]   ;;  %v1312_v12 = vld [vmem:[%s1659_s0 + $0x1c] ss:$36 sps:$4 sm:$0xff]   ;;  %v1318_v17 = vld [vmem:[%s1659_s0 + $0x64] ss:$36 sps:$4 sm:$0xff]  }
  0x1b   :  { %v1310_v11 = vld [vmem:[%s1659_s0 + $0x18] ss:$36 sps:$4 sm:$0xff]   ;;  %v1313_v13 = vld [vmem:[%s1658_s1 + $0x230] sm:$0xff]   ;;  %v1320_v18 = vld [vmem:[%s1659_s0 + $0x60] ss:$36 sps:$4 sm:$0xff]  }
  0x1c   :  { %1101 = vmatpush3.bf16.msra.mxu0 %v1256_v26  ;;  %v1314_v14 = vld [vmem:[%s1659_s0 + $0x5c] ss:$36 sps:$4 sm:$0xff]   ;;  %v1323_v22 = vld [vmem:[%s1658_s1 + $0x210] sm:$0xff]   ;;  %v1324_v23 = vld [vmem:[%s1658_s1 + $0x208] sm:$0xff]  }
  0x1d   :  { %1129 = vmatpush3.bf16.msra.mxu1 %v1257_v27  ;;  %1102 = vmatprep.subr.bf16.mxu0 %v1258_v28  ;;  %v1316_v15 = vld [vmem:[%s1659_s0 + $0x58] ss:$36 sps:$4 sm:$0xff]   ;;  %v1321_v19 = vld [vmem:[%s1658_s1 + $0x220] sm:$0xff]   ;;  %v1327_v25 = vld [vmem:[%s1659_s0 + $0x68] ss:$36 sps:$4 sm:$0xff]  }
  0x1e   :  { %1130 = vmatprep.subr.bf16.mxu1 %v1259_v29  ;;  %v1322_v20 = vld [vmem:[%s1658_s1 + $0x218] sm:$0xff]   ;;  %v1326_v21 = vld [vmem:[%s1659_s0 + $0x20] ss:$36 sps:$4 sm:$0xff]  }
  0x1f   :  { %v1325_v24 = vld [vmem:[%s1658_s1 + $0x200] sm:$0xff]  }
  0x20   :  { %1103 = vmatpush3.bf16.msra.mxu0 %v1260_v30 }
  0x21   :  { %1131 = vmatpush3.bf16.msra.mxu1 %v1261_v31  ;;  %1144 = vmatprep.subr.bf16.mxu0 %v1268_v36 }
  0x22   :  { %1172 = vmatprep.subr.bf16.mxu1 %v1270_v38 }
  0x23   :  { %742 = vmatmul.mubr.bf16.vlgmr.msra.gmra.mxu0 %v1262_v32 }
  0x24   :  { %791 = vmatmul.mubr.bf16.vlgmr.msra.gmra.mxu1 %v1265_v34  ;;  %1145 = vmatpush3.bf16.msra.mxu0 %v1269_v37 }
  0x25   :  { %1173 = vmatpush3.bf16.msra.mxu1 %v1271_v39  ;;  %1146 = vmatprep.subr.bf16.mxu0 %v1272_v40 }
  0x26   :  { %1174 = vmatprep.subr.bf16.mxu1 %v1274_v42  ;;  %749 = vmatprep.mubr.bf16.mxu0 %v1286_v54 }
  0x27   :  { %798 = vmatprep.mubr.bf16.mxu1 %v1288_v55 }
  0x28   :  { %1147 = vmatpush3.bf16.msra.mxu0 %v1273_v41 }
  0x29   :  { %1175 = vmatpush3.bf16.msra.mxu1 %v1275_v43  ;;  %1148 = vmatprep.subr.bf16.mxu0 %v1276_v44 }
  0x2a   :  { %1176 = vmatprep.subr.bf16.mxu1 %v1278_v46 }
  0x2b   :  { %750 = vmatmul.mubr.bf16.gmra.mxu0 %v1291_v57 }
  0x2c   :  { %1149 = vmatpush3.bf16.msra.mxu0 %v1277_v45  ;;  %799 = vmatmul.mubr.bf16.gmra.mxu1 %v1292_v58 }
  0x2d   :  { %1177 = vmatpush3.bf16.msra.mxu1 %v1279_v47  ;;  %1150 = vmatprep.subr.bf16.mxu0 %v1280_v48 }
  0x2e   :  { %1178 = vmatprep.subr.bf16.mxu1 %v1282_v50  ;;  %839 = vmatprep.mubr.bf16.mxu0 %v1307_v8 }
  0x2f   :  { %888 = vmatprep.mubr.bf16.mxu1 %v1312_v12 }
  0x30   :  { %1151 = vmatpush3.bf16.msra.mxu0 %v1281_v49 }
  0x31   :  { %1179 = vmatpush3.bf16.msra.mxu1 %v1283_v51  ;;  %1152 = vmatprep.subr.bf16.mxu0 %v1284_v52 }
  0x32   :  { %1180 = vmatprep.subr.bf16.mxu1 %v1290_v56 }
  0x34   :  { %1153 = vmatpush3.bf16.msra.mxu0 %v1285_v53 }
  0x35   :  { %1181 = vmatpush3.bf16.msra.mxu1 %v1293_v59  ;;  %1154 = vmatprep.subr.bf16.mxu0 %v1294_v60 }
  0x36   :  { %1182 = vmatprep.subr.bf16.mxu1 %v1296_v62 }
  0x38   :  { %1155 = vmatpush3.bf16.msra.mxu0 %v1295_v61 }
  0x39   :  { %1183 = vmatpush3.bf16.msra.mxu1 %v1297_v63  ;;  %1156 = vmatprep.subr.bf16.mxu0 %v1298_v0 }
  0x3a   :  { %1184 = vmatprep.subr.bf16.mxu1 %v1300_v2 }
  0x3c   :  { %1157 = vmatpush3.bf16.msra.mxu0 %v1299_v1 }
  0x3d   :  { %1185 = vmatpush3.bf16.msra.mxu1 %v1301_v3  ;;  %1158 = vmatprep.subr.bf16.mxu0 %v1302_v4 }
  0x3e   :  { %1186 = vmatprep.subr.bf16.mxu1 %v1304_v6 }
  0x40   :  { %1159 = vmatpush3.bf16.msra.mxu0 %v1303_v5 }
  0x41   :  { %1187 = vmatpush3.bf16.msra.mxu1 %v1308_v9  ;;  %1210 = vmatprep.subr.bf16.mxu0 %v1309_v10 }
  0x43   :  { %840 = vmatmul.mubr.bf16.vlgmr.msra.gmra.mxu0 %v1305_v7 }
  0x44   :  { %1211 = vmatpush3.bf16.msra.mxu0 %v1309_v10  ;;  %889 = vmatmul.mubr.bf16.vlgmr.msra.gmra.mxu1 %v1310_v11 }
  0x45   :  { %1212 = vmatprep.subr.bf16.mxu0 %v1313_v13  ;;  %847 = vmatprep.mubr.bf16.mxu0 %v1314_v14 }
  0x46   :  { %896 = vmatprep.mubr.bf16.mxu1 %v1318_v17 }
  0x48   :  { %1213 = vmatpush3.bf16.msra.mxu0 %v1313_v13 }
  0x49   :  { %1214 = vmatprep.subr.bf16.mxu0 %v1317_v16 }
  0x4b   :  { %848 = vmatmul.mubr.bf16.gmra.mxu0 %v1316_v15 }
  0x4c   :  { %1215 = vmatpush3.bf16.msra.mxu0 %v1317_v16  ;;  %897 = vmatmul.mubr.bf16.gmra.mxu1 %v1320_v18  ;;  %v1086_v18 = vld [vmem:[%s1660_s2] ss:$0 sm:$0xff] }
  0x4d   :  { %1216 = vmatprep.subr.bf16.mxu0 %v1321_v19  ;;  %1226 = vmatprep.mubr.bf16.mxu0 %v1326_v21 }
  0x50   :  { %1217 = vmatpush3.bf16.msra.mxu0 %v1321_v19 }
  0x51   :  { %1218 = vmatprep.subr.bf16.mxu0 %v1322_v20 }
  0x54   :  { %1219 = vmatpush3.bf16.msra.mxu0 %v1322_v20 }
  0x55   :  { %1220 = vmatprep.subr.bf16.mxu0 %v1323_v22 }
  0x58   :  { %1221 = vmatpush3.bf16.msra.mxu0 %v1323_v22 }
  0x59   :  { %1222 = vmatprep.subr.bf16.mxu0 %v1324_v23 }
  0x5c   :  { %1223 = vmatpush3.bf16.msra.mxu0 %v1324_v23  ;;  %v1087_v23 = vld [vmem:[%s1661_s3] ss:$0 sm:$0xff] }
  0x5d   :  { %1224 = vmatprep.subr.bf16.mxu0 %v1325_v24 }
  0x60   :  { %1225 = vmatpush3.bf16.msra.mxu0 %v1325_v24 }
  0x63   :  { %1227 = vmatmul.mubr.bf16.vlgmr.msra.gmra.mxu0 %v1327_v25 }
  0xe3   :  { %v1104_v26 = vpop.f32.mrf.mxu0 }
  0xe4   :  { %v1132_v27 = vpop.f32.mrf.mxu1 }
  0xe5   :  { %v1105_v28 = vpop.f32.mrf.mxu0 }
  0xe6   :  { %v1133_v29 = vpop.f32.mrf.mxu1  ;;  %v1106_v57 = vadd.f32 %v1105_v28, %v1104_v26  ;;  %v978_v28 = vld [vmem:[%s1662_s4 + $0x10] sm:$0xff] }
  0xe7   :  { %v1107_v30 = vpop.f32.mrf.mxu0  ;;  %v1134_v58 = vadd.f32 %v1133_v29, %v1132_v27 }
  0xe8   :  { %v1135_v31 = vpop.f32.mrf.mxu1 }
  0xe9   :  { %v1108_v32 = vpop.f32.mrf.mxu0  ;;  %v793_v2 = vadd.f32 %v1134_v58, %v1106_v57 }
  0xea   :  { %v1136_v34 = vpop.f32.mrf.mxu1  ;;  %v1109_v3 = vadd.f32 %v1108_v32, %v1107_v30 }
  0xeb   :  { %v1110_v33 = vpop.f32.mrf.mxu0  ;;  %v1137_v4 = vadd.f32 %v1136_v34, %v1135_v31  ;;  %v976_v34 = vld [vmem:[%s1662_s4] sm:$0xff] }
  0xec   :  { %v1138_v35 = vpop.f32.mrf.mxu1 }
  0xed   :  { %v1111_v36 = vpop.f32.mrf.mxu0  ;;  %v796_v13 = vadd.f32 %v1137_v4, %v1109_v3 }
  0xee   :  { %v1139_v37 = vpop.f32.mrf.mxu1  ;;  %v1112_v55 = vadd.f32 %v1111_v36, %v1110_v33 }
  0xef   :  { %v1113_v38 = vpop.f32.mrf.mxu0  ;;  %v1140_v56 = vadd.f32 %v1139_v37, %v1138_v35 }
  0xf0   :  { %v1141_v39 = vpop.f32.mrf.mxu1 }
  0xf1   :  { %v1114_v40 = vpop.f32.mrf.mxu0  ;;  %v801_v62 = vadd.f32 %v1140_v56, %v1112_v55 }
  0xf2   :  { %v1142_v42 = vpop.f32.mrf.mxu1  ;;  %v1115_v63 = vadd.f32 %v1114_v40, %v1113_v38  ;;  %v979_v40 = vld [vmem:[%s1662_s4 + $0x18] sm:$0xff] }
  0xf3   :  { %v1143_v0 = vadd.f32 %v1142_v42, %v1141_v39 }
  0xf5   :  { %v804_v9 = vadd.f32 %v1143_v0, %v1115_v63 }
 0x103   :  { %v1160_v41 = vpop.f32.mrf.mxu0 }
 0x104   :  { %v1188_v44 = vpop.f32.mrf.mxu1 }
 0x105   :  { %v1161_v43 = vpop.f32.mrf.mxu0 }
 0x106   :  { %v1189_v46 = vpop.f32.mrf.mxu1  ;;  %v1162_v1 = vadd.f32 %v1161_v43, %v1160_v41 }
 0x107   :  { %v1163_v45 = vpop.f32.mrf.mxu0  ;;  %v1190_v11 = vadd.f32 %v1189_v46, %v1188_v44 }
 0x108   :  { %v1191_v48 = vpop.f32.mrf.mxu1  ;;  %v842_v10 = vadd.f32 %v1162_v1, %v793_v2 }
 0x109   :  { %v1164_v47 = vpop.f32.mrf.mxu0 }
 0x10a   :  { %v1192_v50 = vpop.f32.mrf.mxu1  ;;  %v1165_v12 = vadd.f32 %v1164_v47, %v1163_v45  ;;  %v891_v22 = vadd.f32 %v1190_v11, %v842_v10  ;;  %v977_v45 = vld [vmem:[%s1662_s4 + $0x8] sm:$0xff] }
 0x10b   :  { %v1166_v49 = vpop.f32.mrf.mxu0  ;;  %v1193_v20 = vadd.f32 %v1192_v50, %v1191_v48 }
 0x10c   :  { %v1194_v52 = vpop.f32.mrf.mxu1  ;;  %v845_v19 = vadd.f32 %v1165_v12, %v796_v13 }
 0x10d   :  { %v1167_v51 = vpop.f32.mrf.mxu0 }
 0x10e   :  { %v1195_v54 = vpop.f32.mrf.mxu1  ;;  %v1168_v59 = vadd.f32 %v1167_v51, %v1166_v49  ;;  %v894_v33 = vadd.f32 %v1193_v20, %v845_v19 }
 0x10f   :  { %v1169_v53 = vpop.f32.mrf.mxu0  ;;  %v1196_v6 = vadd.f32 %v1195_v54, %v1194_v52 }
 0x110   :  { %v1197_v61 = vpop.f32.mrf.mxu1  ;;  %v850_v5 = vadd.f32 %v1168_v59, %v801_v62 }
 0x111   :  { %v1170_v60 = vpop.f32.mrf.mxu0 }
 0x112   :  { %v1171_v7 = vadd.f32 %v1170_v60, %v1169_v53  ;;  %v1198_v8 = vpop.f32.mrf.mxu1  ;;  %v899_v16 = vadd.f32 %v1196_v6, %v850_v5 }
 0x113   :  { %v1199_v15 = vadd.f32 %v1198_v8, %v1197_v61 }
 0x114   :  { %v853_v14 = vadd.f32 %v1171_v7, %v804_v9 }
 0x116   :  { %v902_v27 = vadd.f32 %v1199_v15, %v853_v14 }
 0x123   :  { %v1228_v17 = vpop.f32.mrf.mxu0 }
 0x124   :  { %v948_v21 = vadd.f32 %v1228_v17, %v899_v16 }
 0x125   :  { %v939_v24 = vpop.f32.mrf.mxu0 }
 0x126   :  { %v963_v25 = vmul.f32 %v1086_v18, %v948_v21  ;;  %v940_v26 = vadd.f32 %v939_v24, %v891_v22 }
 0x127   :  { %v1229_v29 = vpop.f32.mrf.mxu0 }
 0x128   :  { %v974_v30 = vadd.f32 %v1087_v23, %v963_v25  ;;  %v961_v31 = vmul.f32 %v1086_v18, %v940_v26  ;;  %v951_v32 = vadd.f32 %v1229_v29, %v902_v27 }
 0x129   :  { %v942_v35 = vpop.f32.mrf.mxu0 }
 0x12a   :  { %v982_v36 = vadd.f32 %v978_v28, %v974_v30  ;;  %v972_v37 = vadd.f32 %v1087_v23, %v961_v31  ;;  %v964_v38 = vmul.f32 %v1086_v18, %v951_v32  ;;  %v943_v39 = vadd.f32 %v942_v35, %v894_v33 }
 0x12c   :  { %v986_v41 = vmax.f32 %v982_v36, 0.0  ;;  %v980_v42 = vadd.f32 %v976_v34, %v972_v37  ;;  %v975_v43 = vadd.f32 %v1087_v23, %v964_v38  ;;  %v962_v44 = vmul.f32 %v1086_v18, %v943_v39 }
 0x12e   :  { %990 = vst [vmem:[%s1663_s5 + $0x10] sm:$0xff] %v986_v41  ;;  %v984_v46 = vmax.f32 %v980_v42, 0.0  ;;  %v983_v47 = vadd.f32 %v979_v40, %v975_v43  ;;  %v973_v48 = vadd.f32 %v1087_v23, %v962_v44 }
 0x130   :  { %988 = vst [vmem:[%s1663_s5] sm:$0xff] %v984_v46  ;;  %v987_v49 = vmax.f32 %v983_v47, 0.0  ;;  %v981_v50 = vadd.f32 %v977_v45, %v973_v48 }
 0x132   :  { %991 = vst [vmem:[%s1663_s5 + $0x18] sm:$0xff] %v987_v49  ;;  %v985_v51 = vmax.f32 %v981_v50, 0.0 }
 0x134   :  { %989 = vst [vmem:[%s1663_s5 + $0x8] sm:$0xff] %v985_v51 }

// kernel: sound_enc_forward.26
= control target key start
LH: loop header
LB: loop body
LE: loop exit
PB: predicated region body
PF: predicated region fallthrough
CT: control target
= control target key end

     0   :  { %s1630_s1 = inlined_call_operand.vmem [shape: bf16[1152,128], index: 1, kind: input, shape index: {}]   ;;  %s1631_s0 = inlined_call_operand.vmem [shape: bf16[32,1152], index: 0, kind: input, shape index: {}]   ;;  %s1632_s2 = inlined_call_operand.vmem [shape: f32[1,128], index: 2, kind: input, shape index: {}]   ;;  %s1633_s3 = inlined_call_operand.vmem [shape: f32[1,128], index: 3, kind: input, shape index: {}]   ;;  %s1634_s4 = inlined_call_operand.vmem [shape: f32[32,128], index: 4, kind: output, shape index: {}]  }
   0x1   :  { %v1219_v0 = vld [vmem:[%s1630_s1 + $0x78] sm:$0xff]   ;;  %v1223_v4 = vld [vmem:[%s1630_s1 + $0x70] sm:$0xff]   ;;  %v1227_v8 = vld [vmem:[%s1630_s1 + $0x68] sm:$0xff]  }
   0x2   :  { %v1220_v1 = vld [vmem:[%s1630_s1 + $0xf8] sm:$0xff]   ;;  %1077 = vmatprep.subr.bf16.mxu0 %v1219_v0  ;;  %v1224_v5 = vld [vmem:[%s1630_s1 + $0xf0] sm:$0xff]   ;;  %v1228_v9 = vld [vmem:[%s1630_s1 + $0xe8] sm:$0xff]  }
   0x3   :  { %v1221_v2 = vld [vmem:[%s1630_s1 + $0x38] sm:$0xff]   ;;  %1105 = vmatprep.subr.bf16.mxu1 %v1220_v1  ;;  %v1225_v6 = vld [vmem:[%s1630_s1 + $0x30] sm:$0xff]   ;;  %v1229_v10 = vld [vmem:[%s1630_s1 + $0x28] sm:$0xff]  }
   0x4   :  { %v1222_v3 = vld [vmem:[%s1630_s1 + $0xb8] sm:$0xff]   ;;  %1078 = vmatpush3.bf16.msra.mxu0 %v1221_v2  ;;  %v1226_v7 = vld [vmem:[%s1630_s1 + $0xb0] sm:$0xff]   ;;  %v1230_v11 = vld [vmem:[%s1630_s1 + $0xa8] sm:$0xff]  }
   0x5   :  { %1106 = vmatpush3.bf16.msra.mxu1 %v1222_v3  ;;  %1079 = vmatprep.subr.bf16.mxu0 %v1223_v4  ;;  %v1231_v12 = vld [vmem:[%s1630_s1 + $0x60] sm:$0xff]   ;;  %v1235_v16 = vld [vmem:[%s1630_s1 + $0x58] sm:$0xff]   ;;  %v1239_v20 = vld [vmem:[%s1630_s1 + $0x50] sm:$0xff]  }
   0x6   :  { %1107 = vmatprep.subr.bf16.mxu1 %v1224_v5  ;;  %v1232_v13 = vld [vmem:[%s1630_s1 + $0xe0] sm:$0xff]   ;;  %v1236_v17 = vld [vmem:[%s1630_s1 + $0xd8] sm:$0xff]   ;;  %v1240_v21 = vld [vmem:[%s1630_s1 + $0xd0] sm:$0xff]  }
   0x7   :  { %v1233_v14 = vld [vmem:[%s1630_s1 + $0x20] sm:$0xff]   ;;  %v1237_v18 = vld [vmem:[%s1630_s1 + $0x18] sm:$0xff]   ;;  %v1241_v22 = vld [vmem:[%s1630_s1 + $0x10] sm:$0xff]  }
   0x8   :  { %1080 = vmatpush3.bf16.msra.mxu0 %v1225_v6  ;;  %v1234_v15 = vld [vmem:[%s1630_s1 + $0xa0] sm:$0xff]   ;;  %v1238_v19 = vld [vmem:[%s1630_s1 + $0x98] sm:$0xff]   ;;  %v1242_v23 = vld [vmem:[%s1630_s1 + $0x90] sm:$0xff]  }
   0x9   :  { %1108 = vmatpush3.bf16.msra.mxu1 %v1226_v7  ;;  %1081 = vmatprep.subr.bf16.mxu0 %v1227_v8  ;;  %v1243_v24 = vld [vmem:[%s1630_s1 + $0x48] sm:$0xff]   ;;  %v1247_v28 = vld [vmem:[%s1630_s1 + $0x40] sm:$0xff]   ;;  %v1257_v36 = vld [vmem:[%s1630_s1 + $0x178] sm:$0xff]  }
   0xa   :  { %1109 = vmatprep.subr.bf16.mxu1 %v1228_v9  ;;  %v1244_v25 = vld [vmem:[%s1630_s1 + $0xc8] sm:$0xff]   ;;  %v1248_v29 = vld [vmem:[%s1630_s1 + $0xc0] sm:$0xff]   ;;  %v1258_v37 = vld [vmem:[%s1630_s1 + $0x138] sm:$0xff]  }
   0xb   :  { %v1245_v26 = vld [vmem:[%s1630_s1 + $0x8] sm:$0xff]   ;;  %v1249_v30 = vld [vmem:[%s1630_s1] sm:$0xff]   ;;  %v1259_v38 = vld [vmem:[%s1630_s1 + $0x1f8] sm:$0xff]  }
   0xc   :  { %1082 = vmatpush3.bf16.msra.mxu0 %v1229_v10  ;;  %v1246_v27 = vld [vmem:[%s1630_s1 + $0x88] sm:$0xff]   ;;  %v1250_v31 = vld [vmem:[%s1630_s1 + $0x80] sm:$0xff]   ;;  %v1260_v39 = vld [vmem:[%s1630_s1 + $0x1b8] sm:$0xff]  }
   0xd   :  { %1110 = vmatpush3.bf16.msra.mxu1 %v1230_v11  ;;  %1083 = vmatprep.subr.bf16.mxu0 %v1231_v12  ;;  %v1251_v32 = vld [vmem:[%s1631_s0] ss:$36 sps:$4 sm:$0xff]   ;;  %v1254_v34 = vld [vmem:[%s1631_s0 + $0x8] ss:$36 sps:$4 sm:$0xff]   ;;  %v1261_v40 = vld [vmem:[%s1630_s1 + $0x170] sm:$0xff]  }
   0xe   :  { %1111 = vmatprep.subr.bf16.mxu1 %v1232_v13  ;;  %v1253_v33 = vld [vmem:[%s1631_s0 + $0x4] ss:$36 sps:$4 sm:$0xff]   ;;  %v1256_v35 = vld [vmem:[%s1631_s0 + $0xc] ss:$36 sps:$4 sm:$0xff]   ;;  %v1273_v52 = vld [vmem:[%s1630_s1 + $0x158] sm:$0xff]  }
   0xf   :  { %738 = vmatprep.mubr.bf16.mxu0 %v1253_v33  ;;  %787 = vmatprep.mubr.bf16.mxu1 %v1256_v35  ;;  %v1262_v41 = vld [vmem:[%s1630_s1 + $0x130] sm:$0xff]   ;;  %v1265_v44 = vld [vmem:[%s1630_s1 + $0x168] sm:$0xff]   ;;  %v1269_v48 = vld [vmem:[%s1630_s1 + $0x160] sm:$0xff]  }
  0x10   :  { %1084 = vmatpush3.bf16.msra.mxu0 %v1233_v14  ;;  %v1263_v42 = vld [vmem:[%s1630_s1 + $0x1f0] sm:$0xff]   ;;  %v1266_v45 = vld [vmem:[%s1630_s1 + $0x128] sm:$0xff]   ;;  %v1270_v49 = vld [vmem:[%s1630_s1 + $0x120] sm:$0xff]  }
  0x11   :  { %1112 = vmatpush3.bf16.msra.mxu1 %v1234_v15  ;;  %1085 = vmatprep.subr.bf16.mxu0 %v1235_v16  ;;  %v1264_v43 = vld [vmem:[%s1630_s1 + $0x1b0] sm:$0xff]   ;;  %v1267_v46 = vld [vmem:[%s1630_s1 + $0x1e8] sm:$0xff]   ;;  %v1271_v50 = vld [vmem:[%s1630_s1 + $0x1e0] sm:$0xff]  }
  0x12   :  { %1113 = vmatprep.subr.bf16.mxu1 %v1236_v17  ;;  %v1268_v47 = vld [vmem:[%s1630_s1 + $0x1a8] sm:$0xff]   ;;  %v1272_v51 = vld [vmem:[%s1630_s1 + $0x1a0] sm:$0xff]   ;;  %v1274_v53 = vld [vmem:[%s1630_s1 + $0x118] sm:$0xff]  }
  0x13   :  { %v1275_v54 = vld [vmem:[%s1631_s0 + $0x4c] ss:$36 sps:$4 sm:$0xff]   ;;  %v1277_v55 = vld [vmem:[%s1631_s0 + $0x54] ss:$36 sps:$4 sm:$0xff]   ;;  %v1291_v4 = vld [vmem:[%s1630_s1 + $0x140] sm:$0xff]  }
  0x14   :  { %1086 = vmatpush3.bf16.msra.mxu0 %v1237_v18  ;;  %v1279_v56 = vld [vmem:[%s1630_s1 + $0x1d8] sm:$0xff]   ;;  %v1280_v57 = vld [vmem:[%s1631_s0 + $0x48] ss:$36 sps:$4 sm:$0xff]   ;;  %v1281_v58 = vld [vmem:[%s1631_s0 + $0x50] ss:$36 sps:$4 sm:$0xff]  }
  0x15   :  { %1114 = vmatpush3.bf16.msra.mxu1 %v1238_v19  ;;  %1087 = vmatprep.subr.bf16.mxu0 %v1239_v20  ;;  %v1282_v59 = vld [vmem:[%s1630_s1 + $0x198] sm:$0xff]   ;;  %v1283_v60 = vld [vmem:[%s1630_s1 + $0x150] sm:$0xff]   ;;  %v1287_v0 = vld [vmem:[%s1630_s1 + $0x148] sm:$0xff]  }
  0x16   :  { %1115 = vmatprep.subr.bf16.mxu1 %v1240_v21  ;;  %v1284_v61 = vld [vmem:[%s1630_s1 + $0x110] sm:$0xff]   ;;  %v1288_v1 = vld [vmem:[%s1630_s1 + $0x108] sm:$0xff]   ;;  %v1292_v5 = vld [vmem:[%s1630_s1 + $0x100] sm:$0xff]  }
  0x17   :  { %v1285_v62 = vld [vmem:[%s1630_s1 + $0x1d0] sm:$0xff]   ;;  %v1289_v2 = vld [vmem:[%s1630_s1 + $0x1c8] sm:$0xff]   ;;  %v1293_v6 = vld [vmem:[%s1630_s1 + $0x1c0] sm:$0xff]  }
  0x18   :  { %1088 = vmatpush3.bf16.msra.mxu0 %v1241_v22  ;;  %v1286_v63 = vld [vmem:[%s1630_s1 + $0x190] sm:$0xff]   ;;  %v1290_v3 = vld [vmem:[%s1630_s1 + $0x188] sm:$0xff]   ;;  %v1297_v9 = vld [vmem:[%s1630_s1 + $0x180] sm:$0xff]  }
  0x19   :  { %1116 = vmatpush3.bf16.msra.mxu1 %v1242_v23  ;;  %1089 = vmatprep.subr.bf16.mxu0 %v1243_v24  ;;  %v1294_v7 = vld [vmem:[%s1631_s0 + $0x10] ss:$36 sps:$4 sm:$0xff]   ;;  %v1298_v10 = vld [vmem:[%s1630_s1 + $0x238] sm:$0xff]   ;;  %v1306_v16 = vld [vmem:[%s1630_s1 + $0x228] sm:$0xff]  }
  0x1a   :  { %1117 = vmatprep.subr.bf16.mxu1 %v1244_v25  ;;  %v1296_v8 = vld [vmem:[%s1631_s0 + $0x14] ss:$36 sps:$4 sm:$0xff]   ;;  %v1301_v12 = vld [vmem:[%s1631_s0 + $0x1c] ss:$36 sps:$4 sm:$0xff]   ;;  %v1307_v17 = vld [vmem:[%s1631_s0 + $0x64] ss:$36 sps:$4 sm:$0xff]  }
  0x1b   :  { %v1299_v11 = vld [vmem:[%s1631_s0 + $0x18] ss:$36 sps:$4 sm:$0xff]   ;;  %v1302_v13 = vld [vmem:[%s1630_s1 + $0x230] sm:$0xff]   ;;  %v1309_v18 = vld [vmem:[%s1631_s0 + $0x60] ss:$36 sps:$4 sm:$0xff]  }
  0x1c   :  { %1090 = vmatpush3.bf16.msra.mxu0 %v1245_v26  ;;  %v1303_v14 = vld [vmem:[%s1631_s0 + $0x5c] ss:$36 sps:$4 sm:$0xff]   ;;  %v1312_v22 = vld [vmem:[%s1630_s1 + $0x210] sm:$0xff]   ;;  %v1313_v23 = vld [vmem:[%s1630_s1 + $0x208] sm:$0xff]  }
  0x1d   :  { %1118 = vmatpush3.bf16.msra.mxu1 %v1246_v27  ;;  %1091 = vmatprep.subr.bf16.mxu0 %v1247_v28  ;;  %v1305_v15 = vld [vmem:[%s1631_s0 + $0x58] ss:$36 sps:$4 sm:$0xff]   ;;  %v1310_v19 = vld [vmem:[%s1630_s1 + $0x220] sm:$0xff]   ;;  %v1316_v25 = vld [vmem:[%s1631_s0 + $0x68] ss:$36 sps:$4 sm:$0xff]  }
  0x1e   :  { %1119 = vmatprep.subr.bf16.mxu1 %v1248_v29  ;;  %v1311_v20 = vld [vmem:[%s1630_s1 + $0x218] sm:$0xff]   ;;  %v1315_v21 = vld [vmem:[%s1631_s0 + $0x20] ss:$36 sps:$4 sm:$0xff]  }
  0x1f   :  { %v1314_v24 = vld [vmem:[%s1630_s1 + $0x200] sm:$0xff]  }
  0x20   :  { %1092 = vmatpush3.bf16.msra.mxu0 %v1249_v30 }
  0x21   :  { %1120 = vmatpush3.bf16.msra.mxu1 %v1250_v31  ;;  %1133 = vmatprep.subr.bf16.mxu0 %v1257_v36 }
  0x22   :  { %1161 = vmatprep.subr.bf16.mxu1 %v1259_v38 }
  0x23   :  { %739 = vmatmul.mubr.bf16.vlgmr.msra.gmra.mxu0 %v1251_v32 }
  0x24   :  { %788 = vmatmul.mubr.bf16.vlgmr.msra.gmra.mxu1 %v1254_v34  ;;  %1134 = vmatpush3.bf16.msra.mxu0 %v1258_v37 }
  0x25   :  { %1162 = vmatpush3.bf16.msra.mxu1 %v1260_v39  ;;  %1135 = vmatprep.subr.bf16.mxu0 %v1261_v40 }
  0x26   :  { %1163 = vmatprep.subr.bf16.mxu1 %v1263_v42  ;;  %746 = vmatprep.mubr.bf16.mxu0 %v1275_v54 }
  0x27   :  { %795 = vmatprep.mubr.bf16.mxu1 %v1277_v55 }
  0x28   :  { %1136 = vmatpush3.bf16.msra.mxu0 %v1262_v41 }
  0x29   :  { %1164 = vmatpush3.bf16.msra.mxu1 %v1264_v43  ;;  %1137 = vmatprep.subr.bf16.mxu0 %v1265_v44 }
  0x2a   :  { %1165 = vmatprep.subr.bf16.mxu1 %v1267_v46 }
  0x2b   :  { %747 = vmatmul.mubr.bf16.gmra.mxu0 %v1280_v57 }
  0x2c   :  { %1138 = vmatpush3.bf16.msra.mxu0 %v1266_v45  ;;  %796 = vmatmul.mubr.bf16.gmra.mxu1 %v1281_v58 }
  0x2d   :  { %1166 = vmatpush3.bf16.msra.mxu1 %v1268_v47  ;;  %1139 = vmatprep.subr.bf16.mxu0 %v1269_v48 }
  0x2e   :  { %1167 = vmatprep.subr.bf16.mxu1 %v1271_v50  ;;  %836 = vmatprep.mubr.bf16.mxu0 %v1296_v8 }
  0x2f   :  { %885 = vmatprep.mubr.bf16.mxu1 %v1301_v12 }
  0x30   :  { %1140 = vmatpush3.bf16.msra.mxu0 %v1270_v49 }
  0x31   :  { %1168 = vmatpush3.bf16.msra.mxu1 %v1272_v51  ;;  %1141 = vmatprep.subr.bf16.mxu0 %v1273_v52 }
  0x32   :  { %1169 = vmatprep.subr.bf16.mxu1 %v1279_v56 }
  0x34   :  { %1142 = vmatpush3.bf16.msra.mxu0 %v1274_v53 }
  0x35   :  { %1170 = vmatpush3.bf16.msra.mxu1 %v1282_v59  ;;  %1143 = vmatprep.subr.bf16.mxu0 %v1283_v60 }
  0x36   :  { %1171 = vmatprep.subr.bf16.mxu1 %v1285_v62 }
  0x38   :  { %1144 = vmatpush3.bf16.msra.mxu0 %v1284_v61 }
  0x39   :  { %1172 = vmatpush3.bf16.msra.mxu1 %v1286_v63  ;;  %1145 = vmatprep.subr.bf16.mxu0 %v1287_v0 }
  0x3a   :  { %1173 = vmatprep.subr.bf16.mxu1 %v1289_v2 }
  0x3c   :  { %1146 = vmatpush3.bf16.msra.mxu0 %v1288_v1 }
  0x3d   :  { %1174 = vmatpush3.bf16.msra.mxu1 %v1290_v3  ;;  %1147 = vmatprep.subr.bf16.mxu0 %v1291_v4 }
  0x3e   :  { %1175 = vmatprep.subr.bf16.mxu1 %v1293_v6 }
  0x40   :  { %1148 = vmatpush3.bf16.msra.mxu0 %v1292_v5 }
  0x41   :  { %1176 = vmatpush3.bf16.msra.mxu1 %v1297_v9  ;;  %1199 = vmatprep.subr.bf16.mxu0 %v1298_v10 }
  0x43   :  { %837 = vmatmul.mubr.bf16.vlgmr.msra.gmra.mxu0 %v1294_v7 }
  0x44   :  { %1200 = vmatpush3.bf16.msra.mxu0 %v1298_v10  ;;  %886 = vmatmul.mubr.bf16.vlgmr.msra.gmra.mxu1 %v1299_v11 }
  0x45   :  { %1201 = vmatprep.subr.bf16.mxu0 %v1302_v13  ;;  %844 = vmatprep.mubr.bf16.mxu0 %v1303_v14 }
  0x46   :  { %893 = vmatprep.mubr.bf16.mxu1 %v1307_v17 }
  0x48   :  { %1202 = vmatpush3.bf16.msra.mxu0 %v1302_v13 }
  0x49   :  { %1203 = vmatprep.subr.bf16.mxu0 %v1306_v16 }
  0x4b   :  { %845 = vmatmul.mubr.bf16.gmra.mxu0 %v1305_v15 }
  0x4c   :  { %1204 = vmatpush3.bf16.msra.mxu0 %v1306_v16  ;;  %894 = vmatmul.mubr.bf16.gmra.mxu1 %v1309_v18  ;;  %v1075_v18 = vld [vmem:[%s1632_s2] ss:$0 sm:$0xff] }
  0x4d   :  { %1205 = vmatprep.subr.bf16.mxu0 %v1310_v19  ;;  %1215 = vmatprep.mubr.bf16.mxu0 %v1315_v21 }
  0x50   :  { %1206 = vmatpush3.bf16.msra.mxu0 %v1310_v19 }
  0x51   :  { %1207 = vmatprep.subr.bf16.mxu0 %v1311_v20 }
  0x54   :  { %1208 = vmatpush3.bf16.msra.mxu0 %v1311_v20 }
  0x55   :  { %1209 = vmatprep.subr.bf16.mxu0 %v1312_v22 }
  0x58   :  { %1210 = vmatpush3.bf16.msra.mxu0 %v1312_v22 }
  0x59   :  { %1211 = vmatprep.subr.bf16.mxu0 %v1313_v23 }
  0x5c   :  { %1212 = vmatpush3.bf16.msra.mxu0 %v1313_v23  ;;  %v1076_v23 = vld [vmem:[%s1633_s3] ss:$0 sm:$0xff] }
  0x5d   :  { %1213 = vmatprep.subr.bf16.mxu0 %v1314_v24 }
  0x60   :  { %1214 = vmatpush3.bf16.msra.mxu0 %v1314_v24 }
  0x63   :  { %1216 = vmatmul.mubr.bf16.vlgmr.msra.gmra.mxu0 %v1316_v25 }
  0xe3   :  { %v1093_v26 = vpop.f32.mrf.mxu0 }
  0xe4   :  { %v1121_v27 = vpop.f32.mrf.mxu1 }
  0xe5   :  { %v1094_v28 = vpop.f32.mrf.mxu0 }
  0xe6   :  { %v1122_v29 = vpop.f32.mrf.mxu1  ;;  %v1095_v57 = vadd.f32 %v1094_v28, %v1093_v26 }
  0xe7   :  { %v1096_v30 = vpop.f32.mrf.mxu0  ;;  %v1123_v58 = vadd.f32 %v1122_v29, %v1121_v27 }
  0xe8   :  { %v1124_v31 = vpop.f32.mrf.mxu1 }
  0xe9   :  { %v1097_v32 = vpop.f32.mrf.mxu0  ;;  %v790_v2 = vadd.f32 %v1123_v58, %v1095_v57 }
  0xea   :  { %v1125_v34 = vpop.f32.mrf.mxu1  ;;  %v1098_v3 = vadd.f32 %v1097_v32, %v1096_v30 }
  0xeb   :  { %v1099_v33 = vpop.f32.mrf.mxu0  ;;  %v1126_v4 = vadd.f32 %v1125_v34, %v1124_v31 }
  0xec   :  { %v1127_v35 = vpop.f32.mrf.mxu1 }
  0xed   :  { %v1100_v36 = vpop.f32.mrf.mxu0  ;;  %v793_v13 = vadd.f32 %v1126_v4, %v1098_v3 }
  0xee   :  { %v1128_v37 = vpop.f32.mrf.mxu1  ;;  %v1101_v55 = vadd.f32 %v1100_v36, %v1099_v33 }
  0xef   :  { %v1102_v38 = vpop.f32.mrf.mxu0  ;;  %v1129_v56 = vadd.f32 %v1128_v37, %v1127_v35 }
  0xf0   :  { %v1130_v39 = vpop.f32.mrf.mxu1 }
  0xf1   :  { %v1103_v40 = vpop.f32.mrf.mxu0  ;;  %v798_v62 = vadd.f32 %v1129_v56, %v1101_v55 }
  0xf2   :  { %v1131_v42 = vpop.f32.mrf.mxu1  ;;  %v1104_v63 = vadd.f32 %v1103_v40, %v1102_v38 }
  0xf3   :  { %v1132_v0 = vadd.f32 %v1131_v42, %v1130_v39 }
  0xf5   :  { %v801_v9 = vadd.f32 %v1132_v0, %v1104_v63 }
 0x103   :  { %v1149_v41 = vpop.f32.mrf.mxu0 }
 0x104   :  { %v1177_v44 = vpop.f32.mrf.mxu1 }
 0x105   :  { %v1150_v43 = vpop.f32.mrf.mxu0 }
 0x106   :  { %v1178_v46 = vpop.f32.mrf.mxu1  ;;  %v1151_v1 = vadd.f32 %v1150_v43, %v1149_v41 }
 0x107   :  { %v1152_v45 = vpop.f32.mrf.mxu0  ;;  %v1179_v11 = vadd.f32 %v1178_v46, %v1177_v44 }
 0x108   :  { %v1180_v48 = vpop.f32.mrf.mxu1  ;;  %v839_v10 = vadd.f32 %v1151_v1, %v790_v2 }
 0x109   :  { %v1153_v47 = vpop.f32.mrf.mxu0 }
 0x10a   :  { %v1181_v50 = vpop.f32.mrf.mxu1  ;;  %v1154_v12 = vadd.f32 %v1153_v47, %v1152_v45  ;;  %v888_v22 = vadd.f32 %v1179_v11, %v839_v10 }
 0x10b   :  { %v1155_v49 = vpop.f32.mrf.mxu0  ;;  %v1182_v20 = vadd.f32 %v1181_v50, %v1180_v48 }
 0x10c   :  { %v1183_v52 = vpop.f32.mrf.mxu1  ;;  %v842_v19 = vadd.f32 %v1154_v12, %v793_v13 }
 0x10d   :  { %v1156_v51 = vpop.f32.mrf.mxu0 }
 0x10e   :  { %v1184_v54 = vpop.f32.mrf.mxu1  ;;  %v1157_v59 = vadd.f32 %v1156_v51, %v1155_v49  ;;  %v891_v32 = vadd.f32 %v1182_v20, %v842_v19 }
 0x10f   :  { %v1158_v53 = vpop.f32.mrf.mxu0  ;;  %v1185_v6 = vadd.f32 %v1184_v54, %v1183_v52 }
 0x110   :  { %v1186_v61 = vpop.f32.mrf.mxu1  ;;  %v847_v5 = vadd.f32 %v1157_v59, %v798_v62 }
 0x111   :  { %v1159_v60 = vpop.f32.mrf.mxu0 }
 0x112   :  { %v1160_v7 = vadd.f32 %v1159_v60, %v1158_v53  ;;  %v1187_v8 = vpop.f32.mrf.mxu1  ;;  %v896_v16 = vadd.f32 %v1185_v6, %v847_v5 }
 0x113   :  { %v1188_v15 = vadd.f32 %v1187_v8, %v1186_v61 }
 0x114   :  { %v850_v14 = vadd.f32 %v1160_v7, %v801_v9 }
 0x116   :  { %v899_v27 = vadd.f32 %v1188_v15, %v850_v14 }
 0x123   :  { %v1217_v17 = vpop.f32.mrf.mxu0 }
 0x124   :  { %v945_v21 = vadd.f32 %v1217_v17, %v896_v16 }
 0x125   :  { %v936_v24 = vpop.f32.mrf.mxu0 }
 0x126   :  { %v960_v25 = vmul.f32 %v1075_v18, %v945_v21  ;;  %v937_v26 = vadd.f32 %v936_v24, %v888_v22 }
 0x127   :  { %v1218_v28 = vpop.f32.mrf.mxu0 }
 0x128   :  { %v971_v29 = vadd.f32 %v1076_v23, %v960_v25  ;;  %v958_v30 = vmul.f32 %v1075_v18, %v937_v26  ;;  %v948_v31 = vadd.f32 %v1218_v28, %v899_v27 }
 0x129   :  { %v939_v33 = vpop.f32.mrf.mxu0 }
 0x12a   :  { %v975_v34 = vmax.f32 %v971_v29, 0.0  ;;  %v969_v35 = vadd.f32 %v1076_v23, %v958_v30  ;;  %v961_v36 = vmul.f32 %v1075_v18, %v948_v31  ;;  %v940_v37 = vadd.f32 %v939_v33, %v891_v32 }
 0x12c   :  { %979 = vst [vmem:[%s1634_s4 + $0x10] sm:$0xff] %v975_v34  ;;  %v973_v38 = vmax.f32 %v969_v35, 0.0  ;;  %v972_v39 = vadd.f32 %v1076_v23, %v961_v36  ;;  %v959_v40 = vmul.f32 %v1075_v18, %v940_v37 }
 0x12e   :  { %977 = vst [vmem:[%s1634_s4] sm:$0xff] %v973_v38  ;;  %v976_v41 = vmax.f32 %v972_v39, 0.0  ;;  %v970_v42 = vadd.f32 %v1076_v23, %v959_v40 }
 0x130   :  { %980 = vst [vmem:[%s1634_s4 + $0x18] sm:$0xff] %v976_v41  ;;  %v974_v43 = vmax.f32 %v970_v42, 0.0 }
 0x132   :  { %978 = vst [vmem:[%s1634_s4 + $0x8] sm:$0xff] %v974_v43 }

// kernel: sound_enc_forward.29
= control target key start
LH: loop header
LB: loop body
LE: loop exit
PB: predicated region body
PF: predicated region fallthrough
CT: control target
= control target key end

     0   :  { %s2232_s15 = smov 0   ;;  %s2234_s16 = smov 0   ;;  %s2709_s0 = inlined_call_operand.vmem [shape: bf16[8,1152], index: 0, kind: input, shape index: {}]   ;;  %s2710_s1 = inlined_call_operand.vmem [shape: bf16[1152,256], index: 1, kind: input, shape index: {}]   ;;  %s2711_s2 = inlined_call_operand.vmem [shape: f32[1,256], index: 2, kind: input, shape index: {}]   ;;  %s2712_s3 = inlined_call_operand.vmem [shape: f32[1,256], index: 3, kind: input, shape index: {}]   ;;  %s2713_s4 = inlined_call_operand.vmem [shape: f32[8,256], index: 4, kind: output, shape index: {}]  }
   0x1   :  { %s2236_s17 = smov 0   ;;  %s2238_s18 = smov 0  }
   0x2   :  { %s2240_s19 = smov 0  }
   0x3 LB: > { %s23_s20 = sadd.s32 1, %s2199_s18  ;;  %p66_p1 = scmp.ne.s32.totalorder %s2191_s16, %s2187_s15  ;;  %s2203_s19 = sphi %s2240_s19, %s14_s19   ;;  %s2199_s18 = sphi %s2238_s18, %s2717_s18   ;;  %s2195_s17 = sphi %s2236_s17, %s2716_s17   ;;  %s2191_s16 = sphi %s2234_s16, %s2715_s16   ;;  %s2187_s15 = sphi %s2232_s15, %s2714_s15  }
   0x4   : > { %p24_p0 = scmp.ge.s32.totalorder %s23_s20, 2  ;;  %p67_p2 = scmp.eq.s32.totalorder %s2203_s19, 0 }
   0x5   : > { %s59_s22 = sadd.s32 1, %s2191_s16  ;;  %p1834_p5 = scmp.ge.s32.totalorder %s2203_s19, 2 }
   0x6   : > { %s2719_s20 = smov (%p24_p0, %s23_s20), 0  ;;  %p68_p3 = por %p67_p2, %p66_p1 }
   0x7   : > { %s56_s21 = ssub.s32 %s2199_s18, %s2719_s20  ;;  %180 = sbr.rel (%p1834_p5) target bundleno = 112 (0x70), region = 20 }
   0x8   : > { %p57_p4 = scmp.eq.s32.totalorder %s56_s21, 0 }
   0xa   : > { %s2267_s23 = scalar_select %p57_p4, %s2191_s16, %s59_s22  }
   0xc   : > { %183 = sbr.rel (!%p68_p3) target bundleno = 112 (0x70), region = 24  ;;  %s185_s24 = sand.u32 (%p68_p3), 1, %s2191_s16  }
   0xd   : > { %s1835_s25 = sshll.u32 (%p68_p3), %s2199_s18, 2  ;;  %s2040_s26 = smul.u32 (%p68_p3), 576, %s185_s24 }
   0xe   : > { %s2275_s29 = scalar_lea.vmem (%p68_p3), %s2710_s1, %s1835_s25 }
   0xf   : > { %v206_v0 = vld [vmem:[%s2275_s29] sm:$0xf] (%p68_p3)  ;;  %v208_v1 = vld [vmem:[%s2275_s29 + $0x8] sm:$0xf] (%p68_p3)  ;;  %v210_v2 = vld [vmem:[%s2275_s29 + $0x10] sm:$0xf] (%p68_p3) }
  0x10   : > { %v212_v3 = vld [vmem:[%s2275_s29 + $0x18] sm:$0xf] (%p68_p3)  ;;  %v214_v4 = vld [vmem:[%s2275_s29 + $0x20] sm:$0xf] (%p68_p3)  ;;  %s2282_s30 = scalar_lea.vmem (%p68_p3), [#allocation2], %s2040_s26 }
  0x11   : > { %207 = vst [vmem:[%s2282_s30] sm:$0xf] %v206_v0  ;;  %209 = vst [vmem:[%s2282_s30 + $0x4] sm:$0xf] %v208_v1  ;;  %v216_v5 = vld [vmem:[%s2275_s29 + $0x28] sm:$0xf] }
  0x12   : > { %211 = vst [vmem:[%s2282_s30 + $0x8] sm:$0xf] %v210_v2  ;;  %213 = vst [vmem:[%s2282_s30 + $0xc] sm:$0xf] %v212_v3  ;;  %v218_v6 = vld [vmem:[%s2275_s29 + $0x30] sm:$0xf] }
  0x13   : > { %215 = vst [vmem:[%s2282_s30 + $0x10] sm:$0xf] %v214_v4  ;;  %v220_v7 = vld [vmem:[%s2275_s29 + $0x38] sm:$0xf]  ;;  %217 = vst [vmem:[%s2282_s30 + $0x14] sm:$0xf] %v216_v5 }
  0x14   : > { %219 = vst [vmem:[%s2282_s30 + $0x18] sm:$0xf] %v218_v6  ;;  %221 = vst [vmem:[%s2282_s30 + $0x1c] sm:$0xf] %v220_v7  ;;  %v222_v8 = vld [vmem:[%s2275_s29 + $0x40] sm:$0xf] }
  0x15   : > { %v224_v9 = vld [vmem:[%s2275_s29 + $0x48] sm:$0xf]  ;;  %v226_v10 = vld [vmem:[%s2275_s29 + $0x50] sm:$0xf]  ;;  %223 = vst [vmem:[%s2282_s30 + $0x20] sm:$0xf] %v222_v8 }
  0x16   : > { %225 = vst [vmem:[%s2282_s30 + $0x24] sm:$0xf] %v224_v9  ;;  %227 = vst [vmem:[%s2282_s30 + $0x28] sm:$0xf] %v226_v10  ;;  %v228_v11 = vld [vmem:[%s2275_s29 + $0x58] sm:$0xf] }
  0x17   : > { %v230_v12 = vld [vmem:[%s2275_s29 + $0x60] sm:$0xf]  ;;  %v232_v13 = vld [vmem:[%s2275_s29 + $0x68] sm:$0xf]  ;;  %229 = vst [vmem:[%s2282_s30 + $0x2c] sm:$0xf] %v228_v11 }
  0x18   : > { %231 = vst [vmem:[%s2282_s30 + $0x30] sm:$0xf] %v230_v12  ;;  %233 = vst [vmem:[%s2282_s30 + $0x34] sm:$0xf] %v232_v13  ;;  %v234_v14 = vld [vmem:[%s2275_s29 + $0x70] sm:$0xf] }
  0x19   : > { %v236_v15 = vld [vmem:[%s2275_s29 + $0x78] sm:$0xf]  ;;  %v238_v16 = vld [vmem:[%s2275_s29 + $0x80] sm:$0xf]  ;;  %235 = vst [vmem:[%s2282_s30 + $0x38] sm:$0xf] %v234_v14 }
  0x1a   : > { %237 = vst [vmem:[%s2282_s30 + $0x3c] sm:$0xf] %v236_v15  ;;  %239 = vst [vmem:[%s2282_s30 + $0x40] sm:$0xf] %v238_v16  ;;  %v240_v17 = vld [vmem:[%s2275_s29 + $0x88] sm:$0xf] }
  0x1b   : > { %v242_v18 = vld [vmem:[%s2275_s29 + $0x90] sm:$0xf]  ;;  %v244_v19 = vld [vmem:[%s2275_s29 + $0x98] sm:$0xf]  ;;  %241 = vst [vmem:[%s2282_s30 + $0x44] sm:$0xf] %v240_v17 }
  0x1c   : > { %243 = vst [vmem:[%s2282_s30 + $0x48] sm:$0xf] %v242_v18  ;;  %245 = vst [vmem:[%s2282_s30 + $0x4c] sm:$0xf] %v244_v19  ;;  %v246_v20 = vld [vmem:[%s2275_s29 + $0xa0] sm:$0xf] }
  0x1d   : > { %v248_v21 = vld [vmem:[%s2275_s29 + $0xa8] sm:$0xf]  ;;  %v250_v22 = vld [vmem:[%s2275_s29 + $0xb0] sm:$0xf]  ;;  %247 = vst [vmem:[%s2282_s30 + $0x50] sm:$0xf] %v246_v20 }
  0x1e   : > { %249 = vst [vmem:[%s2282_s30 + $0x54] sm:$0xf] %v248_v21  ;;  %251 = vst [vmem:[%s2282_s30 + $0x58] sm:$0xf] %v250_v22  ;;  %v252_v23 = vld [vmem:[%s2275_s29 + $0xb8] sm:$0xf] }
  0x1f   : > { %v254_v24 = vld [vmem:[%s2275_s29 + $0xc0] sm:$0xf]  ;;  %v256_v25 = vld [vmem:[%s2275_s29 + $0xc8] sm:$0xf]  ;;  %253 = vst [vmem:[%s2282_s30 + $0x5c] sm:$0xf] %v252_v23 }
  0x20   : > { %255 = vst [vmem:[%s2282_s30 + $0x60] sm:$0xf] %v254_v24  ;;  %257 = vst [vmem:[%s2282_s30 + $0x64] sm:$0xf] %v256_v25  ;;  %v258_v26 = vld [vmem:[%s2275_s29 + $0xd0] sm:$0xf] }
  0x21   : > { %v260_v27 = vld [vmem:[%s2275_s29 + $0xd8] sm:$0xf]  ;;  %v262_v28 = vld [vmem:[%s2275_s29 + $0xe0] sm:$0xf]  ;;  %259 = vst [vmem:[%s2282_s30 + $0x68] sm:$0xf] %v258_v26 }
  0x22   : > { %261 = vst [vmem:[%s2282_s30 + $0x6c] sm:$0xf] %v260_v27  ;;  %263 = vst [vmem:[%s2282_s30 + $0x70] sm:$0xf] %v262_v28  ;;  %v264_v29 = vld [vmem:[%s2275_s29 + $0xe8] sm:$0xf] }
  0x23   : > { %v266_v30 = vld [vmem:[%s2275_s29 + $0xf0] sm:$0xf]  ;;  %v268_v31 = vld [vmem:[%s2275_s29 + $0xf8] sm:$0xf]  ;;  %265 = vst [vmem:[%s2282_s30 + $0x74] sm:$0xf] %v264_v29 }
  0x24   : > { %267 = vst [vmem:[%s2282_s30 + $0x78] sm:$0xf] %v266_v30  ;;  %269 = vst [vmem:[%s2282_s30 + $0x7c] sm:$0xf] %v268_v31  ;;  %v270_v32 = vld [vmem:[%s2275_s29 + $0x100] sm:$0xf] }
  0x25   : > { %v272_v33 = vld [vmem:[%s2275_s29 + $0x108] sm:$0xf]  ;;  %v274_v34 = vld [vmem:[%s2275_s29 + $0x110] sm:$0xf]  ;;  %271 = vst [vmem:[%s2282_s30 + $0x80] sm:$0xf] %v270_v32 }
  0x26   : > { %273 = vst [vmem:[%s2282_s30 + $0x84] sm:$0xf] %v272_v33  ;;  %275 = vst [vmem:[%s2282_s30 + $0x88] sm:$0xf] %v274_v34  ;;  %v276_v35 = vld [vmem:[%s2275_s29 + $0x118] sm:$0xf] }
  0x27   : > { %v278_v36 = vld [vmem:[%s2275_s29 + $0x120] sm:$0xf]  ;;  %v280_v37 = vld [vmem:[%s2275_s29 + $0x128] sm:$0xf]  ;;  %277 = vst [vmem:[%s2282_s30 + $0x8c] sm:$0xf] %v276_v35 }
  0x28   : > { %279 = vst [vmem:[%s2282_s30 + $0x90] sm:$0xf] %v278_v36  ;;  %281 = vst [vmem:[%s2282_s30 + $0x94] sm:$0xf] %v280_v37  ;;  %v282_v38 = vld [vmem:[%s2275_s29 + $0x130] sm:$0xf] }
  0x29   : > { %v284_v39 = vld [vmem:[%s2275_s29 + $0x138] sm:$0xf]  ;;  %v286_v40 = vld [vmem:[%s2275_s29 + $0x140] sm:$0xf]  ;;  %283 = vst [vmem:[%s2282_s30 + $0x98] sm:$0xf] %v282_v38 }
  0x2a   : > { %285 = vst [vmem:[%s2282_s30 + $0x9c] sm:$0xf] %v284_v39  ;;  %287 = vst [vmem:[%s2282_s30 + $0xa0] sm:$0xf] %v286_v40  ;;  %v288_v41 = vld [vmem:[%s2275_s29 + $0x148] sm:$0xf] }
  0x2b   : > { %v290_v42 = vld [vmem:[%s2275_s29 + $0x150] sm:$0xf]  ;;  %v292_v43 = vld [vmem:[%s2275_s29 + $0x158] sm:$0xf]  ;;  %289 = vst [vmem:[%s2282_s30 + $0xa4] sm:$0xf] %v288_v41 }
  0x2c   : > { %291 = vst [vmem:[%s2282_s30 + $0xa8] sm:$0xf] %v290_v42  ;;  %293 = vst [vmem:[%s2282_s30 + $0xac] sm:$0xf] %v292_v43  ;;  %v294_v44 = vld [vmem:[%s2275_s29 + $0x160] sm:$0xf] }
  0x2d   : > { %v296_v45 = vld [vmem:[%s2275_s29 + $0x168] sm:$0xf]  ;;  %v298_v46 = vld [vmem:[%s2275_s29 + $0x170] sm:$0xf]  ;;  %295 = vst [vmem:[%s2282_s30 + $0xb0] sm:$0xf] %v294_v44 }
  0x2e   : > { %297 = vst [vmem:[%s2282_s30 + $0xb4] sm:$0xf] %v296_v45  ;;  %299 = vst [vmem:[%s2282_s30 + $0xb8] sm:$0xf] %v298_v46  ;;  %v300_v47 = vld [vmem:[%s2275_s29 + $0x178] sm:$0xf] }
  0x2f   : > { %v302_v48 = vld [vmem:[%s2275_s29 + $0x180] sm:$0xf]  ;;  %v304_v49 = vld [vmem:[%s2275_s29 + $0x188] sm:$0xf]  ;;  %301 = vst [vmem:[%s2282_s30 + $0xbc] sm:$0xf] %v300_v47 }
  0x30   : > { %303 = vst [vmem:[%s2282_s30 + $0xc0] sm:$0xf] %v302_v48  ;;  %305 = vst [vmem:[%s2282_s30 + $0xc4] sm:$0xf] %v304_v49  ;;  %v306_v50 = vld [vmem:[%s2275_s29 + $0x190] sm:$0xf] }
  0x31   : > { %v308_v51 = vld [vmem:[%s2275_s29 + $0x198] sm:$0xf]  ;;  %v310_v52 = vld [vmem:[%s2275_s29 + $0x1a0] sm:$0xf]  ;;  %307 = vst [vmem:[%s2282_s30 + $0xc8] sm:$0xf] %v306_v50 }
  0x32   : > { %309 = vst [vmem:[%s2282_s30 + $0xcc] sm:$0xf] %v308_v51  ;;  %311 = vst [vmem:[%s2282_s30 + $0xd0] sm:$0xf] %v310_v52  ;;  %v312_v53 = vld [vmem:[%s2275_s29 + $0x1a8] sm:$0xf] }
  0x33   : > { %v314_v54 = vld [vmem:[%s2275_s29 + $0x1b0] sm:$0xf]  ;;  %v316_v55 = vld [vmem:[%s2275_s29 + $0x1b8] sm:$0xf]  ;;  %313 = vst [vmem:[%s2282_s30 + $0xd4] sm:$0xf] %v312_v53 }
  0x34   : > { %315 = vst [vmem:[%s2282_s30 + $0xd8] sm:$0xf] %v314_v54  ;;  %317 = vst [vmem:[%s2282_s30 + $0xdc] sm:$0xf] %v316_v55  ;;  %v318_v56 = vld [vmem:[%s2275_s29 + $0x1c0] sm:$0xf] }
  0x35   : > { %v320_v57 = vld [vmem:[%s2275_s29 + $0x1c8] sm:$0xf]  ;;  %v322_v58 = vld [vmem:[%s2275_s29 + $0x1d0] sm:$0xf]  ;;  %319 = vst [vmem:[%s2282_s30 + $0xe0] sm:$0xf] %v318_v56 }
  0x36   : > { %321 = vst [vmem:[%s2282_s30 + $0xe4] sm:$0xf] %v320_v57  ;;  %323 = vst [vmem:[%s2282_s30 + $0xe8] sm:$0xf] %v322_v58  ;;  %v324_v59 = vld [vmem:[%s2275_s29 + $0x1d8] sm:$0xf] }
  0x37   : > { %v326_v60 = vld [vmem:[%s2275_s29 + $0x1e0] sm:$0xf]  ;;  %v328_v61 = vld [vmem:[%s2275_s29 + $0x1e8] sm:$0xf]  ;;  %325 = vst [vmem:[%s2282_s30 + $0xec] sm:$0xf] %v324_v59 }
  0x38   : > { %327 = vst [vmem:[%s2282_s30 + $0xf0] sm:$0xf] %v326_v60  ;;  %329 = vst [vmem:[%s2282_s30 + $0xf4] sm:$0xf] %v328_v61  ;;  %v330_v62 = vld [vmem:[%s2275_s29 + $0x1f0] sm:$0xf] }
  0x39   : > { %v332_v63 = vld [vmem:[%s2275_s29 + $0x1f8] sm:$0xf]  ;;  %v334_v0 = vld [vmem:[%s2275_s29 + $0x200] sm:$0xf]  ;;  %331 = vst [vmem:[%s2282_s30 + $0xf8] sm:$0xf] %v330_v62 }
  0x3a   : > { %333 = vst [vmem:[%s2282_s30 + $0xfc] sm:$0xf] %v332_v63  ;;  %335 = vst [vmem:[%s2282_s30 + $0x100] sm:$0xf] %v334_v0  ;;  %v336_v1 = vld [vmem:[%s2275_s29 + $0x208] sm:$0xf] }
  0x3b   : > { %v338_v2 = vld [vmem:[%s2275_s29 + $0x210] sm:$0xf]  ;;  %v340_v3 = vld [vmem:[%s2275_s29 + $0x218] sm:$0xf]  ;;  %337 = vst [vmem:[%s2282_s30 + $0x104] sm:$0xf] %v336_v1 }
  0x3c   : > { %339 = vst [vmem:[%s2282_s30 + $0x108] sm:$0xf] %v338_v2  ;;  %341 = vst [vmem:[%s2282_s30 + $0x10c] sm:$0xf] %v340_v3  ;;  %v342_v4 = vld [vmem:[%s2275_s29 + $0x220] sm:$0xf] }
  0x3d   : > { %v344_v5 = vld [vmem:[%s2275_s29 + $0x228] sm:$0xf]  ;;  %v346_v6 = vld [vmem:[%s2275_s29 + $0x230] sm:$0xf]  ;;  %343 = vst [vmem:[%s2282_s30 + $0x110] sm:$0xf] %v342_v4 }
  0x3e   : > { %345 = vst [vmem:[%s2282_s30 + $0x114] sm:$0xf] %v344_v5  ;;  %347 = vst [vmem:[%s2282_s30 + $0x118] sm:$0xf] %v346_v6  ;;  %v348_v7 = vld [vmem:[%s2275_s29 + $0x238] sm:$0xf] }
  0x3f   : > { %v350_v8 = vld [vmem:[%s2275_s29 + $0x240] sm:$0xf]  ;;  %v352_v9 = vld [vmem:[%s2275_s29 + $0x248] sm:$0xf]  ;;  %349 = vst [vmem:[%s2282_s30 + $0x11c] sm:$0xf] %v348_v7 }
  0x40   : > { %351 = vst [vmem:[%s2282_s30 + $0x120] sm:$0xf] %v350_v8  ;;  %353 = vst [vmem:[%s2282_s30 + $0x124] sm:$0xf] %v352_v9  ;;  %v354_v10 = vld [vmem:[%s2275_s29 + $0x250] sm:$0xf] }
  0x41   : > { %v356_v11 = vld [vmem:[%s2275_s29 + $0x258] sm:$0xf]  ;;  %v358_v12 = vld [vmem:[%s2275_s29 + $0x260] sm:$0xf]  ;;  %355 = vst [vmem:[%s2282_s30 + $0x128] sm:$0xf] %v354_v10 }
  0x42   : > { %357 = vst [vmem:[%s2282_s30 + $0x12c] sm:$0xf] %v356_v11  ;;  %359 = vst [vmem:[%s2282_s30 + $0x130] sm:$0xf] %v358_v12  ;;  %v360_v13 = vld [vmem:[%s2275_s29 + $0x268] sm:$0xf] }
  0x43   : > { %v362_v14 = vld [vmem:[%s2275_s29 + $0x270] sm:$0xf]  ;;  %v364_v15 = vld [vmem:[%s2275_s29 + $0x278] sm:$0xf]  ;;  %361 = vst [vmem:[%s2282_s30 + $0x134] sm:$0xf] %v360_v13 }
  0x44   : > { %363 = vst [vmem:[%s2282_s30 + $0x138] sm:$0xf] %v362_v14  ;;  %365 = vst [vmem:[%s2282_s30 + $0x13c] sm:$0xf] %v364_v15  ;;  %v366_v16 = vld [vmem:[%s2275_s29 + $0x280] sm:$0xf] }
  0x45   : > { %v368_v17 = vld [vmem:[%s2275_s29 + $0x288] sm:$0xf]  ;;  %v370_v18 = vld [vmem:[%s2275_s29 + $0x290] sm:$0xf]  ;;  %367 = vst [vmem:[%s2282_s30 + $0x140] sm:$0xf] %v366_v16 }
  0x46   : > { %369 = vst [vmem:[%s2282_s30 + $0x144] sm:$0xf] %v368_v17  ;;  %371 = vst [vmem:[%s2282_s30 + $0x148] sm:$0xf] %v370_v18  ;;  %v372_v19 = vld [vmem:[%s2275_s29 + $0x298] sm:$0xf] }
  0x47   : > { %v374_v20 = vld [vmem:[%s2275_s29 + $0x2a0] sm:$0xf]  ;;  %v376_v21 = vld [vmem:[%s2275_s29 + $0x2a8] sm:$0xf]  ;;  %373 = vst [vmem:[%s2282_s30 + $0x14c] sm:$0xf] %v372_v19 }
  0x48   : > { %375 = vst [vmem:[%s2282_s30 + $0x150] sm:$0xf] %v374_v20  ;;  %377 = vst [vmem:[%s2282_s30 + $0x154] sm:$0xf] %v376_v21  ;;  %v378_v22 = vld [vmem:[%s2275_s29 + $0x2b0] sm:$0xf] }
  0x49   : > { %v380_v23 = vld [vmem:[%s2275_s29 + $0x2b8] sm:$0xf]  ;;  %v382_v24 = vld [vmem:[%s2275_s29 + $0x2c0] sm:$0xf]  ;;  %379 = vst [vmem:[%s2282_s30 + $0x158] sm:$0xf] %v378_v22 }
  0x4a   : > { %381 = vst [vmem:[%s2282_s30 + $0x15c] sm:$0xf] %v380_v23  ;;  %383 = vst [vmem:[%s2282_s30 + $0x160] sm:$0xf] %v382_v24  ;;  %v384_v25 = vld [vmem:[%s2275_s29 + $0x2c8] sm:$0xf] }
  0x4b   : > { %v386_v26 = vld [vmem:[%s2275_s29 + $0x2d0] sm:$0xf]  ;;  %v388_v27 = vld [vmem:[%s2275_s29 + $0x2d8] sm:$0xf]  ;;  %385 = vst [vmem:[%s2282_s30 + $0x164] sm:$0xf] %v384_v25 }
  0x4c   : > { %387 = vst [vmem:[%s2282_s30 + $0x168] sm:$0xf] %v386_v26  ;;  %389 = vst [vmem:[%s2282_s30 + $0x16c] sm:$0xf] %v388_v27  ;;  %v390_v28 = vld [vmem:[%s2275_s29 + $0x2e0] sm:$0xf] }
  0x4d   : > { %v392_v29 = vld [vmem:[%s2275_s29 + $0x2e8] sm:$0xf]  ;;  %v394_v30 = vld [vmem:[%s2275_s29 + $0x2f0] sm:$0xf]  ;;  %391 = vst [vmem:[%s2282_s30 + $0x170] sm:$0xf] %v390_v28 }
  0x4e   : > { %393 = vst [vmem:[%s2282_s30 + $0x174] sm:$0xf] %v392_v29  ;;  %395 = vst [vmem:[%s2282_s30 + $0x178] sm:$0xf] %v394_v30  ;;  %v396_v31 = vld [vmem:[%s2275_s29 + $0x2f8] sm:$0xf] }
  0x4f   : > { %v398_v32 = vld [vmem:[%s2275_s29 + $0x300] sm:$0xf]  ;;  %v400_v33 = vld [vmem:[%s2275_s29 + $0x308] sm:$0xf]  ;;  %397 = vst [vmem:[%s2282_s30 + $0x17c] sm:$0xf] %v396_v31 }
  0x50   : > { %399 = vst [vmem:[%s2282_s30 + $0x180] sm:$0xf] %v398_v32  ;;  %401 = vst [vmem:[%s2282_s30 + $0x184] sm:$0xf] %v400_v33  ;;  %v402_v34 = vld [vmem:[%s2275_s29 + $0x310] sm:$0xf] }
  0x51   : > { %v404_v35 = vld [vmem:[%s2275_s29 + $0x318] sm:$0xf]  ;;  %v406_v36 = vld [vmem:[%s2275_s29 + $0x320] sm:$0xf]  ;;  %403 = vst [vmem:[%s2282_s30 + $0x188] sm:$0xf] %v402_v34 }
  0x52   : > { %405 = vst [vmem:[%s2282_s30 + $0x18c] sm:$0xf] %v404_v35  ;;  %407 = vst [vmem:[%s2282_s30 + $0x190] sm:$0xf] %v406_v36  ;;  %v408_v37 = vld [vmem:[%s2275_s29 + $0x328] sm:$0xf] }
  0x53   : > { %v410_v38 = vld [vmem:[%s2275_s29 + $0x330] sm:$0xf]  ;;  %v412_v39 = vld [vmem:[%s2275_s29 + $0x338] sm:$0xf]  ;;  %409 = vst [vmem:[%s2282_s30 + $0x194] sm:$0xf] %v408_v37 }
  0x54   : > { %411 = vst [vmem:[%s2282_s30 + $0x198] sm:$0xf] %v410_v38  ;;  %413 = vst [vmem:[%s2282_s30 + $0x19c] sm:$0xf] %v412_v39  ;;  %v414_v40 = vld [vmem:[%s2275_s29 + $0x340] sm:$0xf] }
  0x55   : > { %v416_v41 = vld [vmem:[%s2275_s29 + $0x348] sm:$0xf]  ;;  %v418_v42 = vld [vmem:[%s2275_s29 + $0x350] sm:$0xf]  ;;  %415 = vst [vmem:[%s2282_s30 + $0x1a0] sm:$0xf] %v414_v40 }
  0x56   : > { %417 = vst [vmem:[%s2282_s30 + $0x1a4] sm:$0xf] %v416_v41  ;;  %419 = vst [vmem:[%s2282_s30 + $0x1a8] sm:$0xf] %v418_v42  ;;  %v420_v43 = vld [vmem:[%s2275_s29 + $0x358] sm:$0xf] }
  0x57   : > { %v422_v44 = vld [vmem:[%s2275_s29 + $0x360] sm:$0xf]  ;;  %v424_v45 = vld [vmem:[%s2275_s29 + $0x368] sm:$0xf]  ;;  %421 = vst [vmem:[%s2282_s30 + $0x1ac] sm:$0xf] %v420_v43 }
  0x58   : > { %423 = vst [vmem:[%s2282_s30 + $0x1b0] sm:$0xf] %v422_v44  ;;  %425 = vst [vmem:[%s2282_s30 + $0x1b4] sm:$0xf] %v424_v45  ;;  %v426_v46 = vld [vmem:[%s2275_s29 + $0x370] sm:$0xf] }
  0x59   : > { %v428_v47 = vld [vmem:[%s2275_s29 + $0x378] sm:$0xf]  ;;  %v430_v48 = vld [vmem:[%s2275_s29 + $0x380] sm:$0xf]  ;;  %427 = vst [vmem:[%s2282_s30 + $0x1b8] sm:$0xf] %v426_v46 }
  0x5a   : > { %429 = vst [vmem:[%s2282_s30 + $0x1bc] sm:$0xf] %v428_v47  ;;  %431 = vst [vmem:[%s2282_s30 + $0x1c0] sm:$0xf] %v430_v48  ;;  %v432_v49 = vld [vmem:[%s2275_s29 + $0x388] sm:$0xf] }
  0x5b   : > { %v434_v50 = vld [vmem:[%s2275_s29 + $0x390] sm:$0xf]  ;;  %v436_v51 = vld [vmem:[%s2275_s29 + $0x398] sm:$0xf]  ;;  %433 = vst [vmem:[%s2282_s30 + $0x1c4] sm:$0xf] %v432_v49 }
  0x5c   : > { %435 = vst [vmem:[%s2282_s30 + $0x1c8] sm:$0xf] %v434_v50  ;;  %437 = vst [vmem:[%s2282_s30 + $0x1cc] sm:$0xf] %v436_v51  ;;  %v438_v52 = vld [vmem:[%s2275_s29 + $0x3a0] sm:$0xf] }
  0x5d   : > { %v440_v53 = vld [vmem:[%s2275_s29 + $0x3a8] sm:$0xf]  ;;  %v442_v54 = vld [vmem:[%s2275_s29 + $0x3b0] sm:$0xf]  ;;  %439 = vst [vmem:[%s2282_s30 + $0x1d0] sm:$0xf] %v438_v52 }
  0x5e   : > { %441 = vst [vmem:[%s2282_s30 + $0x1d4] sm:$0xf] %v440_v53  ;;  %443 = vst [vmem:[%s2282_s30 + $0x1d8] sm:$0xf] %v442_v54  ;;  %v444_v55 = vld [vmem:[%s2275_s29 + $0x3b8] sm:$0xf] }
  0x5f   : > { %v446_v56 = vld [vmem:[%s2275_s29 + $0x3c0] sm:$0xf]  ;;  %v448_v57 = vld [vmem:[%s2275_s29 + $0x3c8] sm:$0xf]  ;;  %445 = vst [vmem:[%s2282_s30 + $0x1dc] sm:$0xf] %v444_v55 }
  0x60   : > { %447 = vst [vmem:[%s2282_s30 + $0x1e0] sm:$0xf] %v446_v56  ;;  %449 = vst [vmem:[%s2282_s30 + $0x1e4] sm:$0xf] %v448_v57  ;;  %v450_v58 = vld [vmem:[%s2275_s29 + $0x3d0] sm:$0xf] }
  0x61   : > { %v452_v59 = vld [vmem:[%s2275_s29 + $0x3d8] sm:$0xf]  ;;  %v454_v60 = vld [vmem:[%s2275_s29 + $0x3e0] sm:$0xf]  ;;  %451 = vst [vmem:[%s2282_s30 + $0x1e8] sm:$0xf] %v450_v58 }
  0x62   : > { %453 = vst [vmem:[%s2282_s30 + $0x1ec] sm:$0xf] %v452_v59  ;;  %455 = vst [vmem:[%s2282_s30 + $0x1f0] sm:$0xf] %v454_v60  ;;  %v456_v61 = vld [vmem:[%s2275_s29 + $0x3e8] sm:$0xf] }
  0x63   : > { %v458_v62 = vld [vmem:[%s2275_s29 + $0x3f0] sm:$0xf]  ;;  %v460_v63 = vld [vmem:[%s2275_s29 + $0x3f8] sm:$0xf]  ;;  %457 = vst [vmem:[%s2282_s30 + $0x1f4] sm:$0xf] %v456_v61 }
  0x64   : > { %459 = vst [vmem:[%s2282_s30 + $0x1f8] sm:$0xf] %v458_v62  ;;  %461 = vst [vmem:[%s2282_s30 + $0x1fc] sm:$0xf] %v460_v63  ;;  %v462_v0 = vld [vmem:[%s2275_s29 + $0x400] sm:$0xf] }
  0x65   : > { %v464_v1 = vld [vmem:[%s2275_s29 + $0x408] sm:$0xf]  ;;  %v466_v2 = vld [vmem:[%s2275_s29 + $0x410] sm:$0xf]  ;;  %463 = vst [vmem:[%s2282_s30 + $0x200] sm:$0xf] %v462_v0 }
  0x66   : > { %465 = vst [vmem:[%s2282_s30 + $0x204] sm:$0xf] %v464_v1  ;;  %467 = vst [vmem:[%s2282_s30 + $0x208] sm:$0xf] %v466_v2  ;;  %v468_v3 = vld [vmem:[%s2275_s29 + $0x418] sm:$0xf] }
  0x67   : > { %v470_v4 = vld [vmem:[%s2275_s29 + $0x420] sm:$0xf]  ;;  %v472_v5 = vld [vmem:[%s2275_s29 + $0x428] sm:$0xf]  ;;  %469 = vst [vmem:[%s2282_s30 + $0x20c] sm:$0xf] %v468_v3 }
  0x68   : > { %471 = vst [vmem:[%s2282_s30 + $0x210] sm:$0xf] %v470_v4  ;;  %473 = vst [vmem:[%s2282_s30 + $0x214] sm:$0xf] %v472_v5  ;;  %v474_v6 = vld [vmem:[%s2275_s29 + $0x430] sm:$0xf] }
  0x69   : > { %v476_v7 = vld [vmem:[%s2275_s29 + $0x438] sm:$0xf]  ;;  %v478_v8 = vld [vmem:[%s2275_s29 + $0x440] sm:$0xf]  ;;  %475 = vst [vmem:[%s2282_s30 + $0x218] sm:$0xf] %v474_v6 }
  0x6a   : > { %477 = vst [vmem:[%s2282_s30 + $0x21c] sm:$0xf] %v476_v7  ;;  %479 = vst [vmem:[%s2282_s30 + $0x220] sm:$0xf] %v478_v8  ;;  %v480_v9 = vld [vmem:[%s2275_s29 + $0x448] sm:$0xf] }
  0x6b   : > { %v482_v10 = vld [vmem:[%s2275_s29 + $0x450] sm:$0xf]  ;;  %v484_v11 = vld [vmem:[%s2275_s29 + $0x458] sm:$0xf]  ;;  %481 = vst [vmem:[%s2282_s30 + $0x224] sm:$0xf] %v480_v9 }
  0x6c   : > { %483 = vst [vmem:[%s2282_s30 + $0x228] sm:$0xf] %v482_v10  ;;  %485 = vst [vmem:[%s2282_s30 + $0x22c] sm:$0xf] %v484_v11  ;;  %v486_v12 = vld [vmem:[%s2275_s29 + $0x460] sm:$0xf] }
  0x6d   : > { %v488_v13 = vld [vmem:[%s2275_s29 + $0x468] sm:$0xf]  ;;  %v490_v14 = vld [vmem:[%s2275_s29 + $0x470] sm:$0xf]  ;;  %487 = vst [vmem:[%s2282_s30 + $0x230] sm:$0xf] %v486_v12 }
  0x6e   : > { %489 = vst [vmem:[%s2282_s30 + $0x234] sm:$0xf] %v488_v13  ;;  %491 = vst [vmem:[%s2282_s30 + $0x238] sm:$0xf] %v490_v14  ;;  %v492_v15 = vld [vmem:[%s2275_s29 + $0x478] sm:$0xf] }
  0x6f   : > { %493 = vst [vmem:[%s2282_s30 + $0x23c] sm:$0xf] %v492_v15 }
  0x70 PF: > { %p1836_p6 = scmp.ge.s32.totalorder %s2203_s19, 1  ;;  %p816_p7 = scmp.lt.s32.totalorder %s2203_s19, 3 }
  0x72   : > { %p817_p8 = pnand %p1836_p6, %p816_p7 }
  0x73   : > { %s823_s5 = sand.u32 (!%p817_p8), 1, %s2187_s15   ;;  %p867_p9 = scmp.lt.s32.totalorder (!%p817_p8), %s2195_s17, 1 }
  0x74   : > { %820 = sbr.rel (%p817_p8) target bundleno = 422 (0x1a6), region = 73 }
  0x75   : > { %s2041_s10 = smul.u32 (!%p817_p8), 576, %s823_s5 }
  0x77   : > { %s2584_s11 = scalar_lea.vmem (!%p817_p8), [#allocation2], %s2041_s10 }
  0x79   : > { %v2573_v16 = vld [vmem:[%s2709_s0] sm:$0xff]  ;;  %v2578_v17 = vld [vmem:[%s2709_s0 + $0x8] sm:$0xff]  ;;  %v2084_v20 = vld [vmem:[%s2584_s11 + $0x78] sm:$0xff]   ;;  %vm2206_vm0 = vmmov 0   ;;  %s2721_s17 = smov (!%p867_p9, %s2195_s17), 1 }
  0x7a   : > { %v1839_v18 = vcombine.high %v2573_v16, %v2573_v16  ;;  %v1841_v19 = vcombine.high %v2578_v17, %v2578_v17  ;;  %v2085_v21 = vld [vmem:[%s2584_s11 + $0xf8] sm:$0xff]   ;;  %1923 = vmatprep.subr.bf16.mxu0 %v2084_v20  ;;  %v2088_v24 = vld [vmem:[%s2584_s11 + $0x70] sm:$0xff]   ;;  %v2092_v28 = vld [vmem:[%s2584_s11 + $0x68] sm:$0xff]   ;;  %v1838_v54 = vcombine.low %v2573_v16, %v2573_v16  ;;  %v1840_v55 = vcombine.low %v2578_v17, %v2578_v17  ;;  %s869_s26 = scalar_lea.vmem %s2711_s2, %s2721_s17  ;;  %s872_s29 = scalar_lea.vmem %s2712_s3, %s2721_s17 }
  0x7b   : > { %v2086_v22 = vld [vmem:[%s2584_s11 + $0x38] sm:$0xff]   ;;  %1945 = vmatprep.subr.bf16.mxu1 %v2085_v21  ;;  %v2089_v25 = vld [vmem:[%s2584_s11 + $0xf0] sm:$0xff]   ;;  %v2093_v29 = vld [vmem:[%s2584_s11 + $0xe8] sm:$0xff]   ;;  %s1837_s30 = sshll.u32 %s2721_s17, 3 }
  0x7c   : > { %1527 = vmatprep.mubr.bf16.mxu0 %v1839_v18  ;;  %1567 = vmatprep.mubr.bf16.mxu1 %v1841_v19  ;;  %v2087_v23 = vld [vmem:[%s2584_s11 + $0xb8] sm:$0xff]   ;;  %v2090_v26 = vld [vmem:[%s2584_s11 + $0x30] sm:$0xff]   ;;  %v2094_v30 = vld [vmem:[%s2584_s11 + $0x28] sm:$0xff]   ;;  %s880_s7 = scalar_lea.vmem %s2713_s4, %s1837_s30 }
  0x7d   : > { %1924 = vmatpush3.bf16.msra.mxu0 %v2086_v22  ;;  %1946 = vmatpush3.bf16.msra.mxu1 %v2087_v23  ;;  %v2091_v27 = vld [vmem:[%s2584_s11 + $0xb0] sm:$0xff]   ;;  %v2095_v31 = vld [vmem:[%s2584_s11 + $0xa8] sm:$0xff]   ;;  %v2096_v32 = vld [vmem:[%s2584_s11 + $0x60] sm:$0xff]  }
  0x7e   : > { %1925 = vmatprep.subr.bf16.mxu0 %v2088_v24  ;;  %1947 = vmatprep.subr.bf16.mxu1 %v2089_v25  ;;  %v2097_v33 = vld [vmem:[%s2584_s11 + $0xe0] sm:$0xff]   ;;  %v2100_v36 = vld [vmem:[%s2584_s11 + $0x58] sm:$0xff]   ;;  %v2104_v40 = vld [vmem:[%s2584_s11 + $0x50] sm:$0xff]  }
  0x7f   : > { %v2098_v34 = vld [vmem:[%s2584_s11 + $0x20] sm:$0xff]   ;;  %v2101_v37 = vld [vmem:[%s2584_s11 + $0xd8] sm:$0xff]   ;;  %v2105_v41 = vld [vmem:[%s2584_s11 + $0xd0] sm:$0xff]  }
  0x80   : > { %v2099_v35 = vld [vmem:[%s2584_s11 + $0xa0] sm:$0xff]   ;;  %v2102_v38 = vld [vmem:[%s2584_s11 + $0x18] sm:$0xff]   ;;  %v2106_v42 = vld [vmem:[%s2584_s11 + $0x10] sm:$0xff]  }
  0x81   : > { %1926 = vmatpush3.bf16.msra.mxu0 %v2090_v26  ;;  %1948 = vmatpush3.bf16.msra.mxu1 %v2091_v27  ;;  %v2103_v39 = vld [vmem:[%s2584_s11 + $0x98] sm:$0xff]   ;;  %v2107_v43 = vld [vmem:[%s2584_s11 + $0x90] sm:$0xff]   ;;  %v2108_v44 = vld [vmem:[%s2584_s11 + $0x48] sm:$0xff]  }
  0x82   : > { %1927 = vmatprep.subr.bf16.mxu0 %v2092_v28  ;;  %1949 = vmatprep.subr.bf16.mxu1 %v2093_v29  ;;  %v2109_v45 = vld [vmem:[%s2584_s11 + $0xc8] sm:$0xff]   ;;  %v2112_v48 = vld [vmem:[%s2584_s11 + $0x40] sm:$0xff]   ;;  %v2618_v49 = vld [vmem:[%s2709_s0 + $0x10] sm:$0xff]  ;;  %v2205_v28 = vmov 0.0  }
  0x83   : > { %v2110_v46 = vld [vmem:[%s2584_s11 + $0x8] sm:$0xff]   ;;  %v2113_v50 = vld [vmem:[%s2584_s11 + $0xc0] sm:$0xff]   ;;  %v2625_v52 = vld [vmem:[%s2709_s0 + $0x18] sm:$0xff]  ;;  %v1843_v58 = vcombine.high %v2618_v49, %v2618_v49  ;;  %v1842_v25 = vcombine.low %v2618_v49, %v2618_v49 }
  0x84   : > { %v2111_v47 = vld [vmem:[%s2584_s11 + $0x88] sm:$0xff]   ;;  %v2114_v51 = vld [vmem:[%s2584_s11] sm:$0xff]   ;;  %v2120_v56 = vld [vmem:[%s2584_s11 + $0x178] sm:$0xff]   ;;  %v1845_v61 = vcombine.high %v2625_v52, %v2625_v52  ;;  %v1844_v29 = vcombine.low %v2625_v52, %v2625_v52 }
  0x85   : > { %1928 = vmatpush3.bf16.msra.mxu0 %v2094_v30  ;;  %1950 = vmatpush3.bf16.msra.mxu1 %v2095_v31  ;;  %v2115_v53 = vld [vmem:[%s2584_s11 + $0x80] sm:$0xff]   ;;  %v2121_v57 = vld [vmem:[%s2584_s11 + $0x138] sm:$0xff]   ;;  %v2124_v62 = vld [vmem:[%s2584_s11 + $0x170] sm:$0xff]  }
  0x86   : > { %1929 = vmatprep.subr.bf16.mxu0 %v2096_v32  ;;  %1951 = vmatprep.subr.bf16.mxu1 %v2097_v33  ;;  %v2122_v59 = vld [vmem:[%s2584_s11 + $0x1f8] sm:$0xff]   ;;  %v2125_v63 = vld [vmem:[%s2584_s11 + $0x130] sm:$0xff]   ;;  %v2128_v2 = vld [vmem:[%s2584_s11 + $0x168] sm:$0xff]  }
  0x87   : > { %v2123_v60 = vld [vmem:[%s2584_s11 + $0x1b8] sm:$0xff]   ;;  %v2126_v0 = vld [vmem:[%s2584_s11 + $0x1f0] sm:$0xff]   ;;  %v2129_v3 = vld [vmem:[%s2584_s11 + $0x128] sm:$0xff]  }
  0x88   : > { %v2127_v1 = vld [vmem:[%s2584_s11 + $0x1b0] sm:$0xff]   ;;  %v2130_v4 = vld [vmem:[%s2584_s11 + $0x1e8] sm:$0xff]   ;;  %v2132_v6 = vld [vmem:[%s2584_s11 + $0x160] sm:$0xff]  }
  0x89   : > { %1930 = vmatpush3.bf16.msra.mxu0 %v2098_v34  ;;  %1952 = vmatpush3.bf16.msra.mxu1 %v2099_v35  ;;  %v2131_v5 = vld [vmem:[%s2584_s11 + $0x1a8] sm:$0xff]   ;;  %v2133_v7 = vld [vmem:[%s2584_s11 + $0x120] sm:$0xff]   ;;  %v2136_v10 = vld [vmem:[%s2584_s11 + $0x158] sm:$0xff]  }
  0x8a   : > { %1931 = vmatprep.subr.bf16.mxu0 %v2100_v36  ;;  %1953 = vmatprep.subr.bf16.mxu1 %v2101_v37  ;;  %v2134_v8 = vld [vmem:[%s2584_s11 + $0x1e0] sm:$0xff]   ;;  %v2137_v11 = vld [vmem:[%s2584_s11 + $0x118] sm:$0xff]   ;;  %v2140_v14 = vld [vmem:[%s2584_s11 + $0x150] sm:$0xff]  }
  0x8b   : > { %v2135_v9 = vld [vmem:[%s2584_s11 + $0x1a0] sm:$0xff]   ;;  %v2138_v12 = vld [vmem:[%s2584_s11 + $0x1d8] sm:$0xff]   ;;  %v2141_v15 = vld [vmem:[%s2584_s11 + $0x110] sm:$0xff]  }
  0x8c   : > { %v2139_v13 = vld [vmem:[%s2584_s11 + $0x198] sm:$0xff]   ;;  %v2142_v16 = vld [vmem:[%s2584_s11 + $0x1d0] sm:$0xff]   ;;  %v2144_v18 = vld [vmem:[%s2584_s11 + $0x148] sm:$0xff]  }
  0x8d   : > { %1932 = vmatpush3.bf16.msra.mxu0 %v2102_v38  ;;  %1954 = vmatpush3.bf16.msra.mxu1 %v2103_v39  ;;  %v2143_v17 = vld [vmem:[%s2584_s11 + $0x190] sm:$0xff]   ;;  %v2145_v19 = vld [vmem:[%s2584_s11 + $0x108] sm:$0xff]   ;;  %v2148_v22 = vld [vmem:[%s2584_s11 + $0x140] sm:$0xff]  }
  0x8e   : > { %1933 = vmatprep.subr.bf16.mxu0 %v2104_v40  ;;  %1955 = vmatprep.subr.bf16.mxu1 %v2105_v41  ;;  %v2146_v20 = vld [vmem:[%s2584_s11 + $0x1c8] sm:$0xff]   ;;  %v2149_v23 = vld [vmem:[%s2584_s11 + $0x100] sm:$0xff]   ;;  %v2156_v27 = vld [vmem:[%s2584_s11 + $0x238] sm:$0xff]  }
  0x8f   : > { %v2147_v21 = vld [vmem:[%s2584_s11 + $0x188] sm:$0xff]   ;;  %v2150_v24 = vld [vmem:[%s2584_s11 + $0x1c0] sm:$0xff]   ;;  %v2157_v30 = vld [vmem:[%s2584_s11 + $0x230] sm:$0xff]  }
  0x90   : > { %v2153_v26 = vld [vmem:[%s2584_s11 + $0x180] sm:$0xff]   ;;  %v2158_v31 = vld [vmem:[%s2584_s11 + $0x228] sm:$0xff]   ;;  %v2160_v33 = vld [vmem:[%s2584_s11 + $0x218] sm:$0xff]  }
  0x91   : > { %1934 = vmatpush3.bf16.msra.mxu0 %v2106_v42  ;;  %1956 = vmatpush3.bf16.msra.mxu1 %v2107_v43  ;;  %v2159_v32 = vld [vmem:[%s2584_s11 + $0x220] sm:$0xff]   ;;  %v2161_v34 = vld [vmem:[%s2584_s11 + $0x210] sm:$0xff]   ;;  %v2162_v35 = vld [vmem:[%s2584_s11 + $0x208] sm:$0xff]  }
  0x92   : > { %1935 = vmatprep.subr.bf16.mxu0 %v2108_v44  ;;  %1957 = vmatprep.subr.bf16.mxu1 %v2109_v45  ;;  %v2163_v36 = vld [vmem:[%s2584_s11 + $0x200] sm:$0xff]  }
  0x93   : > { %v2164_v37 = vld [vmem:[%s2709_s0 + $0x20] ss:$0 sps:$4 sm:$0xff]  }
  0x95   : > { %1936 = vmatpush3.bf16.msra.mxu0 %v2110_v46  ;;  %1958 = vmatpush3.bf16.msra.mxu1 %v2111_v47 }
  0x96   : > { %1937 = vmatprep.subr.bf16.mxu0 %v2112_v48  ;;  %1959 = vmatprep.subr.bf16.mxu1 %v2113_v50 }
  0x99   : > { %1938 = vmatpush3.bf16.msra.mxu0 %v2114_v51  ;;  %1960 = vmatpush3.bf16.msra.mxu1 %v2115_v53 }
  0x9a   : > { %1967 = vmatprep.subr.bf16.mxu0 %v2120_v56  ;;  %1989 = vmatprep.subr.bf16.mxu1 %v2122_v59 }
  0x9c   : > { %1528 = vmatmul.mubr.bf16.vlgmr.msra.gmra.mxu0 %v1838_v54  ;;  %1568 = vmatmul.mubr.bf16.vlgmr.msra.gmra.mxu1 %v1840_v55 }
  0x9d   : > { %1968 = vmatpush3.bf16.msra.mxu0 %v2121_v57  ;;  %1607 = vmatprep.mubr.bf16.mxu0 %v1843_v58 }
  0x9e   : > { %1990 = vmatpush3.bf16.msra.mxu1 %v2123_v60  ;;  %1969 = vmatprep.subr.bf16.mxu0 %v2124_v62  ;;  %v1919_v62 = vld [vmem:[%s869_s26] ss:$0 sm:$0xff] }
  0x9f   : > { %1647 = vmatprep.mubr.bf16.mxu1 %v1845_v61  ;;  %1991 = vmatprep.subr.bf16.mxu1 %v2126_v0  ;;  %v1920_v0 = vld [vmem:[%s872_s29] ss:$0 sm:$0xff] }
  0xa1   : > { %1970 = vmatpush3.bf16.msra.mxu0 %v2125_v63 }
  0xa2   : > { %1992 = vmatpush3.bf16.msra.mxu1 %v2127_v1  ;;  %1971 = vmatprep.subr.bf16.mxu0 %v2128_v2 }
  0xa3   : > { %1993 = vmatprep.subr.bf16.mxu1 %v2130_v4 }
  0xa5   : > { %1972 = vmatpush3.bf16.msra.mxu0 %v2129_v3 }
  0xa6   : > { %1994 = vmatpush3.bf16.msra.mxu1 %v2131_v5  ;;  %1973 = vmatprep.subr.bf16.mxu0 %v2132_v6 }
  0xa7   : > { %1995 = vmatprep.subr.bf16.mxu1 %v2134_v8 }
  0xa9   : > { %1974 = vmatpush3.bf16.msra.mxu0 %v2133_v7 }
  0xaa   : > { %1996 = vmatpush3.bf16.msra.mxu1 %v2135_v9  ;;  %1975 = vmatprep.subr.bf16.mxu0 %v2136_v10 }
  0xab   : > { %1997 = vmatprep.subr.bf16.mxu1 %v2138_v12 }
  0xad   : > { %1976 = vmatpush3.bf16.msra.mxu0 %v2137_v11 }
  0xae   : > { %1998 = vmatpush3.bf16.msra.mxu1 %v2139_v13  ;;  %1977 = vmatprep.subr.bf16.mxu0 %v2140_v14 }
  0xaf   : > { %1999 = vmatprep.subr.bf16.mxu1 %v2142_v16 }
  0xb1   : > { %1978 = vmatpush3.bf16.msra.mxu0 %v2141_v15 }
  0xb2   : > { %2000 = vmatpush3.bf16.msra.mxu1 %v2143_v17  ;;  %1979 = vmatprep.subr.bf16.mxu0 %v2144_v18 }
  0xb3   : > { %2001 = vmatprep.subr.bf16.mxu1 %v2146_v20 }
  0xb5   : > { %1980 = vmatpush3.bf16.msra.mxu0 %v2145_v19 }
  0xb6   : > { %2002 = vmatpush3.bf16.msra.mxu1 %v2147_v21  ;;  %1981 = vmatprep.subr.bf16.mxu0 %v2148_v22 }
  0xb7   : > { %2003 = vmatprep.subr.bf16.mxu1 %v2150_v24 }
  0xb9   : > { %1982 = vmatpush3.bf16.msra.mxu0 %v2149_v23 }
  0xba   : > { %2020 = vmatprep.subr.bf16.mxu0 %v2205_v28  ;;  %2004 = vmatpush3.bf16.msra.mxu1 %v2153_v26 }
  0xbc   : > { %1608 = vmatmul.mubr.bf16.vlgmr.msra.gmra.mxu0 %v1842_v25 }
  0xbd   : > { %2021 = vmatpush3.bf16.msra.mxu0 %v2156_v27  ;;  %2036 = vmatprep.mubr.msk.bf16.mxu0 %vm2206_vm0, %v2205_v28 }
  0xbe   : > { %1648 = vmatmul.mubr.bf16.vlgmr.msra.gmra.mxu1 %v1844_v29  ;;  %2022 = vmatprep.subr.bf16.mxu0 %v2205_v28 }
  0xc1   : > { %2023 = vmatpush3.bf16.msra.mxu0 %v2157_v30 }
  0xc2   : > { %2024 = vmatprep.subr.bf16.mxu0 %v2205_v28 }
  0xc5   : > { %2025 = vmatpush3.bf16.msra.mxu0 %v2158_v31 }
  0xc6   : > { %2026 = vmatprep.subr.bf16.mxu0 %v2205_v28 }
  0xc9   : > { %2027 = vmatpush3.bf16.msra.mxu0 %v2159_v32 }
  0xca   : > { %2028 = vmatprep.subr.bf16.mxu0 %v2205_v28 }
  0xcd   : > { %2029 = vmatpush3.bf16.msra.mxu0 %v2160_v33 }
  0xce   : > { %2030 = vmatprep.subr.bf16.mxu0 %v2205_v28 }
  0xd1   : > { %2031 = vmatpush3.bf16.msra.mxu0 %v2161_v34 }
  0xd2   : > { %2032 = vmatprep.subr.bf16.mxu0 %v2205_v28 }
  0xd5   : > { %2033 = vmatpush3.bf16.msra.mxu0 %v2162_v35 }
  0xd6   : > { %2034 = vmatprep.subr.bf16.mxu0 %v2205_v28 }
  0xd9   : > { %2035 = vmatpush3.bf16.msra.mxu0 %v2163_v36 }
  0xdc   : > { %2037 = vmatmul.mubr.bf16.vlgmr.msra.gmra.mxu0 %v2164_v37 }
 0x15c   : > { %v1939_v38 = vpop.f32.mrf.mxu0  ;;  %v1961_v39 = vpop.f32.mrf.mxu1 }
 0x15e   : > { %v1940_v40 = vpop.f32.mrf.mxu0  ;;  %v1962_v41 = vpop.f32.mrf.mxu1 }
 0x15f   : > { %v1941_v54 = vadd.f32 %v1940_v40, %v1939_v38  ;;  %v1963_v55 = vadd.f32 %v1962_v41, %v1961_v39 }
 0x160   : > { %v1942_v42 = vpop.f32.mrf.mxu0  ;;  %v1964_v43 = vpop.f32.mrf.mxu1 }
 0x161   : > { %v1570_v57 = vadd.f32 %v1963_v55, %v1941_v54 }
 0x162   : > { %v1943_v44 = vpop.f32.mrf.mxu0  ;;  %v1965_v45 = vpop.f32.mrf.mxu1 }
 0x17c   : > { %v1983_v46 = vpop.f32.mrf.mxu0 }
 0x17e   : > { %v1984_v47 = vpop.f32.mrf.mxu0  ;;  %v2005_v48 = vpop.f32.mrf.mxu1 }
 0x17f   : > { %v1985_v56 = vadd.f32 %v1984_v47, %v1983_v46 }
 0x180   : > { %v1986_v49 = vpop.f32.mrf.mxu0  ;;  %v2006_v50 = vpop.f32.mrf.mxu1 }
 0x181   : > { %v1610_v58 = vadd.f32 %v1985_v56, %v1570_v57  ;;  %v2007_v59 = vadd.f32 %v2006_v50, %v2005_v48 }
 0x182   : > { %v1987_v51 = vpop.f32.mrf.mxu0  ;;  %v2008_v52 = vpop.f32.mrf.mxu1 }
 0x183   : > { %v1650_v60 = vadd.f32 %v2007_v59, %v1610_v58 }
 0x184   : > { %v2009_v53 = vpop.f32.mrf.mxu1 }
 0x19c   : > { %v1689_v61 = vpop.f32.mrf.mxu0 }
 0x19d   : > { %v1690_v63 = vadd.f32 %v1689_v61, %v1650_v60 }
 0x19e   : > { %v2038_v1 = vpop.f32.mrf.mxu0 }
 0x19f   : > { %v1702_v2 = vmul.f32 %v1919_v62, %v1690_v63 }
 0x1a0   : > { %v1692_v3 = vpop.f32.mrf.mxu0 }
 0x1a1   : > { %v1710_v4 = vadd.f32 %v1920_v0, %v1702_v2 }
 0x1a2   : > { %v2039_v5 = vpop.f32.mrf.mxu0 }
 0x1a3   : > { %v1711_v6 = vmax.f32 %v1710_v4, 0.0 }
 0x1a5   : > { %1712 = vst [vmem:[%s880_s7] sm:$0xff] %v1711_v6 }
 0x1a6 PF: > { %s14_s19 = sadd.s32 1, %s2203_s19   ;;  %s2714_s15 = smov %s2191_s16 }
 0x1a7   : > { %p11_p10 = scmp.ge.s32.totalorder %s14_s19, 4   ;;  %s2715_s16 = smov %s2267_s23 }
 0x1a8   : > { %s2716_s17 = smov %s2199_s18  ;;  %s2717_s18 = smov %s2719_s20 }
 0x1a9   :  { %13 = sbr.rel (!%p11_p10) target bundleno = 3 (0x3), region = 121 }

// kernel: sound_enc_forward.28
= control target key start
LH: loop header
LB: loop body
LE: loop exit
PB: predicated region body
PF: predicated region fallthrough
CT: control target
= control target key end

     0   :  { %s774_s15 = smov 0   ;;  %s776_s16 = smov 0   ;;  %s867_s0 = inlined_call_operand.vmem [shape: bf16[8,128], index: 0, kind: input, shape index: {}]   ;;  %s868_s1 = inlined_call_operand.vmem [shape: bf16[128,256], index: 1, kind: input, shape index: {}]   ;;  %s869_s2 = inlined_call_operand.vmem [shape: f32[1,256], index: 2, kind: input, shape index: {}]   ;;  %s870_s3 = inlined_call_operand.vmem [shape: f32[1,256], index: 3, kind: input, shape index: {}]   ;;  %s871_s4 = inlined_call_operand.vmem [shape: f32[8,256], index: 4, kind: output, shape index: {}]  }
   0x1   :  { %s778_s17 = smov 0   ;;  %s780_s18 = smov 0  }
   0x2   :  { %s782_s19 = smov 0  }
   0x3 LB: > { %s23_s20 = sadd.s32 1, %s741_s18  ;;  %p66_p1 = scmp.ne.s32.totalorder %s733_s16, %s729_s15  ;;  %s745_s19 = sphi %s782_s19, %s14_s19   ;;  %s741_s18 = sphi %s780_s18, %s875_s18   ;;  %s737_s17 = sphi %s778_s17, %s874_s17   ;;  %s733_s16 = sphi %s776_s16, %s873_s16   ;;  %s729_s15 = sphi %s774_s15, %s872_s15  }
   0x4   : > { %p24_p0 = scmp.ge.s32.totalorder %s23_s20, 2  ;;  %p67_p2 = scmp.eq.s32.totalorder %s745_s19, 0 }
   0x5   : > { %s59_s22 = sadd.s32 1, %s733_s16  ;;  %p610_p5 = scmp.ge.s32.totalorder %s745_s19, 2 }
   0x6   : > { %s877_s20 = smov (%p24_p0, %s23_s20), 0  ;;  %p68_p3 = por %p67_p2, %p66_p1 }
   0x7   : > { %s56_s21 = ssub.s32 %s741_s18, %s877_s20  ;;  %179 = sbr.rel (%p610_p5) target bundleno = 26 (0x1a), region = 20 }
   0x8   : > { %p57_p4 = scmp.eq.s32.totalorder %s56_s21, 0 }
   0xa   : > { %s809_s23 = scalar_select %p57_p4, %s733_s16, %s59_s22  }
   0xc   : > { %182 = sbr.rel (!%p68_p3) target bundleno = 26 (0x1a), region = 24  ;;  %s184_s24 = sand.u32 (%p68_p3), 1, %s733_s16  }
   0xd   : > { %s612_s25 = sshll.u32 (%p68_p3), %s741_s18, 2  ;;  %s611_s26 = sshll.u32 (%p68_p3), %s184_s24, 6 }
   0xe   : > { %s817_s29 = scalar_lea.vmem (%p68_p3), %s868_s1, %s612_s25  ;;  %s186_s30 = scalar_lea.vmem (%p68_p3), [#allocation2], %s611_s26 }
   0xf   : > { %v205_v0 = vld [vmem:[%s817_s29] sm:$0xf] (%p68_p3)  ;;  %v207_v1 = vld [vmem:[%s817_s29 + $0x8] sm:$0xf] (%p68_p3)  ;;  %v209_v2 = vld [vmem:[%s817_s29 + $0x10] sm:$0xf] (%p68_p3) }
  0x10   : > { %206 = vst [vmem:[%s186_s30] sm:$0xf] (%p68_p3), %v205_v0  ;;  %208 = vst [vmem:[%s186_s30 + $0x4] sm:$0xf] (%p68_p3), %v207_v1  ;;  %v211_v3 = vld [vmem:[%s817_s29 + $0x18] sm:$0xf] (%p68_p3) }
  0x11   : > { %v213_v4 = vld [vmem:[%s817_s29 + $0x20] sm:$0xf]  ;;  %210 = vst [vmem:[%s186_s30 + $0x8] sm:$0xf] %v209_v2  ;;  %212 = vst [vmem:[%s186_s30 + $0xc] sm:$0xf] %v211_v3 }
  0x12   : > { %214 = vst [vmem:[%s186_s30 + $0x10] sm:$0xf] %v213_v4  ;;  %v215_v5 = vld [vmem:[%s817_s29 + $0x28] sm:$0xf]  ;;  %v217_v6 = vld [vmem:[%s817_s29 + $0x30] sm:$0xf] }
  0x13   : > { %v219_v7 = vld [vmem:[%s817_s29 + $0x38] sm:$0xf]  ;;  %216 = vst [vmem:[%s186_s30 + $0x14] sm:$0xf] %v215_v5  ;;  %218 = vst [vmem:[%s186_s30 + $0x18] sm:$0xf] %v217_v6 }
  0x14   : > { %220 = vst [vmem:[%s186_s30 + $0x1c] sm:$0xf] %v219_v7  ;;  %v221_v8 = vld [vmem:[%s817_s29 + $0x40] sm:$0xf]  ;;  %v223_v9 = vld [vmem:[%s817_s29 + $0x48] sm:$0xf] }
  0x15   : > { %v225_v10 = vld [vmem:[%s817_s29 + $0x50] sm:$0xf]  ;;  %222 = vst [vmem:[%s186_s30 + $0x20] sm:$0xf] %v221_v8  ;;  %224 = vst [vmem:[%s186_s30 + $0x24] sm:$0xf] %v223_v9 }
  0x16   : > { %226 = vst [vmem:[%s186_s30 + $0x28] sm:$0xf] %v225_v10  ;;  %v227_v11 = vld [vmem:[%s817_s29 + $0x58] sm:$0xf]  ;;  %v229_v12 = vld [vmem:[%s817_s29 + $0x60] sm:$0xf] }
  0x17   : > { %v231_v13 = vld [vmem:[%s817_s29 + $0x68] sm:$0xf]  ;;  %228 = vst [vmem:[%s186_s30 + $0x2c] sm:$0xf] %v227_v11  ;;  %230 = vst [vmem:[%s186_s30 + $0x30] sm:$0xf] %v229_v12 }
  0x18   : > { %232 = vst [vmem:[%s186_s30 + $0x34] sm:$0xf] %v231_v13  ;;  %v233_v14 = vld [vmem:[%s817_s29 + $0x70] sm:$0xf]  ;;  %v235_v15 = vld [vmem:[%s817_s29 + $0x78] sm:$0xf] }
  0x19   : > { %234 = vst [vmem:[%s186_s30 + $0x38] sm:$0xf] %v233_v14  ;;  %236 = vst [vmem:[%s186_s30 + $0x3c] sm:$0xf] %v235_v15 }
  0x1a PF: > { %p613_p6 = scmp.ge.s32.totalorder %s745_s19, 1  ;;  %p303_p7 = scmp.lt.s32.totalorder %s745_s19, 3 }
  0x1c   : > { %p304_p8 = pnand %p613_p6, %p303_p7 }
  0x1d   : > { %s310_s5 = sand.u32 (!%p304_p8), 1, %s729_s15   ;;  %p352_p9 = scmp.lt.s32.totalorder (!%p304_p8), %s737_s17, 1 }
  0x1e   : > { %307 = sbr.rel (%p304_p8) target bundleno = 267 (0x10b), region = 73  ;;  %s614_s6 = sshll.u32 (!%p304_p8), %s310_s5, 6 }
  0x1f   : > { %s312_s7 = scalar_lea.vmem (!%p304_p8), [#allocation2], %s614_s6 }
  0x23   : > { %v747_v16 = vmov 0.0   ;;  %vm748_vm0 = vmmov 0   ;;  %v699_v17 = vld [vmem:[%s312_s7 + $0x38] sm:$0xff]   ;;  %v700_v18 = vld [vmem:[%s312_s7 + $0x30] sm:$0xff]   ;;  %v701_v19 = vld [vmem:[%s312_s7 + $0x28] sm:$0xff]   ;;  %s879_s17 = smov (!%p352_p9, %s737_s17), 1 }
  0x24   : > { %637 = vmatprep.subr.bf16.mxu0 %v747_v16  ;;  %653 = vmatprep.mubr.msk.bf16.mxu0 %vm748_vm0, %v747_v16  ;;  %v702_v20 = vld [vmem:[%s312_s7 + $0x20] sm:$0xff]   ;;  %v703_v21 = vld [vmem:[%s312_s7 + $0x18] sm:$0xff]   ;;  %v704_v22 = vld [vmem:[%s312_s7 + $0x10] sm:$0xff]   ;;  %s354_s12 = scalar_lea.vmem %s869_s2, %s879_s17  ;;  %s357_s15 = scalar_lea.vmem %s870_s3, %s879_s17 }
  0x25   : > { %638 = vmatpush3.bf16.msra.mxu0 %v699_v17  ;;  %v705_v23 = vld [vmem:[%s312_s7 + $0x8] sm:$0xff]   ;;  %v706_v24 = vld [vmem:[%s312_s7] sm:$0xff]   ;;  %s615_s21 = sshll.u32 %s879_s17, 3 }
  0x26   : > { %639 = vmatprep.subr.bf16.mxu0 %v747_v16  ;;  %v367_v25 = vld [vmem:[%s867_s0] sm:$0xf]  ;;  %s365_s25 = scalar_lea.vmem %s871_s4, %s615_s21 }
  0x27   : > { %v624_v26 = vld [vmem:[%s354_s12] ss:$0 sm:$0xff] }
  0x28   : > { %v625_v28 = vld [vmem:[%s357_s15] ss:$0 sm:$0xff] }
  0x29   : > { %640 = vmatpush3.bf16.msra.mxu0 %v700_v18 }
  0x2a   : > { %641 = vmatprep.subr.bf16.mxu0 %v747_v16 }
  0x2d   : > { %642 = vmatpush3.bf16.msra.mxu0 %v701_v19 }
  0x2e   : > { %643 = vmatprep.subr.bf16.mxu0 %v747_v16 }
  0x31   : > { %644 = vmatpush3.bf16.msra.mxu0 %v702_v20 }
  0x32   : > { %645 = vmatprep.subr.bf16.mxu0 %v747_v16 }
  0x35   : > { %646 = vmatpush3.bf16.msra.mxu0 %v703_v21 }
  0x36   : > { %647 = vmatprep.subr.bf16.mxu0 %v747_v16 }
  0x39   : > { %648 = vmatpush3.bf16.msra.mxu0 %v704_v22 }
  0x3a   : > { %649 = vmatprep.subr.bf16.mxu0 %v747_v16 }
  0x3d   : > { %650 = vmatpush3.bf16.msra.mxu0 %v705_v23 }
  0x3e   : > { %651 = vmatprep.subr.bf16.mxu0 %v747_v16 }
  0x41   : > { %652 = vmatpush3.bf16.msra.mxu0 %v706_v24 }
  0x44   : > { %654 = vmatmul.mubr.bf16.vlgmr.msra.gmra.mxu0 %v367_v25 }
 0x104   : > { %v466_v27 = vpop.f32.mrf.mxu0 }
 0x105   : > { %v479_v29 = vmul.f32 %v624_v26, %v466_v27 }
 0x106   : > { %v655_v30 = vpop.f32.mrf.mxu0 }
 0x107   : > { %v487_v31 = vadd.f32 %v625_v28, %v479_v29 }
 0x108   : > { %v469_v32 = vpop.f32.mrf.mxu0 }
 0x109   : > { %488 = vst [vmem:[%s365_s25] sm:$0xff] %v487_v31 }
 0x10a   : > { %v656_v33 = vpop.f32.mrf.mxu0 }
 0x10b PF: > { %s14_s19 = sadd.s32 1, %s745_s19   ;;  %s872_s15 = smov %s733_s16 }
 0x10c   : > { %p11_p10 = scmp.ge.s32.totalorder %s14_s19, 4   ;;  %s873_s16 = smov %s809_s23 }
 0x10d   : > { %s874_s17 = smov %s741_s18  ;;  %s875_s18 = smov %s877_s20 }
 0x10e   :  { %13 = sbr.rel (!%p11_p10) target bundleno = 3 (0x3), region = 121 }

// kernel: sound_enc_forward.30
= control target key start
LH: loop header
LB: loop body
LE: loop exit
PB: predicated region body
PF: predicated region fallthrough
CT: control target
= control target key end

     0   :  { %s3902_s18 = smov 0   ;;  %s3904_s19 = smov 0   ;;  %s4766_s0 = inlined_call_operand.vmem [shape: bf16[8,2304], index: 0, kind: input, shape index: {}]   ;;  %s4767_s1 = inlined_call_operand.vmem [shape: bf16[2304,256], index: 1, kind: input, shape index: {}]   ;;  %s4768_s2 = inlined_call_operand.vmem [shape: f32[1,256], index: 2, kind: input, shape index: {}]   ;;  %s4769_s3 = inlined_call_operand.vmem [shape: f32[1,256], index: 3, kind: input, shape index: {}]   ;;  %s4770_s4 = inlined_call_operand.vmem [shape: f32[8,256], index: 4, kind: input, shape index: {}]   ;;  %s4771_s5 = inlined_call_operand.vmem [shape: f32[8,256], index: 5, kind: output, shape index: {}]  }
   0x1   :  { %s3906_s20 = smov 0   ;;  %s3908_s21 = smov 0  }
   0x2   :  { %s3910_s22 = smov 0  }
   0x3 LB: > { %s24_s23 = sadd.s32 1, %s3866_s21  ;;  %p67_p1 = scmp.ne.s32.totalorder %s3858_s19, %s3854_s18  ;;  %s3870_s22 = sphi %s3910_s22, %s15_s22   ;;  %s3866_s21 = sphi %s3908_s21, %s4775_s21   ;;  %s3862_s20 = sphi %s3906_s20, %s4774_s20   ;;  %s3858_s19 = sphi %s3904_s19, %s4773_s19   ;;  %s3854_s18 = sphi %s3902_s18, %s4772_s18  }
   0x4   : > { %p25_p0 = scmp.ge.s32.totalorder %s24_s23, 2  ;;  %p68_p2 = scmp.eq.s32.totalorder %s3870_s22, 0 }
   0x5   : > { %s60_s25 = sadd.s32 1, %s3858_s19  ;;  %p3259_p5 = scmp.ge.s32.totalorder %s3870_s22, 2 }
   0x6   : > { %s4777_s23 = smov (%p25_p0, %s24_s23), 0  ;;  %p69_p3 = por %p68_p2, %p67_p1 }
   0x7   : > { %s57_s24 = ssub.s32 %s3866_s21, %s4777_s23  ;;  %209 = sbr.rel (%p3259_p5) target bundleno = 208 (0xd0), region = 20 }
   0x8   : > { %p58_p4 = scmp.eq.s32.totalorder %s57_s24, 0 }
   0xa   : > { %s3937_s26 = scalar_select %p58_p4, %s3858_s19, %s60_s25  }
   0xc   : > { %212 = sbr.rel (!%p69_p3) target bundleno = 208 (0xd0), region = 24  ;;  %s214_s27 = sand.u32 (%p69_p3), 1, %s3858_s19  }
   0xd   : > { %s3260_s28 = sshll.u32 (%p69_p3), %s3866_s21, 2  ;;  %s3628_s29 = smul.u32 (%p69_p3), 1152, %s214_s27 }
   0xe   : > { %s3945_s7 = scalar_lea.vmem (%p69_p3), %s4767_s1, %s3260_s28 }
   0xf   : > { %v235_v0 = vld [vmem:[%s3945_s7] sm:$0xf] (%p69_p3)  ;;  %v237_v1 = vld [vmem:[%s3945_s7 + $0x8] sm:$0xf] (%p69_p3)  ;;  %v239_v2 = vld [vmem:[%s3945_s7 + $0x10] sm:$0xf] (%p69_p3) }
  0x10   : > { %v241_v3 = vld [vmem:[%s3945_s7 + $0x18] sm:$0xf] (%p69_p3)  ;;  %v243_v4 = vld [vmem:[%s3945_s7 + $0x20] sm:$0xf] (%p69_p3)  ;;  %s3952_s8 = scalar_lea.vmem (%p69_p3), [#allocation2], %s3628_s29 }
  0x11   : > { %236 = vst [vmem:[%s3952_s8] sm:$0xf] %v235_v0  ;;  %238 = vst [vmem:[%s3952_s8 + $0x4] sm:$0xf] %v237_v1  ;;  %v245_v5 = vld [vmem:[%s3945_s7 + $0x28] sm:$0xf] }
  0x12   : > { %240 = vst [vmem:[%s3952_s8 + $0x8] sm:$0xf] %v239_v2  ;;  %242 = vst [vmem:[%s3952_s8 + $0xc] sm:$0xf] %v241_v3  ;;  %v247_v6 = vld [vmem:[%s3945_s7 + $0x30] sm:$0xf] }
  0x13   : > { %244 = vst [vmem:[%s3952_s8 + $0x10] sm:$0xf] %v243_v4  ;;  %v249_v7 = vld [vmem:[%s3945_s7 + $0x38] sm:$0xf]  ;;  %246 = vst [vmem:[%s3952_s8 + $0x14] sm:$0xf] %v245_v5 }
  0x14   : > { %248 = vst [vmem:[%s3952_s8 + $0x18] sm:$0xf] %v247_v6  ;;  %250 = vst [vmem:[%s3952_s8 + $0x1c] sm:$0xf] %v249_v7  ;;  %v251_v8 = vld [vmem:[%s3945_s7 + $0x40] sm:$0xf] }
  0x15   : > { %v253_v9 = vld [vmem:[%s3945_s7 + $0x48] sm:$0xf]  ;;  %v255_v10 = vld [vmem:[%s3945_s7 + $0x50] sm:$0xf]  ;;  %252 = vst [vmem:[%s3952_s8 + $0x20] sm:$0xf] %v251_v8 }
  0x16   : > { %254 = vst [vmem:[%s3952_s8 + $0x24] sm:$0xf] %v253_v9  ;;  %256 = vst [vmem:[%s3952_s8 + $0x28] sm:$0xf] %v255_v10  ;;  %v257_v11 = vld [vmem:[%s3945_s7 + $0x58] sm:$0xf] }
  0x17   : > { %v259_v12 = vld [vmem:[%s3945_s7 + $0x60] sm:$0xf]  ;;  %v261_v13 = vld [vmem:[%s3945_s7 + $0x68] sm:$0xf]  ;;  %258 = vst [vmem:[%s3952_s8 + $0x2c] sm:$0xf] %v257_v11 }
  0x18   : > { %260 = vst [vmem:[%s3952_s8 + $0x30] sm:$0xf] %v259_v12  ;;  %262 = vst [vmem:[%s3952_s8 + $0x34] sm:$0xf] %v261_v13  ;;  %v263_v14 = vld [vmem:[%s3945_s7 + $0x70] sm:$0xf] }
  0x19   : > { %v265_v15 = vld [vmem:[%s3945_s7 + $0x78] sm:$0xf]  ;;  %v267_v16 = vld [vmem:[%s3945_s7 + $0x80] sm:$0xf]  ;;  %264 = vst [vmem:[%s3952_s8 + $0x38] sm:$0xf] %v263_v14 }
  0x1a   : > { %266 = vst [vmem:[%s3952_s8 + $0x3c] sm:$0xf] %v265_v15  ;;  %268 = vst [vmem:[%s3952_s8 + $0x40] sm:$0xf] %v267_v16  ;;  %v269_v17 = vld [vmem:[%s3945_s7 + $0x88] sm:$0xf] }
  0x1b   : > { %v271_v18 = vld [vmem:[%s3945_s7 + $0x90] sm:$0xf]  ;;  %v273_v19 = vld [vmem:[%s3945_s7 + $0x98] sm:$0xf]  ;;  %270 = vst [vmem:[%s3952_s8 + $0x44] sm:$0xf] %v269_v17 }
  0x1c   : > { %272 = vst [vmem:[%s3952_s8 + $0x48] sm:$0xf] %v271_v18  ;;  %274 = vst [vmem:[%s3952_s8 + $0x4c] sm:$0xf] %v273_v19  ;;  %v275_v20 = vld [vmem:[%s3945_s7 + $0xa0] sm:$0xf] }
  0x1d   : > { %v277_v21 = vld [vmem:[%s3945_s7 + $0xa8] sm:$0xf]  ;;  %v279_v22 = vld [vmem:[%s3945_s7 + $0xb0] sm:$0xf]  ;;  %276 = vst [vmem:[%s3952_s8 + $0x50] sm:$0xf] %v275_v20 }
  0x1e   : > { %278 = vst [vmem:[%s3952_s8 + $0x54] sm:$0xf] %v277_v21  ;;  %280 = vst [vmem:[%s3952_s8 + $0x58] sm:$0xf] %v279_v22  ;;  %v281_v23 = vld [vmem:[%s3945_s7 + $0xb8] sm:$0xf] }
  0x1f   : > { %v283_v24 = vld [vmem:[%s3945_s7 + $0xc0] sm:$0xf]  ;;  %v285_v25 = vld [vmem:[%s3945_s7 + $0xc8] sm:$0xf]  ;;  %282 = vst [vmem:[%s3952_s8 + $0x5c] sm:$0xf] %v281_v23 }
  0x20   : > { %284 = vst [vmem:[%s3952_s8 + $0x60] sm:$0xf] %v283_v24  ;;  %286 = vst [vmem:[%s3952_s8 + $0x64] sm:$0xf] %v285_v25  ;;  %v287_v26 = vld [vmem:[%s3945_s7 + $0xd0] sm:$0xf] }
  0x21   : > { %v289_v27 = vld [vmem:[%s3945_s7 + $0xd8] sm:$0xf]  ;;  %v291_v28 = vld [vmem:[%s3945_s7 + $0xe0] sm:$0xf]  ;;  %288 = vst [vmem:[%s3952_s8 + $0x68] sm:$0xf] %v287_v26 }
  0x22   : > { %290 = vst [vmem:[%s3952_s8 + $0x6c] sm:$0xf] %v289_v27  ;;  %292 = vst [vmem:[%s3952_s8 + $0x70] sm:$0xf] %v291_v28  ;;  %v293_v29 = vld [vmem:[%s3945_s7 + $0xe8] sm:$0xf] }
  0x23   : > { %v295_v30 = vld [vmem:[%s3945_s7 + $0xf0] sm:$0xf]  ;;  %v297_v31 = vld [vmem:[%s3945_s7 + $0xf8] sm:$0xf]  ;;  %294 = vst [vmem:[%s3952_s8 + $0x74] sm:$0xf] %v293_v29 }
  0x24   : > { %296 = vst [vmem:[%s3952_s8 + $0x78] sm:$0xf] %v295_v30  ;;  %298 = vst [vmem:[%s3952_s8 + $0x7c] sm:$0xf] %v297_v31  ;;  %v299_v32 = vld [vmem:[%s3945_s7 + $0x100] sm:$0xf] }
  0x25   : > { %v301_v33 = vld [vmem:[%s3945_s7 + $0x108] sm:$0xf]  ;;  %v303_v34 = vld [vmem:[%s3945_s7 + $0x110] sm:$0xf]  ;;  %300 = vst [vmem:[%s3952_s8 + $0x80] sm:$0xf] %v299_v32 }
  0x26   : > { %302 = vst [vmem:[%s3952_s8 + $0x84] sm:$0xf] %v301_v33  ;;  %304 = vst [vmem:[%s3952_s8 + $0x88] sm:$0xf] %v303_v34  ;;  %v305_v35 = vld [vmem:[%s3945_s7 + $0x118] sm:$0xf] }
  0x27   : > { %v307_v36 = vld [vmem:[%s3945_s7 + $0x120] sm:$0xf]  ;;  %v309_v37 = vld [vmem:[%s3945_s7 + $0x128] sm:$0xf]  ;;  %306 = vst [vmem:[%s3952_s8 + $0x8c] sm:$0xf] %v305_v35 }
  0x28   : > { %308 = vst [vmem:[%s3952_s8 + $0x90] sm:$0xf] %v307_v36  ;;  %310 = vst [vmem:[%s3952_s8 + $0x94] sm:$0xf] %v309_v37  ;;  %v311_v38 = vld [vmem:[%s3945_s7 + $0x130] sm:$0xf] }
  0x29   : > { %v313_v39 = vld [vmem:[%s3945_s7 + $0x138] sm:$0xf]  ;;  %v315_v40 = vld [vmem:[%s3945_s7 + $0x140] sm:$0xf]  ;;  %312 = vst [vmem:[%s3952_s8 + $0x98] sm:$0xf] %v311_v38 }
  0x2a   : > { %314 = vst [vmem:[%s3952_s8 + $0x9c] sm:$0xf] %v313_v39  ;;  %316 = vst [vmem:[%s3952_s8 + $0xa0] sm:$0xf] %v315_v40  ;;  %v317_v41 = vld [vmem:[%s3945_s7 + $0x148] sm:$0xf] }
  0x2b   : > { %v319_v42 = vld [vmem:[%s3945_s7 + $0x150] sm:$0xf]  ;;  %v321_v43 = vld [vmem:[%s3945_s7 + $0x158] sm:$0xf]  ;;  %318 = vst [vmem:[%s3952_s8 + $0xa4] sm:$0xf] %v317_v41 }
  0x2c   : > { %320 = vst [vmem:[%s3952_s8 + $0xa8] sm:$0xf] %v319_v42  ;;  %322 = vst [vmem:[%s3952_s8 + $0xac] sm:$0xf] %v321_v43  ;;  %v323_v44 = vld [vmem:[%s3945_s7 + $0x160] sm:$0xf] }
  0x2d   : > { %v325_v45 = vld [vmem:[%s3945_s7 + $0x168] sm:$0xf]  ;;  %v327_v46 = vld [vmem:[%s3945_s7 + $0x170] sm:$0xf]  ;;  %324 = vst [vmem:[%s3952_s8 + $0xb0] sm:$0xf] %v323_v44 }
  0x2e   : > { %326 = vst [vmem:[%s3952_s8 + $0xb4] sm:$0xf] %v325_v45  ;;  %328 = vst [vmem:[%s3952_s8 + $0xb8] sm:$0xf] %v327_v46  ;;  %v329_v47 = vld [vmem:[%s3945_s7 + $0x178] sm:$0xf] }
  0x2f   : > { %v331_v48 = vld [vmem:[%s3945_s7 + $0x180] sm:$0xf]  ;;  %v333_v49 = vld [vmem:[%s3945_s7 + $0x188] sm:$0xf]  ;;  %330 = vst [vmem:[%s3952_s8 + $0xbc] sm:$0xf] %v329_v47 }
  0x30   : > { %332 = vst [vmem:[%s3952_s8 + $0xc0] sm:$0xf] %v331_v48  ;;  %334 = vst [vmem:[%s3952_s8 + $0xc4] sm:$0xf] %v333_v49  ;;  %v335_v50 = vld [vmem:[%s3945_s7 + $0x190] sm:$0xf] }
  0x31   : > { %v337_v51 = vld [vmem:[%s3945_s7 + $0x198] sm:$0xf]  ;;  %v339_v52 = vld [vmem:[%s3945_s7 + $0x1a0] sm:$0xf]  ;;  %336 = vst [vmem:[%s3952_s8 + $0xc8] sm:$0xf] %v335_v50 }
  0x32   : > { %338 = vst [vmem:[%s3952_s8 + $0xcc] sm:$0xf] %v337_v51  ;;  %340 = vst [vmem:[%s3952_s8 + $0xd0] sm:$0xf] %v339_v52  ;;  %v341_v53 = vld [vmem:[%s3945_s7 + $0x1a8] sm:$0xf] }
  0x33   : > { %v343_v54 = vld [vmem:[%s3945_s7 + $0x1b0] sm:$0xf]  ;;  %v345_v55 = vld [vmem:[%s3945_s7 + $0x1b8] sm:$0xf]  ;;  %342 = vst [vmem:[%s3952_s8 + $0xd4] sm:$0xf] %v341_v53 }
  0x34   : > { %344 = vst [vmem:[%s3952_s8 + $0xd8] sm:$0xf] %v343_v54  ;;  %346 = vst [vmem:[%s3952_s8 + $0xdc] sm:$0xf] %v345_v55  ;;  %v347_v56 = vld [vmem:[%s3945_s7 + $0x1c0] sm:$0xf] }
  0x35   : > { %v349_v57 = vld [vmem:[%s3945_s7 + $0x1c8] sm:$0xf]  ;;  %v351_v58 = vld [vmem:[%s3945_s7 + $0x1d0] sm:$0xf]  ;;  %348 = vst [vmem:[%s3952_s8 + $0xe0] sm:$0xf] %v347_v56 }
  0x36   : > { %350 = vst [vmem:[%s3952_s8 + $0xe4] sm:$0xf] %v349_v57  ;;  %352 = vst [vmem:[%s3952_s8 + $0xe8] sm:$0xf] %v351_v58  ;;  %v353_v59 = vld [vmem:[%s3945_s7 + $0x1d8] sm:$0xf] }
  0x37   : > { %v355_v60 = vld [vmem:[%s3945_s7 + $0x1e0] sm:$0xf]  ;;  %v357_v61 = vld [vmem:[%s3945_s7 + $0x1e8] sm:$0xf]  ;;  %354 = vst [vmem:[%s3952_s8 + $0xec] sm:$0xf] %v353_v59 }
  0x38   : > { %356 = vst [vmem:[%s3952_s8 + $0xf0] sm:$0xf] %v355_v60  ;;  %358 = vst [vmem:[%s3952_s8 + $0xf4] sm:$0xf] %v357_v61  ;;  %v359_v62 = vld [vmem:[%s3945_s7 + $0x1f0] sm:$0xf] }
  0x39   : > { %v361_v63 = vld [vmem:[%s3945_s7 + $0x1f8] sm:$0xf]  ;;  %v363_v0 = vld [vmem:[%s3945_s7 + $0x200] sm:$0xf]  ;;  %360 = vst [vmem:[%s3952_s8 + $0xf8] sm:$0xf] %v359_v62 }
  0x3a   : > { %362 = vst [vmem:[%s3952_s8 + $0xfc] sm:$0xf] %v361_v63  ;;  %364 = vst [vmem:[%s3952_s8 + $0x100] sm:$0xf] %v363_v0  ;;  %v365_v1 = vld [vmem:[%s3945_s7 + $0x208] sm:$0xf] }
  0x3b   : > { %v367_v2 = vld [vmem:[%s3945_s7 + $0x210] sm:$0xf]  ;;  %v369_v3 = vld [vmem:[%s3945_s7 + $0x218] sm:$0xf]  ;;  %366 = vst [vmem:[%s3952_s8 + $0x104] sm:$0xf] %v365_v1 }
  0x3c   : > { %368 = vst [vmem:[%s3952_s8 + $0x108] sm:$0xf] %v367_v2  ;;  %370 = vst [vmem:[%s3952_s8 + $0x10c] sm:$0xf] %v369_v3  ;;  %v371_v4 = vld [vmem:[%s3945_s7 + $0x220] sm:$0xf] }
  0x3d   : > { %v373_v5 = vld [vmem:[%s3945_s7 + $0x228] sm:$0xf]  ;;  %v375_v6 = vld [vmem:[%s3945_s7 + $0x230] sm:$0xf]  ;;  %372 = vst [vmem:[%s3952_s8 + $0x110] sm:$0xf] %v371_v4 }
  0x3e   : > { %374 = vst [vmem:[%s3952_s8 + $0x114] sm:$0xf] %v373_v5  ;;  %376 = vst [vmem:[%s3952_s8 + $0x118] sm:$0xf] %v375_v6  ;;  %v377_v7 = vld [vmem:[%s3945_s7 + $0x238] sm:$0xf] }
  0x3f   : > { %v379_v8 = vld [vmem:[%s3945_s7 + $0x240] sm:$0xf]  ;;  %v381_v9 = vld [vmem:[%s3945_s7 + $0x248] sm:$0xf]  ;;  %378 = vst [vmem:[%s3952_s8 + $0x11c] sm:$0xf] %v377_v7 }
  0x40   : > { %380 = vst [vmem:[%s3952_s8 + $0x120] sm:$0xf] %v379_v8  ;;  %382 = vst [vmem:[%s3952_s8 + $0x124] sm:$0xf] %v381_v9  ;;  %v383_v10 = vld [vmem:[%s3945_s7 + $0x250] sm:$0xf] }
  0x41   : > { %v385_v11 = vld [vmem:[%s3945_s7 + $0x258] sm:$0xf]  ;;  %v387_v12 = vld [vmem:[%s3945_s7 + $0x260] sm:$0xf]  ;;  %384 = vst [vmem:[%s3952_s8 + $0x128] sm:$0xf] %v383_v10 }
  0x42   : > { %386 = vst [vmem:[%s3952_s8 + $0x12c] sm:$0xf] %v385_v11  ;;  %388 = vst [vmem:[%s3952_s8 + $0x130] sm:$0xf] %v387_v12  ;;  %v389_v13 = vld [vmem:[%s3945_s7 + $0x268] sm:$0xf] }
  0x43   : > { %v391_v14 = vld [vmem:[%s3945_s7 + $0x270] sm:$0xf]  ;;  %v393_v15 = vld [vmem:[%s3945_s7 + $0x278] sm:$0xf]  ;;  %390 = vst [vmem:[%s3952_s8 + $0x134] sm:$0xf] %v389_v13 }
  0x44   : > { %392 = vst [vmem:[%s3952_s8 + $0x138] sm:$0xf] %v391_v14  ;;  %394 = vst [vmem:[%s3952_s8 + $0x13c] sm:$0xf] %v393_v15  ;;  %v395_v16 = vld [vmem:[%s3945_s7 + $0x280] sm:$0xf] }
  0x45   : > { %v397_v17 = vld [vmem:[%s3945_s7 + $0x288] sm:$0xf]  ;;  %v399_v18 = vld [vmem:[%s3945_s7 + $0x290] sm:$0xf]  ;;  %396 = vst [vmem:[%s3952_s8 + $0x140] sm:$0xf] %v395_v16 }
  0x46   : > { %398 = vst [vmem:[%s3952_s8 + $0x144] sm:$0xf] %v397_v17  ;;  %400 = vst [vmem:[%s3952_s8 + $0x148] sm:$0xf] %v399_v18  ;;  %v401_v19 = vld [vmem:[%s3945_s7 + $0x298] sm:$0xf] }
  0x47   : > { %v403_v20 = vld [vmem:[%s3945_s7 + $0x2a0] sm:$0xf]  ;;  %v405_v21 = vld [vmem:[%s3945_s7 + $0x2a8] sm:$0xf]  ;;  %402 = vst [vmem:[%s3952_s8 + $0x14c] sm:$0xf] %v401_v19 }
  0x48   : > { %404 = vst [vmem:[%s3952_s8 + $0x150] sm:$0xf] %v403_v20  ;;  %406 = vst [vmem:[%s3952_s8 + $0x154] sm:$0xf] %v405_v21  ;;  %v407_v22 = vld [vmem:[%s3945_s7 + $0x2b0] sm:$0xf] }
  0x49   : > { %v409_v23 = vld [vmem:[%s3945_s7 + $0x2b8] sm:$0xf]  ;;  %v411_v24 = vld [vmem:[%s3945_s7 + $0x2c0] sm:$0xf]  ;;  %408 = vst [vmem:[%s3952_s8 + $0x158] sm:$0xf] %v407_v22 }
  0x4a   : > { %410 = vst [vmem:[%s3952_s8 + $0x15c] sm:$0xf] %v409_v23  ;;  %412 = vst [vmem:[%s3952_s8 + $0x160] sm:$0xf] %v411_v24  ;;  %v413_v25 = vld [vmem:[%s3945_s7 + $0x2c8] sm:$0xf] }
  0x4b   : > { %v415_v26 = vld [vmem:[%s3945_s7 + $0x2d0] sm:$0xf]  ;;  %v417_v27 = vld [vmem:[%s3945_s7 + $0x2d8] sm:$0xf]  ;;  %414 = vst [vmem:[%s3952_s8 + $0x164] sm:$0xf] %v413_v25 }
  0x4c   : > { %416 = vst [vmem:[%s3952_s8 + $0x168] sm:$0xf] %v415_v26  ;;  %418 = vst [vmem:[%s3952_s8 + $0x16c] sm:$0xf] %v417_v27  ;;  %v419_v28 = vld [vmem:[%s3945_s7 + $0x2e0] sm:$0xf] }
  0x4d   : > { %v421_v29 = vld [vmem:[%s3945_s7 + $0x2e8] sm:$0xf]  ;;  %v423_v30 = vld [vmem:[%s3945_s7 + $0x2f0] sm:$0xf]  ;;  %420 = vst [vmem:[%s3952_s8 + $0x170] sm:$0xf] %v419_v28 }
  0x4e   : > { %422 = vst [vmem:[%s3952_s8 + $0x174] sm:$0xf] %v421_v29  ;;  %424 = vst [vmem:[%s3952_s8 + $0x178] sm:$0xf] %v423_v30  ;;  %v425_v31 = vld [vmem:[%s3945_s7 + $0x2f8] sm:$0xf] }
  0x4f   : > { %v427_v32 = vld [vmem:[%s3945_s7 + $0x300] sm:$0xf]  ;;  %v429_v33 = vld [vmem:[%s3945_s7 + $0x308] sm:$0xf]  ;;  %426 = vst [vmem:[%s3952_s8 + $0x17c] sm:$0xf] %v425_v31 }
  0x50   : > { %428 = vst [vmem:[%s3952_s8 + $0x180] sm:$0xf] %v427_v32  ;;  %430 = vst [vmem:[%s3952_s8 + $0x184] sm:$0xf] %v429_v33  ;;  %v431_v34 = vld [vmem:[%s3945_s7 + $0x310] sm:$0xf] }
  0x51   : > { %v433_v35 = vld [vmem:[%s3945_s7 + $0x318] sm:$0xf]  ;;  %v435_v36 = vld [vmem:[%s3945_s7 + $0x320] sm:$0xf]  ;;  %432 = vst [vmem:[%s3952_s8 + $0x188] sm:$0xf] %v431_v34 }
  0x52   : > { %434 = vst [vmem:[%s3952_s8 + $0x18c] sm:$0xf] %v433_v35  ;;  %436 = vst [vmem:[%s3952_s8 + $0x190] sm:$0xf] %v435_v36  ;;  %v437_v37 = vld [vmem:[%s3945_s7 + $0x328] sm:$0xf] }
  0x53   : > { %v439_v38 = vld [vmem:[%s3945_s7 + $0x330] sm:$0xf]  ;;  %v441_v39 = vld [vmem:[%s3945_s7 + $0x338] sm:$0xf]  ;;  %438 = vst [vmem:[%s3952_s8 + $0x194] sm:$0xf] %v437_v37 }
  0x54   : > { %440 = vst [vmem:[%s3952_s8 + $0x198] sm:$0xf] %v439_v38  ;;  %442 = vst [vmem:[%s3952_s8 + $0x19c] sm:$0xf] %v441_v39  ;;  %v443_v40 = vld [vmem:[%s3945_s7 + $0x340] sm:$0xf] }
  0x55   : > { %v445_v41 = vld [vmem:[%s3945_s7 + $0x348] sm:$0xf]  ;;  %v447_v42 = vld [vmem:[%s3945_s7 + $0x350] sm:$0xf]  ;;  %444 = vst [vmem:[%s3952_s8 + $0x1a0] sm:$0xf] %v443_v40 }
  0x56   : > { %446 = vst [vmem:[%s3952_s8 + $0x1a4] sm:$0xf] %v445_v41  ;;  %448 = vst [vmem:[%s3952_s8 + $0x1a8] sm:$0xf] %v447_v42  ;;  %v449_v43 = vld [vmem:[%s3945_s7 + $0x358] sm:$0xf] }
  0x57   : > { %v451_v44 = vld [vmem:[%s3945_s7 + $0x360] sm:$0xf]  ;;  %v453_v45 = vld [vmem:[%s3945_s7 + $0x368] sm:$0xf]  ;;  %450 = vst [vmem:[%s3952_s8 + $0x1ac] sm:$0xf] %v449_v43 }
  0x58   : > { %452 = vst [vmem:[%s3952_s8 + $0x1b0] sm:$0xf] %v451_v44  ;;  %454 = vst [vmem:[%s3952_s8 + $0x1b4] sm:$0xf] %v453_v45  ;;  %v455_v46 = vld [vmem:[%s3945_s7 + $0x370] sm:$0xf] }
  0x59   : > { %v457_v47 = vld [vmem:[%s3945_s7 + $0x378] sm:$0xf]  ;;  %v459_v48 = vld [vmem:[%s3945_s7 + $0x380] sm:$0xf]  ;;  %456 = vst [vmem:[%s3952_s8 + $0x1b8] sm:$0xf] %v455_v46 }
  0x5a   : > { %458 = vst [vmem:[%s3952_s8 + $0x1bc] sm:$0xf] %v457_v47  ;;  %460 = vst [vmem:[%s3952_s8 + $0x1c0] sm:$0xf] %v459_v48  ;;  %v461_v49 = vld [vmem:[%s3945_s7 + $0x388] sm:$0xf] }
  0x5b   : > { %v463_v50 = vld [vmem:[%s3945_s7 + $0x390] sm:$0xf]  ;;  %v465_v51 = vld [vmem:[%s3945_s7 + $0x398] sm:$0xf]  ;;  %462 = vst [vmem:[%s3952_s8 + $0x1c4] sm:$0xf] %v461_v49 }
  0x5c   : > { %464 = vst [vmem:[%s3952_s8 + $0x1c8] sm:$0xf] %v463_v50  ;;  %466 = vst [vmem:[%s3952_s8 + $0x1cc] sm:$0xf] %v465_v51  ;;  %v467_v52 = vld [vmem:[%s3945_s7 + $0x3a0] sm:$0xf] }
  0x5d   : > { %v469_v53 = vld [vmem:[%s3945_s7 + $0x3a8] sm:$0xf]  ;;  %v471_v54 = vld [vmem:[%s3945_s7 + $0x3b0] sm:$0xf]  ;;  %468 = vst [vmem:[%s3952_s8 + $0x1d0] sm:$0xf] %v467_v52 }
  0x5e   : > { %470 = vst [vmem:[%s3952_s8 + $0x1d4] sm:$0xf] %v469_v53  ;;  %472 = vst [vmem:[%s3952_s8 + $0x1d8] sm:$0xf] %v471_v54  ;;  %v473_v55 = vld [vmem:[%s3945_s7 + $0x3b8] sm:$0xf] }
  0x5f   : > { %v475_v56 = vld [vmem:[%s3945_s7 + $0x3c0] sm:$0xf]  ;;  %v477_v57 = vld [vmem:[%s3945_s7 + $0x3c8] sm:$0xf]  ;;  %474 = vst [vmem:[%s3952_s8 + $0x1dc] sm:$0xf] %v473_v55 }
  0x60   : > { %476 = vst [vmem:[%s3952_s8 + $0x1e0] sm:$0xf] %v475_v56  ;;  %478 = vst [vmem:[%s3952_s8 + $0x1e4] sm:$0xf] %v477_v57  ;;  %v479_v58 = vld [vmem:[%s3945_s7 + $0x3d0] sm:$0xf] }
  0x61   : > { %v481_v59 = vld [vmem:[%s3945_s7 + $0x3d8] sm:$0xf]  ;;  %v483_v60 = vld [vmem:[%s3945_s7 + $0x3e0] sm:$0xf]  ;;  %480 = vst [vmem:[%s3952_s8 + $0x1e8] sm:$0xf] %v479_v58 }
  0x62   : > { %482 = vst [vmem:[%s3952_s8 + $0x1ec] sm:$0xf] %v481_v59  ;;  %484 = vst [vmem:[%s3952_s8 + $0x1f0] sm:$0xf] %v483_v60  ;;  %v485_v61 = vld [vmem:[%s3945_s7 + $0x3e8] sm:$0xf] }
  0x63   : > { %v487_v62 = vld [vmem:[%s3945_s7 + $0x3f0] sm:$0xf]  ;;  %v489_v63 = vld [vmem:[%s3945_s7 + $0x3f8] sm:$0xf]  ;;  %486 = vst [vmem:[%s3952_s8 + $0x1f4] sm:$0xf] %v485_v61 }
  0x64   : > { %488 = vst [vmem:[%s3952_s8 + $0x1f8] sm:$0xf] %v487_v62  ;;  %490 = vst [vmem:[%s3952_s8 + $0x1fc] sm:$0xf] %v489_v63  ;;  %v491_v0 = vld [vmem:[%s3945_s7 + $0x400] sm:$0xf] }
  0x65   : > { %v493_v1 = vld [vmem:[%s3945_s7 + $0x408] sm:$0xf]  ;;  %v495_v2 = vld [vmem:[%s3945_s7 + $0x410] sm:$0xf]  ;;  %492 = vst [vmem:[%s3952_s8 + $0x200] sm:$0xf] %v491_v0 }
  0x66   : > { %494 = vst [vmem:[%s3952_s8 + $0x204] sm:$0xf] %v493_v1  ;;  %496 = vst [vmem:[%s3952_s8 + $0x208] sm:$0xf] %v495_v2  ;;  %v497_v3 = vld [vmem:[%s3945_s7 + $0x418] sm:$0xf] }
  0x67   : > { %v499_v4 = vld [vmem:[%s3945_s7 + $0x420] sm:$0xf]  ;;  %v501_v5 = vld [vmem:[%s3945_s7 + $0x428] sm:$0xf]  ;;  %498 = vst [vmem:[%s3952_s8 + $0x20c] sm:$0xf] %v497_v3 }
  0x68   : > { %500 = vst [vmem:[%s3952_s8 + $0x210] sm:$0xf] %v499_v4  ;;  %502 = vst [vmem:[%s3952_s8 + $0x214] sm:$0xf] %v501_v5  ;;  %v503_v6 = vld [vmem:[%s3945_s7 + $0x430] sm:$0xf] }
  0x69   : > { %v505_v7 = vld [vmem:[%s3945_s7 + $0x438] sm:$0xf]  ;;  %v507_v8 = vld [vmem:[%s3945_s7 + $0x440] sm:$0xf]  ;;  %504 = vst [vmem:[%s3952_s8 + $0x218] sm:$0xf] %v503_v6 }
  0x6a   : > { %506 = vst [vmem:[%s3952_s8 + $0x21c] sm:$0xf] %v505_v7  ;;  %508 = vst [vmem:[%s3952_s8 + $0x220] sm:$0xf] %v507_v8  ;;  %v509_v9 = vld [vmem:[%s3945_s7 + $0x448] sm:$0xf] }
  0x6b   : > { %v511_v10 = vld [vmem:[%s3945_s7 + $0x450] sm:$0xf]  ;;  %v513_v11 = vld [vmem:[%s3945_s7 + $0x458] sm:$0xf]  ;;  %510 = vst [vmem:[%s3952_s8 + $0x224] sm:$0xf] %v509_v9 }
  0x6c   : > { %512 = vst [vmem:[%s3952_s8 + $0x228] sm:$0xf] %v511_v10  ;;  %514 = vst [vmem:[%s3952_s8 + $0x22c] sm:$0xf] %v513_v11  ;;  %v515_v12 = vld [vmem:[%s3945_s7 + $0x460] sm:$0xf] }
  0x6d   : > { %v517_v13 = vld [vmem:[%s3945_s7 + $0x468] sm:$0xf]  ;;  %v519_v14 = vld [vmem:[%s3945_s7 + $0x470] sm:$0xf]  ;;  %516 = vst [vmem:[%s3952_s8 + $0x230] sm:$0xf] %v515_v12 }
  0x6e   : > { %518 = vst [vmem:[%s3952_s8 + $0x234] sm:$0xf] %v517_v13  ;;  %520 = vst [vmem:[%s3952_s8 + $0x238] sm:$0xf] %v519_v14  ;;  %v521_v15 = vld [vmem:[%s3945_s7 + $0x478] sm:$0xf] }
  0x6f   : > { %v523_v16 = vld [vmem:[%s3945_s7 + $0x480] sm:$0xf]  ;;  %v525_v17 = vld [vmem:[%s3945_s7 + $0x488] sm:$0xf]  ;;  %522 = vst [vmem:[%s3952_s8 + $0x23c] sm:$0xf] %v521_v15 }
  0x70   : > { %524 = vst [vmem:[%s3952_s8 + $0x240] sm:$0xf] %v523_v16  ;;  %526 = vst [vmem:[%s3952_s8 + $0x244] sm:$0xf] %v525_v17  ;;  %v527_v18 = vld [vmem:[%s3945_s7 + $0x490] sm:$0xf] }
  0x71   : > { %v529_v19 = vld [vmem:[%s3945_s7 + $0x498] sm:$0xf]  ;;  %v531_v20 = vld [vmem:[%s3945_s7 + $0x4a0] sm:$0xf]  ;;  %528 = vst [vmem:[%s3952_s8 + $0x248] sm:$0xf] %v527_v18 }
  0x72   : > { %530 = vst [vmem:[%s3952_s8 + $0x24c] sm:$0xf] %v529_v19  ;;  %532 = vst [vmem:[%s3952_s8 + $0x250] sm:$0xf] %v531_v20  ;;  %v533_v21 = vld [vmem:[%s3945_s7 + $0x4a8] sm:$0xf] }
  0x73   : > { %v535_v22 = vld [vmem:[%s3945_s7 + $0x4b0] sm:$0xf]  ;;  %v537_v23 = vld [vmem:[%s3945_s7 + $0x4b8] sm:$0xf]  ;;  %534 = vst [vmem:[%s3952_s8 + $0x254] sm:$0xf] %v533_v21 }
  0x74   : > { %536 = vst [vmem:[%s3952_s8 + $0x258] sm:$0xf] %v535_v22  ;;  %538 = vst [vmem:[%s3952_s8 + $0x25c] sm:$0xf] %v537_v23  ;;  %v539_v24 = vld [vmem:[%s3945_s7 + $0x4c0] sm:$0xf] }
  0x75   : > { %v541_v25 = vld [vmem:[%s3945_s7 + $0x4c8] sm:$0xf]  ;;  %v543_v26 = vld [vmem:[%s3945_s7 + $0x4d0] sm:$0xf]  ;;  %540 = vst [vmem:[%s3952_s8 + $0x260] sm:$0xf] %v539_v24 }
  0x76   : > { %542 = vst [vmem:[%s3952_s8 + $0x264] sm:$0xf] %v541_v25  ;;  %544 = vst [vmem:[%s3952_s8 + $0x268] sm:$0xf] %v543_v26  ;;  %v545_v27 = vld [vmem:[%s3945_s7 + $0x4d8] sm:$0xf] }
  0x77   : > { %v547_v28 = vld [vmem:[%s3945_s7 + $0x4e0] sm:$0xf]  ;;  %v549_v29 = vld [vmem:[%s3945_s7 + $0x4e8] sm:$0xf]  ;;  %546 = vst [vmem:[%s3952_s8 + $0x26c] sm:$0xf] %v545_v27 }
  0x78   : > { %548 = vst [vmem:[%s3952_s8 + $0x270] sm:$0xf] %v547_v28  ;;  %550 = vst [vmem:[%s3952_s8 + $0x274] sm:$0xf] %v549_v29  ;;  %v551_v30 = vld [vmem:[%s3945_s7 + $0x4f0] sm:$0xf] }
  0x79   : > { %v553_v31 = vld [vmem:[%s3945_s7 + $0x4f8] sm:$0xf]  ;;  %v555_v32 = vld [vmem:[%s3945_s7 + $0x500] sm:$0xf]  ;;  %552 = vst [vmem:[%s3952_s8 + $0x278] sm:$0xf] %v551_v30 }
  0x7a   : > { %554 = vst [vmem:[%s3952_s8 + $0x27c] sm:$0xf] %v553_v31  ;;  %556 = vst [vmem:[%s3952_s8 + $0x280] sm:$0xf] %v555_v32  ;;  %v557_v33 = vld [vmem:[%s3945_s7 + $0x508] sm:$0xf] }
  0x7b   : > { %v559_v34 = vld [vmem:[%s3945_s7 + $0x510] sm:$0xf]  ;;  %v561_v35 = vld [vmem:[%s3945_s7 + $0x518] sm:$0xf]  ;;  %558 = vst [vmem:[%s3952_s8 + $0x284] sm:$0xf] %v557_v33 }
  0x7c   : > { %560 = vst [vmem:[%s3952_s8 + $0x288] sm:$0xf] %v559_v34  ;;  %562 = vst [vmem:[%s3952_s8 + $0x28c] sm:$0xf] %v561_v35  ;;  %v563_v36 = vld [vmem:[%s3945_s7 + $0x520] sm:$0xf] }
  0x7d   : > { %v565_v37 = vld [vmem:[%s3945_s7 + $0x528] sm:$0xf]  ;;  %v567_v38 = vld [vmem:[%s3945_s7 + $0x530] sm:$0xf]  ;;  %564 = vst [vmem:[%s3952_s8 + $0x290] sm:$0xf] %v563_v36 }
  0x7e   : > { %566 = vst [vmem:[%s3952_s8 + $0x294] sm:$0xf] %v565_v37  ;;  %568 = vst [vmem:[%s3952_s8 + $0x298] sm:$0xf] %v567_v38  ;;  %v569_v39 = vld [vmem:[%s3945_s7 + $0x538] sm:$0xf] }
  0x7f   : > { %v571_v40 = vld [vmem:[%s3945_s7 + $0x540] sm:$0xf]  ;;  %v573_v41 = vld [vmem:[%s3945_s7 + $0x548] sm:$0xf]  ;;  %570 = vst [vmem:[%s3952_s8 + $0x29c] sm:$0xf] %v569_v39 }
  0x80   : > { %572 = vst [vmem:[%s3952_s8 + $0x2a0] sm:$0xf] %v571_v40  ;;  %574 = vst [vmem:[%s3952_s8 + $0x2a4] sm:$0xf] %v573_v41  ;;  %v575_v42 = vld [vmem:[%s3945_s7 + $0x550] sm:$0xf] }
  0x81   : > { %v577_v43 = vld [vmem:[%s3945_s7 + $0x558] sm:$0xf]  ;;  %v579_v44 = vld [vmem:[%s3945_s7 + $0x560] sm:$0xf]  ;;  %576 = vst [vmem:[%s3952_s8 + $0x2a8] sm:$0xf] %v575_v42 }
  0x82   : > { %578 = vst [vmem:[%s3952_s8 + $0x2ac] sm:$0xf] %v577_v43  ;;  %580 = vst [vmem:[%s3952_s8 + $0x2b0] sm:$0xf] %v579_v44  ;;  %v581_v45 = vld [vmem:[%s3945_s7 + $0x568] sm:$0xf] }
  0x83   : > { %v583_v46 = vld [vmem:[%s3945_s7 + $0x570] sm:$0xf]  ;;  %v585_v47 = vld [vmem:[%s3945_s7 + $0x578] sm:$0xf]  ;;  %582 = vst [vmem:[%s3952_s8 + $0x2b4] sm:$0xf] %v581_v45 }
  0x84   : > { %584 = vst [vmem:[%s3952_s8 + $0x2b8] sm:$0xf] %v583_v46  ;;  %586 = vst [vmem:[%s3952_s8 + $0x2bc] sm:$0xf] %v585_v47  ;;  %v587_v48 = vld [vmem:[%s3945_s7 + $0x580] sm:$0xf] }
  0x85   : > { %v589_v49 = vld [vmem:[%s3945_s7 + $0x588] sm:$0xf]  ;;  %v591_v50 = vld [vmem:[%s3945_s7 + $0x590] sm:$0xf]  ;;  %588 = vst [vmem:[%s3952_s8 + $0x2c0] sm:$0xf] %v587_v48 }
  0x86   : > { %590 = vst [vmem:[%s3952_s8 + $0x2c4] sm:$0xf] %v589_v49  ;;  %592 = vst [vmem:[%s3952_s8 + $0x2c8] sm:$0xf] %v591_v50  ;;  %v593_v51 = vld [vmem:[%s3945_s7 + $0x598] sm:$0xf] }
  0x87   : > { %v595_v52 = vld [vmem:[%s3945_s7 + $0x5a0] sm:$0xf]  ;;  %v597_v53 = vld [vmem:[%s3945_s7 + $0x5a8] sm:$0xf]  ;;  %594 = vst [vmem:[%s3952_s8 + $0x2cc] sm:$0xf] %v593_v51 }
  0x88   : > { %596 = vst [vmem:[%s3952_s8 + $0x2d0] sm:$0xf] %v595_v52  ;;  %598 = vst [vmem:[%s3952_s8 + $0x2d4] sm:$0xf] %v597_v53  ;;  %v599_v54 = vld [vmem:[%s3945_s7 + $0x5b0] sm:$0xf] }
  0x89   : > { %v601_v55 = vld [vmem:[%s3945_s7 + $0x5b8] sm:$0xf]  ;;  %v603_v56 = vld [vmem:[%s3945_s7 + $0x5c0] sm:$0xf]  ;;  %600 = vst [vmem:[%s3952_s8 + $0x2d8] sm:$0xf] %v599_v54 }
  0x8a   : > { %602 = vst [vmem:[%s3952_s8 + $0x2dc] sm:$0xf] %v601_v55  ;;  %604 = vst [vmem:[%s3952_s8 + $0x2e0] sm:$0xf] %v603_v56  ;;  %v605_v57 = vld [vmem:[%s3945_s7 + $0x5c8] sm:$0xf] }
  0x8b   : > { %v607_v58 = vld [vmem:[%s3945_s7 + $0x5d0] sm:$0xf]  ;;  %v609_v59 = vld [vmem:[%s3945_s7 + $0x5d8] sm:$0xf]  ;;  %606 = vst [vmem:[%s3952_s8 + $0x2e4] sm:$0xf] %v605_v57 }
  0x8c   : > { %608 = vst [vmem:[%s3952_s8 + $0x2e8] sm:$0xf] %v607_v58  ;;  %610 = vst [vmem:[%s3952_s8 + $0x2ec] sm:$0xf] %v609_v59  ;;  %v611_v60 = vld [vmem:[%s3945_s7 + $0x5e0] sm:$0xf] }
  0x8d   : > { %v613_v61 = vld [vmem:[%s3945_s7 + $0x5e8] sm:$0xf]  ;;  %v615_v62 = vld [vmem:[%s3945_s7 + $0x5f0] sm:$0xf]  ;;  %612 = vst [vmem:[%s3952_s8 + $0x2f0] sm:$0xf] %v611_v60 }
  0x8e   : > { %614 = vst [vmem:[%s3952_s8 + $0x2f4] sm:$0xf] %v613_v61  ;;  %616 = vst [vmem:[%s3952_s8 + $0x2f8] sm:$0xf] %v615_v62  ;;  %v617_v63 = vld [vmem:[%s3945_s7 + $0x5f8] sm:$0xf] }
  0x8f   : > { %v619_v0 = vld [vmem:[%s3945_s7 + $0x600] sm:$0xf]  ;;  %v621_v1 = vld [vmem:[%s3945_s7 + $0x608] sm:$0xf]  ;;  %618 = vst [vmem:[%s3952_s8 + $0x2fc] sm:$0xf] %v617_v63 }
  0x90   : > { %620 = vst [vmem:[%s3952_s8 + $0x300] sm:$0xf] %v619_v0  ;;  %622 = vst [vmem:[%s3952_s8 + $0x304] sm:$0xf] %v621_v1  ;;  %v623_v2 = vld [vmem:[%s3945_s7 + $0x610] sm:$0xf] }
  0x91   : > { %v625_v3 = vld [vmem:[%s3945_s7 + $0x618] sm:$0xf]  ;;  %v627_v4 = vld [vmem:[%s3945_s7 + $0x620] sm:$0xf]  ;;  %624 = vst [vmem:[%s3952_s8 + $0x308] sm:$0xf] %v623_v2 }
  0x92   : > { %626 = vst [vmem:[%s3952_s8 + $0x30c] sm:$0xf] %v625_v3  ;;  %628 = vst [vmem:[%s3952_s8 + $0x310] sm:$0xf] %v627_v4  ;;  %v629_v5 = vld [vmem:[%s3945_s7 + $0x628] sm:$0xf] }
  0x93   : > { %v631_v6 = vld [vmem:[%s3945_s7 + $0x630] sm:$0xf]  ;;  %v633_v7 = vld [vmem:[%s3945_s7 + $0x638] sm:$0xf]  ;;  %630 = vst [vmem:[%s3952_s8 + $0x314] sm:$0xf] %v629_v5 }
  0x94   : > { %632 = vst [vmem:[%s3952_s8 + $0x318] sm:$0xf] %v631_v6  ;;  %634 = vst [vmem:[%s3952_s8 + $0x31c] sm:$0xf] %v633_v7  ;;  %v635_v8 = vld [vmem:[%s3945_s7 + $0x640] sm:$0xf] }
  0x95   : > { %v637_v9 = vld [vmem:[%s3945_s7 + $0x648] sm:$0xf]  ;;  %v639_v10 = vld [vmem:[%s3945_s7 + $0x650] sm:$0xf]  ;;  %636 = vst [vmem:[%s3952_s8 + $0x320] sm:$0xf] %v635_v8 }
  0x96   : > { %638 = vst [vmem:[%s3952_s8 + $0x324] sm:$0xf] %v637_v9  ;;  %640 = vst [vmem:[%s3952_s8 + $0x328] sm:$0xf] %v639_v10  ;;  %v641_v11 = vld [vmem:[%s3945_s7 + $0x658] sm:$0xf] }
  0x97   : > { %v643_v12 = vld [vmem:[%s3945_s7 + $0x660] sm:$0xf]  ;;  %v645_v13 = vld [vmem:[%s3945_s7 + $0x668] sm:$0xf]  ;;  %642 = vst [vmem:[%s3952_s8 + $0x32c] sm:$0xf] %v641_v11 }
  0x98   : > { %644 = vst [vmem:[%s3952_s8 + $0x330] sm:$0xf] %v643_v12  ;;  %646 = vst [vmem:[%s3952_s8 + $0x334] sm:$0xf] %v645_v13  ;;  %v647_v14 = vld [vmem:[%s3945_s7 + $0x670] sm:$0xf] }
  0x99   : > { %v649_v15 = vld [vmem:[%s3945_s7 + $0x678] sm:$0xf]  ;;  %v651_v16 = vld [vmem:[%s3945_s7 + $0x680] sm:$0xf]  ;;  %648 = vst [vmem:[%s3952_s8 + $0x338] sm:$0xf] %v647_v14 }
  0x9a   : > { %650 = vst [vmem:[%s3952_s8 + $0x33c] sm:$0xf] %v649_v15  ;;  %652 = vst [vmem:[%s3952_s8 + $0x340] sm:$0xf] %v651_v16  ;;  %v653_v17 = vld [vmem:[%s3945_s7 + $0x688] sm:$0xf] }
  0x9b   : > { %v655_v18 = vld [vmem:[%s3945_s7 + $0x690] sm:$0xf]  ;;  %v657_v19 = vld [vmem:[%s3945_s7 + $0x698] sm:$0xf]  ;;  %654 = vst [vmem:[%s3952_s8 + $0x344] sm:$0xf] %v653_v17 }
  0x9c   : > { %656 = vst [vmem:[%s3952_s8 + $0x348] sm:$0xf] %v655_v18  ;;  %658 = vst [vmem:[%s3952_s8 + $0x34c] sm:$0xf] %v657_v19  ;;  %v659_v20 = vld [vmem:[%s3945_s7 + $0x6a0] sm:$0xf] }
  0x9d   : > { %v661_v21 = vld [vmem:[%s3945_s7 + $0x6a8] sm:$0xf]  ;;  %v663_v22 = vld [vmem:[%s3945_s7 + $0x6b0] sm:$0xf]  ;;  %660 = vst [vmem:[%s3952_s8 + $0x350] sm:$0xf] %v659_v20 }
  0x9e   : > { %662 = vst [vmem:[%s3952_s8 + $0x354] sm:$0xf] %v661_v21  ;;  %664 = vst [vmem:[%s3952_s8 + $0x358] sm:$0xf] %v663_v22  ;;  %v665_v23 = vld [vmem:[%s3945_s7 + $0x6b8] sm:$0xf] }
  0x9f   : > { %v667_v24 = vld [vmem:[%s3945_s7 + $0x6c0] sm:$0xf]  ;;  %v669_v25 = vld [vmem:[%s3945_s7 + $0x6c8] sm:$0xf]  ;;  %666 = vst [vmem:[%s3952_s8 + $0x35c] sm:$0xf] %v665_v23 }
  0xa0   : > { %668 = vst [vmem:[%s3952_s8 + $0x360] sm:$0xf] %v667_v24  ;;  %670 = vst [vmem:[%s3952_s8 + $0x364] sm:$0xf] %v669_v25  ;;  %v671_v26 = vld [vmem:[%s3945_s7 + $0x6d0] sm:$0xf] }
  0xa1   : > { %v673_v27 = vld [vmem:[%s3945_s7 + $0x6d8] sm:$0xf]  ;;  %v675_v28 = vld [vmem:[%s3945_s7 + $0x6e0] sm:$0xf]  ;;  %672 = vst [vmem:[%s3952_s8 + $0x368] sm:$0xf] %v671_v26 }
  0xa2   : > { %674 = vst [vmem:[%s3952_s8 + $0x36c] sm:$0xf] %v673_v27  ;;  %676 = vst [vmem:[%s3952_s8 + $0x370] sm:$0xf] %v675_v28  ;;  %v677_v29 = vld [vmem:[%s3945_s7 + $0x6e8] sm:$0xf] }
  0xa3   : > { %v679_v30 = vld [vmem:[%s3945_s7 + $0x6f0] sm:$0xf]  ;;  %v681_v31 = vld [vmem:[%s3945_s7 + $0x6f8] sm:$0xf]  ;;  %678 = vst [vmem:[%s3952_s8 + $0x374] sm:$0xf] %v677_v29 }
  0xa4   : > { %680 = vst [vmem:[%s3952_s8 + $0x378] sm:$0xf] %v679_v30  ;;  %682 = vst [vmem:[%s3952_s8 + $0x37c] sm:$0xf] %v681_v31  ;;  %v683_v32 = vld [vmem:[%s3945_s7 + $0x700] sm:$0xf] }
  0xa5   : > { %v685_v33 = vld [vmem:[%s3945_s7 + $0x708] sm:$0xf]  ;;  %v687_v34 = vld [vmem:[%s3945_s7 + $0x710] sm:$0xf]  ;;  %684 = vst [vmem:[%s3952_s8 + $0x380] sm:$0xf] %v683_v32 }
  0xa6   : > { %686 = vst [vmem:[%s3952_s8 + $0x384] sm:$0xf] %v685_v33  ;;  %688 = vst [vmem:[%s3952_s8 + $0x388] sm:$0xf] %v687_v34  ;;  %v689_v35 = vld [vmem:[%s3945_s7 + $0x718] sm:$0xf] }
  0xa7   : > { %v691_v36 = vld [vmem:[%s3945_s7 + $0x720] sm:$0xf]  ;;  %v693_v37 = vld [vmem:[%s3945_s7 + $0x728] sm:$0xf]  ;;  %690 = vst [vmem:[%s3952_s8 + $0x38c] sm:$0xf] %v689_v35 }
  0xa8   : > { %692 = vst [vmem:[%s3952_s8 + $0x390] sm:$0xf] %v691_v36  ;;  %694 = vst [vmem:[%s3952_s8 + $0x394] sm:$0xf] %v693_v37  ;;  %v695_v38 = vld [vmem:[%s3945_s7 + $0x730] sm:$0xf] }
  0xa9   : > { %v697_v39 = vld [vmem:[%s3945_s7 + $0x738] sm:$0xf]  ;;  %v699_v40 = vld [vmem:[%s3945_s7 + $0x740] sm:$0xf]  ;;  %696 = vst [vmem:[%s3952_s8 + $0x398] sm:$0xf] %v695_v38 }
  0xaa   : > { %698 = vst [vmem:[%s3952_s8 + $0x39c] sm:$0xf] %v697_v39  ;;  %700 = vst [vmem:[%s3952_s8 + $0x3a0] sm:$0xf] %v699_v40  ;;  %v701_v41 = vld [vmem:[%s3945_s7 + $0x748] sm:$0xf] }
  0xab   : > { %v703_v42 = vld [vmem:[%s3945_s7 + $0x750] sm:$0xf]  ;;  %v705_v43 = vld [vmem:[%s3945_s7 + $0x758] sm:$0xf]  ;;  %702 = vst [vmem:[%s3952_s8 + $0x3a4] sm:$0xf] %v701_v41 }
  0xac   : > { %704 = vst [vmem:[%s3952_s8 + $0x3a8] sm:$0xf] %v703_v42  ;;  %706 = vst [vmem:[%s3952_s8 + $0x3ac] sm:$0xf] %v705_v43  ;;  %v707_v44 = vld [vmem:[%s3945_s7 + $0x760] sm:$0xf] }
  0xad   : > { %v709_v45 = vld [vmem:[%s3945_s7 + $0x768] sm:$0xf]  ;;  %v711_v46 = vld [vmem:[%s3945_s7 + $0x770] sm:$0xf]  ;;  %708 = vst [vmem:[%s3952_s8 + $0x3b0] sm:$0xf] %v707_v44 }
  0xae   : > { %710 = vst [vmem:[%s3952_s8 + $0x3b4] sm:$0xf] %v709_v45  ;;  %712 = vst [vmem:[%s3952_s8 + $0x3b8] sm:$0xf] %v711_v46  ;;  %v713_v47 = vld [vmem:[%s3945_s7 + $0x778] sm:$0xf] }
  0xaf   : > { %v715_v48 = vld [vmem:[%s3945_s7 + $0x780] sm:$0xf]  ;;  %v717_v49 = vld [vmem:[%s3945_s7 + $0x788] sm:$0xf]  ;;  %714 = vst [vmem:[%s3952_s8 + $0x3bc] sm:$0xf] %v713_v47 }
  0xb0   : > { %716 = vst [vmem:[%s3952_s8 + $0x3c0] sm:$0xf] %v715_v48  ;;  %718 = vst [vmem:[%s3952_s8 + $0x3c4] sm:$0xf] %v717_v49  ;;  %v719_v50 = vld [vmem:[%s3945_s7 + $0x790] sm:$0xf] }
  0xb1   : > { %v721_v51 = vld [vmem:[%s3945_s7 + $0x798] sm:$0xf]  ;;  %v723_v52 = vld [vmem:[%s3945_s7 + $0x7a0] sm:$0xf]  ;;  %720 = vst [vmem:[%s3952_s8 + $0x3c8] sm:$0xf] %v719_v50 }
  0xb2   : > { %722 = vst [vmem:[%s3952_s8 + $0x3cc] sm:$0xf] %v721_v51  ;;  %724 = vst [vmem:[%s3952_s8 + $0x3d0] sm:$0xf] %v723_v52  ;;  %v725_v53 = vld [vmem:[%s3945_s7 + $0x7a8] sm:$0xf] }
  0xb3   : > { %v727_v54 = vld [vmem:[%s3945_s7 + $0x7b0] sm:$0xf]  ;;  %v729_v55 = vld [vmem:[%s3945_s7 + $0x7b8] sm:$0xf]  ;;  %726 = vst [vmem:[%s3952_s8 + $0x3d4] sm:$0xf] %v725_v53 }
  0xb4   : > { %728 = vst [vmem:[%s3952_s8 + $0x3d8] sm:$0xf] %v727_v54  ;;  %730 = vst [vmem:[%s3952_s8 + $0x3dc] sm:$0xf] %v729_v55  ;;  %v731_v56 = vld [vmem:[%s3945_s7 + $0x7c0] sm:$0xf] }
  0xb5   : > { %v733_v57 = vld [vmem:[%s3945_s7 + $0x7c8] sm:$0xf]  ;;  %v735_v58 = vld [vmem:[%s3945_s7 + $0x7d0] sm:$0xf]  ;;  %732 = vst [vmem:[%s3952_s8 + $0x3e0] sm:$0xf] %v731_v56 }
  0xb6   : > { %734 = vst [vmem:[%s3952_s8 + $0x3e4] sm:$0xf] %v733_v57  ;;  %736 = vst [vmem:[%s3952_s8 + $0x3e8] sm:$0xf] %v735_v58  ;;  %v737_v59 = vld [vmem:[%s3945_s7 + $0x7d8] sm:$0xf] }
  0xb7   : > { %v739_v60 = vld [vmem:[%s3945_s7 + $0x7e0] sm:$0xf]  ;;  %v741_v61 = vld [vmem:[%s3945_s7 + $0x7e8] sm:$0xf]  ;;  %738 = vst [vmem:[%s3952_s8 + $0x3ec] sm:$0xf] %v737_v59 }
  0xb8   : > { %740 = vst [vmem:[%s3952_s8 + $0x3f0] sm:$0xf] %v739_v60  ;;  %742 = vst [vmem:[%s3952_s8 + $0x3f4] sm:$0xf] %v741_v61  ;;  %v743_v62 = vld [vmem:[%s3945_s7 + $0x7f0] sm:$0xf] }
  0xb9   : > { %v745_v63 = vld [vmem:[%s3945_s7 + $0x7f8] sm:$0xf]  ;;  %v747_v0 = vld [vmem:[%s3945_s7 + $0x800] sm:$0xf]  ;;  %744 = vst [vmem:[%s3952_s8 + $0x3f8] sm:$0xf] %v743_v62 }
  0xba   : > { %746 = vst [vmem:[%s3952_s8 + $0x3fc] sm:$0xf] %v745_v63  ;;  %748 = vst [vmem:[%s3952_s8 + $0x400] sm:$0xf] %v747_v0  ;;  %v749_v1 = vld [vmem:[%s3945_s7 + $0x808] sm:$0xf] }
  0xbb   : > { %v751_v2 = vld [vmem:[%s3945_s7 + $0x810] sm:$0xf]  ;;  %v753_v3 = vld [vmem:[%s3945_s7 + $0x818] sm:$0xf]  ;;  %750 = vst [vmem:[%s3952_s8 + $0x404] sm:$0xf] %v749_v1 }
  0xbc   : > { %752 = vst [vmem:[%s3952_s8 + $0x408] sm:$0xf] %v751_v2  ;;  %754 = vst [vmem:[%s3952_s8 + $0x40c] sm:$0xf] %v753_v3  ;;  %v755_v4 = vld [vmem:[%s3945_s7 + $0x820] sm:$0xf] }
  0xbd   : > { %v757_v5 = vld [vmem:[%s3945_s7 + $0x828] sm:$0xf]  ;;  %v759_v6 = vld [vmem:[%s3945_s7 + $0x830] sm:$0xf]  ;;  %756 = vst [vmem:[%s3952_s8 + $0x410] sm:$0xf] %v755_v4 }
  0xbe   : > { %758 = vst [vmem:[%s3952_s8 + $0x414] sm:$0xf] %v757_v5  ;;  %760 = vst [vmem:[%s3952_s8 + $0x418] sm:$0xf] %v759_v6  ;;  %v761_v7 = vld [vmem:[%s3945_s7 + $0x838] sm:$0xf] }
  0xbf   : > { %v763_v8 = vld [vmem:[%s3945_s7 + $0x840] sm:$0xf]  ;;  %v765_v9 = vld [vmem:[%s3945_s7 + $0x848] sm:$0xf]  ;;  %762 = vst [vmem:[%s3952_s8 + $0x41c] sm:$0xf] %v761_v7 }
  0xc0   : > { %764 = vst [vmem:[%s3952_s8 + $0x420] sm:$0xf] %v763_v8  ;;  %766 = vst [vmem:[%s3952_s8 + $0x424] sm:$0xf] %v765_v9  ;;  %v767_v10 = vld [vmem:[%s3945_s7 + $0x850] sm:$0xf] }
  0xc1   : > { %v769_v11 = vld [vmem:[%s3945_s7 + $0x858] sm:$0xf]  ;;  %v771_v12 = vld [vmem:[%s3945_s7 + $0x860] sm:$0xf]  ;;  %768 = vst [vmem:[%s3952_s8 + $0x428] sm:$0xf] %v767_v10 }
  0xc2   : > { %770 = vst [vmem:[%s3952_s8 + $0x42c] sm:$0xf] %v769_v11  ;;  %772 = vst [vmem:[%s3952_s8 + $0x430] sm:$0xf] %v771_v12  ;;  %v773_v13 = vld [vmem:[%s3945_s7 + $0x868] sm:$0xf] }
  0xc3   : > { %v775_v14 = vld [vmem:[%s3945_s7 + $0x870] sm:$0xf]  ;;  %v777_v15 = vld [vmem:[%s3945_s7 + $0x878] sm:$0xf]  ;;  %774 = vst [vmem:[%s3952_s8 + $0x434] sm:$0xf] %v773_v13 }
  0xc4   : > { %776 = vst [vmem:[%s3952_s8 + $0x438] sm:$0xf] %v775_v14  ;;  %778 = vst [vmem:[%s3952_s8 + $0x43c] sm:$0xf] %v777_v15  ;;  %v779_v16 = vld [vmem:[%s3945_s7 + $0x880] sm:$0xf] }
  0xc5   : > { %v781_v17 = vld [vmem:[%s3945_s7 + $0x888] sm:$0xf]  ;;  %v783_v18 = vld [vmem:[%s3945_s7 + $0x890] sm:$0xf]  ;;  %780 = vst [vmem:[%s3952_s8 + $0x440] sm:$0xf] %v779_v16 }
  0xc6   : > { %782 = vst [vmem:[%s3952_s8 + $0x444] sm:$0xf] %v781_v17  ;;  %784 = vst [vmem:[%s3952_s8 + $0x448] sm:$0xf] %v783_v18  ;;  %v785_v19 = vld [vmem:[%s3945_s7 + $0x898] sm:$0xf] }
  0xc7   : > { %v787_v20 = vld [vmem:[%s3945_s7 + $0x8a0] sm:$0xf]  ;;  %v789_v21 = vld [vmem:[%s3945_s7 + $0x8a8] sm:$0xf]  ;;  %786 = vst [vmem:[%s3952_s8 + $0x44c] sm:$0xf] %v785_v19 }
  0xc8   : > { %788 = vst [vmem:[%s3952_s8 + $0x450] sm:$0xf] %v787_v20  ;;  %790 = vst [vmem:[%s3952_s8 + $0x454] sm:$0xf] %v789_v21  ;;  %v791_v22 = vld [vmem:[%s3945_s7 + $0x8b0] sm:$0xf] }
  0xc9   : > { %v793_v23 = vld [vmem:[%s3945_s7 + $0x8b8] sm:$0xf]  ;;  %v795_v24 = vld [vmem:[%s3945_s7 + $0x8c0] sm:$0xf]  ;;  %792 = vst [vmem:[%s3952_s8 + $0x458] sm:$0xf] %v791_v22 }
  0xca   : > { %794 = vst [vmem:[%s3952_s8 + $0x45c] sm:$0xf] %v793_v23  ;;  %796 = vst [vmem:[%s3952_s8 + $0x460] sm:$0xf] %v795_v24  ;;  %v797_v25 = vld [vmem:[%s3945_s7 + $0x8c8] sm:$0xf] }
  0xcb   : > { %v799_v26 = vld [vmem:[%s3945_s7 + $0x8d0] sm:$0xf]  ;;  %v801_v27 = vld [vmem:[%s3945_s7 + $0x8d8] sm:$0xf]  ;;  %798 = vst [vmem:[%s3952_s8 + $0x464] sm:$0xf] %v797_v25 }
  0xcc   : > { %800 = vst [vmem:[%s3952_s8 + $0x468] sm:$0xf] %v799_v26  ;;  %802 = vst [vmem:[%s3952_s8 + $0x46c] sm:$0xf] %v801_v27  ;;  %v803_v28 = vld [vmem:[%s3945_s7 + $0x8e0] sm:$0xf] }
  0xcd   : > { %v805_v29 = vld [vmem:[%s3945_s7 + $0x8e8] sm:$0xf]  ;;  %v807_v30 = vld [vmem:[%s3945_s7 + $0x8f0] sm:$0xf]  ;;  %804 = vst [vmem:[%s3952_s8 + $0x470] sm:$0xf] %v803_v28 }
  0xce   : > { %806 = vst [vmem:[%s3952_s8 + $0x474] sm:$0xf] %v805_v29  ;;  %808 = vst [vmem:[%s3952_s8 + $0x478] sm:$0xf] %v807_v30  ;;  %v809_v31 = vld [vmem:[%s3945_s7 + $0x8f8] sm:$0xf] }
  0xcf   : > { %810 = vst [vmem:[%s3952_s8 + $0x47c] sm:$0xf] %v809_v31 }
  0xd0 PF: > { %p3261_p6 = scmp.ge.s32.totalorder %s3870_s22, 1  ;;  %p1432_p7 = scmp.lt.s32.totalorder %s3870_s22, 3 }
  0xd2   : > { %p1433_p8 = pnand %p3261_p6, %p1432_p7 }
  0xd3   : > { %s1439_s9 = sand.u32 (!%p1433_p8), 1, %s3854_s18   ;;  %p1493_p9 = scmp.lt.s32.totalorder (!%p1433_p8), %s3862_s20, 1 }
  0xd4   : > { %1436 = sbr.rel (%p1433_p8) target bundleno = 588 (0x24c), region = 77 }
  0xd5   : > { %s3629_s14 = smul.u32 (!%p1433_p8), 1152, %s1439_s9 }
  0xd7   : > { %s4542_s15 = scalar_lea.vmem (!%p1433_p8), [#allocation2], %s3629_s14 }
  0xd9   : > { %v4531_v32 = vld [vmem:[%s4766_s0] sm:$0xff]  ;;  %v4536_v33 = vld [vmem:[%s4766_s0 + $0x8] sm:$0xff]  ;;  %v3670_v36 = vld [vmem:[%s4542_s15 + $0x78] sm:$0xff]   ;;  %s4779_s20 = smov (!%p1493_p9, %s3862_s20), 1 }
  0xda   : > { %v3265_v34 = vcombine.high %v4531_v32, %v4531_v32  ;;  %v3267_v35 = vcombine.high %v4536_v33, %v4536_v33  ;;  %v3671_v37 = vld [vmem:[%s4542_s15 + $0xf8] sm:$0xff]   ;;  %3430 = vmatprep.subr.bf16.mxu0 %v3670_v36  ;;  %v3674_v40 = vld [vmem:[%s4542_s15 + $0x70] sm:$0xff]   ;;  %v3678_v44 = vld [vmem:[%s4542_s15 + $0x68] sm:$0xff]   ;;  %v3264_v6 = vcombine.low %v4531_v32, %v4531_v32  ;;  %v3266_v7 = vcombine.low %v4536_v33, %v4536_v33  ;;  %s1495_s13 = scalar_lea.vmem %s4768_s2, %s4779_s20  ;;  %s3262_s14 = sshll.u32 %s4779_s20, 3 }
  0xdb   : > { %v3672_v38 = vld [vmem:[%s4542_s15 + $0x38] sm:$0xff]   ;;  %3452 = vmatprep.subr.bf16.mxu1 %v3671_v37  ;;  %v3675_v41 = vld [vmem:[%s4542_s15 + $0xf0] sm:$0xff]   ;;  %v3679_v45 = vld [vmem:[%s4542_s15 + $0xe8] sm:$0xff]   ;;  %s1498_s17 = scalar_lea.vmem %s4769_s3, %s4779_s20  ;;  %s1506_s25 = scalar_lea.vmem %s4770_s4, %s3262_s14 }
  0xdc   : > { %2772 = vmatprep.mubr.bf16.mxu0 %v3265_v34  ;;  %2812 = vmatprep.mubr.bf16.mxu1 %v3267_v35  ;;  %v3673_v39 = vld [vmem:[%s4542_s15 + $0xb8] sm:$0xff]   ;;  %v3676_v42 = vld [vmem:[%s4542_s15 + $0x30] sm:$0xff]   ;;  %v3680_v46 = vld [vmem:[%s4542_s15 + $0x28] sm:$0xff]   ;;  %s1514_s29 = scalar_lea.vmem %s4771_s5, %s3262_s14 }
  0xdd   : > { %3431 = vmatpush3.bf16.msra.mxu0 %v3672_v38  ;;  %3453 = vmatpush3.bf16.msra.mxu1 %v3673_v39  ;;  %v3677_v43 = vld [vmem:[%s4542_s15 + $0xb0] sm:$0xff]   ;;  %v3681_v47 = vld [vmem:[%s4542_s15 + $0xa8] sm:$0xff]   ;;  %v3682_v48 = vld [vmem:[%s4542_s15 + $0x60] sm:$0xff]  }
  0xde   : > { %3432 = vmatprep.subr.bf16.mxu0 %v3674_v40  ;;  %3454 = vmatprep.subr.bf16.mxu1 %v3675_v41  ;;  %v3683_v49 = vld [vmem:[%s4542_s15 + $0xe0] sm:$0xff]   ;;  %v3686_v52 = vld [vmem:[%s4542_s15 + $0x58] sm:$0xff]   ;;  %v3690_v56 = vld [vmem:[%s4542_s15 + $0x50] sm:$0xff]  }
  0xdf   : > { %v3684_v50 = vld [vmem:[%s4542_s15 + $0x20] sm:$0xff]   ;;  %v3687_v53 = vld [vmem:[%s4542_s15 + $0xd8] sm:$0xff]   ;;  %v3691_v57 = vld [vmem:[%s4542_s15 + $0xd0] sm:$0xff]  }
  0xe0   : > { %v3685_v51 = vld [vmem:[%s4542_s15 + $0xa0] sm:$0xff]   ;;  %v3688_v54 = vld [vmem:[%s4542_s15 + $0x18] sm:$0xff]   ;;  %v3692_v58 = vld [vmem:[%s4542_s15 + $0x10] sm:$0xff]  }
  0xe1   : > { %3433 = vmatpush3.bf16.msra.mxu0 %v3676_v42  ;;  %3455 = vmatpush3.bf16.msra.mxu1 %v3677_v43  ;;  %v3689_v55 = vld [vmem:[%s4542_s15 + $0x98] sm:$0xff]   ;;  %v3693_v59 = vld [vmem:[%s4542_s15 + $0x90] sm:$0xff]   ;;  %v3694_v60 = vld [vmem:[%s4542_s15 + $0x48] sm:$0xff]  }
  0xe2   : > { %3434 = vmatprep.subr.bf16.mxu0 %v3678_v44  ;;  %3456 = vmatprep.subr.bf16.mxu1 %v3679_v45  ;;  %v3695_v61 = vld [vmem:[%s4542_s15 + $0xc8] sm:$0xff]   ;;  %v3698_v0 = vld [vmem:[%s4542_s15 + $0x40] sm:$0xff]   ;;  %v4576_v1 = vld [vmem:[%s4766_s0 + $0x10] sm:$0xff] }
  0xe3   : > { %v3696_v62 = vld [vmem:[%s4542_s15 + $0x8] sm:$0xff]   ;;  %v3699_v2 = vld [vmem:[%s4542_s15 + $0xc0] sm:$0xff]   ;;  %v4583_v4 = vld [vmem:[%s4766_s0 + $0x18] sm:$0xff]  ;;  %v3269_v10 = vcombine.high %v4576_v1, %v4576_v1  ;;  %v3268_v43 = vcombine.low %v4576_v1, %v4576_v1 }
  0xe4   : > { %v3697_v63 = vld [vmem:[%s4542_s15 + $0x88] sm:$0xff]   ;;  %v3700_v3 = vld [vmem:[%s4542_s15] sm:$0xff]   ;;  %v3706_v8 = vld [vmem:[%s4542_s15 + $0x178] sm:$0xff]   ;;  %v3271_v13 = vcombine.high %v4583_v4, %v4583_v4 }
  0xe5   : > { %3435 = vmatpush3.bf16.msra.mxu0 %v3680_v46  ;;  %3457 = vmatpush3.bf16.msra.mxu1 %v3681_v47  ;;  %v3701_v5 = vld [vmem:[%s4542_s15 + $0x80] sm:$0xff]   ;;  %v3707_v9 = vld [vmem:[%s4542_s15 + $0x138] sm:$0xff]   ;;  %v3710_v14 = vld [vmem:[%s4542_s15 + $0x170] sm:$0xff]   ;;  %v3270_v46 = vcombine.low %v4583_v4, %v4583_v4 }
  0xe6   : > { %3436 = vmatprep.subr.bf16.mxu0 %v3682_v48  ;;  %3458 = vmatprep.subr.bf16.mxu1 %v3683_v49  ;;  %v3708_v11 = vld [vmem:[%s4542_s15 + $0x1f8] sm:$0xff]   ;;  %v3711_v15 = vld [vmem:[%s4542_s15 + $0x130] sm:$0xff]   ;;  %v3714_v18 = vld [vmem:[%s4542_s15 + $0x168] sm:$0xff]  }
  0xe7   : > { %v3709_v12 = vld [vmem:[%s4542_s15 + $0x1b8] sm:$0xff]   ;;  %v3712_v16 = vld [vmem:[%s4542_s15 + $0x1f0] sm:$0xff]   ;;  %v3715_v19 = vld [vmem:[%s4542_s15 + $0x128] sm:$0xff]  }
  0xe8   : > { %v3713_v17 = vld [vmem:[%s4542_s15 + $0x1b0] sm:$0xff]   ;;  %v3716_v20 = vld [vmem:[%s4542_s15 + $0x1e8] sm:$0xff]   ;;  %v3718_v22 = vld [vmem:[%s4542_s15 + $0x160] sm:$0xff]  }
  0xe9   : > { %3437 = vmatpush3.bf16.msra.mxu0 %v3684_v50  ;;  %3459 = vmatpush3.bf16.msra.mxu1 %v3685_v51  ;;  %v3717_v21 = vld [vmem:[%s4542_s15 + $0x1a8] sm:$0xff]   ;;  %v3719_v23 = vld [vmem:[%s4542_s15 + $0x120] sm:$0xff]   ;;  %v3722_v26 = vld [vmem:[%s4542_s15 + $0x158] sm:$0xff]  }
  0xea   : > { %3438 = vmatprep.subr.bf16.mxu0 %v3686_v52  ;;  %3460 = vmatprep.subr.bf16.mxu1 %v3687_v53  ;;  %v3720_v24 = vld [vmem:[%s4542_s15 + $0x1e0] sm:$0xff]   ;;  %v3723_v27 = vld [vmem:[%s4542_s15 + $0x118] sm:$0xff]   ;;  %v3726_v30 = vld [vmem:[%s4542_s15 + $0x150] sm:$0xff]  }
  0xeb   : > { %v3721_v25 = vld [vmem:[%s4542_s15 + $0x1a0] sm:$0xff]   ;;  %v3724_v28 = vld [vmem:[%s4542_s15 + $0x1d8] sm:$0xff]   ;;  %v3727_v31 = vld [vmem:[%s4542_s15 + $0x110] sm:$0xff]  }
  0xec   : > { %v3725_v29 = vld [vmem:[%s4542_s15 + $0x198] sm:$0xff]   ;;  %v3728_v32 = vld [vmem:[%s4542_s15 + $0x1d0] sm:$0xff]   ;;  %v3730_v34 = vld [vmem:[%s4542_s15 + $0x148] sm:$0xff]  }
  0xed   : > { %3439 = vmatpush3.bf16.msra.mxu0 %v3688_v54  ;;  %3461 = vmatpush3.bf16.msra.mxu1 %v3689_v55  ;;  %v3729_v33 = vld [vmem:[%s4542_s15 + $0x190] sm:$0xff]   ;;  %v3731_v35 = vld [vmem:[%s4542_s15 + $0x108] sm:$0xff]   ;;  %v3734_v38 = vld [vmem:[%s4542_s15 + $0x140] sm:$0xff]  }
  0xee   : > { %3440 = vmatprep.subr.bf16.mxu0 %v3690_v56  ;;  %3462 = vmatprep.subr.bf16.mxu1 %v3691_v57  ;;  %v3732_v36 = vld [vmem:[%s4542_s15 + $0x1c8] sm:$0xff]   ;;  %v4626_v39 = vld [vmem:[%s4766_s0 + $0x20] sm:$0xff]  ;;  %v3740_v45 = vld [vmem:[%s4542_s15 + $0x278] sm:$0xff]  }
  0xef   : > { %v3733_v37 = vld [vmem:[%s4542_s15 + $0x188] sm:$0xff]   ;;  %v3735_v40 = vld [vmem:[%s4542_s15 + $0x100] sm:$0xff]   ;;  %v3743_v47 = vld [vmem:[%s4542_s15 + $0x238] sm:$0xff]   ;;  %v3273_v48 = vcombine.high %v4626_v39, %v4626_v39 }
  0xf0   : > { %v3736_v41 = vld [vmem:[%s4542_s15 + $0x1c0] sm:$0xff]   ;;  %v4633_v42 = vld [vmem:[%s4766_s0 + $0x28] sm:$0xff]  ;;  %v3744_v49 = vld [vmem:[%s4542_s15 + $0x2f8] sm:$0xff]  }
  0xf1   : > { %3441 = vmatpush3.bf16.msra.mxu0 %v3692_v58  ;;  %3463 = vmatpush3.bf16.msra.mxu1 %v3693_v59  ;;  %v3739_v44 = vld [vmem:[%s4542_s15 + $0x180] sm:$0xff]   ;;  %v3745_v50 = vld [vmem:[%s4542_s15 + $0x2b8] sm:$0xff]   ;;  %v3275_v51 = vcombine.high %v4633_v42, %v4633_v42  ;;  %v3746_v52 = vld [vmem:[%s4542_s15 + $0x270] sm:$0xff]  }
  0xf2   : > { %3442 = vmatprep.subr.bf16.mxu0 %v3694_v60  ;;  %3464 = vmatprep.subr.bf16.mxu1 %v3695_v61  ;;  %v3747_v53 = vld [vmem:[%s4542_s15 + $0x230] sm:$0xff]   ;;  %v3750_v56 = vld [vmem:[%s4542_s15 + $0x268] sm:$0xff]   ;;  %v3754_v60 = vld [vmem:[%s4542_s15 + $0x260] sm:$0xff]  }
  0xf3   : > { %v3748_v54 = vld [vmem:[%s4542_s15 + $0x2f0] sm:$0xff]   ;;  %v3751_v57 = vld [vmem:[%s4542_s15 + $0x228] sm:$0xff]   ;;  %v3755_v61 = vld [vmem:[%s4542_s15 + $0x220] sm:$0xff]  }
  0xf4   : > { %v3749_v55 = vld [vmem:[%s4542_s15 + $0x2b0] sm:$0xff]   ;;  %v3752_v58 = vld [vmem:[%s4542_s15 + $0x2e8] sm:$0xff]   ;;  %v3759_v1 = vld [vmem:[%s4542_s15 + $0x218] sm:$0xff]  }
  0xf5   : > { %3443 = vmatpush3.bf16.msra.mxu0 %v3696_v62  ;;  %3465 = vmatpush3.bf16.msra.mxu1 %v3697_v63  ;;  %v3753_v59 = vld [vmem:[%s4542_s15 + $0x2a8] sm:$0xff]   ;;  %v3756_v62 = vld [vmem:[%s4542_s15 + $0x2e0] sm:$0xff]   ;;  %v3762_v4 = vld [vmem:[%s4542_s15 + $0x250] sm:$0xff]  }
  0xf6   : > { %3444 = vmatprep.subr.bf16.mxu0 %v3698_v0  ;;  %3466 = vmatprep.subr.bf16.mxu1 %v3699_v2  ;;  %v3757_v63 = vld [vmem:[%s4542_s15 + $0x2a0] sm:$0xff]   ;;  %v3758_v0 = vld [vmem:[%s4542_s15 + $0x258] sm:$0xff]  }
  0xf7   : > { %v3760_v2 = vld [vmem:[%s4542_s15 + $0x2d8] sm:$0xff]  }
  0xf9   : > { %3445 = vmatpush3.bf16.msra.mxu0 %v3700_v3  ;;  %3467 = vmatpush3.bf16.msra.mxu1 %v3701_v5  ;;  %v3761_v3 = vld [vmem:[%s4542_s15 + $0x298] sm:$0xff]   ;;  %v3763_v5 = vld [vmem:[%s4542_s15 + $0x210] sm:$0xff]  }
  0xfa   : > { %3474 = vmatprep.subr.bf16.mxu0 %v3706_v8  ;;  %3496 = vmatprep.subr.bf16.mxu1 %v3708_v11  ;;  %v3766_v8 = vld [vmem:[%s4542_s15 + $0x248] sm:$0xff]  }
  0xfb   : > { %v3769_v11 = vld [vmem:[%s4542_s15 + $0x288] sm:$0xff]  }
  0xfc   : > { %2773 = vmatmul.mubr.bf16.vlgmr.msra.gmra.mxu0 %v3264_v6  ;;  %2813 = vmatmul.mubr.bf16.vlgmr.msra.gmra.mxu1 %v3266_v7  ;;  %v3764_v6 = vld [vmem:[%s4542_s15 + $0x2d0] sm:$0xff]  }
  0xfd   : > { %3475 = vmatpush3.bf16.msra.mxu0 %v3707_v9  ;;  %2852 = vmatprep.mubr.bf16.mxu0 %v3269_v10  ;;  %v3765_v7 = vld [vmem:[%s4542_s15 + $0x290] sm:$0xff]   ;;  %v3767_v9 = vld [vmem:[%s4542_s15 + $0x208] sm:$0xff]  }
  0xfe   : > { %3497 = vmatpush3.bf16.msra.mxu1 %v3709_v12  ;;  %3476 = vmatprep.subr.bf16.mxu0 %v3710_v14  ;;  %v3768_v10 = vld [vmem:[%s4542_s15 + $0x2c8] sm:$0xff]   ;;  %v3770_v12 = vld [vmem:[%s4542_s15 + $0x240] sm:$0xff]  }
  0xff   : > { %2892 = vmatprep.mubr.bf16.mxu1 %v3271_v13  ;;  %3498 = vmatprep.subr.bf16.mxu1 %v3712_v16  ;;  %v3771_v13 = vld [vmem:[%s4542_s15 + $0x200] sm:$0xff]  }
 0x100   : > { %v3772_v14 = vld [vmem:[%s4542_s15 + $0x2c0] sm:$0xff]  }
 0x101   : > { %3477 = vmatpush3.bf16.msra.mxu0 %v3711_v15  ;;  %v3272_v15 = vcombine.low %v4626_v39, %v4626_v39  ;;  %v3775_v16 = vld [vmem:[%s4542_s15 + $0x280] sm:$0xff]   ;;  %v3799_v39 = vld [vmem:[%s4542_s15 + $0x310] sm:$0xff]  }
 0x102   : > { %3499 = vmatpush3.bf16.msra.mxu1 %v3713_v17  ;;  %3478 = vmatprep.subr.bf16.mxu0 %v3714_v18  ;;  %v3776_v17 = vld [vmem:[%s4542_s15 + $0x378] sm:$0xff]   ;;  %v3274_v18 = vcombine.low %v4633_v42, %v4633_v42  ;;  %v3802_v42 = vld [vmem:[%s4542_s15 + $0x348] sm:$0xff]  }
 0x103   : > { %3500 = vmatprep.subr.bf16.mxu1 %v3716_v20  ;;  %v3780_v20 = vld [vmem:[%s4542_s15 + $0x3f8] sm:$0xff]  }
 0x105   : > { %3479 = vmatpush3.bf16.msra.mxu0 %v3715_v19  ;;  %v3779_v19 = vld [vmem:[%s4542_s15 + $0x338] sm:$0xff]  }
 0x106   : > { %3501 = vmatpush3.bf16.msra.mxu1 %v3717_v21  ;;  %3480 = vmatprep.subr.bf16.mxu0 %v3718_v22  ;;  %v3781_v21 = vld [vmem:[%s4542_s15 + $0x3b8] sm:$0xff]   ;;  %v3782_v22 = vld [vmem:[%s4542_s15 + $0x370] sm:$0xff]  }
 0x107   : > { %3502 = vmatprep.subr.bf16.mxu1 %v3720_v24  ;;  %v3784_v24 = vld [vmem:[%s4542_s15 + $0x3f0] sm:$0xff]  }
 0x109   : > { %3481 = vmatpush3.bf16.msra.mxu0 %v3719_v23  ;;  %v3783_v23 = vld [vmem:[%s4542_s15 + $0x330] sm:$0xff]  }
 0x10a   : > { %3503 = vmatpush3.bf16.msra.mxu1 %v3721_v25  ;;  %3482 = vmatprep.subr.bf16.mxu0 %v3722_v26  ;;  %v3785_v25 = vld [vmem:[%s4542_s15 + $0x3b0] sm:$0xff]   ;;  %v3786_v26 = vld [vmem:[%s4542_s15 + $0x368] sm:$0xff]  }
 0x10b   : > { %3504 = vmatprep.subr.bf16.mxu1 %v3724_v28  ;;  %v3788_v28 = vld [vmem:[%s4542_s15 + $0x3e8] sm:$0xff]  }
 0x10d   : > { %3483 = vmatpush3.bf16.msra.mxu0 %v3723_v27  ;;  %v3787_v27 = vld [vmem:[%s4542_s15 + $0x328] sm:$0xff]  }
 0x10e   : > { %3505 = vmatpush3.bf16.msra.mxu1 %v3725_v29  ;;  %3484 = vmatprep.subr.bf16.mxu0 %v3726_v30  ;;  %v3789_v29 = vld [vmem:[%s4542_s15 + $0x3a8] sm:$0xff]   ;;  %v3790_v30 = vld [vmem:[%s4542_s15 + $0x360] sm:$0xff]  }
 0x10f   : > { %3506 = vmatprep.subr.bf16.mxu1 %v3728_v32  ;;  %v3792_v32 = vld [vmem:[%s4542_s15 + $0x3e0] sm:$0xff]  }
 0x111   : > { %3485 = vmatpush3.bf16.msra.mxu0 %v3727_v31  ;;  %v3791_v31 = vld [vmem:[%s4542_s15 + $0x320] sm:$0xff]  }
 0x112   : > { %3507 = vmatpush3.bf16.msra.mxu1 %v3729_v33  ;;  %3486 = vmatprep.subr.bf16.mxu0 %v3730_v34  ;;  %v3793_v33 = vld [vmem:[%s4542_s15 + $0x3a0] sm:$0xff]   ;;  %v3794_v34 = vld [vmem:[%s4542_s15 + $0x358] sm:$0xff]  }
 0x113   : > { %3508 = vmatprep.subr.bf16.mxu1 %v3732_v36  ;;  %v3796_v36 = vld [vmem:[%s4542_s15 + $0x3d8] sm:$0xff]  }
 0x115   : > { %3487 = vmatpush3.bf16.msra.mxu0 %v3731_v35  ;;  %v3795_v35 = vld [vmem:[%s4542_s15 + $0x318] sm:$0xff]  }
 0x116   : > { %3509 = vmatpush3.bf16.msra.mxu1 %v3733_v37  ;;  %3488 = vmatprep.subr.bf16.mxu0 %v3734_v38  ;;  %v3797_v37 = vld [vmem:[%s4542_s15 + $0x398] sm:$0xff]   ;;  %v3798_v38 = vld [vmem:[%s4542_s15 + $0x350] sm:$0xff]  }
 0x117   : > { %3510 = vmatprep.subr.bf16.mxu1 %v3736_v41  ;;  %v3801_v41 = vld [vmem:[%s4542_s15 + $0x390] sm:$0xff]  }
 0x119   : > { %3489 = vmatpush3.bf16.msra.mxu0 %v3735_v40  ;;  %v3800_v40 = vld [vmem:[%s4542_s15 + $0x3d0] sm:$0xff]  }
 0x11a   : > { %3511 = vmatpush3.bf16.msra.mxu1 %v3739_v44  ;;  %3518 = vmatprep.subr.bf16.mxu0 %v3740_v45  ;;  %v3804_v44 = vld [vmem:[%s4542_s15 + $0x3c8] sm:$0xff]  }
 0x11b   : > { %3540 = vmatprep.subr.bf16.mxu1 %v3744_v49  ;;  %v3805_v45 = vld [vmem:[%s4542_s15 + $0x388] sm:$0xff]   ;;  %v1522_v49 = vld [vmem:[%s4766_s0 + $0x30] sm:$0xff] }
 0x11c   : > { %2853 = vmatmul.mubr.bf16.vlgmr.msra.gmra.mxu0 %v3268_v43  ;;  %v3803_v43 = vld [vmem:[%s4542_s15 + $0x308] sm:$0xff]  }
 0x11d   : > { %3519 = vmatpush3.bf16.msra.mxu0 %v3743_v47  ;;  %2893 = vmatmul.mubr.bf16.vlgmr.msra.gmra.mxu1 %v3270_v46  ;;  %v3806_v46 = vld [vmem:[%s4542_s15 + $0x340] sm:$0xff]  }
 0x11e   : > { %2932 = vmatprep.mubr.bf16.mxu0 %v3273_v48  ;;  %3541 = vmatpush3.bf16.msra.mxu1 %v3745_v50  ;;  %v3807_v47 = vld [vmem:[%s4542_s15 + $0x300] sm:$0xff]   ;;  %v3276_v50 = vcombine.low %v1522_v49, %v1522_v49 }
 0x11f   : > { %3520 = vmatprep.subr.bf16.mxu0 %v3746_v52  ;;  %2972 = vmatprep.mubr.bf16.mxu1 %v3275_v51  ;;  %v3808_v48 = vld [vmem:[%s4542_s15 + $0x3c0] sm:$0xff]   ;;  %v3277_v51 = vcombine.high %v1522_v49, %v1522_v49 }
 0x120   : > { %3542 = vmatprep.subr.bf16.mxu1 %v3748_v54  ;;  %v3811_v52 = vld [vmem:[%s4542_s15 + $0x380] sm:$0xff]   ;;  %v1523_v54 = vld [vmem:[%s4766_s0 + $0x38] sm:$0xff] }
 0x121   : > { %3521 = vmatpush3.bf16.msra.mxu0 %v3747_v53  ;;  %v3812_v53 = vld [vmem:[%s4542_s15 + $0x478] sm:$0xff]  }
 0x122   : > { %3543 = vmatpush3.bf16.msra.mxu1 %v3749_v55  ;;  %3522 = vmatprep.subr.bf16.mxu0 %v3750_v56  ;;  %v3278_v55 = vcombine.low %v1523_v54, %v1523_v54  ;;  %v3279_v56 = vcombine.high %v1523_v54, %v1523_v54 }
 0x123   : > { %3544 = vmatprep.subr.bf16.mxu1 %v3752_v58  ;;  %v3816_v58 = vld [vmem:[%s4542_s15 + $0x470] sm:$0xff]  }
 0x125   : > { %3523 = vmatpush3.bf16.msra.mxu0 %v3751_v57  ;;  %v3815_v57 = vld [vmem:[%s4542_s15 + $0x438] sm:$0xff]  }
 0x126   : > { %3545 = vmatpush3.bf16.msra.mxu1 %v3753_v59  ;;  %3524 = vmatprep.subr.bf16.mxu0 %v3754_v60  ;;  %v3817_v59 = vld [vmem:[%s4542_s15 + $0x430] sm:$0xff]   ;;  %v3818_v60 = vld [vmem:[%s4542_s15 + $0x468] sm:$0xff]  }
 0x127   : > { %3546 = vmatprep.subr.bf16.mxu1 %v3756_v62  ;;  %v3820_v62 = vld [vmem:[%s4542_s15 + $0x460] sm:$0xff]  }
 0x129   : > { %3525 = vmatpush3.bf16.msra.mxu0 %v3755_v61  ;;  %v3819_v61 = vld [vmem:[%s4542_s15 + $0x428] sm:$0xff]  }
 0x12a   : > { %3547 = vmatpush3.bf16.msra.mxu1 %v3757_v63  ;;  %3526 = vmatprep.subr.bf16.mxu0 %v3758_v0  ;;  %v3821_v63 = vld [vmem:[%s4542_s15 + $0x420] sm:$0xff]   ;;  %v3822_v0 = vld [vmem:[%s4542_s15 + $0x458] sm:$0xff]  }
 0x12b   : > { %3548 = vmatprep.subr.bf16.mxu1 %v3760_v2  ;;  %v1524_v2 = vld [vmem:[%s4766_s0 + $0x40] sm:$0xff] }
 0x12d   : > { %3527 = vmatpush3.bf16.msra.mxu0 %v3759_v1  ;;  %v3823_v1 = vld [vmem:[%s4542_s15 + $0x418] sm:$0xff]  }
 0x12e   : > { %3549 = vmatpush3.bf16.msra.mxu1 %v3761_v3  ;;  %3528 = vmatprep.subr.bf16.mxu0 %v3762_v4  ;;  %v3824_v3 = vld [vmem:[%s4542_s15 + $0x450] sm:$0xff]   ;;  %v3281_v4 = vcombine.high %v1524_v2, %v1524_v2 }
 0x12f   : > { %3550 = vmatprep.subr.bf16.mxu1 %v3764_v6  ;;  %v3826_v6 = vld [vmem:[%s4542_s15 + $0x448] sm:$0xff]  }
 0x131   : > { %3529 = vmatpush3.bf16.msra.mxu0 %v3763_v5  ;;  %v3825_v5 = vld [vmem:[%s4542_s15 + $0x410] sm:$0xff]  }
 0x132   : > { %3551 = vmatpush3.bf16.msra.mxu1 %v3765_v7  ;;  %3530 = vmatprep.subr.bf16.mxu0 %v3766_v8  ;;  %v3827_v7 = vld [vmem:[%s4542_s15 + $0x408] sm:$0xff]   ;;  %v3828_v8 = vld [vmem:[%s4542_s15 + $0x440] sm:$0xff]  }
 0x133   : > { %3552 = vmatprep.subr.bf16.mxu1 %v3768_v10  ;;  %v3280_v10 = vcombine.low %v1524_v2, %v1524_v2 }
 0x135   : > { %3531 = vmatpush3.bf16.msra.mxu0 %v3767_v9  ;;  %v3829_v9 = vld [vmem:[%s4542_s15 + $0x400] sm:$0xff]  }
 0x136   : > { %3553 = vmatpush3.bf16.msra.mxu1 %v3769_v11  ;;  %3532 = vmatprep.subr.bf16.mxu0 %v3770_v12 }
 0x137   : > { %3554 = vmatprep.subr.bf16.mxu1 %v3772_v14 }
 0x139   : > { %3533 = vmatpush3.bf16.msra.mxu0 %v3771_v13 }
 0x13a   : > { %3555 = vmatpush3.bf16.msra.mxu1 %v3775_v16  ;;  %3562 = vmatprep.subr.bf16.mxu0 %v3776_v17 }
 0x13b   : > { %3584 = vmatprep.subr.bf16.mxu1 %v3780_v20 }
 0x13c   : > { %2933 = vmatmul.mubr.bf16.vlgmr.msra.gmra.mxu0 %v3272_v15 }
 0x13d   : > { %3563 = vmatpush3.bf16.msra.mxu0 %v3779_v19  ;;  %2973 = vmatmul.mubr.bf16.vlgmr.msra.gmra.mxu1 %v3274_v18 }
 0x13e   : > { %3585 = vmatpush3.bf16.msra.mxu1 %v3781_v21  ;;  %3564 = vmatprep.subr.bf16.mxu0 %v3782_v22 }
 0x13f   : > { %3586 = vmatprep.subr.bf16.mxu1 %v3784_v24  ;;  %3012 = vmatprep.mubr.bf16.mxu0 %v3277_v51 }
 0x140   : > { %3052 = vmatprep.mubr.bf16.mxu1 %v3279_v56 }
 0x141   : > { %3565 = vmatpush3.bf16.msra.mxu0 %v3783_v23 }
 0x142   : > { %3587 = vmatpush3.bf16.msra.mxu1 %v3785_v25  ;;  %3566 = vmatprep.subr.bf16.mxu0 %v3786_v26 }
 0x143   : > { %3588 = vmatprep.subr.bf16.mxu1 %v3788_v28 }
 0x145   : > { %3567 = vmatpush3.bf16.msra.mxu0 %v3787_v27 }
 0x146   : > { %3589 = vmatpush3.bf16.msra.mxu1 %v3789_v29  ;;  %3568 = vmatprep.subr.bf16.mxu0 %v3790_v30 }
 0x147   : > { %3590 = vmatprep.subr.bf16.mxu1 %v3792_v32 }
 0x149   : > { %3569 = vmatpush3.bf16.msra.mxu0 %v3791_v31 }
 0x14a   : > { %3591 = vmatpush3.bf16.msra.mxu1 %v3793_v33  ;;  %3570 = vmatprep.subr.bf16.mxu0 %v3794_v34 }
 0x14b   : > { %3592 = vmatprep.subr.bf16.mxu1 %v3796_v36 }
 0x14d   : > { %3571 = vmatpush3.bf16.msra.mxu0 %v3795_v35 }
 0x14e   : > { %3593 = vmatpush3.bf16.msra.mxu1 %v3797_v37  ;;  %3572 = vmatprep.subr.bf16.mxu0 %v3798_v38 }
 0x14f   : > { %3594 = vmatprep.subr.bf16.mxu1 %v3800_v40 }
 0x151   : > { %3573 = vmatpush3.bf16.msra.mxu0 %v3799_v39 }
 0x152   : > { %3595 = vmatpush3.bf16.msra.mxu1 %v3801_v41  ;;  %3574 = vmatprep.subr.bf16.mxu0 %v3802_v42 }
 0x153   : > { %3596 = vmatprep.subr.bf16.mxu1 %v3804_v44 }
 0x155   : > { %3575 = vmatpush3.bf16.msra.mxu0 %v3803_v43 }
 0x156   : > { %3597 = vmatpush3.bf16.msra.mxu1 %v3805_v45  ;;  %3576 = vmatprep.subr.bf16.mxu0 %v3806_v46 }
 0x157   : > { %3598 = vmatprep.subr.bf16.mxu1 %v3808_v48 }
 0x159   : > { %3577 = vmatpush3.bf16.msra.mxu0 %v3807_v47 }
 0x15a   : > { %3599 = vmatpush3.bf16.msra.mxu1 %v3811_v52  ;;  %3606 = vmatprep.subr.bf16.mxu0 %v3812_v53 }
 0x15c   : > { %3013 = vmatmul.mubr.bf16.vlgmr.msra.gmra.mxu0 %v3276_v50 }
 0x15d   : > { %3607 = vmatpush3.bf16.msra.mxu0 %v3815_v57  ;;  %3053 = vmatmul.mubr.bf16.vlgmr.msra.gmra.mxu1 %v3278_v55 }
 0x15e   : > { %3608 = vmatprep.subr.bf16.mxu0 %v3816_v58  ;;  %3092 = vmatprep.mubr.bf16.mxu0 %v3281_v4 }
 0x161   : > { %3609 = vmatpush3.bf16.msra.mxu0 %v3817_v59 }
 0x162   : > { %3610 = vmatprep.subr.bf16.mxu0 %v3818_v60 }
 0x165   : > { %3611 = vmatpush3.bf16.msra.mxu0 %v3819_v61  ;;  %v3426_v61 = vld [vmem:[%s1495_s13] ss:$0 sm:$0xff] }
 0x166   : > { %3612 = vmatprep.subr.bf16.mxu0 %v3820_v62 }
 0x169   : > { %3613 = vmatpush3.bf16.msra.mxu0 %v3821_v63 }
 0x16a   : > { %3614 = vmatprep.subr.bf16.mxu0 %v3822_v0  ;;  %v3427_v0 = vld [vmem:[%s1498_s17] ss:$0 sm:$0xff] }
 0x16d   : > { %3615 = vmatpush3.bf16.msra.mxu0 %v3823_v1 }
 0x16e   : > { %3616 = vmatprep.subr.bf16.mxu0 %v3824_v3  ;;  %v3116_v3 = vld [vmem:[%s1506_s25] sm:$0xff] }
 0x171   : > { %3617 = vmatpush3.bf16.msra.mxu0 %v3825_v5 }
 0x172   : > { %3618 = vmatprep.subr.bf16.mxu0 %v3826_v6 }
 0x175   : > { %3619 = vmatpush3.bf16.msra.mxu0 %v3827_v7 }
 0x176   : > { %3620 = vmatprep.subr.bf16.mxu0 %v3828_v8 }
 0x179   : > { %3621 = vmatpush3.bf16.msra.mxu0 %v3829_v9 }
 0x17c   : > { %3093 = vmatmul.mubr.bf16.vlgmr.msra.gmra.mxu0 %v3280_v10 }
 0x1bc   : > { %v3446_v11 = vpop.f32.mrf.mxu0  ;;  %v3468_v12 = vpop.f32.mrf.mxu1 }
 0x1be   : > { %v3447_v13 = vpop.f32.mrf.mxu0  ;;  %v3469_v15 = vpop.f32.mrf.mxu1 }
 0x1bf   : > { %v3448_v14 = vadd.f32 %v3447_v13, %v3446_v11  ;;  %v3470_v16 = vadd.f32 %v3469_v15, %v3468_v12 }
 0x1c0   : > { %v3449_v17 = vpop.f32.mrf.mxu0  ;;  %v3471_v18 = vpop.f32.mrf.mxu1 }
 0x1c1   : > { %v2815_v19 = vadd.f32 %v3470_v16, %v3448_v14 }
 0x1c2   : > { %v3450_v20 = vpop.f32.mrf.mxu0  ;;  %v3472_v21 = vpop.f32.mrf.mxu1 }
 0x1dc   : > { %v3490_v22 = vpop.f32.mrf.mxu0 }
 0x1dd   : > { %v3512_v24 = vpop.f32.mrf.mxu1 }
 0x1de   : > { %v3491_v23 = vpop.f32.mrf.mxu0 }
 0x1df   : > { %v3492_v25 = vadd.f32 %v3491_v23, %v3490_v22  ;;  %v3513_v27 = vpop.f32.mrf.mxu1 }
 0x1e0   : > { %v3493_v26 = vpop.f32.mrf.mxu0  ;;  %v3514_v29 = vadd.f32 %v3513_v27, %v3512_v24 }
 0x1e1   : > { %v2855_v28 = vadd.f32 %v3492_v25, %v2815_v19  ;;  %v3515_v31 = vpop.f32.mrf.mxu1 }
 0x1e2   : > { %v3494_v30 = vpop.f32.mrf.mxu0 }
 0x1e3   : > { %v2895_v32 = vadd.f32 %v3514_v29, %v2855_v28  ;;  %v3516_v33 = vpop.f32.mrf.mxu1 }
 0x1fc   : > { %v3534_v34 = vpop.f32.mrf.mxu0 }
 0x1fd   : > { %v3556_v36 = vpop.f32.mrf.mxu1 }
 0x1fe   : > { %v3535_v35 = vpop.f32.mrf.mxu0 }
 0x1ff   : > { %v3557_v38 = vpop.f32.mrf.mxu1  ;;  %v3536_v50 = vadd.f32 %v3535_v35, %v3534_v34 }
 0x200   : > { %v3537_v37 = vpop.f32.mrf.mxu0  ;;  %v3558_v52 = vadd.f32 %v3557_v38, %v3556_v36 }
 0x201   : > { %v3559_v40 = vpop.f32.mrf.mxu1  ;;  %v2935_v51 = vadd.f32 %v3536_v50, %v2895_v32 }
 0x202   : > { %v3538_v39 = vpop.f32.mrf.mxu0 }
 0x203   : > { %v3560_v41 = vpop.f32.mrf.mxu1  ;;  %v2975_v54 = vadd.f32 %v3558_v52, %v2935_v51 }
 0x21c   : > { %v3578_v42 = vpop.f32.mrf.mxu0 }
 0x21d   : > { %v3600_v44 = vpop.f32.mrf.mxu1 }
 0x21e   : > { %v3579_v43 = vpop.f32.mrf.mxu0 }
 0x21f   : > { %v3601_v46 = vpop.f32.mrf.mxu1  ;;  %v3580_v53 = vadd.f32 %v3579_v43, %v3578_v42 }
 0x220   : > { %v3581_v45 = vpop.f32.mrf.mxu0  ;;  %v3602_v56 = vadd.f32 %v3601_v46, %v3600_v44 }
 0x221   : > { %v3603_v48 = vpop.f32.mrf.mxu1  ;;  %v3015_v55 = vadd.f32 %v3580_v53, %v2975_v54 }
 0x222   : > { %v3582_v47 = vpop.f32.mrf.mxu0 }
 0x223   : > { %v3604_v49 = vpop.f32.mrf.mxu1  ;;  %v3055_v59 = vadd.f32 %v3602_v56, %v3015_v55 }
 0x23c   : > { %v3622_v57 = vpop.f32.mrf.mxu0 }
 0x23e   : > { %v3623_v58 = vpop.f32.mrf.mxu0 }
 0x23f   : > { %v3624_v60 = vadd.f32 %v3623_v58, %v3622_v57 }
 0x240   : > { %v3625_v62 = vpop.f32.mrf.mxu0 }
 0x241   : > { %v3095_v63 = vadd.f32 %v3624_v60, %v3055_v59 }
 0x242   : > { %v3626_v1 = vpop.f32.mrf.mxu0 }
 0x243   : > { %v3107_v2 = vmul.f32 %v3426_v61, %v3095_v63 }
 0x245   : > { %v3115_v4 = vadd.f32 %v3427_v0, %v3107_v2 }
 0x247   : > { %v3117_v5 = vadd.f32 %v3116_v3, %v3115_v4 }
 0x249   : > { %v3118_v6 = vmax.f32 %v3117_v5, 0.0 }
 0x24b   : > { %3119 = vst [vmem:[%s1514_s29] sm:$0xff] %v3118_v6 }
 0x24c PF: > { %s15_s22 = sadd.s32 1, %s3870_s22   ;;  %s4772_s18 = smov %s3858_s19 }
 0x24d   : > { %p12_p10 = scmp.ge.s32.totalorder %s15_s22, 4   ;;  %s4773_s19 = smov %s3937_s26 }
 0x24e   : > { %s4774_s20 = smov %s3866_s21  ;;  %s4775_s21 = smov %s4777_s23 }
 0x24f   :  { %14 = sbr.rel (!%p12_p10) target bundleno = 3 (0x3), region = 128 }

// kernel: sound_enc_forward.31
= control target key start
LH: loop header
LB: loop body
LE: loop exit
PB: predicated region body
PF: predicated region fallthrough
CT: control target
= control target key end

     0   :  { %s3818_s15 = smov 0   ;;  %s3820_s16 = smov 0   ;;  %s4679_s0 = inlined_call_operand.vmem [shape: bf16[8,2304], index: 0, kind: input, shape index: {}]   ;;  %s4680_s1 = inlined_call_operand.vmem [shape: bf16[2304,256], index: 1, kind: input, shape index: {}]   ;;  %s4681_s2 = inlined_call_operand.vmem [shape: f32[1,256], index: 2, kind: input, shape index: {}]   ;;  %s4682_s3 = inlined_call_operand.vmem [shape: f32[1,256], index: 3, kind: input, shape index: {}]   ;;  %s4683_s4 = inlined_call_operand.vmem [shape: f32[8,256], index: 4, kind: output, shape index: {}]  }
   0x1   :  { %s3822_s17 = smov 0   ;;  %s3824_s18 = smov 0  }
   0x2   :  { %s3826_s19 = smov 0  }
   0x3 LB: > { %s23_s20 = sadd.s32 1, %s3787_s18  ;;  %p66_p1 = scmp.ne.s32.totalorder %s3779_s16, %s3775_s15  ;;  %s3791_s19 = sphi %s3826_s19, %s14_s19   ;;  %s3787_s18 = sphi %s3824_s18, %s4687_s18   ;;  %s3783_s17 = sphi %s3822_s17, %s4686_s17   ;;  %s3779_s16 = sphi %s3820_s16, %s4685_s16   ;;  %s3775_s15 = sphi %s3818_s15, %s4684_s15  }
   0x4   : > { %p24_p0 = scmp.ge.s32.totalorder %s23_s20, 2  ;;  %p67_p2 = scmp.eq.s32.totalorder %s3791_s19, 0 }
   0x5   : > { %s59_s22 = sadd.s32 1, %s3779_s16  ;;  %p3181_p5 = scmp.ge.s32.totalorder %s3791_s19, 2 }
   0x6   : > { %s4689_s20 = smov (%p24_p0, %s23_s20), 0  ;;  %p68_p3 = por %p67_p2, %p66_p1 }
   0x7   : > { %s56_s21 = ssub.s32 %s3787_s18, %s4689_s20  ;;  %180 = sbr.rel (%p3181_p5) target bundleno = 208 (0xd0), region = 20 }
   0x8   : > { %p57_p4 = scmp.eq.s32.totalorder %s56_s21, 0 }
   0xa   : > { %s3853_s23 = scalar_select %p57_p4, %s3779_s16, %s59_s22  }
   0xc   : > { %183 = sbr.rel (!%p68_p3) target bundleno = 208 (0xd0), region = 24  ;;  %s185_s24 = sand.u32 (%p68_p3), 1, %s3779_s16  }
   0xd   : > { %s3182_s25 = sshll.u32 (%p68_p3), %s3787_s18, 2  ;;  %s3549_s26 = smul.u32 (%p68_p3), 1152, %s185_s24 }
   0xe   : > { %s3861_s29 = scalar_lea.vmem (%p68_p3), %s4680_s1, %s3182_s25 }
   0xf   : > { %v206_v0 = vld [vmem:[%s3861_s29] sm:$0xf] (%p68_p3)  ;;  %v208_v1 = vld [vmem:[%s3861_s29 + $0x8] sm:$0xf] (%p68_p3)  ;;  %v210_v2 = vld [vmem:[%s3861_s29 + $0x10] sm:$0xf] (%p68_p3) }
  0x10   : > { %v212_v3 = vld [vmem:[%s3861_s29 + $0x18] sm:$0xf] (%p68_p3)  ;;  %v214_v4 = vld [vmem:[%s3861_s29 + $0x20] sm:$0xf] (%p68_p3)  ;;  %s3868_s30 = scalar_lea.vmem (%p68_p3), [#allocation2], %s3549_s26 }
  0x11   : > { %207 = vst [vmem:[%s3868_s30] sm:$0xf] %v206_v0  ;;  %209 = vst [vmem:[%s3868_s30 + $0x4] sm:$0xf] %v208_v1  ;;  %v216_v5 = vld [vmem:[%s3861_s29 + $0x28] sm:$0xf] }
  0x12   : > { %211 = vst [vmem:[%s3868_s30 + $0x8] sm:$0xf] %v210_v2  ;;  %213 = vst [vmem:[%s3868_s30 + $0xc] sm:$0xf] %v212_v3  ;;  %v218_v6 = vld [vmem:[%s3861_s29 + $0x30] sm:$0xf] }
  0x13   : > { %215 = vst [vmem:[%s3868_s30 + $0x10] sm:$0xf] %v214_v4  ;;  %v220_v7 = vld [vmem:[%s3861_s29 + $0x38] sm:$0xf]  ;;  %217 = vst [vmem:[%s3868_s30 + $0x14] sm:$0xf] %v216_v5 }
  0x14   : > { %219 = vst [vmem:[%s3868_s30 + $0x18] sm:$0xf] %v218_v6  ;;  %221 = vst [vmem:[%s3868_s30 + $0x1c] sm:$0xf] %v220_v7  ;;  %v222_v8 = vld [vmem:[%s3861_s29 + $0x40] sm:$0xf] }
  0x15   : > { %v224_v9 = vld [vmem:[%s3861_s29 + $0x48] sm:$0xf]  ;;  %v226_v10 = vld [vmem:[%s3861_s29 + $0x50] sm:$0xf]  ;;  %223 = vst [vmem:[%s3868_s30 + $0x20] sm:$0xf] %v222_v8 }
  0x16   : > { %225 = vst [vmem:[%s3868_s30 + $0x24] sm:$0xf] %v224_v9  ;;  %227 = vst [vmem:[%s3868_s30 + $0x28] sm:$0xf] %v226_v10  ;;  %v228_v11 = vld [vmem:[%s3861_s29 + $0x58] sm:$0xf] }
  0x17   : > { %v230_v12 = vld [vmem:[%s3861_s29 + $0x60] sm:$0xf]  ;;  %v232_v13 = vld [vmem:[%s3861_s29 + $0x68] sm:$0xf]  ;;  %229 = vst [vmem:[%s3868_s30 + $0x2c] sm:$0xf] %v228_v11 }
  0x18   : > { %231 = vst [vmem:[%s3868_s30 + $0x30] sm:$0xf] %v230_v12  ;;  %233 = vst [vmem:[%s3868_s30 + $0x34] sm:$0xf] %v232_v13  ;;  %v234_v14 = vld [vmem:[%s3861_s29 + $0x70] sm:$0xf] }
  0x19   : > { %v236_v15 = vld [vmem:[%s3861_s29 + $0x78] sm:$0xf]  ;;  %v238_v16 = vld [vmem:[%s3861_s29 + $0x80] sm:$0xf]  ;;  %235 = vst [vmem:[%s3868_s30 + $0x38] sm:$0xf] %v234_v14 }
  0x1a   : > { %237 = vst [vmem:[%s3868_s30 + $0x3c] sm:$0xf] %v236_v15  ;;  %239 = vst [vmem:[%s3868_s30 + $0x40] sm:$0xf] %v238_v16  ;;  %v240_v17 = vld [vmem:[%s3861_s29 + $0x88] sm:$0xf] }
  0x1b   : > { %v242_v18 = vld [vmem:[%s3861_s29 + $0x90] sm:$0xf]  ;;  %v244_v19 = vld [vmem:[%s3861_s29 + $0x98] sm:$0xf]  ;;  %241 = vst [vmem:[%s3868_s30 + $0x44] sm:$0xf] %v240_v17 }
  0x1c   : > { %243 = vst [vmem:[%s3868_s30 + $0x48] sm:$0xf] %v242_v18  ;;  %245 = vst [vmem:[%s3868_s30 + $0x4c] sm:$0xf] %v244_v19  ;;  %v246_v20 = vld [vmem:[%s3861_s29 + $0xa0] sm:$0xf] }
  0x1d   : > { %v248_v21 = vld [vmem:[%s3861_s29 + $0xa8] sm:$0xf]  ;;  %v250_v22 = vld [vmem:[%s3861_s29 + $0xb0] sm:$0xf]  ;;  %247 = vst [vmem:[%s3868_s30 + $0x50] sm:$0xf] %v246_v20 }
  0x1e   : > { %249 = vst [vmem:[%s3868_s30 + $0x54] sm:$0xf] %v248_v21  ;;  %251 = vst [vmem:[%s3868_s30 + $0x58] sm:$0xf] %v250_v22  ;;  %v252_v23 = vld [vmem:[%s3861_s29 + $0xb8] sm:$0xf] }
  0x1f   : > { %v254_v24 = vld [vmem:[%s3861_s29 + $0xc0] sm:$0xf]  ;;  %v256_v25 = vld [vmem:[%s3861_s29 + $0xc8] sm:$0xf]  ;;  %253 = vst [vmem:[%s3868_s30 + $0x5c] sm:$0xf] %v252_v23 }
  0x20   : > { %255 = vst [vmem:[%s3868_s30 + $0x60] sm:$0xf] %v254_v24  ;;  %257 = vst [vmem:[%s3868_s30 + $0x64] sm:$0xf] %v256_v25  ;;  %v258_v26 = vld [vmem:[%s3861_s29 + $0xd0] sm:$0xf] }
  0x21   : > { %v260_v27 = vld [vmem:[%s3861_s29 + $0xd8] sm:$0xf]  ;;  %v262_v28 = vld [vmem:[%s3861_s29 + $0xe0] sm:$0xf]  ;;  %259 = vst [vmem:[%s3868_s30 + $0x68] sm:$0xf] %v258_v26 }
  0x22   : > { %261 = vst [vmem:[%s3868_s30 + $0x6c] sm:$0xf] %v260_v27  ;;  %263 = vst [vmem:[%s3868_s30 + $0x70] sm:$0xf] %v262_v28  ;;  %v264_v29 = vld [vmem:[%s3861_s29 + $0xe8] sm:$0xf] }
  0x23   : > { %v266_v30 = vld [vmem:[%s3861_s29 + $0xf0] sm:$0xf]  ;;  %v268_v31 = vld [vmem:[%s3861_s29 + $0xf8] sm:$0xf]  ;;  %265 = vst [vmem:[%s3868_s30 + $0x74] sm:$0xf] %v264_v29 }
  0x24   : > { %267 = vst [vmem:[%s3868_s30 + $0x78] sm:$0xf] %v266_v30  ;;  %269 = vst [vmem:[%s3868_s30 + $0x7c] sm:$0xf] %v268_v31  ;;  %v270_v32 = vld [vmem:[%s3861_s29 + $0x100] sm:$0xf] }
  0x25   : > { %v272_v33 = vld [vmem:[%s3861_s29 + $0x108] sm:$0xf]  ;;  %v274_v34 = vld [vmem:[%s3861_s29 + $0x110] sm:$0xf]  ;;  %271 = vst [vmem:[%s3868_s30 + $0x80] sm:$0xf] %v270_v32 }
  0x26   : > { %273 = vst [vmem:[%s3868_s30 + $0x84] sm:$0xf] %v272_v33  ;;  %275 = vst [vmem:[%s3868_s30 + $0x88] sm:$0xf] %v274_v34  ;;  %v276_v35 = vld [vmem:[%s3861_s29 + $0x118] sm:$0xf] }
  0x27   : > { %v278_v36 = vld [vmem:[%s3861_s29 + $0x120] sm:$0xf]  ;;  %v280_v37 = vld [vmem:[%s3861_s29 + $0x128] sm:$0xf]  ;;  %277 = vst [vmem:[%s3868_s30 + $0x8c] sm:$0xf] %v276_v35 }
  0x28   : > { %279 = vst [vmem:[%s3868_s30 + $0x90] sm:$0xf] %v278_v36  ;;  %281 = vst [vmem:[%s3868_s30 + $0x94] sm:$0xf] %v280_v37  ;;  %v282_v38 = vld [vmem:[%s3861_s29 + $0x130] sm:$0xf] }
  0x29   : > { %v284_v39 = vld [vmem:[%s3861_s29 + $0x138] sm:$0xf]  ;;  %v286_v40 = vld [vmem:[%s3861_s29 + $0x140] sm:$0xf]  ;;  %283 = vst [vmem:[%s3868_s30 + $0x98] sm:$0xf] %v282_v38 }
  0x2a   : > { %285 = vst [vmem:[%s3868_s30 + $0x9c] sm:$0xf] %v284_v39  ;;  %287 = vst [vmem:[%s3868_s30 + $0xa0] sm:$0xf] %v286_v40  ;;  %v288_v41 = vld [vmem:[%s3861_s29 + $0x148] sm:$0xf] }
  0x2b   : > { %v290_v42 = vld [vmem:[%s3861_s29 + $0x150] sm:$0xf]  ;;  %v292_v43 = vld [vmem:[%s3861_s29 + $0x158] sm:$0xf]  ;;  %289 = vst [vmem:[%s3868_s30 + $0xa4] sm:$0xf] %v288_v41 }
  0x2c   : > { %291 = vst [vmem:[%s3868_s30 + $0xa8] sm:$0xf] %v290_v42  ;;  %293 = vst [vmem:[%s3868_s30 + $0xac] sm:$0xf] %v292_v43  ;;  %v294_v44 = vld [vmem:[%s3861_s29 + $0x160] sm:$0xf] }
  0x2d   : > { %v296_v45 = vld [vmem:[%s3861_s29 + $0x168] sm:$0xf]  ;;  %v298_v46 = vld [vmem:[%s3861_s29 + $0x170] sm:$0xf]  ;;  %295 = vst [vmem:[%s3868_s30 + $0xb0] sm:$0xf] %v294_v44 }
  0x2e   : > { %297 = vst [vmem:[%s3868_s30 + $0xb4] sm:$0xf] %v296_v45  ;;  %299 = vst [vmem:[%s3868_s30 + $0xb8] sm:$0xf] %v298_v46  ;;  %v300_v47 = vld [vmem:[%s3861_s29 + $0x178] sm:$0xf] }
  0x2f   : > { %v302_v48 = vld [vmem:[%s3861_s29 + $0x180] sm:$0xf]  ;;  %v304_v49 = vld [vmem:[%s3861_s29 + $0x188] sm:$0xf]  ;;  %301 = vst [vmem:[%s3868_s30 + $0xbc] sm:$0xf] %v300_v47 }
  0x30   : > { %303 = vst [vmem:[%s3868_s30 + $0xc0] sm:$0xf] %v302_v48  ;;  %305 = vst [vmem:[%s3868_s30 + $0xc4] sm:$0xf] %v304_v49  ;;  %v306_v50 = vld [vmem:[%s3861_s29 + $0x190] sm:$0xf] }
  0x31   : > { %v308_v51 = vld [vmem:[%s3861_s29 + $0x198] sm:$0xf]  ;;  %v310_v52 = vld [vmem:[%s3861_s29 + $0x1a0] sm:$0xf]  ;;  %307 = vst [vmem:[%s3868_s30 + $0xc8] sm:$0xf] %v306_v50 }
  0x32   : > { %309 = vst [vmem:[%s3868_s30 + $0xcc] sm:$0xf] %v308_v51  ;;  %311 = vst [vmem:[%s3868_s30 + $0xd0] sm:$0xf] %v310_v52  ;;  %v312_v53 = vld [vmem:[%s3861_s29 + $0x1a8] sm:$0xf] }
  0x33   : > { %v314_v54 = vld [vmem:[%s3861_s29 + $0x1b0] sm:$0xf]  ;;  %v316_v55 = vld [vmem:[%s3861_s29 + $0x1b8] sm:$0xf]  ;;  %313 = vst [vmem:[%s3868_s30 + $0xd4] sm:$0xf] %v312_v53 }
  0x34   : > { %315 = vst [vmem:[%s3868_s30 + $0xd8] sm:$0xf] %v314_v54  ;;  %317 = vst [vmem:[%s3868_s30 + $0xdc] sm:$0xf] %v316_v55  ;;  %v318_v56 = vld [vmem:[%s3861_s29 + $0x1c0] sm:$0xf] }
  0x35   : > { %v320_v57 = vld [vmem:[%s3861_s29 + $0x1c8] sm:$0xf]  ;;  %v322_v58 = vld [vmem:[%s3861_s29 + $0x1d0] sm:$0xf]  ;;  %319 = vst [vmem:[%s3868_s30 + $0xe0] sm:$0xf] %v318_v56 }
  0x36   : > { %321 = vst [vmem:[%s3868_s30 + $0xe4] sm:$0xf] %v320_v57  ;;  %323 = vst [vmem:[%s3868_s30 + $0xe8] sm:$0xf] %v322_v58  ;;  %v324_v59 = vld [vmem:[%s3861_s29 + $0x1d8] sm:$0xf] }
  0x37   : > { %v326_v60 = vld [vmem:[%s3861_s29 + $0x1e0] sm:$0xf]  ;;  %v328_v61 = vld [vmem:[%s3861_s29 + $0x1e8] sm:$0xf]  ;;  %325 = vst [vmem:[%s3868_s30 + $0xec] sm:$0xf] %v324_v59 }
  0x38   : > { %327 = vst [vmem:[%s3868_s30 + $0xf0] sm:$0xf] %v326_v60  ;;  %329 = vst [vmem:[%s3868_s30 + $0xf4] sm:$0xf] %v328_v61  ;;  %v330_v62 = vld [vmem:[%s3861_s29 + $0x1f0] sm:$0xf] }
  0x39   : > { %v332_v63 = vld [vmem:[%s3861_s29 + $0x1f8] sm:$0xf]  ;;  %v334_v0 = vld [vmem:[%s3861_s29 + $0x200] sm:$0xf]  ;;  %331 = vst [vmem:[%s3868_s30 + $0xf8] sm:$0xf] %v330_v62 }
  0x3a   : > { %333 = vst [vmem:[%s3868_s30 + $0xfc] sm:$0xf] %v332_v63  ;;  %335 = vst [vmem:[%s3868_s30 + $0x100] sm:$0xf] %v334_v0  ;;  %v336_v1 = vld [vmem:[%s3861_s29 + $0x208] sm:$0xf] }
  0x3b   : > { %v338_v2 = vld [vmem:[%s3861_s29 + $0x210] sm:$0xf]  ;;  %v340_v3 = vld [vmem:[%s3861_s29 + $0x218] sm:$0xf]  ;;  %337 = vst [vmem:[%s3868_s30 + $0x104] sm:$0xf] %v336_v1 }
  0x3c   : > { %339 = vst [vmem:[%s3868_s30 + $0x108] sm:$0xf] %v338_v2  ;;  %341 = vst [vmem:[%s3868_s30 + $0x10c] sm:$0xf] %v340_v3  ;;  %v342_v4 = vld [vmem:[%s3861_s29 + $0x220] sm:$0xf] }
  0x3d   : > { %v344_v5 = vld [vmem:[%s3861_s29 + $0x228] sm:$0xf]  ;;  %v346_v6 = vld [vmem:[%s3861_s29 + $0x230] sm:$0xf]  ;;  %343 = vst [vmem:[%s3868_s30 + $0x110] sm:$0xf] %v342_v4 }
  0x3e   : > { %345 = vst [vmem:[%s3868_s30 + $0x114] sm:$0xf] %v344_v5  ;;  %347 = vst [vmem:[%s3868_s30 + $0x118] sm:$0xf] %v346_v6  ;;  %v348_v7 = vld [vmem:[%s3861_s29 + $0x238] sm:$0xf] }
  0x3f   : > { %v350_v8 = vld [vmem:[%s3861_s29 + $0x240] sm:$0xf]  ;;  %v352_v9 = vld [vmem:[%s3861_s29 + $0x248] sm:$0xf]  ;;  %349 = vst [vmem:[%s3868_s30 + $0x11c] sm:$0xf] %v348_v7 }
  0x40   : > { %351 = vst [vmem:[%s3868_s30 + $0x120] sm:$0xf] %v350_v8  ;;  %353 = vst [vmem:[%s3868_s30 + $0x124] sm:$0xf] %v352_v9  ;;  %v354_v10 = vld [vmem:[%s3861_s29 + $0x250] sm:$0xf] }
  0x41   : > { %v356_v11 = vld [vmem:[%s3861_s29 + $0x258] sm:$0xf]  ;;  %v358_v12 = vld [vmem:[%s3861_s29 + $0x260] sm:$0xf]  ;;  %355 = vst [vmem:[%s3868_s30 + $0x128] sm:$0xf] %v354_v10 }
  0x42   : > { %357 = vst [vmem:[%s3868_s30 + $0x12c] sm:$0xf] %v356_v11  ;;  %359 = vst [vmem:[%s3868_s30 + $0x130] sm:$0xf] %v358_v12  ;;  %v360_v13 = vld [vmem:[%s3861_s29 + $0x268] sm:$0xf] }
  0x43   : > { %v362_v14 = vld [vmem:[%s3861_s29 + $0x270] sm:$0xf]  ;;  %v364_v15 = vld [vmem:[%s3861_s29 + $0x278] sm:$0xf]  ;;  %361 = vst [vmem:[%s3868_s30 + $0x134] sm:$0xf] %v360_v13 }
  0x44   : > { %363 = vst [vmem:[%s3868_s30 + $0x138] sm:$0xf] %v362_v14  ;;  %365 = vst [vmem:[%s3868_s30 + $0x13c] sm:$0xf] %v364_v15  ;;  %v366_v16 = vld [vmem:[%s3861_s29 + $0x280] sm:$0xf] }
  0x45   : > { %v368_v17 = vld [vmem:[%s3861_s29 + $0x288] sm:$0xf]  ;;  %v370_v18 = vld [vmem:[%s3861_s29 + $0x290] sm:$0xf]  ;;  %367 = vst [vmem:[%s3868_s30 + $0x140] sm:$0xf] %v366_v16 }
  0x46   : > { %369 = vst [vmem:[%s3868_s30 + $0x144] sm:$0xf] %v368_v17  ;;  %371 = vst [vmem:[%s3868_s30 + $0x148] sm:$0xf] %v370_v18  ;;  %v372_v19 = vld [vmem:[%s3861_s29 + $0x298] sm:$0xf] }
  0x47   : > { %v374_v20 = vld [vmem:[%s3861_s29 + $0x2a0] sm:$0xf]  ;;  %v376_v21 = vld [vmem:[%s3861_s29 + $0x2a8] sm:$0xf]  ;;  %373 = vst [vmem:[%s3868_s30 + $0x14c] sm:$0xf] %v372_v19 }
  0x48   : > { %375 = vst [vmem:[%s3868_s30 + $0x150] sm:$0xf] %v374_v20  ;;  %377 = vst [vmem:[%s3868_s30 + $0x154] sm:$0xf] %v376_v21  ;;  %v378_v22 = vld [vmem:[%s3861_s29 + $0x2b0] sm:$0xf] }
  0x49   : > { %v380_v23 = vld [vmem:[%s3861_s29 + $0x2b8] sm:$0xf]  ;;  %v382_v24 = vld [vmem:[%s3861_s29 + $0x2c0] sm:$0xf]  ;;  %379 = vst [vmem:[%s3868_s30 + $0x158] sm:$0xf] %v378_v22 }
  0x4a   : > { %381 = vst [vmem:[%s3868_s30 + $0x15c] sm:$0xf] %v380_v23  ;;  %383 = vst [vmem:[%s3868_s30 + $0x160] sm:$0xf] %v382_v24  ;;  %v384_v25 = vld [vmem:[%s3861_s29 + $0x2c8] sm:$0xf] }
  0x4b   : > { %v386_v26 = vld [vmem:[%s3861_s29 + $0x2d0] sm:$0xf]  ;;  %v388_v27 = vld [vmem:[%s3861_s29 + $0x2d8] sm:$0xf]  ;;  %385 = vst [vmem:[%s3868_s30 + $0x164] sm:$0xf] %v384_v25 }
  0x4c   : > { %387 = vst [vmem:[%s3868_s30 + $0x168] sm:$0xf] %v386_v26  ;;  %389 = vst [vmem:[%s3868_s30 + $0x16c] sm:$0xf] %v388_v27  ;;  %v390_v28 = vld [vmem:[%s3861_s29 + $0x2e0] sm:$0xf] }
  0x4d   : > { %v392_v29 = vld [vmem:[%s3861_s29 + $0x2e8] sm:$0xf]  ;;  %v394_v30 = vld [vmem:[%s3861_s29 + $0x2f0] sm:$0xf]  ;;  %391 = vst [vmem:[%s3868_s30 + $0x170] sm:$0xf] %v390_v28 }
  0x4e   : > { %393 = vst [vmem:[%s3868_s30 + $0x174] sm:$0xf] %v392_v29  ;;  %395 = vst [vmem:[%s3868_s30 + $0x178] sm:$0xf] %v394_v30  ;;  %v396_v31 = vld [vmem:[%s3861_s29 + $0x2f8] sm:$0xf] }
  0x4f   : > { %v398_v32 = vld [vmem:[%s3861_s29 + $0x300] sm:$0xf]  ;;  %v400_v33 = vld [vmem:[%s3861_s29 + $0x308] sm:$0xf]  ;;  %397 = vst [vmem:[%s3868_s30 + $0x17c] sm:$0xf] %v396_v31 }
  0x50   : > { %399 = vst [vmem:[%s3868_s30 + $0x180] sm:$0xf] %v398_v32  ;;  %401 = vst [vmem:[%s3868_s30 + $0x184] sm:$0xf] %v400_v33  ;;  %v402_v34 = vld [vmem:[%s3861_s29 + $0x310] sm:$0xf] }
  0x51   : > { %v404_v35 = vld [vmem:[%s3861_s29 + $0x318] sm:$0xf]  ;;  %v406_v36 = vld [vmem:[%s3861_s29 + $0x320] sm:$0xf]  ;;  %403 = vst [vmem:[%s3868_s30 + $0x188] sm:$0xf] %v402_v34 }
  0x52   : > { %405 = vst [vmem:[%s3868_s30 + $0x18c] sm:$0xf] %v404_v35  ;;  %407 = vst [vmem:[%s3868_s30 + $0x190] sm:$0xf] %v406_v36  ;;  %v408_v37 = vld [vmem:[%s3861_s29 + $0x328] sm:$0xf] }
  0x53   : > { %v410_v38 = vld [vmem:[%s3861_s29 + $0x330] sm:$0xf]  ;;  %v412_v39 = vld [vmem:[%s3861_s29 + $0x338] sm:$0xf]  ;;  %409 = vst [vmem:[%s3868_s30 + $0x194] sm:$0xf] %v408_v37 }
  0x54   : > { %411 = vst [vmem:[%s3868_s30 + $0x198] sm:$0xf] %v410_v38  ;;  %413 = vst [vmem:[%s3868_s30 + $0x19c] sm:$0xf] %v412_v39  ;;  %v414_v40 = vld [vmem:[%s3861_s29 + $0x340] sm:$0xf] }
  0x55   : > { %v416_v41 = vld [vmem:[%s3861_s29 + $0x348] sm:$0xf]  ;;  %v418_v42 = vld [vmem:[%s3861_s29 + $0x350] sm:$0xf]  ;;  %415 = vst [vmem:[%s3868_s30 + $0x1a0] sm:$0xf] %v414_v40 }
  0x56   : > { %417 = vst [vmem:[%s3868_s30 + $0x1a4] sm:$0xf] %v416_v41  ;;  %419 = vst [vmem:[%s3868_s30 + $0x1a8] sm:$0xf] %v418_v42  ;;  %v420_v43 = vld [vmem:[%s3861_s29 + $0x358] sm:$0xf] }
  0x57   : > { %v422_v44 = vld [vmem:[%s3861_s29 + $0x360] sm:$0xf]  ;;  %v424_v45 = vld [vmem:[%s3861_s29 + $0x368] sm:$0xf]  ;;  %421 = vst [vmem:[%s3868_s30 + $0x1ac] sm:$0xf] %v420_v43 }
  0x58   : > { %423 = vst [vmem:[%s3868_s30 + $0x1b0] sm:$0xf] %v422_v44  ;;  %425 = vst [vmem:[%s3868_s30 + $0x1b4] sm:$0xf] %v424_v45  ;;  %v426_v46 = vld [vmem:[%s3861_s29 + $0x370] sm:$0xf] }
  0x59   : > { %v428_v47 = vld [vmem:[%s3861_s29 + $0x378] sm:$0xf]  ;;  %v430_v48 = vld [vmem:[%s3861_s29 + $0x380] sm:$0xf]  ;;  %427 = vst [vmem:[%s3868_s30 + $0x1b8] sm:$0xf] %v426_v46 }
  0x5a   : > { %429 = vst [vmem:[%s3868_s30 + $0x1bc] sm:$0xf] %v428_v47  ;;  %431 = vst [vmem:[%s3868_s30 + $0x1c0] sm:$0xf] %v430_v48  ;;  %v432_v49 = vld [vmem:[%s3861_s29 + $0x388] sm:$0xf] }
  0x5b   : > { %v434_v50 = vld [vmem:[%s3861_s29 + $0x390] sm:$0xf]  ;;  %v436_v51 = vld [vmem:[%s3861_s29 + $0x398] sm:$0xf]  ;;  %433 = vst [vmem:[%s3868_s30 + $0x1c4] sm:$0xf] %v432_v49 }
  0x5c   : > { %435 = vst [vmem:[%s3868_s30 + $0x1c8] sm:$0xf] %v434_v50  ;;  %437 = vst [vmem:[%s3868_s30 + $0x1cc] sm:$0xf] %v436_v51  ;;  %v438_v52 = vld [vmem:[%s3861_s29 + $0x3a0] sm:$0xf] }
  0x5d   : > { %v440_v53 = vld [vmem:[%s3861_s29 + $0x3a8] sm:$0xf]  ;;  %v442_v54 = vld [vmem:[%s3861_s29 + $0x3b0] sm:$0xf]  ;;  %439 = vst [vmem:[%s3868_s30 + $0x1d0] sm:$0xf] %v438_v52 }
  0x5e   : > { %441 = vst [vmem:[%s3868_s30 + $0x1d4] sm:$0xf] %v440_v53  ;;  %443 = vst [vmem:[%s3868_s30 + $0x1d8] sm:$0xf] %v442_v54  ;;  %v444_v55 = vld [vmem:[%s3861_s29 + $0x3b8] sm:$0xf] }
  0x5f   : > { %v446_v56 = vld [vmem:[%s3861_s29 + $0x3c0] sm:$0xf]  ;;  %v448_v57 = vld [vmem:[%s3861_s29 + $0x3c8] sm:$0xf]  ;;  %445 = vst [vmem:[%s3868_s30 + $0x1dc] sm:$0xf] %v444_v55 }
  0x60   : > { %447 = vst [vmem:[%s3868_s30 + $0x1e0] sm:$0xf] %v446_v56  ;;  %449 = vst [vmem:[%s3868_s30 + $0x1e4] sm:$0xf] %v448_v57  ;;  %v450_v58 = vld [vmem:[%s3861_s29 + $0x3d0] sm:$0xf] }
  0x61   : > { %v452_v59 = vld [vmem:[%s3861_s29 + $0x3d8] sm:$0xf]  ;;  %v454_v60 = vld [vmem:[%s3861_s29 + $0x3e0] sm:$0xf]  ;;  %451 = vst [vmem:[%s3868_s30 + $0x1e8] sm:$0xf] %v450_v58 }
  0x62   : > { %453 = vst [vmem:[%s3868_s30 + $0x1ec] sm:$0xf] %v452_v59  ;;  %455 = vst [vmem:[%s3868_s30 + $0x1f0] sm:$0xf] %v454_v60  ;;  %v456_v61 = vld [vmem:[%s3861_s29 + $0x3e8] sm:$0xf] }
  0x63   : > { %v458_v62 = vld [vmem:[%s3861_s29 + $0x3f0] sm:$0xf]  ;;  %v460_v63 = vld [vmem:[%s3861_s29 + $0x3f8] sm:$0xf]  ;;  %457 = vst [vmem:[%s3868_s30 + $0x1f4] sm:$0xf] %v456_v61 }
  0x64   : > { %459 = vst [vmem:[%s3868_s30 + $0x1f8] sm:$0xf] %v458_v62  ;;  %461 = vst [vmem:[%s3868_s30 + $0x1fc] sm:$0xf] %v460_v63  ;;  %v462_v0 = vld [vmem:[%s3861_s29 + $0x400] sm:$0xf] }
  0x65   : > { %v464_v1 = vld [vmem:[%s3861_s29 + $0x408] sm:$0xf]  ;;  %v466_v2 = vld [vmem:[%s3861_s29 + $0x410] sm:$0xf]  ;;  %463 = vst [vmem:[%s3868_s30 + $0x200] sm:$0xf] %v462_v0 }
  0x66   : > { %465 = vst [vmem:[%s3868_s30 + $0x204] sm:$0xf] %v464_v1  ;;  %467 = vst [vmem:[%s3868_s30 + $0x208] sm:$0xf] %v466_v2  ;;  %v468_v3 = vld [vmem:[%s3861_s29 + $0x418] sm:$0xf] }
  0x67   : > { %v470_v4 = vld [vmem:[%s3861_s29 + $0x420] sm:$0xf]  ;;  %v472_v5 = vld [vmem:[%s3861_s29 + $0x428] sm:$0xf]  ;;  %469 = vst [vmem:[%s3868_s30 + $0x20c] sm:$0xf] %v468_v3 }
  0x68   : > { %471 = vst [vmem:[%s3868_s30 + $0x210] sm:$0xf] %v470_v4  ;;  %473 = vst [vmem:[%s3868_s30 + $0x214] sm:$0xf] %v472_v5  ;;  %v474_v6 = vld [vmem:[%s3861_s29 + $0x430] sm:$0xf] }
  0x69   : > { %v476_v7 = vld [vmem:[%s3861_s29 + $0x438] sm:$0xf]  ;;  %v478_v8 = vld [vmem:[%s3861_s29 + $0x440] sm:$0xf]  ;;  %475 = vst [vmem:[%s3868_s30 + $0x218] sm:$0xf] %v474_v6 }
  0x6a   : > { %477 = vst [vmem:[%s3868_s30 + $0x21c] sm:$0xf] %v476_v7  ;;  %479 = vst [vmem:[%s3868_s30 + $0x220] sm:$0xf] %v478_v8  ;;  %v480_v9 = vld [vmem:[%s3861_s29 + $0x448] sm:$0xf] }
  0x6b   : > { %v482_v10 = vld [vmem:[%s3861_s29 + $0x450] sm:$0xf]  ;;  %v484_v11 = vld [vmem:[%s3861_s29 + $0x458] sm:$0xf]  ;;  %481 = vst [vmem:[%s3868_s30 + $0x224] sm:$0xf] %v480_v9 }
  0x6c   : > { %483 = vst [vmem:[%s3868_s30 + $0x228] sm:$0xf] %v482_v10  ;;  %485 = vst [vmem:[%s3868_s30 + $0x22c] sm:$0xf] %v484_v11  ;;  %v486_v12 = vld [vmem:[%s3861_s29 + $0x460] sm:$0xf] }
  0x6d   : > { %v488_v13 = vld [vmem:[%s3861_s29 + $0x468] sm:$0xf]  ;;  %v490_v14 = vld [vmem:[%s3861_s29 + $0x470] sm:$0xf]  ;;  %487 = vst [vmem:[%s3868_s30 + $0x230] sm:$0xf] %v486_v12 }
  0x6e   : > { %489 = vst [vmem:[%s3868_s30 + $0x234] sm:$0xf] %v488_v13  ;;  %491 = vst [vmem:[%s3868_s30 + $0x238] sm:$0xf] %v490_v14  ;;  %v492_v15 = vld [vmem:[%s3861_s29 + $0x478] sm:$0xf] }
  0x6f   : > { %v494_v16 = vld [vmem:[%s3861_s29 + $0x480] sm:$0xf]  ;;  %v496_v17 = vld [vmem:[%s3861_s29 + $0x488] sm:$0xf]  ;;  %493 = vst [vmem:[%s3868_s30 + $0x23c] sm:$0xf] %v492_v15 }
  0x70   : > { %495 = vst [vmem:[%s3868_s30 + $0x240] sm:$0xf] %v494_v16  ;;  %497 = vst [vmem:[%s3868_s30 + $0x244] sm:$0xf] %v496_v17  ;;  %v498_v18 = vld [vmem:[%s3861_s29 + $0x490] sm:$0xf] }
  0x71   : > { %v500_v19 = vld [vmem:[%s3861_s29 + $0x498] sm:$0xf]  ;;  %v502_v20 = vld [vmem:[%s3861_s29 + $0x4a0] sm:$0xf]  ;;  %499 = vst [vmem:[%s3868_s30 + $0x248] sm:$0xf] %v498_v18 }
  0x72   : > { %501 = vst [vmem:[%s3868_s30 + $0x24c] sm:$0xf] %v500_v19  ;;  %503 = vst [vmem:[%s3868_s30 + $0x250] sm:$0xf] %v502_v20  ;;  %v504_v21 = vld [vmem:[%s3861_s29 + $0x4a8] sm:$0xf] }
  0x73   : > { %v506_v22 = vld [vmem:[%s3861_s29 + $0x4b0] sm:$0xf]  ;;  %v508_v23 = vld [vmem:[%s3861_s29 + $0x4b8] sm:$0xf]  ;;  %505 = vst [vmem:[%s3868_s30 + $0x254] sm:$0xf] %v504_v21 }
  0x74   : > { %507 = vst [vmem:[%s3868_s30 + $0x258] sm:$0xf] %v506_v22  ;;  %509 = vst [vmem:[%s3868_s30 + $0x25c] sm:$0xf] %v508_v23  ;;  %v510_v24 = vld [vmem:[%s3861_s29 + $0x4c0] sm:$0xf] }
  0x75   : > { %v512_v25 = vld [vmem:[%s3861_s29 + $0x4c8] sm:$0xf]  ;;  %v514_v26 = vld [vmem:[%s3861_s29 + $0x4d0] sm:$0xf]  ;;  %511 = vst [vmem:[%s3868_s30 + $0x260] sm:$0xf] %v510_v24 }
  0x76   : > { %513 = vst [vmem:[%s3868_s30 + $0x264] sm:$0xf] %v512_v25  ;;  %515 = vst [vmem:[%s3868_s30 + $0x268] sm:$0xf] %v514_v26  ;;  %v516_v27 = vld [vmem:[%s3861_s29 + $0x4d8] sm:$0xf] }
  0x77   : > { %v518_v28 = vld [vmem:[%s3861_s29 + $0x4e0] sm:$0xf]  ;;  %v520_v29 = vld [vmem:[%s3861_s29 + $0x4e8] sm:$0xf]  ;;  %517 = vst [vmem:[%s3868_s30 + $0x26c] sm:$0xf] %v516_v27 }
  0x78   : > { %519 = vst [vmem:[%s3868_s30 + $0x270] sm:$0xf] %v518_v28  ;;  %521 = vst [vmem:[%s3868_s30 + $0x274] sm:$0xf] %v520_v29  ;;  %v522_v30 = vld [vmem:[%s3861_s29 + $0x4f0] sm:$0xf] }
  0x79   : > { %v524_v31 = vld [vmem:[%s3861_s29 + $0x4f8] sm:$0xf]  ;;  %v526_v32 = vld [vmem:[%s3861_s29 + $0x500] sm:$0xf]  ;;  %523 = vst [vmem:[%s3868_s30 + $0x278] sm:$0xf] %v522_v30 }
  0x7a   : > { %525 = vst [vmem:[%s3868_s30 + $0x27c] sm:$0xf] %v524_v31  ;;  %527 = vst [vmem:[%s3868_s30 + $0x280] sm:$0xf] %v526_v32  ;;  %v528_v33 = vld [vmem:[%s3861_s29 + $0x508] sm:$0xf] }
  0x7b   : > { %v530_v34 = vld [vmem:[%s3861_s29 + $0x510] sm:$0xf]  ;;  %v532_v35 = vld [vmem:[%s3861_s29 + $0x518] sm:$0xf]  ;;  %529 = vst [vmem:[%s3868_s30 + $0x284] sm:$0xf] %v528_v33 }
  0x7c   : > { %531 = vst [vmem:[%s3868_s30 + $0x288] sm:$0xf] %v530_v34  ;;  %533 = vst [vmem:[%s3868_s30 + $0x28c] sm:$0xf] %v532_v35  ;;  %v534_v36 = vld [vmem:[%s3861_s29 + $0x520] sm:$0xf] }
  0x7d   : > { %v536_v37 = vld [vmem:[%s3861_s29 + $0x528] sm:$0xf]  ;;  %v538_v38 = vld [vmem:[%s3861_s29 + $0x530] sm:$0xf]  ;;  %535 = vst [vmem:[%s3868_s30 + $0x290] sm:$0xf] %v534_v36 }
  0x7e   : > { %537 = vst [vmem:[%s3868_s30 + $0x294] sm:$0xf] %v536_v37  ;;  %539 = vst [vmem:[%s3868_s30 + $0x298] sm:$0xf] %v538_v38  ;;  %v540_v39 = vld [vmem:[%s3861_s29 + $0x538] sm:$0xf] }
  0x7f   : > { %v542_v40 = vld [vmem:[%s3861_s29 + $0x540] sm:$0xf]  ;;  %v544_v41 = vld [vmem:[%s3861_s29 + $0x548] sm:$0xf]  ;;  %541 = vst [vmem:[%s3868_s30 + $0x29c] sm:$0xf] %v540_v39 }
  0x80   : > { %543 = vst [vmem:[%s3868_s30 + $0x2a0] sm:$0xf] %v542_v40  ;;  %545 = vst [vmem:[%s3868_s30 + $0x2a4] sm:$0xf] %v544_v41  ;;  %v546_v42 = vld [vmem:[%s3861_s29 + $0x550] sm:$0xf] }
  0x81   : > { %v548_v43 = vld [vmem:[%s3861_s29 + $0x558] sm:$0xf]  ;;  %v550_v44 = vld [vmem:[%s3861_s29 + $0x560] sm:$0xf]  ;;  %547 = vst [vmem:[%s3868_s30 + $0x2a8] sm:$0xf] %v546_v42 }
  0x82   : > { %549 = vst [vmem:[%s3868_s30 + $0x2ac] sm:$0xf] %v548_v43  ;;  %551 = vst [vmem:[%s3868_s30 + $0x2b0] sm:$0xf] %v550_v44  ;;  %v552_v45 = vld [vmem:[%s3861_s29 + $0x568] sm:$0xf] }
  0x83   : > { %v554_v46 = vld [vmem:[%s3861_s29 + $0x570] sm:$0xf]  ;;  %v556_v47 = vld [vmem:[%s3861_s29 + $0x578] sm:$0xf]  ;;  %553 = vst [vmem:[%s3868_s30 + $0x2b4] sm:$0xf] %v552_v45 }
  0x84   : > { %555 = vst [vmem:[%s3868_s30 + $0x2b8] sm:$0xf] %v554_v46  ;;  %557 = vst [vmem:[%s3868_s30 + $0x2bc] sm:$0xf] %v556_v47  ;;  %v558_v48 = vld [vmem:[%s3861_s29 + $0x580] sm:$0xf] }
  0x85   : > { %v560_v49 = vld [vmem:[%s3861_s29 + $0x588] sm:$0xf]  ;;  %v562_v50 = vld [vmem:[%s3861_s29 + $0x590] sm:$0xf]  ;;  %559 = vst [vmem:[%s3868_s30 + $0x2c0] sm:$0xf] %v558_v48 }
  0x86   : > { %561 = vst [vmem:[%s3868_s30 + $0x2c4] sm:$0xf] %v560_v49  ;;  %563 = vst [vmem:[%s3868_s30 + $0x2c8] sm:$0xf] %v562_v50  ;;  %v564_v51 = vld [vmem:[%s3861_s29 + $0x598] sm:$0xf] }
  0x87   : > { %v566_v52 = vld [vmem:[%s3861_s29 + $0x5a0] sm:$0xf]  ;;  %v568_v53 = vld [vmem:[%s3861_s29 + $0x5a8] sm:$0xf]  ;;  %565 = vst [vmem:[%s3868_s30 + $0x2cc] sm:$0xf] %v564_v51 }
  0x88   : > { %567 = vst [vmem:[%s3868_s30 + $0x2d0] sm:$0xf] %v566_v52  ;;  %569 = vst [vmem:[%s3868_s30 + $0x2d4] sm:$0xf] %v568_v53  ;;  %v570_v54 = vld [vmem:[%s3861_s29 + $0x5b0] sm:$0xf] }
  0x89   : > { %v572_v55 = vld [vmem:[%s3861_s29 + $0x5b8] sm:$0xf]  ;;  %v574_v56 = vld [vmem:[%s3861_s29 + $0x5c0] sm:$0xf]  ;;  %571 = vst [vmem:[%s3868_s30 + $0x2d8] sm:$0xf] %v570_v54 }
  0x8a   : > { %573 = vst [vmem:[%s3868_s30 + $0x2dc] sm:$0xf] %v572_v55  ;;  %575 = vst [vmem:[%s3868_s30 + $0x2e0] sm:$0xf] %v574_v56  ;;  %v576_v57 = vld [vmem:[%s3861_s29 + $0x5c8] sm:$0xf] }
  0x8b   : > { %v578_v58 = vld [vmem:[%s3861_s29 + $0x5d0] sm:$0xf]  ;;  %v580_v59 = vld [vmem:[%s3861_s29 + $0x5d8] sm:$0xf]  ;;  %577 = vst [vmem:[%s3868_s30 + $0x2e4] sm:$0xf] %v576_v57 }
  0x8c   : > { %579 = vst [vmem:[%s3868_s30 + $0x2e8] sm:$0xf] %v578_v58  ;;  %581 = vst [vmem:[%s3868_s30 + $0x2ec] sm:$0xf] %v580_v59  ;;  %v582_v60 = vld [vmem:[%s3861_s29 + $0x5e0] sm:$0xf] }
  0x8d   : > { %v584_v61 = vld [vmem:[%s3861_s29 + $0x5e8] sm:$0xf]  ;;  %v586_v62 = vld [vmem:[%s3861_s29 + $0x5f0] sm:$0xf]  ;;  %583 = vst [vmem:[%s3868_s30 + $0x2f0] sm:$0xf] %v582_v60 }
  0x8e   : > { %585 = vst [vmem:[%s3868_s30 + $0x2f4] sm:$0xf] %v584_v61  ;;  %587 = vst [vmem:[%s3868_s30 + $0x2f8] sm:$0xf] %v586_v62  ;;  %v588_v63 = vld [vmem:[%s3861_s29 + $0x5f8] sm:$0xf] }
  0x8f   : > { %v590_v0 = vld [vmem:[%s3861_s29 + $0x600] sm:$0xf]  ;;  %v592_v1 = vld [vmem:[%s3861_s29 + $0x608] sm:$0xf]  ;;  %589 = vst [vmem:[%s3868_s30 + $0x2fc] sm:$0xf] %v588_v63 }
  0x90   : > { %591 = vst [vmem:[%s3868_s30 + $0x300] sm:$0xf] %v590_v0  ;;  %593 = vst [vmem:[%s3868_s30 + $0x304] sm:$0xf] %v592_v1  ;;  %v594_v2 = vld [vmem:[%s3861_s29 + $0x610] sm:$0xf] }
  0x91   : > { %v596_v3 = vld [vmem:[%s3861_s29 + $0x618] sm:$0xf]  ;;  %v598_v4 = vld [vmem:[%s3861_s29 + $0x620] sm:$0xf]  ;;  %595 = vst [vmem:[%s3868_s30 + $0x308] sm:$0xf] %v594_v2 }
  0x92   : > { %597 = vst [vmem:[%s3868_s30 + $0x30c] sm:$0xf] %v596_v3  ;;  %599 = vst [vmem:[%s3868_s30 + $0x310] sm:$0xf] %v598_v4  ;;  %v600_v5 = vld [vmem:[%s3861_s29 + $0x628] sm:$0xf] }
  0x93   : > { %v602_v6 = vld [vmem:[%s3861_s29 + $0x630] sm:$0xf]  ;;  %v604_v7 = vld [vmem:[%s3861_s29 + $0x638] sm:$0xf]  ;;  %601 = vst [vmem:[%s3868_s30 + $0x314] sm:$0xf] %v600_v5 }
  0x94   : > { %603 = vst [vmem:[%s3868_s30 + $0x318] sm:$0xf] %v602_v6  ;;  %605 = vst [vmem:[%s3868_s30 + $0x31c] sm:$0xf] %v604_v7  ;;  %v606_v8 = vld [vmem:[%s3861_s29 + $0x640] sm:$0xf] }
  0x95   : > { %v608_v9 = vld [vmem:[%s3861_s29 + $0x648] sm:$0xf]  ;;  %v610_v10 = vld [vmem:[%s3861_s29 + $0x650] sm:$0xf]  ;;  %607 = vst [vmem:[%s3868_s30 + $0x320] sm:$0xf] %v606_v8 }
  0x96   : > { %609 = vst [vmem:[%s3868_s30 + $0x324] sm:$0xf] %v608_v9  ;;  %611 = vst [vmem:[%s3868_s30 + $0x328] sm:$0xf] %v610_v10  ;;  %v612_v11 = vld [vmem:[%s3861_s29 + $0x658] sm:$0xf] }
  0x97   : > { %v614_v12 = vld [vmem:[%s3861_s29 + $0x660] sm:$0xf]  ;;  %v616_v13 = vld [vmem:[%s3861_s29 + $0x668] sm:$0xf]  ;;  %613 = vst [vmem:[%s3868_s30 + $0x32c] sm:$0xf] %v612_v11 }
  0x98   : > { %615 = vst [vmem:[%s3868_s30 + $0x330] sm:$0xf] %v614_v12  ;;  %617 = vst [vmem:[%s3868_s30 + $0x334] sm:$0xf] %v616_v13  ;;  %v618_v14 = vld [vmem:[%s3861_s29 + $0x670] sm:$0xf] }
  0x99   : > { %v620_v15 = vld [vmem:[%s3861_s29 + $0x678] sm:$0xf]  ;;  %v622_v16 = vld [vmem:[%s3861_s29 + $0x680] sm:$0xf]  ;;  %619 = vst [vmem:[%s3868_s30 + $0x338] sm:$0xf] %v618_v14 }
  0x9a   : > { %621 = vst [vmem:[%s3868_s30 + $0x33c] sm:$0xf] %v620_v15  ;;  %623 = vst [vmem:[%s3868_s30 + $0x340] sm:$0xf] %v622_v16  ;;  %v624_v17 = vld [vmem:[%s3861_s29 + $0x688] sm:$0xf] }
  0x9b   : > { %v626_v18 = vld [vmem:[%s3861_s29 + $0x690] sm:$0xf]  ;;  %v628_v19 = vld [vmem:[%s3861_s29 + $0x698] sm:$0xf]  ;;  %625 = vst [vmem:[%s3868_s30 + $0x344] sm:$0xf] %v624_v17 }
  0x9c   : > { %627 = vst [vmem:[%s3868_s30 + $0x348] sm:$0xf] %v626_v18  ;;  %629 = vst [vmem:[%s3868_s30 + $0x34c] sm:$0xf] %v628_v19  ;;  %v630_v20 = vld [vmem:[%s3861_s29 + $0x6a0] sm:$0xf] }
  0x9d   : > { %v632_v21 = vld [vmem:[%s3861_s29 + $0x6a8] sm:$0xf]  ;;  %v634_v22 = vld [vmem:[%s3861_s29 + $0x6b0] sm:$0xf]  ;;  %631 = vst [vmem:[%s3868_s30 + $0x350] sm:$0xf] %v630_v20 }
  0x9e   : > { %633 = vst [vmem:[%s3868_s30 + $0x354] sm:$0xf] %v632_v21  ;;  %635 = vst [vmem:[%s3868_s30 + $0x358] sm:$0xf] %v634_v22  ;;  %v636_v23 = vld [vmem:[%s3861_s29 + $0x6b8] sm:$0xf] }
  0x9f   : > { %v638_v24 = vld [vmem:[%s3861_s29 + $0x6c0] sm:$0xf]  ;;  %v640_v25 = vld [vmem:[%s3861_s29 + $0x6c8] sm:$0xf]  ;;  %637 = vst [vmem:[%s3868_s30 + $0x35c] sm:$0xf] %v636_v23 }
  0xa0   : > { %639 = vst [vmem:[%s3868_s30 + $0x360] sm:$0xf] %v638_v24  ;;  %641 = vst [vmem:[%s3868_s30 + $0x364] sm:$0xf] %v640_v25  ;;  %v642_v26 = vld [vmem:[%s3861_s29 + $0x6d0] sm:$0xf] }
  0xa1   : > { %v644_v27 = vld [vmem:[%s3861_s29 + $0x6d8] sm:$0xf]  ;;  %v646_v28 = vld [vmem:[%s3861_s29 + $0x6e0] sm:$0xf]  ;;  %643 = vst [vmem:[%s3868_s30 + $0x368] sm:$0xf] %v642_v26 }
  0xa2   : > { %645 = vst [vmem:[%s3868_s30 + $0x36c] sm:$0xf] %v644_v27  ;;  %647 = vst [vmem:[%s3868_s30 + $0x370] sm:$0xf] %v646_v28  ;;  %v648_v29 = vld [vmem:[%s3861_s29 + $0x6e8] sm:$0xf] }
  0xa3   : > { %v650_v30 = vld [vmem:[%s3861_s29 + $0x6f0] sm:$0xf]  ;;  %v652_v31 = vld [vmem:[%s3861_s29 + $0x6f8] sm:$0xf]  ;;  %649 = vst [vmem:[%s3868_s30 + $0x374] sm:$0xf] %v648_v29 }
  0xa4   : > { %651 = vst [vmem:[%s3868_s30 + $0x378] sm:$0xf] %v650_v30  ;;  %653 = vst [vmem:[%s3868_s30 + $0x37c] sm:$0xf] %v652_v31  ;;  %v654_v32 = vld [vmem:[%s3861_s29 + $0x700] sm:$0xf] }
  0xa5   : > { %v656_v33 = vld [vmem:[%s3861_s29 + $0x708] sm:$0xf]  ;;  %v658_v34 = vld [vmem:[%s3861_s29 + $0x710] sm:$0xf]  ;;  %655 = vst [vmem:[%s3868_s30 + $0x380] sm:$0xf] %v654_v32 }
  0xa6   : > { %657 = vst [vmem:[%s3868_s30 + $0x384] sm:$0xf] %v656_v33  ;;  %659 = vst [vmem:[%s3868_s30 + $0x388] sm:$0xf] %v658_v34  ;;  %v660_v35 = vld [vmem:[%s3861_s29 + $0x718] sm:$0xf] }
  0xa7   : > { %v662_v36 = vld [vmem:[%s3861_s29 + $0x720] sm:$0xf]  ;;  %v664_v37 = vld [vmem:[%s3861_s29 + $0x728] sm:$0xf]  ;;  %661 = vst [vmem:[%s3868_s30 + $0x38c] sm:$0xf] %v660_v35 }
  0xa8   : > { %663 = vst [vmem:[%s3868_s30 + $0x390] sm:$0xf] %v662_v36  ;;  %665 = vst [vmem:[%s3868_s30 + $0x394] sm:$0xf] %v664_v37  ;;  %v666_v38 = vld [vmem:[%s3861_s29 + $0x730] sm:$0xf] }
  0xa9   : > { %v668_v39 = vld [vmem:[%s3861_s29 + $0x738] sm:$0xf]  ;;  %v670_v40 = vld [vmem:[%s3861_s29 + $0x740] sm:$0xf]  ;;  %667 = vst [vmem:[%s3868_s30 + $0x398] sm:$0xf] %v666_v38 }
  0xaa   : > { %669 = vst [vmem:[%s3868_s30 + $0x39c] sm:$0xf] %v668_v39  ;;  %671 = vst [vmem:[%s3868_s30 + $0x3a0] sm:$0xf] %v670_v40  ;;  %v672_v41 = vld [vmem:[%s3861_s29 + $0x748] sm:$0xf] }
  0xab   : > { %v674_v42 = vld [vmem:[%s3861_s29 + $0x750] sm:$0xf]  ;;  %v676_v43 = vld [vmem:[%s3861_s29 + $0x758] sm:$0xf]  ;;  %673 = vst [vmem:[%s3868_s30 + $0x3a4] sm:$0xf] %v672_v41 }
  0xac   : > { %675 = vst [vmem:[%s3868_s30 + $0x3a8] sm:$0xf] %v674_v42  ;;  %677 = vst [vmem:[%s3868_s30 + $0x3ac] sm:$0xf] %v676_v43  ;;  %v678_v44 = vld [vmem:[%s3861_s29 + $0x760] sm:$0xf] }
  0xad   : > { %v680_v45 = vld [vmem:[%s3861_s29 + $0x768] sm:$0xf]  ;;  %v682_v46 = vld [vmem:[%s3861_s29 + $0x770] sm:$0xf]  ;;  %679 = vst [vmem:[%s3868_s30 + $0x3b0] sm:$0xf] %v678_v44 }
  0xae   : > { %681 = vst [vmem:[%s3868_s30 + $0x3b4] sm:$0xf] %v680_v45  ;;  %683 = vst [vmem:[%s3868_s30 + $0x3b8] sm:$0xf] %v682_v46  ;;  %v684_v47 = vld [vmem:[%s3861_s29 + $0x778] sm:$0xf] }
  0xaf   : > { %v686_v48 = vld [vmem:[%s3861_s29 + $0x780] sm:$0xf]  ;;  %v688_v49 = vld [vmem:[%s3861_s29 + $0x788] sm:$0xf]  ;;  %685 = vst [vmem:[%s3868_s30 + $0x3bc] sm:$0xf] %v684_v47 }
  0xb0   : > { %687 = vst [vmem:[%s3868_s30 + $0x3c0] sm:$0xf] %v686_v48  ;;  %689 = vst [vmem:[%s3868_s30 + $0x3c4] sm:$0xf] %v688_v49  ;;  %v690_v50 = vld [vmem:[%s3861_s29 + $0x790] sm:$0xf] }
  0xb1   : > { %v692_v51 = vld [vmem:[%s3861_s29 + $0x798] sm:$0xf]  ;;  %v694_v52 = vld [vmem:[%s3861_s29 + $0x7a0] sm:$0xf]  ;;  %691 = vst [vmem:[%s3868_s30 + $0x3c8] sm:$0xf] %v690_v50 }
  0xb2   : > { %693 = vst [vmem:[%s3868_s30 + $0x3cc] sm:$0xf] %v692_v51  ;;  %695 = vst [vmem:[%s3868_s30 + $0x3d0] sm:$0xf] %v694_v52  ;;  %v696_v53 = vld [vmem:[%s3861_s29 + $0x7a8] sm:$0xf] }
  0xb3   : > { %v698_v54 = vld [vmem:[%s3861_s29 + $0x7b0] sm:$0xf]  ;;  %v700_v55 = vld [vmem:[%s3861_s29 + $0x7b8] sm:$0xf]  ;;  %697 = vst [vmem:[%s3868_s30 + $0x3d4] sm:$0xf] %v696_v53 }
  0xb4   : > { %699 = vst [vmem:[%s3868_s30 + $0x3d8] sm:$0xf] %v698_v54  ;;  %701 = vst [vmem:[%s3868_s30 + $0x3dc] sm:$0xf] %v700_v55  ;;  %v702_v56 = vld [vmem:[%s3861_s29 + $0x7c0] sm:$0xf] }
  0xb5   : > { %v704_v57 = vld [vmem:[%s3861_s29 + $0x7c8] sm:$0xf]  ;;  %v706_v58 = vld [vmem:[%s3861_s29 + $0x7d0] sm:$0xf]  ;;  %703 = vst [vmem:[%s3868_s30 + $0x3e0] sm:$0xf] %v702_v56 }
  0xb6   : > { %705 = vst [vmem:[%s3868_s30 + $0x3e4] sm:$0xf] %v704_v57  ;;  %707 = vst [vmem:[%s3868_s30 + $0x3e8] sm:$0xf] %v706_v58  ;;  %v708_v59 = vld [vmem:[%s3861_s29 + $0x7d8] sm:$0xf] }
  0xb7   : > { %v710_v60 = vld [vmem:[%s3861_s29 + $0x7e0] sm:$0xf]  ;;  %v712_v61 = vld [vmem:[%s3861_s29 + $0x7e8] sm:$0xf]  ;;  %709 = vst [vmem:[%s3868_s30 + $0x3ec] sm:$0xf] %v708_v59 }
  0xb8   : > { %711 = vst [vmem:[%s3868_s30 + $0x3f0] sm:$0xf] %v710_v60  ;;  %713 = vst [vmem:[%s3868_s30 + $0x3f4] sm:$0xf] %v712_v61  ;;  %v714_v62 = vld [vmem:[%s3861_s29 + $0x7f0] sm:$0xf] }
  0xb9   : > { %v716_v63 = vld [vmem:[%s3861_s29 + $0x7f8] sm:$0xf]  ;;  %v718_v0 = vld [vmem:[%s3861_s29 + $0x800] sm:$0xf]  ;;  %715 = vst [vmem:[%s3868_s30 + $0x3f8] sm:$0xf] %v714_v62 }
  0xba   : > { %717 = vst [vmem:[%s3868_s30 + $0x3fc] sm:$0xf] %v716_v63  ;;  %719 = vst [vmem:[%s3868_s30 + $0x400] sm:$0xf] %v718_v0  ;;  %v720_v1 = vld [vmem:[%s3861_s29 + $0x808] sm:$0xf] }
  0xbb   : > { %v722_v2 = vld [vmem:[%s3861_s29 + $0x810] sm:$0xf]  ;;  %v724_v3 = vld [vmem:[%s3861_s29 + $0x818] sm:$0xf]  ;;  %721 = vst [vmem:[%s3868_s30 + $0x404] sm:$0xf] %v720_v1 }
  0xbc   : > { %723 = vst [vmem:[%s3868_s30 + $0x408] sm:$0xf] %v722_v2  ;;  %725 = vst [vmem:[%s3868_s30 + $0x40c] sm:$0xf] %v724_v3  ;;  %v726_v4 = vld [vmem:[%s3861_s29 + $0x820] sm:$0xf] }
  0xbd   : > { %v728_v5 = vld [vmem:[%s3861_s29 + $0x828] sm:$0xf]  ;;  %v730_v6 = vld [vmem:[%s3861_s29 + $0x830] sm:$0xf]  ;;  %727 = vst [vmem:[%s3868_s30 + $0x410] sm:$0xf] %v726_v4 }
  0xbe   : > { %729 = vst [vmem:[%s3868_s30 + $0x414] sm:$0xf] %v728_v5  ;;  %731 = vst [vmem:[%s3868_s30 + $0x418] sm:$0xf] %v730_v6  ;;  %v732_v7 = vld [vmem:[%s3861_s29 + $0x838] sm:$0xf] }
  0xbf   : > { %v734_v8 = vld [vmem:[%s3861_s29 + $0x840] sm:$0xf]  ;;  %v736_v9 = vld [vmem:[%s3861_s29 + $0x848] sm:$0xf]  ;;  %733 = vst [vmem:[%s3868_s30 + $0x41c] sm:$0xf] %v732_v7 }
  0xc0   : > { %735 = vst [vmem:[%s3868_s30 + $0x420] sm:$0xf] %v734_v8  ;;  %737 = vst [vmem:[%s3868_s30 + $0x424] sm:$0xf] %v736_v9  ;;  %v738_v10 = vld [vmem:[%s3861_s29 + $0x850] sm:$0xf] }
  0xc1   : > { %v740_v11 = vld [vmem:[%s3861_s29 + $0x858] sm:$0xf]  ;;  %v742_v12 = vld [vmem:[%s3861_s29 + $0x860] sm:$0xf]  ;;  %739 = vst [vmem:[%s3868_s30 + $0x428] sm:$0xf] %v738_v10 }
  0xc2   : > { %741 = vst [vmem:[%s3868_s30 + $0x42c] sm:$0xf] %v740_v11  ;;  %743 = vst [vmem:[%s3868_s30 + $0x430] sm:$0xf] %v742_v12  ;;  %v744_v13 = vld [vmem:[%s3861_s29 + $0x868] sm:$0xf] }
  0xc3   : > { %v746_v14 = vld [vmem:[%s3861_s29 + $0x870] sm:$0xf]  ;;  %v748_v15 = vld [vmem:[%s3861_s29 + $0x878] sm:$0xf]  ;;  %745 = vst [vmem:[%s3868_s30 + $0x434] sm:$0xf] %v744_v13 }
  0xc4   : > { %747 = vst [vmem:[%s3868_s30 + $0x438] sm:$0xf] %v746_v14  ;;  %749 = vst [vmem:[%s3868_s30 + $0x43c] sm:$0xf] %v748_v15  ;;  %v750_v16 = vld [vmem:[%s3861_s29 + $0x880] sm:$0xf] }
  0xc5   : > { %v752_v17 = vld [vmem:[%s3861_s29 + $0x888] sm:$0xf]  ;;  %v754_v18 = vld [vmem:[%s3861_s29 + $0x890] sm:$0xf]  ;;  %751 = vst [vmem:[%s3868_s30 + $0x440] sm:$0xf] %v750_v16 }
  0xc6   : > { %753 = vst [vmem:[%s3868_s30 + $0x444] sm:$0xf] %v752_v17  ;;  %755 = vst [vmem:[%s3868_s30 + $0x448] sm:$0xf] %v754_v18  ;;  %v756_v19 = vld [vmem:[%s3861_s29 + $0x898] sm:$0xf] }
  0xc7   : > { %v758_v20 = vld [vmem:[%s3861_s29 + $0x8a0] sm:$0xf]  ;;  %v760_v21 = vld [vmem:[%s3861_s29 + $0x8a8] sm:$0xf]  ;;  %757 = vst [vmem:[%s3868_s30 + $0x44c] sm:$0xf] %v756_v19 }
  0xc8   : > { %759 = vst [vmem:[%s3868_s30 + $0x450] sm:$0xf] %v758_v20  ;;  %761 = vst [vmem:[%s3868_s30 + $0x454] sm:$0xf] %v760_v21  ;;  %v762_v22 = vld [vmem:[%s3861_s29 + $0x8b0] sm:$0xf] }
  0xc9   : > { %v764_v23 = vld [vmem:[%s3861_s29 + $0x8b8] sm:$0xf]  ;;  %v766_v24 = vld [vmem:[%s3861_s29 + $0x8c0] sm:$0xf]  ;;  %763 = vst [vmem:[%s3868_s30 + $0x458] sm:$0xf] %v762_v22 }
  0xca   : > { %765 = vst [vmem:[%s3868_s30 + $0x45c] sm:$0xf] %v764_v23  ;;  %767 = vst [vmem:[%s3868_s30 + $0x460] sm:$0xf] %v766_v24  ;;  %v768_v25 = vld [vmem:[%s3861_s29 + $0x8c8] sm:$0xf] }
  0xcb   : > { %v770_v26 = vld [vmem:[%s3861_s29 + $0x8d0] sm:$0xf]  ;;  %v772_v27 = vld [vmem:[%s3861_s29 + $0x8d8] sm:$0xf]  ;;  %769 = vst [vmem:[%s3868_s30 + $0x464] sm:$0xf] %v768_v25 }
  0xcc   : > { %771 = vst [vmem:[%s3868_s30 + $0x468] sm:$0xf] %v770_v26  ;;  %773 = vst [vmem:[%s3868_s30 + $0x46c] sm:$0xf] %v772_v27  ;;  %v774_v28 = vld [vmem:[%s3861_s29 + $0x8e0] sm:$0xf] }
  0xcd   : > { %v776_v29 = vld [vmem:[%s3861_s29 + $0x8e8] sm:$0xf]  ;;  %v778_v30 = vld [vmem:[%s3861_s29 + $0x8f0] sm:$0xf]  ;;  %775 = vst [vmem:[%s3868_s30 + $0x470] sm:$0xf] %v774_v28 }
  0xce   : > { %777 = vst [vmem:[%s3868_s30 + $0x474] sm:$0xf] %v776_v29  ;;  %779 = vst [vmem:[%s3868_s30 + $0x478] sm:$0xf] %v778_v30  ;;  %v780_v31 = vld [vmem:[%s3861_s29 + $0x8f8] sm:$0xf] }
  0xcf   : > { %781 = vst [vmem:[%s3868_s30 + $0x47c] sm:$0xf] %v780_v31 }
  0xd0 PF: > { %p3183_p6 = scmp.ge.s32.totalorder %s3791_s19, 1  ;;  %p1392_p7 = scmp.lt.s32.totalorder %s3791_s19, 3 }
  0xd2   : > { %p1393_p8 = pnand %p3183_p6, %p1392_p7 }
  0xd3   : > { %s1399_s5 = sand.u32 (!%p1393_p8), 1, %s3775_s15   ;;  %p1443_p9 = scmp.lt.s32.totalorder (!%p1393_p8), %s3783_s17, 1 }
  0xd4   : > { %1396 = sbr.rel (%p1393_p8) target bundleno = 586 (0x24a), region = 73 }
  0xd5   : > { %s3550_s10 = smul.u32 (!%p1393_p8), 1152, %s1399_s5 }
  0xd7   : > { %s4458_s11 = scalar_lea.vmem (!%p1393_p8), [#allocation2], %s3550_s10 }
  0xd9   : > { %v4447_v32 = vld [vmem:[%s4679_s0] sm:$0xff]  ;;  %v4452_v33 = vld [vmem:[%s4679_s0 + $0x8] sm:$0xff]  ;;  %v3591_v36 = vld [vmem:[%s4458_s11 + $0x78] sm:$0xff]   ;;  %s4691_s17 = smov (!%p1443_p9, %s3783_s17), 1 }
  0xda   : > { %v3186_v34 = vcombine.high %v4447_v32, %v4447_v32  ;;  %v3188_v35 = vcombine.high %v4452_v33, %v4452_v33  ;;  %v3592_v37 = vld [vmem:[%s4458_s11 + $0xf8] sm:$0xff]   ;;  %3351 = vmatprep.subr.bf16.mxu0 %v3591_v36  ;;  %v3595_v40 = vld [vmem:[%s4458_s11 + $0x70] sm:$0xff]   ;;  %v3599_v44 = vld [vmem:[%s4458_s11 + $0x68] sm:$0xff]   ;;  %v3185_v6 = vcombine.low %v4447_v32, %v4447_v32  ;;  %v3187_v7 = vcombine.low %v4452_v33, %v4452_v33  ;;  %s1445_s8 = scalar_lea.vmem %s4681_s2, %s4691_s17  ;;  %s3184_s12 = sshll.u32 %s4691_s17, 3 }
  0xdb   : > { %v3593_v38 = vld [vmem:[%s4458_s11 + $0x38] sm:$0xff]   ;;  %3373 = vmatprep.subr.bf16.mxu1 %v3592_v37  ;;  %v3596_v41 = vld [vmem:[%s4458_s11 + $0xf0] sm:$0xff]   ;;  %v3600_v45 = vld [vmem:[%s4458_s11 + $0xe8] sm:$0xff]   ;;  %s1456_s15 = scalar_lea.vmem %s4683_s4, %s3184_s12 }
  0xdc   : > { %2714 = vmatprep.mubr.bf16.mxu0 %v3186_v34  ;;  %2754 = vmatprep.mubr.bf16.mxu1 %v3188_v35  ;;  %v3594_v39 = vld [vmem:[%s4458_s11 + $0xb8] sm:$0xff]   ;;  %v3597_v42 = vld [vmem:[%s4458_s11 + $0x30] sm:$0xff]   ;;  %v3601_v46 = vld [vmem:[%s4458_s11 + $0x28] sm:$0xff]  }
  0xdd   : > { %3352 = vmatpush3.bf16.msra.mxu0 %v3593_v38  ;;  %3374 = vmatpush3.bf16.msra.mxu1 %v3594_v39  ;;  %v3598_v43 = vld [vmem:[%s4458_s11 + $0xb0] sm:$0xff]   ;;  %v3602_v47 = vld [vmem:[%s4458_s11 + $0xa8] sm:$0xff]   ;;  %v3603_v48 = vld [vmem:[%s4458_s11 + $0x60] sm:$0xff]  }
  0xde   : > { %3353 = vmatprep.subr.bf16.mxu0 %v3595_v40  ;;  %3375 = vmatprep.subr.bf16.mxu1 %v3596_v41  ;;  %v3604_v49 = vld [vmem:[%s4458_s11 + $0xe0] sm:$0xff]   ;;  %v3607_v52 = vld [vmem:[%s4458_s11 + $0x58] sm:$0xff]   ;;  %v3611_v56 = vld [vmem:[%s4458_s11 + $0x50] sm:$0xff]  }
  0xdf   : > { %v3605_v50 = vld [vmem:[%s4458_s11 + $0x20] sm:$0xff]   ;;  %v3608_v53 = vld [vmem:[%s4458_s11 + $0xd8] sm:$0xff]   ;;  %v3612_v57 = vld [vmem:[%s4458_s11 + $0xd0] sm:$0xff]  }
  0xe0   : > { %v3606_v51 = vld [vmem:[%s4458_s11 + $0xa0] sm:$0xff]   ;;  %v3609_v54 = vld [vmem:[%s4458_s11 + $0x18] sm:$0xff]   ;;  %v3613_v58 = vld [vmem:[%s4458_s11 + $0x10] sm:$0xff]  }
  0xe1   : > { %3354 = vmatpush3.bf16.msra.mxu0 %v3597_v42  ;;  %3376 = vmatpush3.bf16.msra.mxu1 %v3598_v43  ;;  %v3610_v55 = vld [vmem:[%s4458_s11 + $0x98] sm:$0xff]   ;;  %v3614_v59 = vld [vmem:[%s4458_s11 + $0x90] sm:$0xff]   ;;  %v3615_v60 = vld [vmem:[%s4458_s11 + $0x48] sm:$0xff]  }
  0xe2   : > { %3355 = vmatprep.subr.bf16.mxu0 %v3599_v44  ;;  %3377 = vmatprep.subr.bf16.mxu1 %v3600_v45  ;;  %v3616_v61 = vld [vmem:[%s4458_s11 + $0xc8] sm:$0xff]   ;;  %v3619_v0 = vld [vmem:[%s4458_s11 + $0x40] sm:$0xff]   ;;  %v4492_v1 = vld [vmem:[%s4679_s0 + $0x10] sm:$0xff] }
  0xe3   : > { %v3617_v62 = vld [vmem:[%s4458_s11 + $0x8] sm:$0xff]   ;;  %v3620_v2 = vld [vmem:[%s4458_s11 + $0xc0] sm:$0xff]   ;;  %v4499_v4 = vld [vmem:[%s4679_s0 + $0x18] sm:$0xff]  ;;  %v3190_v10 = vcombine.high %v4492_v1, %v4492_v1  ;;  %v3189_v43 = vcombine.low %v4492_v1, %v4492_v1 }
  0xe4   : > { %v3618_v63 = vld [vmem:[%s4458_s11 + $0x88] sm:$0xff]   ;;  %v3621_v3 = vld [vmem:[%s4458_s11] sm:$0xff]   ;;  %v3627_v8 = vld [vmem:[%s4458_s11 + $0x178] sm:$0xff]   ;;  %v3192_v13 = vcombine.high %v4499_v4, %v4499_v4 }
  0xe5   : > { %3356 = vmatpush3.bf16.msra.mxu0 %v3601_v46  ;;  %3378 = vmatpush3.bf16.msra.mxu1 %v3602_v47  ;;  %v3622_v5 = vld [vmem:[%s4458_s11 + $0x80] sm:$0xff]   ;;  %v3628_v9 = vld [vmem:[%s4458_s11 + $0x138] sm:$0xff]   ;;  %v3631_v14 = vld [vmem:[%s4458_s11 + $0x170] sm:$0xff]   ;;  %v3191_v46 = vcombine.low %v4499_v4, %v4499_v4 }
  0xe6   : > { %3357 = vmatprep.subr.bf16.mxu0 %v3603_v48  ;;  %3379 = vmatprep.subr.bf16.mxu1 %v3604_v49  ;;  %v3629_v11 = vld [vmem:[%s4458_s11 + $0x1f8] sm:$0xff]   ;;  %v3632_v15 = vld [vmem:[%s4458_s11 + $0x130] sm:$0xff]   ;;  %v3635_v18 = vld [vmem:[%s4458_s11 + $0x168] sm:$0xff]  }
  0xe7   : > { %v3630_v12 = vld [vmem:[%s4458_s11 + $0x1b8] sm:$0xff]   ;;  %v3633_v16 = vld [vmem:[%s4458_s11 + $0x1f0] sm:$0xff]   ;;  %v3636_v19 = vld [vmem:[%s4458_s11 + $0x128] sm:$0xff]  }
  0xe8   : > { %v3634_v17 = vld [vmem:[%s4458_s11 + $0x1b0] sm:$0xff]   ;;  %v3637_v20 = vld [vmem:[%s4458_s11 + $0x1e8] sm:$0xff]   ;;  %v3639_v22 = vld [vmem:[%s4458_s11 + $0x160] sm:$0xff]  }
  0xe9   : > { %3358 = vmatpush3.bf16.msra.mxu0 %v3605_v50  ;;  %3380 = vmatpush3.bf16.msra.mxu1 %v3606_v51  ;;  %v3638_v21 = vld [vmem:[%s4458_s11 + $0x1a8] sm:$0xff]   ;;  %v3640_v23 = vld [vmem:[%s4458_s11 + $0x120] sm:$0xff]   ;;  %v3643_v26 = vld [vmem:[%s4458_s11 + $0x158] sm:$0xff]  }
  0xea   : > { %3359 = vmatprep.subr.bf16.mxu0 %v3607_v52  ;;  %3381 = vmatprep.subr.bf16.mxu1 %v3608_v53  ;;  %v3641_v24 = vld [vmem:[%s4458_s11 + $0x1e0] sm:$0xff]   ;;  %v3644_v27 = vld [vmem:[%s4458_s11 + $0x118] sm:$0xff]   ;;  %v3647_v30 = vld [vmem:[%s4458_s11 + $0x150] sm:$0xff]  }
  0xeb   : > { %v3642_v25 = vld [vmem:[%s4458_s11 + $0x1a0] sm:$0xff]   ;;  %v3645_v28 = vld [vmem:[%s4458_s11 + $0x1d8] sm:$0xff]   ;;  %v3648_v31 = vld [vmem:[%s4458_s11 + $0x110] sm:$0xff]  }
  0xec   : > { %v3646_v29 = vld [vmem:[%s4458_s11 + $0x198] sm:$0xff]   ;;  %v3649_v32 = vld [vmem:[%s4458_s11 + $0x1d0] sm:$0xff]   ;;  %v3651_v34 = vld [vmem:[%s4458_s11 + $0x148] sm:$0xff]  }
  0xed   : > { %3360 = vmatpush3.bf16.msra.mxu0 %v3609_v54  ;;  %3382 = vmatpush3.bf16.msra.mxu1 %v3610_v55  ;;  %v3650_v33 = vld [vmem:[%s4458_s11 + $0x190] sm:$0xff]   ;;  %v3652_v35 = vld [vmem:[%s4458_s11 + $0x108] sm:$0xff]   ;;  %v3655_v38 = vld [vmem:[%s4458_s11 + $0x140] sm:$0xff]  }
  0xee   : > { %3361 = vmatprep.subr.bf16.mxu0 %v3611_v56  ;;  %3383 = vmatprep.subr.bf16.mxu1 %v3612_v57  ;;  %v3653_v36 = vld [vmem:[%s4458_s11 + $0x1c8] sm:$0xff]   ;;  %v4542_v39 = vld [vmem:[%s4679_s0 + $0x20] sm:$0xff]  ;;  %v3661_v45 = vld [vmem:[%s4458_s11 + $0x278] sm:$0xff]  }
  0xef   : > { %v3654_v37 = vld [vmem:[%s4458_s11 + $0x188] sm:$0xff]   ;;  %v3656_v40 = vld [vmem:[%s4458_s11 + $0x100] sm:$0xff]   ;;  %v3664_v47 = vld [vmem:[%s4458_s11 + $0x238] sm:$0xff]   ;;  %v3194_v48 = vcombine.high %v4542_v39, %v4542_v39 }
  0xf0   : > { %v3657_v41 = vld [vmem:[%s4458_s11 + $0x1c0] sm:$0xff]   ;;  %v4549_v42 = vld [vmem:[%s4679_s0 + $0x28] sm:$0xff]  ;;  %v3665_v49 = vld [vmem:[%s4458_s11 + $0x2f8] sm:$0xff]  }
  0xf1   : > { %3362 = vmatpush3.bf16.msra.mxu0 %v3613_v58  ;;  %3384 = vmatpush3.bf16.msra.mxu1 %v3614_v59  ;;  %v3660_v44 = vld [vmem:[%s4458_s11 + $0x180] sm:$0xff]   ;;  %v3666_v50 = vld [vmem:[%s4458_s11 + $0x2b8] sm:$0xff]   ;;  %v3196_v51 = vcombine.high %v4549_v42, %v4549_v42  ;;  %v3667_v52 = vld [vmem:[%s4458_s11 + $0x270] sm:$0xff]  }
  0xf2   : > { %3363 = vmatprep.subr.bf16.mxu0 %v3615_v60  ;;  %3385 = vmatprep.subr.bf16.mxu1 %v3616_v61  ;;  %v3668_v53 = vld [vmem:[%s4458_s11 + $0x230] sm:$0xff]   ;;  %v3671_v56 = vld [vmem:[%s4458_s11 + $0x268] sm:$0xff]   ;;  %v3675_v60 = vld [vmem:[%s4458_s11 + $0x260] sm:$0xff]  }
  0xf3   : > { %v3669_v54 = vld [vmem:[%s4458_s11 + $0x2f0] sm:$0xff]   ;;  %v3672_v57 = vld [vmem:[%s4458_s11 + $0x228] sm:$0xff]   ;;  %v3676_v61 = vld [vmem:[%s4458_s11 + $0x220] sm:$0xff]  }
  0xf4   : > { %v3670_v55 = vld [vmem:[%s4458_s11 + $0x2b0] sm:$0xff]   ;;  %v3673_v58 = vld [vmem:[%s4458_s11 + $0x2e8] sm:$0xff]   ;;  %v3680_v1 = vld [vmem:[%s4458_s11 + $0x218] sm:$0xff]  }
  0xf5   : > { %3364 = vmatpush3.bf16.msra.mxu0 %v3617_v62  ;;  %3386 = vmatpush3.bf16.msra.mxu1 %v3618_v63  ;;  %v3674_v59 = vld [vmem:[%s4458_s11 + $0x2a8] sm:$0xff]   ;;  %v3677_v62 = vld [vmem:[%s4458_s11 + $0x2e0] sm:$0xff]   ;;  %v3683_v4 = vld [vmem:[%s4458_s11 + $0x250] sm:$0xff]  }
  0xf6   : > { %3365 = vmatprep.subr.bf16.mxu0 %v3619_v0  ;;  %3387 = vmatprep.subr.bf16.mxu1 %v3620_v2  ;;  %v3678_v63 = vld [vmem:[%s4458_s11 + $0x2a0] sm:$0xff]   ;;  %v3679_v0 = vld [vmem:[%s4458_s11 + $0x258] sm:$0xff]  }
  0xf7   : > { %v3681_v2 = vld [vmem:[%s4458_s11 + $0x2d8] sm:$0xff]  }
  0xf9   : > { %3366 = vmatpush3.bf16.msra.mxu0 %v3621_v3  ;;  %3388 = vmatpush3.bf16.msra.mxu1 %v3622_v5  ;;  %v3682_v3 = vld [vmem:[%s4458_s11 + $0x298] sm:$0xff]   ;;  %v3684_v5 = vld [vmem:[%s4458_s11 + $0x210] sm:$0xff]  }
  0xfa   : > { %3395 = vmatprep.subr.bf16.mxu0 %v3627_v8  ;;  %3417 = vmatprep.subr.bf16.mxu1 %v3629_v11  ;;  %v3687_v8 = vld [vmem:[%s4458_s11 + $0x248] sm:$0xff]  }
  0xfb   : > { %v3690_v11 = vld [vmem:[%s4458_s11 + $0x288] sm:$0xff]  }
  0xfc   : > { %2715 = vmatmul.mubr.bf16.vlgmr.msra.gmra.mxu0 %v3185_v6  ;;  %2755 = vmatmul.mubr.bf16.vlgmr.msra.gmra.mxu1 %v3187_v7  ;;  %v3685_v6 = vld [vmem:[%s4458_s11 + $0x2d0] sm:$0xff]  }
  0xfd   : > { %3396 = vmatpush3.bf16.msra.mxu0 %v3628_v9  ;;  %2794 = vmatprep.mubr.bf16.mxu0 %v3190_v10  ;;  %v3686_v7 = vld [vmem:[%s4458_s11 + $0x290] sm:$0xff]   ;;  %v3688_v9 = vld [vmem:[%s4458_s11 + $0x208] sm:$0xff]  }
  0xfe   : > { %3418 = vmatpush3.bf16.msra.mxu1 %v3630_v12  ;;  %3397 = vmatprep.subr.bf16.mxu0 %v3631_v14  ;;  %v3689_v10 = vld [vmem:[%s4458_s11 + $0x2c8] sm:$0xff]   ;;  %v3691_v12 = vld [vmem:[%s4458_s11 + $0x240] sm:$0xff]  }
  0xff   : > { %2834 = vmatprep.mubr.bf16.mxu1 %v3192_v13  ;;  %3419 = vmatprep.subr.bf16.mxu1 %v3633_v16  ;;  %v3692_v13 = vld [vmem:[%s4458_s11 + $0x200] sm:$0xff]  }
 0x100   : > { %v3693_v14 = vld [vmem:[%s4458_s11 + $0x2c0] sm:$0xff]  }
 0x101   : > { %3398 = vmatpush3.bf16.msra.mxu0 %v3632_v15  ;;  %v3193_v15 = vcombine.low %v4542_v39, %v4542_v39  ;;  %v3696_v16 = vld [vmem:[%s4458_s11 + $0x280] sm:$0xff]   ;;  %v3720_v39 = vld [vmem:[%s4458_s11 + $0x310] sm:$0xff]  }
 0x102   : > { %3420 = vmatpush3.bf16.msra.mxu1 %v3634_v17  ;;  %3399 = vmatprep.subr.bf16.mxu0 %v3635_v18  ;;  %v3697_v17 = vld [vmem:[%s4458_s11 + $0x378] sm:$0xff]   ;;  %v3195_v18 = vcombine.low %v4549_v42, %v4549_v42  ;;  %v3723_v42 = vld [vmem:[%s4458_s11 + $0x348] sm:$0xff]  }
 0x103   : > { %3421 = vmatprep.subr.bf16.mxu1 %v3637_v20  ;;  %v3701_v20 = vld [vmem:[%s4458_s11 + $0x3f8] sm:$0xff]  }
 0x105   : > { %3400 = vmatpush3.bf16.msra.mxu0 %v3636_v19  ;;  %v3700_v19 = vld [vmem:[%s4458_s11 + $0x338] sm:$0xff]  }
 0x106   : > { %3422 = vmatpush3.bf16.msra.mxu1 %v3638_v21  ;;  %3401 = vmatprep.subr.bf16.mxu0 %v3639_v22  ;;  %v3702_v21 = vld [vmem:[%s4458_s11 + $0x3b8] sm:$0xff]   ;;  %v3703_v22 = vld [vmem:[%s4458_s11 + $0x370] sm:$0xff]  }
 0x107   : > { %3423 = vmatprep.subr.bf16.mxu1 %v3641_v24  ;;  %v3705_v24 = vld [vmem:[%s4458_s11 + $0x3f0] sm:$0xff]  }
 0x109   : > { %3402 = vmatpush3.bf16.msra.mxu0 %v3640_v23  ;;  %v3704_v23 = vld [vmem:[%s4458_s11 + $0x330] sm:$0xff]  }
 0x10a   : > { %3424 = vmatpush3.bf16.msra.mxu1 %v3642_v25  ;;  %3403 = vmatprep.subr.bf16.mxu0 %v3643_v26  ;;  %v3706_v25 = vld [vmem:[%s4458_s11 + $0x3b0] sm:$0xff]   ;;  %v3707_v26 = vld [vmem:[%s4458_s11 + $0x368] sm:$0xff]  }
 0x10b   : > { %3425 = vmatprep.subr.bf16.mxu1 %v3645_v28  ;;  %v3709_v28 = vld [vmem:[%s4458_s11 + $0x3e8] sm:$0xff]  }
 0x10d   : > { %3404 = vmatpush3.bf16.msra.mxu0 %v3644_v27  ;;  %v3708_v27 = vld [vmem:[%s4458_s11 + $0x328] sm:$0xff]  }
 0x10e   : > { %3426 = vmatpush3.bf16.msra.mxu1 %v3646_v29  ;;  %3405 = vmatprep.subr.bf16.mxu0 %v3647_v30  ;;  %v3710_v29 = vld [vmem:[%s4458_s11 + $0x3a8] sm:$0xff]   ;;  %v3711_v30 = vld [vmem:[%s4458_s11 + $0x360] sm:$0xff]  }
 0x10f   : > { %3427 = vmatprep.subr.bf16.mxu1 %v3649_v32  ;;  %v3713_v32 = vld [vmem:[%s4458_s11 + $0x3e0] sm:$0xff]  }
 0x111   : > { %3406 = vmatpush3.bf16.msra.mxu0 %v3648_v31  ;;  %v3712_v31 = vld [vmem:[%s4458_s11 + $0x320] sm:$0xff]  }
 0x112   : > { %3428 = vmatpush3.bf16.msra.mxu1 %v3650_v33  ;;  %3407 = vmatprep.subr.bf16.mxu0 %v3651_v34  ;;  %v3714_v33 = vld [vmem:[%s4458_s11 + $0x3a0] sm:$0xff]   ;;  %v3715_v34 = vld [vmem:[%s4458_s11 + $0x358] sm:$0xff]  }
 0x113   : > { %3429 = vmatprep.subr.bf16.mxu1 %v3653_v36  ;;  %v3717_v36 = vld [vmem:[%s4458_s11 + $0x3d8] sm:$0xff]  }
 0x115   : > { %3408 = vmatpush3.bf16.msra.mxu0 %v3652_v35  ;;  %v3716_v35 = vld [vmem:[%s4458_s11 + $0x318] sm:$0xff]  }
 0x116   : > { %3430 = vmatpush3.bf16.msra.mxu1 %v3654_v37  ;;  %3409 = vmatprep.subr.bf16.mxu0 %v3655_v38  ;;  %v3718_v37 = vld [vmem:[%s4458_s11 + $0x398] sm:$0xff]   ;;  %v3719_v38 = vld [vmem:[%s4458_s11 + $0x350] sm:$0xff]  }
 0x117   : > { %3431 = vmatprep.subr.bf16.mxu1 %v3657_v41  ;;  %v3722_v41 = vld [vmem:[%s4458_s11 + $0x390] sm:$0xff]  }
 0x119   : > { %3410 = vmatpush3.bf16.msra.mxu0 %v3656_v40  ;;  %v3721_v40 = vld [vmem:[%s4458_s11 + $0x3d0] sm:$0xff]  }
 0x11a   : > { %3432 = vmatpush3.bf16.msra.mxu1 %v3660_v44  ;;  %3439 = vmatprep.subr.bf16.mxu0 %v3661_v45  ;;  %v3725_v44 = vld [vmem:[%s4458_s11 + $0x3c8] sm:$0xff]  }
 0x11b   : > { %3461 = vmatprep.subr.bf16.mxu1 %v3665_v49  ;;  %v3726_v45 = vld [vmem:[%s4458_s11 + $0x388] sm:$0xff]   ;;  %v1464_v49 = vld [vmem:[%s4679_s0 + $0x30] sm:$0xff] }
 0x11c   : > { %2795 = vmatmul.mubr.bf16.vlgmr.msra.gmra.mxu0 %v3189_v43  ;;  %v3724_v43 = vld [vmem:[%s4458_s11 + $0x308] sm:$0xff]  }
 0x11d   : > { %3440 = vmatpush3.bf16.msra.mxu0 %v3664_v47  ;;  %2835 = vmatmul.mubr.bf16.vlgmr.msra.gmra.mxu1 %v3191_v46  ;;  %v3727_v46 = vld [vmem:[%s4458_s11 + $0x340] sm:$0xff]  }
 0x11e   : > { %2874 = vmatprep.mubr.bf16.mxu0 %v3194_v48  ;;  %3462 = vmatpush3.bf16.msra.mxu1 %v3666_v50  ;;  %v3728_v47 = vld [vmem:[%s4458_s11 + $0x300] sm:$0xff]   ;;  %v3197_v50 = vcombine.low %v1464_v49, %v1464_v49 }
 0x11f   : > { %3441 = vmatprep.subr.bf16.mxu0 %v3667_v52  ;;  %2914 = vmatprep.mubr.bf16.mxu1 %v3196_v51  ;;  %v3729_v48 = vld [vmem:[%s4458_s11 + $0x3c0] sm:$0xff]   ;;  %v3198_v51 = vcombine.high %v1464_v49, %v1464_v49 }
 0x120   : > { %3463 = vmatprep.subr.bf16.mxu1 %v3669_v54  ;;  %v3732_v52 = vld [vmem:[%s4458_s11 + $0x380] sm:$0xff]   ;;  %v1465_v54 = vld [vmem:[%s4679_s0 + $0x38] sm:$0xff] }
 0x121   : > { %3442 = vmatpush3.bf16.msra.mxu0 %v3668_v53  ;;  %v3733_v53 = vld [vmem:[%s4458_s11 + $0x478] sm:$0xff]  }
 0x122   : > { %3464 = vmatpush3.bf16.msra.mxu1 %v3670_v55  ;;  %3443 = vmatprep.subr.bf16.mxu0 %v3671_v56  ;;  %v3199_v55 = vcombine.low %v1465_v54, %v1465_v54  ;;  %v3200_v56 = vcombine.high %v1465_v54, %v1465_v54 }
 0x123   : > { %3465 = vmatprep.subr.bf16.mxu1 %v3673_v58  ;;  %v3737_v58 = vld [vmem:[%s4458_s11 + $0x470] sm:$0xff]  }
 0x125   : > { %3444 = vmatpush3.bf16.msra.mxu0 %v3672_v57  ;;  %v3736_v57 = vld [vmem:[%s4458_s11 + $0x438] sm:$0xff]  }
 0x126   : > { %3466 = vmatpush3.bf16.msra.mxu1 %v3674_v59  ;;  %3445 = vmatprep.subr.bf16.mxu0 %v3675_v60  ;;  %v3738_v59 = vld [vmem:[%s4458_s11 + $0x430] sm:$0xff]   ;;  %v3739_v60 = vld [vmem:[%s4458_s11 + $0x468] sm:$0xff]  }
 0x127   : > { %3467 = vmatprep.subr.bf16.mxu1 %v3677_v62  ;;  %v3741_v62 = vld [vmem:[%s4458_s11 + $0x460] sm:$0xff]  }
 0x129   : > { %3446 = vmatpush3.bf16.msra.mxu0 %v3676_v61  ;;  %v3740_v61 = vld [vmem:[%s4458_s11 + $0x428] sm:$0xff]  }
 0x12a   : > { %3468 = vmatpush3.bf16.msra.mxu1 %v3678_v63  ;;  %3447 = vmatprep.subr.bf16.mxu0 %v3679_v0  ;;  %v3742_v63 = vld [vmem:[%s4458_s11 + $0x420] sm:$0xff]   ;;  %v3743_v0 = vld [vmem:[%s4458_s11 + $0x458] sm:$0xff]  }
 0x12b   : > { %3469 = vmatprep.subr.bf16.mxu1 %v3681_v2  ;;  %v1466_v2 = vld [vmem:[%s4679_s0 + $0x40] sm:$0xff] }
 0x12d   : > { %3448 = vmatpush3.bf16.msra.mxu0 %v3680_v1  ;;  %v3744_v1 = vld [vmem:[%s4458_s11 + $0x418] sm:$0xff]  }
 0x12e   : > { %3470 = vmatpush3.bf16.msra.mxu1 %v3682_v3  ;;  %3449 = vmatprep.subr.bf16.mxu0 %v3683_v4  ;;  %v3745_v3 = vld [vmem:[%s4458_s11 + $0x450] sm:$0xff]   ;;  %v3202_v4 = vcombine.high %v1466_v2, %v1466_v2 }
 0x12f   : > { %3471 = vmatprep.subr.bf16.mxu1 %v3685_v6  ;;  %v3747_v6 = vld [vmem:[%s4458_s11 + $0x448] sm:$0xff]  }
 0x131   : > { %3450 = vmatpush3.bf16.msra.mxu0 %v3684_v5  ;;  %v3746_v5 = vld [vmem:[%s4458_s11 + $0x410] sm:$0xff]  }
 0x132   : > { %3472 = vmatpush3.bf16.msra.mxu1 %v3686_v7  ;;  %3451 = vmatprep.subr.bf16.mxu0 %v3687_v8  ;;  %v3748_v7 = vld [vmem:[%s4458_s11 + $0x408] sm:$0xff]   ;;  %v3749_v8 = vld [vmem:[%s4458_s11 + $0x440] sm:$0xff]  }
 0x133   : > { %3473 = vmatprep.subr.bf16.mxu1 %v3689_v10  ;;  %v3201_v10 = vcombine.low %v1466_v2, %v1466_v2 }
 0x135   : > { %3452 = vmatpush3.bf16.msra.mxu0 %v3688_v9  ;;  %v3750_v9 = vld [vmem:[%s4458_s11 + $0x400] sm:$0xff]   ;;  %s1448_s11 = scalar_lea.vmem %s4682_s3, %s4691_s17 }
 0x136   : > { %3474 = vmatpush3.bf16.msra.mxu1 %v3690_v11  ;;  %3453 = vmatprep.subr.bf16.mxu0 %v3691_v12 }
 0x137   : > { %3475 = vmatprep.subr.bf16.mxu1 %v3693_v14 }
 0x139   : > { %3454 = vmatpush3.bf16.msra.mxu0 %v3692_v13 }
 0x13a   : > { %3476 = vmatpush3.bf16.msra.mxu1 %v3696_v16  ;;  %3483 = vmatprep.subr.bf16.mxu0 %v3697_v17 }
 0x13b   : > { %3505 = vmatprep.subr.bf16.mxu1 %v3701_v20 }
 0x13c   : > { %2875 = vmatmul.mubr.bf16.vlgmr.msra.gmra.mxu0 %v3193_v15 }
 0x13d   : > { %3484 = vmatpush3.bf16.msra.mxu0 %v3700_v19  ;;  %2915 = vmatmul.mubr.bf16.vlgmr.msra.gmra.mxu1 %v3195_v18 }
 0x13e   : > { %3506 = vmatpush3.bf16.msra.mxu1 %v3702_v21  ;;  %3485 = vmatprep.subr.bf16.mxu0 %v3703_v22 }
 0x13f   : > { %3507 = vmatprep.subr.bf16.mxu1 %v3705_v24  ;;  %2954 = vmatprep.mubr.bf16.mxu0 %v3198_v51 }
 0x140   : > { %2994 = vmatprep.mubr.bf16.mxu1 %v3200_v56 }
 0x141   : > { %3486 = vmatpush3.bf16.msra.mxu0 %v3704_v23 }
 0x142   : > { %3508 = vmatpush3.bf16.msra.mxu1 %v3706_v25  ;;  %3487 = vmatprep.subr.bf16.mxu0 %v3707_v26 }
 0x143   : > { %3509 = vmatprep.subr.bf16.mxu1 %v3709_v28 }
 0x145   : > { %3488 = vmatpush3.bf16.msra.mxu0 %v3708_v27 }
 0x146   : > { %3510 = vmatpush3.bf16.msra.mxu1 %v3710_v29  ;;  %3489 = vmatprep.subr.bf16.mxu0 %v3711_v30 }
 0x147   : > { %3511 = vmatprep.subr.bf16.mxu1 %v3713_v32 }
 0x149   : > { %3490 = vmatpush3.bf16.msra.mxu0 %v3712_v31 }
 0x14a   : > { %3512 = vmatpush3.bf16.msra.mxu1 %v3714_v33  ;;  %3491 = vmatprep.subr.bf16.mxu0 %v3715_v34 }
 0x14b   : > { %3513 = vmatprep.subr.bf16.mxu1 %v3717_v36 }
 0x14d   : > { %3492 = vmatpush3.bf16.msra.mxu0 %v3716_v35 }
 0x14e   : > { %3514 = vmatpush3.bf16.msra.mxu1 %v3718_v37  ;;  %3493 = vmatprep.subr.bf16.mxu0 %v3719_v38 }
 0x14f   : > { %3515 = vmatprep.subr.bf16.mxu1 %v3721_v40 }
 0x151   : > { %3494 = vmatpush3.bf16.msra.mxu0 %v3720_v39 }
 0x152   : > { %3516 = vmatpush3.bf16.msra.mxu1 %v3722_v41  ;;  %3495 = vmatprep.subr.bf16.mxu0 %v3723_v42 }
 0x153   : > { %3517 = vmatprep.subr.bf16.mxu1 %v3725_v44 }
 0x155   : > { %3496 = vmatpush3.bf16.msra.mxu0 %v3724_v43 }
 0x156   : > { %3518 = vmatpush3.bf16.msra.mxu1 %v3726_v45  ;;  %3497 = vmatprep.subr.bf16.mxu0 %v3727_v46 }
 0x157   : > { %3519 = vmatprep.subr.bf16.mxu1 %v3729_v48 }
 0x159   : > { %3498 = vmatpush3.bf16.msra.mxu0 %v3728_v47 }
 0x15a   : > { %3520 = vmatpush3.bf16.msra.mxu1 %v3732_v52  ;;  %3527 = vmatprep.subr.bf16.mxu0 %v3733_v53 }
 0x15c   : > { %2955 = vmatmul.mubr.bf16.vlgmr.msra.gmra.mxu0 %v3197_v50 }
 0x15d   : > { %3528 = vmatpush3.bf16.msra.mxu0 %v3736_v57  ;;  %2995 = vmatmul.mubr.bf16.vlgmr.msra.gmra.mxu1 %v3199_v55 }
 0x15e   : > { %3529 = vmatprep.subr.bf16.mxu0 %v3737_v58  ;;  %3034 = vmatprep.mubr.bf16.mxu0 %v3202_v4 }
 0x161   : > { %3530 = vmatpush3.bf16.msra.mxu0 %v3738_v59 }
 0x162   : > { %3531 = vmatprep.subr.bf16.mxu0 %v3739_v60 }
 0x165   : > { %3532 = vmatpush3.bf16.msra.mxu0 %v3740_v61  ;;  %v3347_v61 = vld [vmem:[%s1445_s8] ss:$0 sm:$0xff] }
 0x166   : > { %3533 = vmatprep.subr.bf16.mxu0 %v3741_v62 }
 0x169   : > { %3534 = vmatpush3.bf16.msra.mxu0 %v3742_v63 }
 0x16a   : > { %3535 = vmatprep.subr.bf16.mxu0 %v3743_v0  ;;  %v3348_v0 = vld [vmem:[%s1448_s11] ss:$0 sm:$0xff] }
 0x16d   : > { %3536 = vmatpush3.bf16.msra.mxu0 %v3744_v1 }
 0x16e   : > { %3537 = vmatprep.subr.bf16.mxu0 %v3745_v3 }
 0x171   : > { %3538 = vmatpush3.bf16.msra.mxu0 %v3746_v5 }
 0x172   : > { %3539 = vmatprep.subr.bf16.mxu0 %v3747_v6 }
 0x175   : > { %3540 = vmatpush3.bf16.msra.mxu0 %v3748_v7 }
 0x176   : > { %3541 = vmatprep.subr.bf16.mxu0 %v3749_v8 }
 0x179   : > { %3542 = vmatpush3.bf16.msra.mxu0 %v3750_v9 }
 0x17c   : > { %3035 = vmatmul.mubr.bf16.vlgmr.msra.gmra.mxu0 %v3201_v10 }
 0x1bc   : > { %v3367_v11 = vpop.f32.mrf.mxu0  ;;  %v3389_v12 = vpop.f32.mrf.mxu1 }
 0x1be   : > { %v3368_v13 = vpop.f32.mrf.mxu0  ;;  %v3390_v15 = vpop.f32.mrf.mxu1 }
 0x1bf   : > { %v3369_v14 = vadd.f32 %v3368_v13, %v3367_v11  ;;  %v3391_v16 = vadd.f32 %v3390_v15, %v3389_v12 }
 0x1c0   : > { %v3370_v17 = vpop.f32.mrf.mxu0  ;;  %v3392_v18 = vpop.f32.mrf.mxu1 }
 0x1c1   : > { %v2757_v19 = vadd.f32 %v3391_v16, %v3369_v14 }
 0x1c2   : > { %v3371_v20 = vpop.f32.mrf.mxu0  ;;  %v3393_v21 = vpop.f32.mrf.mxu1 }
 0x1dc   : > { %v3411_v22 = vpop.f32.mrf.mxu0 }
 0x1dd   : > { %v3433_v24 = vpop.f32.mrf.mxu1 }
 0x1de   : > { %v3412_v23 = vpop.f32.mrf.mxu0 }
 0x1df   : > { %v3413_v25 = vadd.f32 %v3412_v23, %v3411_v22  ;;  %v3434_v27 = vpop.f32.mrf.mxu1 }
 0x1e0   : > { %v3414_v26 = vpop.f32.mrf.mxu0  ;;  %v3435_v29 = vadd.f32 %v3434_v27, %v3433_v24 }
 0x1e1   : > { %v2797_v28 = vadd.f32 %v3413_v25, %v2757_v19  ;;  %v3436_v31 = vpop.f32.mrf.mxu1 }
 0x1e2   : > { %v3415_v30 = vpop.f32.mrf.mxu0 }
 0x1e3   : > { %v2837_v32 = vadd.f32 %v3435_v29, %v2797_v28  ;;  %v3437_v33 = vpop.f32.mrf.mxu1 }
 0x1fc   : > { %v3455_v34 = vpop.f32.mrf.mxu0 }
 0x1fd   : > { %v3477_v36 = vpop.f32.mrf.mxu1 }
 0x1fe   : > { %v3456_v35 = vpop.f32.mrf.mxu0 }
 0x1ff   : > { %v3478_v38 = vpop.f32.mrf.mxu1  ;;  %v3457_v50 = vadd.f32 %v3456_v35, %v3455_v34 }
 0x200   : > { %v3458_v37 = vpop.f32.mrf.mxu0  ;;  %v3479_v52 = vadd.f32 %v3478_v38, %v3477_v36 }
 0x201   : > { %v3480_v40 = vpop.f32.mrf.mxu1  ;;  %v2877_v51 = vadd.f32 %v3457_v50, %v2837_v32 }
 0x202   : > { %v3459_v39 = vpop.f32.mrf.mxu0 }
 0x203   : > { %v3481_v41 = vpop.f32.mrf.mxu1  ;;  %v2917_v54 = vadd.f32 %v3479_v52, %v2877_v51 }
 0x21c   : > { %v3499_v42 = vpop.f32.mrf.mxu0 }
 0x21d   : > { %v3521_v44 = vpop.f32.mrf.mxu1 }
 0x21e   : > { %v3500_v43 = vpop.f32.mrf.mxu0 }
 0x21f   : > { %v3522_v46 = vpop.f32.mrf.mxu1  ;;  %v3501_v53 = vadd.f32 %v3500_v43, %v3499_v42 }
 0x220   : > { %v3502_v45 = vpop.f32.mrf.mxu0  ;;  %v3523_v56 = vadd.f32 %v3522_v46, %v3521_v44 }
 0x221   : > { %v3524_v48 = vpop.f32.mrf.mxu1  ;;  %v2957_v55 = vadd.f32 %v3501_v53, %v2917_v54 }
 0x222   : > { %v3503_v47 = vpop.f32.mrf.mxu0 }
 0x223   : > { %v3525_v49 = vpop.f32.mrf.mxu1  ;;  %v2997_v59 = vadd.f32 %v3523_v56, %v2957_v55 }
 0x23c   : > { %v3543_v57 = vpop.f32.mrf.mxu0 }
 0x23e   : > { %v3544_v58 = vpop.f32.mrf.mxu0 }
 0x23f   : > { %v3545_v60 = vadd.f32 %v3544_v58, %v3543_v57 }
 0x240   : > { %v3546_v62 = vpop.f32.mrf.mxu0 }
 0x241   : > { %v3037_v63 = vadd.f32 %v3545_v60, %v2997_v59 }
 0x242   : > { %v3547_v1 = vpop.f32.mrf.mxu0 }
 0x243   : > { %v3049_v2 = vmul.f32 %v3347_v61, %v3037_v63 }
 0x245   : > { %v3057_v3 = vadd.f32 %v3348_v0, %v3049_v2 }
 0x247   : > { %v3058_v4 = vmax.f32 %v3057_v3, 0.0 }
 0x249   : > { %3059 = vst [vmem:[%s1456_s15] sm:$0xff] %v3058_v4 }
 0x24a PF: > { %s14_s19 = sadd.s32 1, %s3791_s19   ;;  %s4684_s15 = smov %s3779_s16 }
 0x24b   : > { %p11_p10 = scmp.ge.s32.totalorder %s14_s19, 4   ;;  %s4685_s16 = smov %s3853_s23 }
 0x24c   : > { %s4686_s17 = smov %s3787_s18  ;;  %s4687_s18 = smov %s4689_s20 }
 0x24d   :  { %13 = sbr.rel (!%p11_p10) target bundleno = 3 (0x3), region = 121 }

// kernel: sound_enc_forward.33
= control target key start
LH: loop header
LB: loop body
LE: loop exit
PB: predicated region body
PF: predicated region fallthrough
CT: control target
= control target key end

     0   :  { %s4663_s15 = smov 0   ;;  %s4665_s16 = smov 0   ;;  %s5691_s0 = inlined_call_operand.vmem [shape: bf16[8,2304], index: 0, kind: input, shape index: {}]   ;;  %s5692_s1 = inlined_call_operand.vmem [shape: bf16[2304,1024], index: 1, kind: input, shape index: {}]   ;;  %s5693_s2 = inlined_call_operand.vmem [shape: f32[1,1024], index: 2, kind: input, shape index: {}]   ;;  %s5694_s3 = inlined_call_operand.vmem [shape: f32[1,1024], index: 3, kind: input, shape index: {}]   ;;  %s5695_s4 = inlined_call_operand.vmem [shape: f32[8,1024], index: 4, kind: output, shape index: {}]  }
   0x1   :  { %s4667_s17 = smov 0   ;;  %s4669_s18 = smov 0  }
   0x2   :  { %s4671_s19 = smov 0  }
   0x3 LB: > { %s23_s20 = sadd.s32 1, %s4632_s18  ;;  %p66_p1 = scmp.ne.s32.totalorder %s4624_s16, %s4620_s15  ;;  %s4636_s19 = sphi %s4671_s19, %s14_s19   ;;  %s4632_s18 = sphi %s4669_s18, %s5699_s18   ;;  %s4628_s17 = sphi %s4667_s17, %s5698_s17   ;;  %s4624_s16 = sphi %s4665_s16, %s5697_s16   ;;  %s4620_s15 = sphi %s4663_s15, %s5696_s15  }
   0x4   : > { %p24_p0 = scmp.ge.s32.totalorder %s23_s20, 4  ;;  %p67_p2 = scmp.eq.s32.totalorder %s4636_s19, 0 }
   0x5   : > { %s59_s22 = sadd.s32 1, %s4624_s16  ;;  %p3789_p5 = scmp.ge.s32.totalorder %s4636_s19, 4 }
   0x6   : > { %s5701_s20 = smov (%p24_p0, %s23_s20), 0  ;;  %p68_p3 = por %p67_p2, %p66_p1 }
   0x7   : > { %s56_s21 = ssub.s32 %s4632_s18, %s5701_s20  ;;  %180 = sbr.rel (%p3789_p5) target bundleno = 304 (0x130), region = 20 }
   0x8   : > { %p57_p4 = scmp.eq.s32.totalorder %s56_s21, 0 }
   0xa   : > { %s4698_s23 = scalar_select %p57_p4, %s4624_s16, %s59_s22  }
   0xc   : > { %183 = sbr.rel (!%p68_p3) target bundleno = 304 (0x130), region = 24  ;;  %s185_s24 = sand.u32 (%p68_p3), 1, %s4624_s16  }
   0xd   : > { %s4105_s25 = sshll.u32 (%p68_p3), %s4632_s18, 3  ;;  %s4106_s26 = smul.u32 (%p68_p3), 2304, %s185_s24 }
   0xe   : > { %s4706_s29 = scalar_lea.vmem (%p68_p3), %s5692_s1, %s4105_s25 }
   0xf   : > { %v793_v0 = vld [vmem:[%s4706_s29] sm:$0xff] (%p68_p3)  ;;  %s4714_s30 = scalar_lea.vmem (%p68_p3), [#allocation2], %s4106_s26 }
  0x10   : > { %v795_v1 = vld [vmem:[%s4706_s29 + $0x20] sm:$0xff] (%p68_p3)  ;;  %794 = vst [vmem:[%s4714_s30] sm:$0xff] (%p68_p3), %v793_v0 }
  0x11   : > { %v797_v2 = vld [vmem:[%s4706_s29 + $0x40] sm:$0xff]  ;;  %796 = vst [vmem:[%s4714_s30 + $0x8] sm:$0xff] %v795_v1 }
  0x12   : > { %v799_v3 = vld [vmem:[%s4706_s29 + $0x60] sm:$0xff]  ;;  %798 = vst [vmem:[%s4714_s30 + $0x10] sm:$0xff] %v797_v2 }
  0x13   : > { %v801_v4 = vld [vmem:[%s4706_s29 + $0x80] sm:$0xff]  ;;  %800 = vst [vmem:[%s4714_s30 + $0x18] sm:$0xff] %v799_v3 }
  0x14   : > { %v803_v5 = vld [vmem:[%s4706_s29 + $0xa0] sm:$0xff]  ;;  %802 = vst [vmem:[%s4714_s30 + $0x20] sm:$0xff] %v801_v4 }
  0x15   : > { %804 = vst [vmem:[%s4714_s30 + $0x28] sm:$0xff] %v803_v5  ;;  %v805_v6 = vld [vmem:[%s4706_s29 + $0xc0] sm:$0xff] }
  0x16   : > { %v807_v7 = vld [vmem:[%s4706_s29 + $0xe0] sm:$0xff]  ;;  %806 = vst [vmem:[%s4714_s30 + $0x30] sm:$0xff] %v805_v6 }
  0x17   : > { %v809_v8 = vld [vmem:[%s4706_s29 + $0x100] sm:$0xff]  ;;  %808 = vst [vmem:[%s4714_s30 + $0x38] sm:$0xff] %v807_v7 }
  0x18   : > { %810 = vst [vmem:[%s4714_s30 + $0x40] sm:$0xff] %v809_v8  ;;  %v811_v9 = vld [vmem:[%s4706_s29 + $0x120] sm:$0xff] }
  0x19   : > { %v813_v10 = vld [vmem:[%s4706_s29 + $0x140] sm:$0xff]  ;;  %812 = vst [vmem:[%s4714_s30 + $0x48] sm:$0xff] %v811_v9 }
  0x1a   : > { %v815_v11 = vld [vmem:[%s4706_s29 + $0x160] sm:$0xff]  ;;  %814 = vst [vmem:[%s4714_s30 + $0x50] sm:$0xff] %v813_v10 }
  0x1b   : > { %816 = vst [vmem:[%s4714_s30 + $0x58] sm:$0xff] %v815_v11  ;;  %v817_v12 = vld [vmem:[%s4706_s29 + $0x180] sm:$0xff] }
  0x1c   : > { %v819_v13 = vld [vmem:[%s4706_s29 + $0x1a0] sm:$0xff]  ;;  %818 = vst [vmem:[%s4714_s30 + $0x60] sm:$0xff] %v817_v12 }
  0x1d   : > { %v821_v14 = vld [vmem:[%s4706_s29 + $0x1c0] sm:$0xff]  ;;  %820 = vst [vmem:[%s4714_s30 + $0x68] sm:$0xff] %v819_v13 }
  0x1e   : > { %822 = vst [vmem:[%s4714_s30 + $0x70] sm:$0xff] %v821_v14  ;;  %v823_v15 = vld [vmem:[%s4706_s29 + $0x1e0] sm:$0xff] }
  0x1f   : > { %v825_v16 = vld [vmem:[%s4706_s29 + $0x200] sm:$0xff]  ;;  %824 = vst [vmem:[%s4714_s30 + $0x78] sm:$0xff] %v823_v15 }
  0x20   : > { %v827_v17 = vld [vmem:[%s4706_s29 + $0x220] sm:$0xff]  ;;  %826 = vst [vmem:[%s4714_s30 + $0x80] sm:$0xff] %v825_v16 }
  0x21   : > { %828 = vst [vmem:[%s4714_s30 + $0x88] sm:$0xff] %v827_v17  ;;  %v829_v18 = vld [vmem:[%s4706_s29 + $0x240] sm:$0xff] }
  0x22   : > { %v831_v19 = vld [vmem:[%s4706_s29 + $0x260] sm:$0xff]  ;;  %830 = vst [vmem:[%s4714_s30 + $0x90] sm:$0xff] %v829_v18 }
  0x23   : > { %v833_v20 = vld [vmem:[%s4706_s29 + $0x280] sm:$0xff]  ;;  %832 = vst [vmem:[%s4714_s30 + $0x98] sm:$0xff] %v831_v19 }
  0x24   : > { %834 = vst [vmem:[%s4714_s30 + $0xa0] sm:$0xff] %v833_v20  ;;  %v835_v21 = vld [vmem:[%s4706_s29 + $0x2a0] sm:$0xff] }
  0x25   : > { %v837_v22 = vld [vmem:[%s4706_s29 + $0x2c0] sm:$0xff]  ;;  %836 = vst [vmem:[%s4714_s30 + $0xa8] sm:$0xff] %v835_v21 }
  0x26   : > { %v839_v23 = vld [vmem:[%s4706_s29 + $0x2e0] sm:$0xff]  ;;  %838 = vst [vmem:[%s4714_s30 + $0xb0] sm:$0xff] %v837_v22 }
  0x27   : > { %840 = vst [vmem:[%s4714_s30 + $0xb8] sm:$0xff] %v839_v23  ;;  %v841_v24 = vld [vmem:[%s4706_s29 + $0x300] sm:$0xff] }
  0x28   : > { %v843_v25 = vld [vmem:[%s4706_s29 + $0x320] sm:$0xff]  ;;  %842 = vst [vmem:[%s4714_s30 + $0xc0] sm:$0xff] %v841_v24 }
  0x29   : > { %v845_v26 = vld [vmem:[%s4706_s29 + $0x340] sm:$0xff]  ;;  %844 = vst [vmem:[%s4714_s30 + $0xc8] sm:$0xff] %v843_v25 }
  0x2a   : > { %846 = vst [vmem:[%s4714_s30 + $0xd0] sm:$0xff] %v845_v26  ;;  %v847_v27 = vld [vmem:[%s4706_s29 + $0x360] sm:$0xff] }
  0x2b   : > { %v849_v28 = vld [vmem:[%s4706_s29 + $0x380] sm:$0xff]  ;;  %848 = vst [vmem:[%s4714_s30 + $0xd8] sm:$0xff] %v847_v27 }
  0x2c   : > { %v851_v29 = vld [vmem:[%s4706_s29 + $0x3a0] sm:$0xff]  ;;  %850 = vst [vmem:[%s4714_s30 + $0xe0] sm:$0xff] %v849_v28 }
  0x2d   : > { %852 = vst [vmem:[%s4714_s30 + $0xe8] sm:$0xff] %v851_v29  ;;  %v853_v30 = vld [vmem:[%s4706_s29 + $0x3c0] sm:$0xff] }
  0x2e   : > { %v855_v31 = vld [vmem:[%s4706_s29 + $0x3e0] sm:$0xff]  ;;  %854 = vst [vmem:[%s4714_s30 + $0xf0] sm:$0xff] %v853_v30 }
  0x2f   : > { %v857_v32 = vld [vmem:[%s4706_s29 + $0x400] sm:$0xff]  ;;  %856 = vst [vmem:[%s4714_s30 + $0xf8] sm:$0xff] %v855_v31 }
  0x30   : > { %858 = vst [vmem:[%s4714_s30 + $0x100] sm:$0xff] %v857_v32  ;;  %v859_v33 = vld [vmem:[%s4706_s29 + $0x420] sm:$0xff] }
  0x31   : > { %v861_v34 = vld [vmem:[%s4706_s29 + $0x440] sm:$0xff]  ;;  %860 = vst [vmem:[%s4714_s30 + $0x108] sm:$0xff] %v859_v33 }
  0x32   : > { %v863_v35 = vld [vmem:[%s4706_s29 + $0x460] sm:$0xff]  ;;  %862 = vst [vmem:[%s4714_s30 + $0x110] sm:$0xff] %v861_v34 }
  0x33   : > { %864 = vst [vmem:[%s4714_s30 + $0x118] sm:$0xff] %v863_v35  ;;  %v865_v36 = vld [vmem:[%s4706_s29 + $0x480] sm:$0xff] }
  0x34   : > { %v867_v37 = vld [vmem:[%s4706_s29 + $0x4a0] sm:$0xff]  ;;  %866 = vst [vmem:[%s4714_s30 + $0x120] sm:$0xff] %v865_v36 }
  0x35   : > { %v869_v38 = vld [vmem:[%s4706_s29 + $0x4c0] sm:$0xff]  ;;  %868 = vst [vmem:[%s4714_s30 + $0x128] sm:$0xff] %v867_v37 }
  0x36   : > { %870 = vst [vmem:[%s4714_s30 + $0x130] sm:$0xff] %v869_v38  ;;  %v871_v39 = vld [vmem:[%s4706_s29 + $0x4e0] sm:$0xff] }
  0x37   : > { %v873_v40 = vld [vmem:[%s4706_s29 + $0x500] sm:$0xff]  ;;  %872 = vst [vmem:[%s4714_s30 + $0x138] sm:$0xff] %v871_v39 }
  0x38   : > { %v875_v41 = vld [vmem:[%s4706_s29 + $0x520] sm:$0xff]  ;;  %874 = vst [vmem:[%s4714_s30 + $0x140] sm:$0xff] %v873_v40 }
  0x39   : > { %876 = vst [vmem:[%s4714_s30 + $0x148] sm:$0xff] %v875_v41  ;;  %v877_v42 = vld [vmem:[%s4706_s29 + $0x540] sm:$0xff] }
  0x3a   : > { %v879_v43 = vld [vmem:[%s4706_s29 + $0x560] sm:$0xff]  ;;  %878 = vst [vmem:[%s4714_s30 + $0x150] sm:$0xff] %v877_v42 }
  0x3b   : > { %v881_v44 = vld [vmem:[%s4706_s29 + $0x580] sm:$0xff]  ;;  %880 = vst [vmem:[%s4714_s30 + $0x158] sm:$0xff] %v879_v43 }
  0x3c   : > { %882 = vst [vmem:[%s4714_s30 + $0x160] sm:$0xff] %v881_v44  ;;  %v883_v45 = vld [vmem:[%s4706_s29 + $0x5a0] sm:$0xff] }
  0x3d   : > { %v885_v46 = vld [vmem:[%s4706_s29 + $0x5c0] sm:$0xff]  ;;  %884 = vst [vmem:[%s4714_s30 + $0x168] sm:$0xff] %v883_v45 }
  0x3e   : > { %v887_v47 = vld [vmem:[%s4706_s29 + $0x5e0] sm:$0xff]  ;;  %886 = vst [vmem:[%s4714_s30 + $0x170] sm:$0xff] %v885_v46 }
  0x3f   : > { %888 = vst [vmem:[%s4714_s30 + $0x178] sm:$0xff] %v887_v47  ;;  %v889_v48 = vld [vmem:[%s4706_s29 + $0x600] sm:$0xff] }
  0x40   : > { %v891_v49 = vld [vmem:[%s4706_s29 + $0x620] sm:$0xff]  ;;  %890 = vst [vmem:[%s4714_s30 + $0x180] sm:$0xff] %v889_v48 }
  0x41   : > { %v893_v50 = vld [vmem:[%s4706_s29 + $0x640] sm:$0xff]  ;;  %892 = vst [vmem:[%s4714_s30 + $0x188] sm:$0xff] %v891_v49 }
  0x42   : > { %894 = vst [vmem:[%s4714_s30 + $0x190] sm:$0xff] %v893_v50  ;;  %v895_v51 = vld [vmem:[%s4706_s29 + $0x660] sm:$0xff] }
  0x43   : > { %v897_v52 = vld [vmem:[%s4706_s29 + $0x680] sm:$0xff]  ;;  %896 = vst [vmem:[%s4714_s30 + $0x198] sm:$0xff] %v895_v51 }
  0x44   : > { %v899_v53 = vld [vmem:[%s4706_s29 + $0x6a0] sm:$0xff]  ;;  %898 = vst [vmem:[%s4714_s30 + $0x1a0] sm:$0xff] %v897_v52 }
  0x45   : > { %900 = vst [vmem:[%s4714_s30 + $0x1a8] sm:$0xff] %v899_v53  ;;  %v901_v54 = vld [vmem:[%s4706_s29 + $0x6c0] sm:$0xff] }
  0x46   : > { %v903_v55 = vld [vmem:[%s4706_s29 + $0x6e0] sm:$0xff]  ;;  %902 = vst [vmem:[%s4714_s30 + $0x1b0] sm:$0xff] %v901_v54 }
  0x47   : > { %v905_v56 = vld [vmem:[%s4706_s29 + $0x700] sm:$0xff]  ;;  %904 = vst [vmem:[%s4714_s30 + $0x1b8] sm:$0xff] %v903_v55 }
  0x48   : > { %906 = vst [vmem:[%s4714_s30 + $0x1c0] sm:$0xff] %v905_v56  ;;  %v907_v57 = vld [vmem:[%s4706_s29 + $0x720] sm:$0xff] }
  0x49   : > { %v909_v58 = vld [vmem:[%s4706_s29 + $0x740] sm:$0xff]  ;;  %908 = vst [vmem:[%s4714_s30 + $0x1c8] sm:$0xff] %v907_v57 }
  0x4a   : > { %v911_v59 = vld [vmem:[%s4706_s29 + $0x760] sm:$0xff]  ;;  %910 = vst [vmem:[%s4714_s30 + $0x1d0] sm:$0xff] %v909_v58 }
  0x4b   : > { %912 = vst [vmem:[%s4714_s30 + $0x1d8] sm:$0xff] %v911_v59  ;;  %v913_v60 = vld [vmem:[%s4706_s29 + $0x780] sm:$0xff] }
  0x4c   : > { %v915_v61 = vld [vmem:[%s4706_s29 + $0x7a0] sm:$0xff]  ;;  %914 = vst [vmem:[%s4714_s30 + $0x1e0] sm:$0xff] %v913_v60 }
  0x4d   : > { %v917_v62 = vld [vmem:[%s4706_s29 + $0x7c0] sm:$0xff]  ;;  %916 = vst [vmem:[%s4714_s30 + $0x1e8] sm:$0xff] %v915_v61 }
  0x4e   : > { %918 = vst [vmem:[%s4714_s30 + $0x1f0] sm:$0xff] %v917_v62  ;;  %v919_v63 = vld [vmem:[%s4706_s29 + $0x7e0] sm:$0xff] }
  0x4f   : > { %v921_v0 = vld [vmem:[%s4706_s29 + $0x800] sm:$0xff]  ;;  %920 = vst [vmem:[%s4714_s30 + $0x1f8] sm:$0xff] %v919_v63 }
  0x50   : > { %v923_v1 = vld [vmem:[%s4706_s29 + $0x820] sm:$0xff]  ;;  %922 = vst [vmem:[%s4714_s30 + $0x200] sm:$0xff] %v921_v0 }
  0x51   : > { %924 = vst [vmem:[%s4714_s30 + $0x208] sm:$0xff] %v923_v1  ;;  %v925_v2 = vld [vmem:[%s4706_s29 + $0x840] sm:$0xff] }
  0x52   : > { %v927_v3 = vld [vmem:[%s4706_s29 + $0x860] sm:$0xff]  ;;  %926 = vst [vmem:[%s4714_s30 + $0x210] sm:$0xff] %v925_v2 }
  0x53   : > { %v929_v4 = vld [vmem:[%s4706_s29 + $0x880] sm:$0xff]  ;;  %928 = vst [vmem:[%s4714_s30 + $0x218] sm:$0xff] %v927_v3 }
  0x54   : > { %930 = vst [vmem:[%s4714_s30 + $0x220] sm:$0xff] %v929_v4  ;;  %v931_v5 = vld [vmem:[%s4706_s29 + $0x8a0] sm:$0xff] }
  0x55   : > { %v933_v6 = vld [vmem:[%s4706_s29 + $0x8c0] sm:$0xff]  ;;  %932 = vst [vmem:[%s4714_s30 + $0x228] sm:$0xff] %v931_v5 }
  0x56   : > { %v935_v7 = vld [vmem:[%s4706_s29 + $0x8e0] sm:$0xff]  ;;  %934 = vst [vmem:[%s4714_s30 + $0x230] sm:$0xff] %v933_v6 }
  0x57   : > { %936 = vst [vmem:[%s4714_s30 + $0x238] sm:$0xff] %v935_v7  ;;  %v937_v8 = vld [vmem:[%s4706_s29 + $0x900] sm:$0xff] }
  0x58   : > { %v939_v9 = vld [vmem:[%s4706_s29 + $0x920] sm:$0xff]  ;;  %938 = vst [vmem:[%s4714_s30 + $0x240] sm:$0xff] %v937_v8 }
  0x59   : > { %v941_v10 = vld [vmem:[%s4706_s29 + $0x940] sm:$0xff]  ;;  %940 = vst [vmem:[%s4714_s30 + $0x248] sm:$0xff] %v939_v9 }
  0x5a   : > { %942 = vst [vmem:[%s4714_s30 + $0x250] sm:$0xff] %v941_v10  ;;  %v943_v11 = vld [vmem:[%s4706_s29 + $0x960] sm:$0xff] }
  0x5b   : > { %v945_v12 = vld [vmem:[%s4706_s29 + $0x980] sm:$0xff]  ;;  %944 = vst [vmem:[%s4714_s30 + $0x258] sm:$0xff] %v943_v11 }
  0x5c   : > { %v947_v13 = vld [vmem:[%s4706_s29 + $0x9a0] sm:$0xff]  ;;  %946 = vst [vmem:[%s4714_s30 + $0x260] sm:$0xff] %v945_v12 }
  0x5d   : > { %948 = vst [vmem:[%s4714_s30 + $0x268] sm:$0xff] %v947_v13  ;;  %v949_v14 = vld [vmem:[%s4706_s29 + $0x9c0] sm:$0xff] }
  0x5e   : > { %v951_v15 = vld [vmem:[%s4706_s29 + $0x9e0] sm:$0xff]  ;;  %950 = vst [vmem:[%s4714_s30 + $0x270] sm:$0xff] %v949_v14 }
  0x5f   : > { %v953_v16 = vld [vmem:[%s4706_s29 + $0xa00] sm:$0xff]  ;;  %952 = vst [vmem:[%s4714_s30 + $0x278] sm:$0xff] %v951_v15 }
  0x60   : > { %954 = vst [vmem:[%s4714_s30 + $0x280] sm:$0xff] %v953_v16  ;;  %v955_v17 = vld [vmem:[%s4706_s29 + $0xa20] sm:$0xff] }
  0x61   : > { %v957_v18 = vld [vmem:[%s4706_s29 + $0xa40] sm:$0xff]  ;;  %956 = vst [vmem:[%s4714_s30 + $0x288] sm:$0xff] %v955_v17 }
  0x62   : > { %v959_v19 = vld [vmem:[%s4706_s29 + $0xa60] sm:$0xff]  ;;  %958 = vst [vmem:[%s4714_s30 + $0x290] sm:$0xff] %v957_v18 }
  0x63   : > { %960 = vst [vmem:[%s4714_s30 + $0x298] sm:$0xff] %v959_v19  ;;  %v961_v20 = vld [vmem:[%s4706_s29 + $0xa80] sm:$0xff] }
  0x64   : > { %v963_v21 = vld [vmem:[%s4706_s29 + $0xaa0] sm:$0xff]  ;;  %962 = vst [vmem:[%s4714_s30 + $0x2a0] sm:$0xff] %v961_v20 }
  0x65   : > { %v965_v22 = vld [vmem:[%s4706_s29 + $0xac0] sm:$0xff]  ;;  %964 = vst [vmem:[%s4714_s30 + $0x2a8] sm:$0xff] %v963_v21 }
  0x66   : > { %966 = vst [vmem:[%s4714_s30 + $0x2b0] sm:$0xff] %v965_v22  ;;  %v967_v23 = vld [vmem:[%s4706_s29 + $0xae0] sm:$0xff] }
  0x67   : > { %v969_v24 = vld [vmem:[%s4706_s29 + $0xb00] sm:$0xff]  ;;  %968 = vst [vmem:[%s4714_s30 + $0x2b8] sm:$0xff] %v967_v23 }
  0x68   : > { %v971_v25 = vld [vmem:[%s4706_s29 + $0xb20] sm:$0xff]  ;;  %970 = vst [vmem:[%s4714_s30 + $0x2c0] sm:$0xff] %v969_v24 }
  0x69   : > { %972 = vst [vmem:[%s4714_s30 + $0x2c8] sm:$0xff] %v971_v25  ;;  %v973_v26 = vld [vmem:[%s4706_s29 + $0xb40] sm:$0xff] }
  0x6a   : > { %v975_v27 = vld [vmem:[%s4706_s29 + $0xb60] sm:$0xff]  ;;  %974 = vst [vmem:[%s4714_s30 + $0x2d0] sm:$0xff] %v973_v26 }
  0x6b   : > { %v977_v28 = vld [vmem:[%s4706_s29 + $0xb80] sm:$0xff]  ;;  %976 = vst [vmem:[%s4714_s30 + $0x2d8] sm:$0xff] %v975_v27 }
  0x6c   : > { %978 = vst [vmem:[%s4714_s30 + $0x2e0] sm:$0xff] %v977_v28  ;;  %v979_v29 = vld [vmem:[%s4706_s29 + $0xba0] sm:$0xff] }
  0x6d   : > { %v981_v30 = vld [vmem:[%s4706_s29 + $0xbc0] sm:$0xff]  ;;  %980 = vst [vmem:[%s4714_s30 + $0x2e8] sm:$0xff] %v979_v29 }
  0x6e   : > { %v983_v31 = vld [vmem:[%s4706_s29 + $0xbe0] sm:$0xff]  ;;  %982 = vst [vmem:[%s4714_s30 + $0x2f0] sm:$0xff] %v981_v30 }
  0x6f   : > { %984 = vst [vmem:[%s4714_s30 + $0x2f8] sm:$0xff] %v983_v31  ;;  %v985_v32 = vld [vmem:[%s4706_s29 + $0xc00] sm:$0xff] }
  0x70   : > { %v987_v33 = vld [vmem:[%s4706_s29 + $0xc20] sm:$0xff]  ;;  %986 = vst [vmem:[%s4714_s30 + $0x300] sm:$0xff] %v985_v32 }
  0x71   : > { %v989_v34 = vld [vmem:[%s4706_s29 + $0xc40] sm:$0xff]  ;;  %988 = vst [vmem:[%s4714_s30 + $0x308] sm:$0xff] %v987_v33 }
  0x72   : > { %990 = vst [vmem:[%s4714_s30 + $0x310] sm:$0xff] %v989_v34  ;;  %v991_v35 = vld [vmem:[%s4706_s29 + $0xc60] sm:$0xff] }
  0x73   : > { %v993_v36 = vld [vmem:[%s4706_s29 + $0xc80] sm:$0xff]  ;;  %992 = vst [vmem:[%s4714_s30 + $0x318] sm:$0xff] %v991_v35 }
  0x74   : > { %v995_v37 = vld [vmem:[%s4706_s29 + $0xca0] sm:$0xff]  ;;  %994 = vst [vmem:[%s4714_s30 + $0x320] sm:$0xff] %v993_v36 }
  0x75   : > { %996 = vst [vmem:[%s4714_s30 + $0x328] sm:$0xff] %v995_v37  ;;  %v997_v38 = vld [vmem:[%s4706_s29 + $0xcc0] sm:$0xff] }
  0x76   : > { %v999_v39 = vld [vmem:[%s4706_s29 + $0xce0] sm:$0xff]  ;;  %998 = vst [vmem:[%s4714_s30 + $0x330] sm:$0xff] %v997_v38 }
  0x77   : > { %v1001_v40 = vld [vmem:[%s4706_s29 + $0xd00] sm:$0xff]  ;;  %1000 = vst [vmem:[%s4714_s30 + $0x338] sm:$0xff] %v999_v39 }
  0x78   : > { %1002 = vst [vmem:[%s4714_s30 + $0x340] sm:$0xff] %v1001_v40  ;;  %v1003_v41 = vld [vmem:[%s4706_s29 + $0xd20] sm:$0xff] }
  0x79   : > { %v1005_v42 = vld [vmem:[%s4706_s29 + $0xd40] sm:$0xff]  ;;  %1004 = vst [vmem:[%s4714_s30 + $0x348] sm:$0xff] %v1003_v41 }
  0x7a   : > { %v1007_v43 = vld [vmem:[%s4706_s29 + $0xd60] sm:$0xff]  ;;  %1006 = vst [vmem:[%s4714_s30 + $0x350] sm:$0xff] %v1005_v42 }
  0x7b   : > { %1008 = vst [vmem:[%s4714_s30 + $0x358] sm:$0xff] %v1007_v43  ;;  %v1009_v44 = vld [vmem:[%s4706_s29 + $0xd80] sm:$0xff] }
  0x7c   : > { %v1011_v45 = vld [vmem:[%s4706_s29 + $0xda0] sm:$0xff]  ;;  %1010 = vst [vmem:[%s4714_s30 + $0x360] sm:$0xff] %v1009_v44 }
  0x7d   : > { %v1013_v46 = vld [vmem:[%s4706_s29 + $0xdc0] sm:$0xff]  ;;  %1012 = vst [vmem:[%s4714_s30 + $0x368] sm:$0xff] %v1011_v45 }
  0x7e   : > { %1014 = vst [vmem:[%s4714_s30 + $0x370] sm:$0xff] %v1013_v46  ;;  %v1015_v47 = vld [vmem:[%s4706_s29 + $0xde0] sm:$0xff] }
  0x7f   : > { %v1017_v48 = vld [vmem:[%s4706_s29 + $0xe00] sm:$0xff]  ;;  %1016 = vst [vmem:[%s4714_s30 + $0x378] sm:$0xff] %v1015_v47 }
  0x80   : > { %v1019_v49 = vld [vmem:[%s4706_s29 + $0xe20] sm:$0xff]  ;;  %1018 = vst [vmem:[%s4714_s30 + $0x380] sm:$0xff] %v1017_v48 }
  0x81   : > { %1020 = vst [vmem:[%s4714_s30 + $0x388] sm:$0xff] %v1019_v49  ;;  %v1021_v50 = vld [vmem:[%s4706_s29 + $0xe40] sm:$0xff] }
  0x82   : > { %v1023_v51 = vld [vmem:[%s4706_s29 + $0xe60] sm:$0xff]  ;;  %1022 = vst [vmem:[%s4714_s30 + $0x390] sm:$0xff] %v1021_v50 }
  0x83   : > { %v1025_v52 = vld [vmem:[%s4706_s29 + $0xe80] sm:$0xff]  ;;  %1024 = vst [vmem:[%s4714_s30 + $0x398] sm:$0xff] %v1023_v51 }
  0x84   : > { %1026 = vst [vmem:[%s4714_s30 + $0x3a0] sm:$0xff] %v1025_v52  ;;  %v1027_v53 = vld [vmem:[%s4706_s29 + $0xea0] sm:$0xff] }
  0x85   : > { %v1029_v54 = vld [vmem:[%s4706_s29 + $0xec0] sm:$0xff]  ;;  %1028 = vst [vmem:[%s4714_s30 + $0x3a8] sm:$0xff] %v1027_v53 }
  0x86   : > { %v1031_v55 = vld [vmem:[%s4706_s29 + $0xee0] sm:$0xff]  ;;  %1030 = vst [vmem:[%s4714_s30 + $0x3b0] sm:$0xff] %v1029_v54 }
  0x87   : > { %1032 = vst [vmem:[%s4714_s30 + $0x3b8] sm:$0xff] %v1031_v55  ;;  %v1033_v56 = vld [vmem:[%s4706_s29 + $0xf00] sm:$0xff] }
  0x88   : > { %v1035_v57 = vld [vmem:[%s4706_s29 + $0xf20] sm:$0xff]  ;;  %1034 = vst [vmem:[%s4714_s30 + $0x3c0] sm:$0xff] %v1033_v56 }
  0x89   : > { %v1037_v58 = vld [vmem:[%s4706_s29 + $0xf40] sm:$0xff]  ;;  %1036 = vst [vmem:[%s4714_s30 + $0x3c8] sm:$0xff] %v1035_v57 }
  0x8a   : > { %1038 = vst [vmem:[%s4714_s30 + $0x3d0] sm:$0xff] %v1037_v58  ;;  %v1039_v59 = vld [vmem:[%s4706_s29 + $0xf60] sm:$0xff] }
  0x8b   : > { %v1041_v60 = vld [vmem:[%s4706_s29 + $0xf80] sm:$0xff]  ;;  %1040 = vst [vmem:[%s4714_s30 + $0x3d8] sm:$0xff] %v1039_v59 }
  0x8c   : > { %v1043_v61 = vld [vmem:[%s4706_s29 + $0xfa0] sm:$0xff]  ;;  %1042 = vst [vmem:[%s4714_s30 + $0x3e0] sm:$0xff] %v1041_v60 }
  0x8d   : > { %1044 = vst [vmem:[%s4714_s30 + $0x3e8] sm:$0xff] %v1043_v61  ;;  %v1045_v62 = vld [vmem:[%s4706_s29 + $0xfc0] sm:$0xff] }
  0x8e   : > { %v1047_v63 = vld [vmem:[%s4706_s29 + $0xfe0] sm:$0xff]  ;;  %1046 = vst [vmem:[%s4714_s30 + $0x3f0] sm:$0xff] %v1045_v62 }
  0x8f   : > { %v1049_v0 = vld [vmem:[%s4706_s29 + $0x1000] sm:$0xff]  ;;  %1048 = vst [vmem:[%s4714_s30 + $0x3f8] sm:$0xff] %v1047_v63 }
  0x90   : > { %1050 = vst [vmem:[%s4714_s30 + $0x400] sm:$0xff] %v1049_v0  ;;  %v1051_v1 = vld [vmem:[%s4706_s29 + $0x1020] sm:$0xff] }
  0x91   : > { %v1053_v2 = vld [vmem:[%s4706_s29 + $0x1040] sm:$0xff]  ;;  %1052 = vst [vmem:[%s4714_s30 + $0x408] sm:$0xff] %v1051_v1 }
  0x92   : > { %v1055_v3 = vld [vmem:[%s4706_s29 + $0x1060] sm:$0xff]  ;;  %1054 = vst [vmem:[%s4714_s30 + $0x410] sm:$0xff] %v1053_v2 }
  0x93   : > { %1056 = vst [vmem:[%s4714_s30 + $0x418] sm:$0xff] %v1055_v3  ;;  %v1057_v4 = vld [vmem:[%s4706_s29 + $0x1080] sm:$0xff] }
  0x94   : > { %v1059_v5 = vld [vmem:[%s4706_s29 + $0x10a0] sm:$0xff]  ;;  %1058 = vst [vmem:[%s4714_s30 + $0x420] sm:$0xff] %v1057_v4 }
  0x95   : > { %v1061_v6 = vld [vmem:[%s4706_s29 + $0x10c0] sm:$0xff]  ;;  %1060 = vst [vmem:[%s4714_s30 + $0x428] sm:$0xff] %v1059_v5 }
  0x96   : > { %1062 = vst [vmem:[%s4714_s30 + $0x430] sm:$0xff] %v1061_v6  ;;  %v1063_v7 = vld [vmem:[%s4706_s29 + $0x10e0] sm:$0xff] }
  0x97   : > { %v1065_v8 = vld [vmem:[%s4706_s29 + $0x1100] sm:$0xff]  ;;  %1064 = vst [vmem:[%s4714_s30 + $0x438] sm:$0xff] %v1063_v7 }
  0x98   : > { %v1067_v9 = vld [vmem:[%s4706_s29 + $0x1120] sm:$0xff]  ;;  %1066 = vst [vmem:[%s4714_s30 + $0x440] sm:$0xff] %v1065_v8 }
  0x99   : > { %1068 = vst [vmem:[%s4714_s30 + $0x448] sm:$0xff] %v1067_v9  ;;  %v1069_v10 = vld [vmem:[%s4706_s29 + $0x1140] sm:$0xff] }
  0x9a   : > { %v1071_v11 = vld [vmem:[%s4706_s29 + $0x1160] sm:$0xff]  ;;  %1070 = vst [vmem:[%s4714_s30 + $0x450] sm:$0xff] %v1069_v10 }
  0x9b   : > { %v1073_v12 = vld [vmem:[%s4706_s29 + $0x1180] sm:$0xff]  ;;  %1072 = vst [vmem:[%s4714_s30 + $0x458] sm:$0xff] %v1071_v11 }
  0x9c   : > { %1074 = vst [vmem:[%s4714_s30 + $0x460] sm:$0xff] %v1073_v12  ;;  %v1075_v13 = vld [vmem:[%s4706_s29 + $0x11a0] sm:$0xff] }
  0x9d   : > { %v1077_v14 = vld [vmem:[%s4706_s29 + $0x11c0] sm:$0xff]  ;;  %1076 = vst [vmem:[%s4714_s30 + $0x468] sm:$0xff] %v1075_v13 }
  0x9e   : > { %v1079_v15 = vld [vmem:[%s4706_s29 + $0x11e0] sm:$0xff]  ;;  %1078 = vst [vmem:[%s4714_s30 + $0x470] sm:$0xff] %v1077_v14 }
  0x9f   : > { %1080 = vst [vmem:[%s4714_s30 + $0x478] sm:$0xff] %v1079_v15  ;;  %v1081_v16 = vld [vmem:[%s4706_s29 + $0x1200] sm:$0xff] }
  0xa0   : > { %v1083_v17 = vld [vmem:[%s4706_s29 + $0x1220] sm:$0xff]  ;;  %1082 = vst [vmem:[%s4714_s30 + $0x480] sm:$0xff] %v1081_v16 }
  0xa1   : > { %v1085_v18 = vld [vmem:[%s4706_s29 + $0x1240] sm:$0xff]  ;;  %1084 = vst [vmem:[%s4714_s30 + $0x488] sm:$0xff] %v1083_v17 }
  0xa2   : > { %1086 = vst [vmem:[%s4714_s30 + $0x490] sm:$0xff] %v1085_v18  ;;  %v1087_v19 = vld [vmem:[%s4706_s29 + $0x1260] sm:$0xff] }
  0xa3   : > { %v1089_v20 = vld [vmem:[%s4706_s29 + $0x1280] sm:$0xff]  ;;  %1088 = vst [vmem:[%s4714_s30 + $0x498] sm:$0xff] %v1087_v19 }
  0xa4   : > { %v1091_v21 = vld [vmem:[%s4706_s29 + $0x12a0] sm:$0xff]  ;;  %1090 = vst [vmem:[%s4714_s30 + $0x4a0] sm:$0xff] %v1089_v20 }
  0xa5   : > { %1092 = vst [vmem:[%s4714_s30 + $0x4a8] sm:$0xff] %v1091_v21  ;;  %v1093_v22 = vld [vmem:[%s4706_s29 + $0x12c0] sm:$0xff] }
  0xa6   : > { %v1095_v23 = vld [vmem:[%s4706_s29 + $0x12e0] sm:$0xff]  ;;  %1094 = vst [vmem:[%s4714_s30 + $0x4b0] sm:$0xff] %v1093_v22 }
  0xa7   : > { %v1097_v24 = vld [vmem:[%s4706_s29 + $0x1300] sm:$0xff]  ;;  %1096 = vst [vmem:[%s4714_s30 + $0x4b8] sm:$0xff] %v1095_v23 }
  0xa8   : > { %1098 = vst [vmem:[%s4714_s30 + $0x4c0] sm:$0xff] %v1097_v24  ;;  %v1099_v25 = vld [vmem:[%s4706_s29 + $0x1320] sm:$0xff] }
  0xa9   : > { %v1101_v26 = vld [vmem:[%s4706_s29 + $0x1340] sm:$0xff]  ;;  %1100 = vst [vmem:[%s4714_s30 + $0x4c8] sm:$0xff] %v1099_v25 }
  0xaa   : > { %v1103_v27 = vld [vmem:[%s4706_s29 + $0x1360] sm:$0xff]  ;;  %1102 = vst [vmem:[%s4714_s30 + $0x4d0] sm:$0xff] %v1101_v26 }
  0xab   : > { %1104 = vst [vmem:[%s4714_s30 + $0x4d8] sm:$0xff] %v1103_v27  ;;  %v1105_v28 = vld [vmem:[%s4706_s29 + $0x1380] sm:$0xff] }
  0xac   : > { %v1107_v29 = vld [vmem:[%s4706_s29 + $0x13a0] sm:$0xff]  ;;  %1106 = vst [vmem:[%s4714_s30 + $0x4e0] sm:$0xff] %v1105_v28 }
  0xad   : > { %v1109_v30 = vld [vmem:[%s4706_s29 + $0x13c0] sm:$0xff]  ;;  %1108 = vst [vmem:[%s4714_s30 + $0x4e8] sm:$0xff] %v1107_v29 }
  0xae   : > { %1110 = vst [vmem:[%s4714_s30 + $0x4f0] sm:$0xff] %v1109_v30  ;;  %v1111_v31 = vld [vmem:[%s4706_s29 + $0x13e0] sm:$0xff] }
  0xaf   : > { %v1113_v32 = vld [vmem:[%s4706_s29 + $0x1400] sm:$0xff]  ;;  %1112 = vst [vmem:[%s4714_s30 + $0x4f8] sm:$0xff] %v1111_v31 }
  0xb0   : > { %v1115_v33 = vld [vmem:[%s4706_s29 + $0x1420] sm:$0xff]  ;;  %1114 = vst [vmem:[%s4714_s30 + $0x500] sm:$0xff] %v1113_v32 }
  0xb1   : > { %1116 = vst [vmem:[%s4714_s30 + $0x508] sm:$0xff] %v1115_v33  ;;  %v1117_v34 = vld [vmem:[%s4706_s29 + $0x1440] sm:$0xff] }
  0xb2   : > { %v1119_v35 = vld [vmem:[%s4706_s29 + $0x1460] sm:$0xff]  ;;  %1118 = vst [vmem:[%s4714_s30 + $0x510] sm:$0xff] %v1117_v34 }
  0xb3   : > { %v1121_v36 = vld [vmem:[%s4706_s29 + $0x1480] sm:$0xff]  ;;  %1120 = vst [vmem:[%s4714_s30 + $0x518] sm:$0xff] %v1119_v35 }
  0xb4   : > { %1122 = vst [vmem:[%s4714_s30 + $0x520] sm:$0xff] %v1121_v36  ;;  %v1123_v37 = vld [vmem:[%s4706_s29 + $0x14a0] sm:$0xff] }
  0xb5   : > { %v1125_v38 = vld [vmem:[%s4706_s29 + $0x14c0] sm:$0xff]  ;;  %1124 = vst [vmem:[%s4714_s30 + $0x528] sm:$0xff] %v1123_v37 }
  0xb6   : > { %v1127_v39 = vld [vmem:[%s4706_s29 + $0x14e0] sm:$0xff]  ;;  %1126 = vst [vmem:[%s4714_s30 + $0x530] sm:$0xff] %v1125_v38 }
  0xb7   : > { %1128 = vst [vmem:[%s4714_s30 + $0x538] sm:$0xff] %v1127_v39  ;;  %v1129_v40 = vld [vmem:[%s4706_s29 + $0x1500] sm:$0xff] }
  0xb8   : > { %v1131_v41 = vld [vmem:[%s4706_s29 + $0x1520] sm:$0xff]  ;;  %1130 = vst [vmem:[%s4714_s30 + $0x540] sm:$0xff] %v1129_v40 }
  0xb9   : > { %v1133_v42 = vld [vmem:[%s4706_s29 + $0x1540] sm:$0xff]  ;;  %1132 = vst [vmem:[%s4714_s30 + $0x548] sm:$0xff] %v1131_v41 }
  0xba   : > { %1134 = vst [vmem:[%s4714_s30 + $0x550] sm:$0xff] %v1133_v42  ;;  %v1135_v43 = vld [vmem:[%s4706_s29 + $0x1560] sm:$0xff] }
  0xbb   : > { %v1137_v44 = vld [vmem:[%s4706_s29 + $0x1580] sm:$0xff]  ;;  %1136 = vst [vmem:[%s4714_s30 + $0x558] sm:$0xff] %v1135_v43 }
  0xbc   : > { %v1139_v45 = vld [vmem:[%s4706_s29 + $0x15a0] sm:$0xff]  ;;  %1138 = vst [vmem:[%s4714_s30 + $0x560] sm:$0xff] %v1137_v44 }
  0xbd   : > { %1140 = vst [vmem:[%s4714_s30 + $0x568] sm:$0xff] %v1139_v45  ;;  %v1141_v46 = vld [vmem:[%s4706_s29 + $0x15c0] sm:$0xff] }
  0xbe   : > { %v1143_v47 = vld [vmem:[%s4706_s29 + $0x15e0] sm:$0xff]  ;;  %1142 = vst [vmem:[%s4714_s30 + $0x570] sm:$0xff] %v1141_v46 }
  0xbf   : > { %v1145_v48 = vld [vmem:[%s4706_s29 + $0x1600] sm:$0xff]  ;;  %1144 = vst [vmem:[%s4714_s30 + $0x578] sm:$0xff] %v1143_v47 }
  0xc0   : > { %1146 = vst [vmem:[%s4714_s30 + $0x580] sm:$0xff] %v1145_v48  ;;  %v1147_v49 = vld [vmem:[%s4706_s29 + $0x1620] sm:$0xff] }
  0xc1   : > { %v1149_v50 = vld [vmem:[%s4706_s29 + $0x1640] sm:$0xff]  ;;  %1148 = vst [vmem:[%s4714_s30 + $0x588] sm:$0xff] %v1147_v49 }
  0xc2   : > { %v1151_v51 = vld [vmem:[%s4706_s29 + $0x1660] sm:$0xff]  ;;  %1150 = vst [vmem:[%s4714_s30 + $0x590] sm:$0xff] %v1149_v50 }
  0xc3   : > { %1152 = vst [vmem:[%s4714_s30 + $0x598] sm:$0xff] %v1151_v51  ;;  %v1153_v52 = vld [vmem:[%s4706_s29 + $0x1680] sm:$0xff] }
  0xc4   : > { %v1155_v53 = vld [vmem:[%s4706_s29 + $0x16a0] sm:$0xff]  ;;  %1154 = vst [vmem:[%s4714_s30 + $0x5a0] sm:$0xff] %v1153_v52 }
  0xc5   : > { %v1157_v54 = vld [vmem:[%s4706_s29 + $0x16c0] sm:$0xff]  ;;  %1156 = vst [vmem:[%s4714_s30 + $0x5a8] sm:$0xff] %v1155_v53 }
  0xc6   : > { %1158 = vst [vmem:[%s4714_s30 + $0x5b0] sm:$0xff] %v1157_v54  ;;  %v1159_v55 = vld [vmem:[%s4706_s29 + $0x16e0] sm:$0xff] }
  0xc7   : > { %v1161_v56 = vld [vmem:[%s4706_s29 + $0x1700] sm:$0xff]  ;;  %1160 = vst [vmem:[%s4714_s30 + $0x5b8] sm:$0xff] %v1159_v55 }
  0xc8   : > { %v1163_v57 = vld [vmem:[%s4706_s29 + $0x1720] sm:$0xff]  ;;  %1162 = vst [vmem:[%s4714_s30 + $0x5c0] sm:$0xff] %v1161_v56 }
  0xc9   : > { %1164 = vst [vmem:[%s4714_s30 + $0x5c8] sm:$0xff] %v1163_v57  ;;  %v1165_v58 = vld [vmem:[%s4706_s29 + $0x1740] sm:$0xff] }
  0xca   : > { %v1167_v59 = vld [vmem:[%s4706_s29 + $0x1760] sm:$0xff]  ;;  %1166 = vst [vmem:[%s4714_s30 + $0x5d0] sm:$0xff] %v1165_v58 }
  0xcb   : > { %v1169_v60 = vld [vmem:[%s4706_s29 + $0x1780] sm:$0xff]  ;;  %1168 = vst [vmem:[%s4714_s30 + $0x5d8] sm:$0xff] %v1167_v59 }
  0xcc   : > { %1170 = vst [vmem:[%s4714_s30 + $0x5e0] sm:$0xff] %v1169_v60  ;;  %v1171_v61 = vld [vmem:[%s4706_s29 + $0x17a0] sm:$0xff] }
  0xcd   : > { %v1173_v62 = vld [vmem:[%s4706_s29 + $0x17c0] sm:$0xff]  ;;  %1172 = vst [vmem:[%s4714_s30 + $0x5e8] sm:$0xff] %v1171_v61 }
  0xce   : > { %v1175_v63 = vld [vmem:[%s4706_s29 + $0x17e0] sm:$0xff]  ;;  %1174 = vst [vmem:[%s4714_s30 + $0x5f0] sm:$0xff] %v1173_v62 }
  0xcf   : > { %1176 = vst [vmem:[%s4714_s30 + $0x5f8] sm:$0xff] %v1175_v63  ;;  %v1177_v0 = vld [vmem:[%s4706_s29 + $0x1800] sm:$0xff] }
  0xd0   : > { %v1179_v1 = vld [vmem:[%s4706_s29 + $0x1820] sm:$0xff]  ;;  %1178 = vst [vmem:[%s4714_s30 + $0x600] sm:$0xff] %v1177_v0 }
  0xd1   : > { %v1181_v2 = vld [vmem:[%s4706_s29 + $0x1840] sm:$0xff]  ;;  %1180 = vst [vmem:[%s4714_s30 + $0x608] sm:$0xff] %v1179_v1 }
  0xd2   : > { %1182 = vst [vmem:[%s4714_s30 + $0x610] sm:$0xff] %v1181_v2  ;;  %v1183_v3 = vld [vmem:[%s4706_s29 + $0x1860] sm:$0xff] }
  0xd3   : > { %v1185_v4 = vld [vmem:[%s4706_s29 + $0x1880] sm:$0xff]  ;;  %1184 = vst [vmem:[%s4714_s30 + $0x618] sm:$0xff] %v1183_v3 }
  0xd4   : > { %v1187_v5 = vld [vmem:[%s4706_s29 + $0x18a0] sm:$0xff]  ;;  %1186 = vst [vmem:[%s4714_s30 + $0x620] sm:$0xff] %v1185_v4 }
  0xd5   : > { %1188 = vst [vmem:[%s4714_s30 + $0x628] sm:$0xff] %v1187_v5  ;;  %v1189_v6 = vld [vmem:[%s4706_s29 + $0x18c0] sm:$0xff] }
  0xd6   : > { %v1191_v7 = vld [vmem:[%s4706_s29 + $0x18e0] sm:$0xff]  ;;  %1190 = vst [vmem:[%s4714_s30 + $0x630] sm:$0xff] %v1189_v6 }
  0xd7   : > { %v1193_v8 = vld [vmem:[%s4706_s29 + $0x1900] sm:$0xff]  ;;  %1192 = vst [vmem:[%s4714_s30 + $0x638] sm:$0xff] %v1191_v7 }
  0xd8   : > { %1194 = vst [vmem:[%s4714_s30 + $0x640] sm:$0xff] %v1193_v8  ;;  %v1195_v9 = vld [vmem:[%s4706_s29 + $0x1920] sm:$0xff] }
  0xd9   : > { %v1197_v10 = vld [vmem:[%s4706_s29 + $0x1940] sm:$0xff]  ;;  %1196 = vst [vmem:[%s4714_s30 + $0x648] sm:$0xff] %v1195_v9 }
  0xda   : > { %v1199_v11 = vld [vmem:[%s4706_s29 + $0x1960] sm:$0xff]  ;;  %1198 = vst [vmem:[%s4714_s30 + $0x650] sm:$0xff] %v1197_v10 }
  0xdb   : > { %1200 = vst [vmem:[%s4714_s30 + $0x658] sm:$0xff] %v1199_v11  ;;  %v1201_v12 = vld [vmem:[%s4706_s29 + $0x1980] sm:$0xff] }
  0xdc   : > { %v1203_v13 = vld [vmem:[%s4706_s29 + $0x19a0] sm:$0xff]  ;;  %1202 = vst [vmem:[%s4714_s30 + $0x660] sm:$0xff] %v1201_v12 }
  0xdd   : > { %v1205_v14 = vld [vmem:[%s4706_s29 + $0x19c0] sm:$0xff]  ;;  %1204 = vst [vmem:[%s4714_s30 + $0x668] sm:$0xff] %v1203_v13 }
  0xde   : > { %1206 = vst [vmem:[%s4714_s30 + $0x670] sm:$0xff] %v1205_v14  ;;  %v1207_v15 = vld [vmem:[%s4706_s29 + $0x19e0] sm:$0xff] }
  0xdf   : > { %v1209_v16 = vld [vmem:[%s4706_s29 + $0x1a00] sm:$0xff]  ;;  %1208 = vst [vmem:[%s4714_s30 + $0x678] sm:$0xff] %v1207_v15 }
  0xe0   : > { %v1211_v17 = vld [vmem:[%s4706_s29 + $0x1a20] sm:$0xff]  ;;  %1210 = vst [vmem:[%s4714_s30 + $0x680] sm:$0xff] %v1209_v16 }
  0xe1   : > { %1212 = vst [vmem:[%s4714_s30 + $0x688] sm:$0xff] %v1211_v17  ;;  %v1213_v18 = vld [vmem:[%s4706_s29 + $0x1a40] sm:$0xff] }
  0xe2   : > { %v1215_v19 = vld [vmem:[%s4706_s29 + $0x1a60] sm:$0xff]  ;;  %1214 = vst [vmem:[%s4714_s30 + $0x690] sm:$0xff] %v1213_v18 }
  0xe3   : > { %v1217_v20 = vld [vmem:[%s4706_s29 + $0x1a80] sm:$0xff]  ;;  %1216 = vst [vmem:[%s4714_s30 + $0x698] sm:$0xff] %v1215_v19 }
  0xe4   : > { %1218 = vst [vmem:[%s4714_s30 + $0x6a0] sm:$0xff] %v1217_v20  ;;  %v1219_v21 = vld [vmem:[%s4706_s29 + $0x1aa0] sm:$0xff] }
  0xe5   : > { %v1221_v22 = vld [vmem:[%s4706_s29 + $0x1ac0] sm:$0xff]  ;;  %1220 = vst [vmem:[%s4714_s30 + $0x6a8] sm:$0xff] %v1219_v21 }
  0xe6   : > { %v1223_v23 = vld [vmem:[%s4706_s29 + $0x1ae0] sm:$0xff]  ;;  %1222 = vst [vmem:[%s4714_s30 + $0x6b0] sm:$0xff] %v1221_v22 }
  0xe7   : > { %1224 = vst [vmem:[%s4714_s30 + $0x6b8] sm:$0xff] %v1223_v23  ;;  %v1225_v24 = vld [vmem:[%s4706_s29 + $0x1b00] sm:$0xff] }
  0xe8   : > { %v1227_v25 = vld [vmem:[%s4706_s29 + $0x1b20] sm:$0xff]  ;;  %1226 = vst [vmem:[%s4714_s30 + $0x6c0] sm:$0xff] %v1225_v24 }
  0xe9   : > { %v1229_v26 = vld [vmem:[%s4706_s29 + $0x1b40] sm:$0xff]  ;;  %1228 = vst [vmem:[%s4714_s30 + $0x6c8] sm:$0xff] %v1227_v25 }
  0xea   : > { %1230 = vst [vmem:[%s4714_s30 + $0x6d0] sm:$0xff] %v1229_v26  ;;  %v1231_v27 = vld [vmem:[%s4706_s29 + $0x1b60] sm:$0xff] }
  0xeb   : > { %v1233_v28 = vld [vmem:[%s4706_s29 + $0x1b80] sm:$0xff]  ;;  %1232 = vst [vmem:[%s4714_s30 + $0x6d8] sm:$0xff] %v1231_v27 }
  0xec   : > { %v1235_v29 = vld [vmem:[%s4706_s29 + $0x1ba0] sm:$0xff]  ;;  %1234 = vst [vmem:[%s4714_s30 + $0x6e0] sm:$0xff] %v1233_v28 }
  0xed   : > { %1236 = vst [vmem:[%s4714_s30 + $0x6e8] sm:$0xff] %v1235_v29  ;;  %v1237_v30 = vld [vmem:[%s4706_s29 + $0x1bc0] sm:$0xff] }
  0xee   : > { %v1239_v31 = vld [vmem:[%s4706_s29 + $0x1be0] sm:$0xff]  ;;  %1238 = vst [vmem:[%s4714_s30 + $0x6f0] sm:$0xff] %v1237_v30 }
  0xef   : > { %v1241_v32 = vld [vmem:[%s4706_s29 + $0x1c00] sm:$0xff]  ;;  %1240 = vst [vmem:[%s4714_s30 + $0x6f8] sm:$0xff] %v1239_v31 }
  0xf0   : > { %1242 = vst [vmem:[%s4714_s30 + $0x700] sm:$0xff] %v1241_v32  ;;  %v1243_v33 = vld [vmem:[%s4706_s29 + $0x1c20] sm:$0xff] }
  0xf1   : > { %v1245_v34 = vld [vmem:[%s4706_s29 + $0x1c40] sm:$0xff]  ;;  %1244 = vst [vmem:[%s4714_s30 + $0x708] sm:$0xff] %v1243_v33 }
  0xf2   : > { %v1247_v35 = vld [vmem:[%s4706_s29 + $0x1c60] sm:$0xff]  ;;  %1246 = vst [vmem:[%s4714_s30 + $0x710] sm:$0xff] %v1245_v34 }
  0xf3   : > { %1248 = vst [vmem:[%s4714_s30 + $0x718] sm:$0xff] %v1247_v35  ;;  %v1249_v36 = vld [vmem:[%s4706_s29 + $0x1c80] sm:$0xff] }
  0xf4   : > { %v1251_v37 = vld [vmem:[%s4706_s29 + $0x1ca0] sm:$0xff]  ;;  %1250 = vst [vmem:[%s4714_s30 + $0x720] sm:$0xff] %v1249_v36 }
  0xf5   : > { %v1253_v38 = vld [vmem:[%s4706_s29 + $0x1cc0] sm:$0xff]  ;;  %1252 = vst [vmem:[%s4714_s30 + $0x728] sm:$0xff] %v1251_v37 }
  0xf6   : > { %1254 = vst [vmem:[%s4714_s30 + $0x730] sm:$0xff] %v1253_v38  ;;  %v1255_v39 = vld [vmem:[%s4706_s29 + $0x1ce0] sm:$0xff] }
  0xf7   : > { %v1257_v40 = vld [vmem:[%s4706_s29 + $0x1d00] sm:$0xff]  ;;  %1256 = vst [vmem:[%s4714_s30 + $0x738] sm:$0xff] %v1255_v39 }
  0xf8   : > { %v1259_v41 = vld [vmem:[%s4706_s29 + $0x1d20] sm:$0xff]  ;;  %1258 = vst [vmem:[%s4714_s30 + $0x740] sm:$0xff] %v1257_v40 }
  0xf9   : > { %1260 = vst [vmem:[%s4714_s30 + $0x748] sm:$0xff] %v1259_v41  ;;  %v1261_v42 = vld [vmem:[%s4706_s29 + $0x1d40] sm:$0xff] }
  0xfa   : > { %v1263_v43 = vld [vmem:[%s4706_s29 + $0x1d60] sm:$0xff]  ;;  %1262 = vst [vmem:[%s4714_s30 + $0x750] sm:$0xff] %v1261_v42 }
  0xfb   : > { %v1265_v44 = vld [vmem:[%s4706_s29 + $0x1d80] sm:$0xff]  ;;  %1264 = vst [vmem:[%s4714_s30 + $0x758] sm:$0xff] %v1263_v43 }
  0xfc   : > { %1266 = vst [vmem:[%s4714_s30 + $0x760] sm:$0xff] %v1265_v44  ;;  %v1267_v45 = vld [vmem:[%s4706_s29 + $0x1da0] sm:$0xff] }
  0xfd   : > { %v1269_v46 = vld [vmem:[%s4706_s29 + $0x1dc0] sm:$0xff]  ;;  %1268 = vst [vmem:[%s4714_s30 + $0x768] sm:$0xff] %v1267_v45 }
  0xfe   : > { %v1271_v47 = vld [vmem:[%s4706_s29 + $0x1de0] sm:$0xff]  ;;  %1270 = vst [vmem:[%s4714_s30 + $0x770] sm:$0xff] %v1269_v46 }
  0xff   : > { %1272 = vst [vmem:[%s4714_s30 + $0x778] sm:$0xff] %v1271_v47  ;;  %v1273_v48 = vld [vmem:[%s4706_s29 + $0x1e00] sm:$0xff] }
 0x100   : > { %v1275_v49 = vld [vmem:[%s4706_s29 + $0x1e20] sm:$0xff]  ;;  %1274 = vst [vmem:[%s4714_s30 + $0x780] sm:$0xff] %v1273_v48 }
 0x101   : > { %v1277_v50 = vld [vmem:[%s4706_s29 + $0x1e40] sm:$0xff]  ;;  %1276 = vst [vmem:[%s4714_s30 + $0x788] sm:$0xff] %v1275_v49 }
 0x102   : > { %1278 = vst [vmem:[%s4714_s30 + $0x790] sm:$0xff] %v1277_v50  ;;  %v1279_v51 = vld [vmem:[%s4706_s29 + $0x1e60] sm:$0xff] }
 0x103   : > { %v1281_v52 = vld [vmem:[%s4706_s29 + $0x1e80] sm:$0xff]  ;;  %1280 = vst [vmem:[%s4714_s30 + $0x798] sm:$0xff] %v1279_v51 }
 0x104   : > { %v1283_v53 = vld [vmem:[%s4706_s29 + $0x1ea0] sm:$0xff]  ;;  %1282 = vst [vmem:[%s4714_s30 + $0x7a0] sm:$0xff] %v1281_v52 }
 0x105   : > { %1284 = vst [vmem:[%s4714_s30 + $0x7a8] sm:$0xff] %v1283_v53  ;;  %v1285_v54 = vld [vmem:[%s4706_s29 + $0x1ec0] sm:$0xff] }
 0x106   : > { %v1287_v55 = vld [vmem:[%s4706_s29 + $0x1ee0] sm:$0xff]  ;;  %1286 = vst [vmem:[%s4714_s30 + $0x7b0] sm:$0xff] %v1285_v54 }
 0x107   : > { %v1289_v56 = vld [vmem:[%s4706_s29 + $0x1f00] sm:$0xff]  ;;  %1288 = vst [vmem:[%s4714_s30 + $0x7b8] sm:$0xff] %v1287_v55 }
 0x108   : > { %1290 = vst [vmem:[%s4714_s30 + $0x7c0] sm:$0xff] %v1289_v56  ;;  %v1291_v57 = vld [vmem:[%s4706_s29 + $0x1f20] sm:$0xff] }
 0x109   : > { %v1293_v58 = vld [vmem:[%s4706_s29 + $0x1f40] sm:$0xff]  ;;  %1292 = vst [vmem:[%s4714_s30 + $0x7c8] sm:$0xff] %v1291_v57 }
 0x10a   : > { %v1295_v59 = vld [vmem:[%s4706_s29 + $0x1f60] sm:$0xff]  ;;  %1294 = vst [vmem:[%s4714_s30 + $0x7d0] sm:$0xff] %v1293_v58 }
 0x10b   : > { %1296 = vst [vmem:[%s4714_s30 + $0x7d8] sm:$0xff] %v1295_v59  ;;  %v1297_v60 = vld [vmem:[%s4706_s29 + $0x1f80] sm:$0xff] }
 0x10c   : > { %v1299_v61 = vld [vmem:[%s4706_s29 + $0x1fa0] sm:$0xff]  ;;  %1298 = vst [vmem:[%s4714_s30 + $0x7e0] sm:$0xff] %v1297_v60 }
 0x10d   : > { %v1301_v62 = vld [vmem:[%s4706_s29 + $0x1fc0] sm:$0xff]  ;;  %1300 = vst [vmem:[%s4714_s30 + $0x7e8] sm:$0xff] %v1299_v61 }
 0x10e   : > { %1302 = vst [vmem:[%s4714_s30 + $0x7f0] sm:$0xff] %v1301_v62  ;;  %v1303_v63 = vld [vmem:[%s4706_s29 + $0x1fe0] sm:$0xff] }
 0x10f   : > { %v1305_v0 = vld [vmem:[%s4706_s29 + $0x2000] sm:$0xff]  ;;  %1304 = vst [vmem:[%s4714_s30 + $0x7f8] sm:$0xff] %v1303_v63 }
 0x110   : > { %v1307_v1 = vld [vmem:[%s4706_s29 + $0x2020] sm:$0xff]  ;;  %1306 = vst [vmem:[%s4714_s30 + $0x800] sm:$0xff] %v1305_v0 }
 0x111   : > { %1308 = vst [vmem:[%s4714_s30 + $0x808] sm:$0xff] %v1307_v1  ;;  %v1309_v2 = vld [vmem:[%s4706_s29 + $0x2040] sm:$0xff] }
 0x112   : > { %v1311_v3 = vld [vmem:[%s4706_s29 + $0x2060] sm:$0xff]  ;;  %1310 = vst [vmem:[%s4714_s30 + $0x810] sm:$0xff] %v1309_v2 }
 0x113   : > { %v1313_v4 = vld [vmem:[%s4706_s29 + $0x2080] sm:$0xff]  ;;  %1312 = vst [vmem:[%s4714_s30 + $0x818] sm:$0xff] %v1311_v3 }
 0x114   : > { %1314 = vst [vmem:[%s4714_s30 + $0x820] sm:$0xff] %v1313_v4  ;;  %v1315_v5 = vld [vmem:[%s4706_s29 + $0x20a0] sm:$0xff] }
 0x115   : > { %v1317_v6 = vld [vmem:[%s4706_s29 + $0x20c0] sm:$0xff]  ;;  %1316 = vst [vmem:[%s4714_s30 + $0x828] sm:$0xff] %v1315_v5 }
 0x116   : > { %v1319_v7 = vld [vmem:[%s4706_s29 + $0x20e0] sm:$0xff]  ;;  %1318 = vst [vmem:[%s4714_s30 + $0x830] sm:$0xff] %v1317_v6 }
 0x117   : > { %1320 = vst [vmem:[%s4714_s30 + $0x838] sm:$0xff] %v1319_v7  ;;  %v1321_v8 = vld [vmem:[%s4706_s29 + $0x2100] sm:$0xff] }
 0x118   : > { %v1323_v9 = vld [vmem:[%s4706_s29 + $0x2120] sm:$0xff]  ;;  %1322 = vst [vmem:[%s4714_s30 + $0x840] sm:$0xff] %v1321_v8 }
 0x119   : > { %v1325_v10 = vld [vmem:[%s4706_s29 + $0x2140] sm:$0xff]  ;;  %1324 = vst [vmem:[%s4714_s30 + $0x848] sm:$0xff] %v1323_v9 }
 0x11a   : > { %1326 = vst [vmem:[%s4714_s30 + $0x850] sm:$0xff] %v1325_v10  ;;  %v1327_v11 = vld [vmem:[%s4706_s29 + $0x2160] sm:$0xff] }
 0x11b   : > { %v1329_v12 = vld [vmem:[%s4706_s29 + $0x2180] sm:$0xff]  ;;  %1328 = vst [vmem:[%s4714_s30 + $0x858] sm:$0xff] %v1327_v11 }
 0x11c   : > { %v1331_v13 = vld [vmem:[%s4706_s29 + $0x21a0] sm:$0xff]  ;;  %1330 = vst [vmem:[%s4714_s30 + $0x860] sm:$0xff] %v1329_v12 }
 0x11d   : > { %1332 = vst [vmem:[%s4714_s30 + $0x868] sm:$0xff] %v1331_v13  ;;  %v1333_v14 = vld [vmem:[%s4706_s29 + $0x21c0] sm:$0xff] }
 0x11e   : > { %v1335_v15 = vld [vmem:[%s4706_s29 + $0x21e0] sm:$0xff]  ;;  %1334 = vst [vmem:[%s4714_s30 + $0x870] sm:$0xff] %v1333_v14 }
 0x11f   : > { %v1337_v16 = vld [vmem:[%s4706_s29 + $0x2200] sm:$0xff]  ;;  %1336 = vst [vmem:[%s4714_s30 + $0x878] sm:$0xff] %v1335_v15 }
 0x120   : > { %1338 = vst [vmem:[%s4714_s30 + $0x880] sm:$0xff] %v1337_v16  ;;  %v1339_v17 = vld [vmem:[%s4706_s29 + $0x2220] sm:$0xff] }
 0x121   : > { %v1341_v18 = vld [vmem:[%s4706_s29 + $0x2240] sm:$0xff]  ;;  %1340 = vst [vmem:[%s4714_s30 + $0x888] sm:$0xff] %v1339_v17 }
 0x122   : > { %v1343_v19 = vld [vmem:[%s4706_s29 + $0x2260] sm:$0xff]  ;;  %1342 = vst [vmem:[%s4714_s30 + $0x890] sm:$0xff] %v1341_v18 }
 0x123   : > { %1344 = vst [vmem:[%s4714_s30 + $0x898] sm:$0xff] %v1343_v19  ;;  %v1345_v20 = vld [vmem:[%s4706_s29 + $0x2280] sm:$0xff] }
 0x124   : > { %v1347_v21 = vld [vmem:[%s4706_s29 + $0x22a0] sm:$0xff]  ;;  %1346 = vst [vmem:[%s4714_s30 + $0x8a0] sm:$0xff] %v1345_v20 }
 0x125   : > { %v1349_v22 = vld [vmem:[%s4706_s29 + $0x22c0] sm:$0xff]  ;;  %1348 = vst [vmem:[%s4714_s30 + $0x8a8] sm:$0xff] %v1347_v21 }
 0x126   : > { %1350 = vst [vmem:[%s4714_s30 + $0x8b0] sm:$0xff] %v1349_v22  ;;  %v1351_v23 = vld [vmem:[%s4706_s29 + $0x22e0] sm:$0xff] }
 0x127   : > { %v1353_v24 = vld [vmem:[%s4706_s29 + $0x2300] sm:$0xff]  ;;  %1352 = vst [vmem:[%s4714_s30 + $0x8b8] sm:$0xff] %v1351_v23 }
 0x128   : > { %v1355_v25 = vld [vmem:[%s4706_s29 + $0x2320] sm:$0xff]  ;;  %1354 = vst [vmem:[%s4714_s30 + $0x8c0] sm:$0xff] %v1353_v24 }
 0x129   : > { %1356 = vst [vmem:[%s4714_s30 + $0x8c8] sm:$0xff] %v1355_v25  ;;  %v1357_v26 = vld [vmem:[%s4706_s29 + $0x2340] sm:$0xff] }
 0x12a   : > { %v1359_v27 = vld [vmem:[%s4706_s29 + $0x2360] sm:$0xff]  ;;  %1358 = vst [vmem:[%s4714_s30 + $0x8d0] sm:$0xff] %v1357_v26 }
 0x12b   : > { %v1361_v28 = vld [vmem:[%s4706_s29 + $0x2380] sm:$0xff]  ;;  %1360 = vst [vmem:[%s4714_s30 + $0x8d8] sm:$0xff] %v1359_v27 }
 0x12c   : > { %1362 = vst [vmem:[%s4714_s30 + $0x8e0] sm:$0xff] %v1361_v28  ;;  %v1363_v29 = vld [vmem:[%s4706_s29 + $0x23a0] sm:$0xff] }
 0x12d   : > { %v1365_v30 = vld [vmem:[%s4706_s29 + $0x23c0] sm:$0xff]  ;;  %1364 = vst [vmem:[%s4714_s30 + $0x8e8] sm:$0xff] %v1363_v29 }
 0x12e   : > { %v1367_v31 = vld [vmem:[%s4706_s29 + $0x23e0] sm:$0xff]  ;;  %1366 = vst [vmem:[%s4714_s30 + $0x8f0] sm:$0xff] %v1365_v30 }
 0x12f   : > { %1368 = vst [vmem:[%s4714_s30 + $0x8f8] sm:$0xff] %v1367_v31 }
 0x130 PF: > { %p3792_p6 = scmp.ge.s32.totalorder %s4636_s19, 1  ;;  %p1389_p7 = scmp.lt.s32.totalorder %s4636_s19, 5 }
 0x132   : > { %p1390_p8 = pnand %p3792_p6, %p1389_p7 }
 0x133   : > { %s1396_s5 = sand.u32 (!%p1390_p8), 1, %s4620_s15   ;;  %s3793_s6 = sshll.u32 (!%p1390_p8), %s4628_s17, 1 }
 0x134   : > { %1393 = sbr.rel (%p1390_p8) target bundleno = 838 (0x346), region = 70  ;;  %p1445_p9 = scmp.lt.s32.totalorder (!%p1390_p8), %s3793_s6, 7 }
 0x135   : > { %s4107_s10 = smul.u32 (!%p1390_p8), 2304, %s1396_s5 }
 0x137   : > { %s5303_s11 = scalar_lea.vmem (!%p1390_p8), [#allocation2], %s4107_s10 }
 0x139   : > { %v5292_v32 = vld [vmem:[%s5691_s0] sm:$0xff]  ;;  %v5297_v33 = vld [vmem:[%s5691_s0 + $0x8] sm:$0xff]  ;;  %v4148_v36 = vld [vmem:[%s5303_s11 + $0x74] ss:$8 sps:$4 sm:$0xff]   ;;  %s5703_s6 = smov (!%p1445_p9, %s3793_s6), 7 }
 0x13a   : > { %v3798_v34 = vcombine.high %v5292_v32, %v5292_v32  ;;  %v3800_v35 = vcombine.high %v5297_v33, %v5297_v33  ;;  %v4150_v37 = vld [vmem:[%s5303_s11 + $0x174] ss:$8 sps:$4 sm:$0xff]   ;;  %3264 = vmatprep.subr.bf16.mxu0 %v4148_v36  ;;  %v4152_v38 = vld [vmem:[%s5303_s11 + $0x70] ss:$8 sps:$4 sm:$0xff]   ;;  %v4154_v40 = vld [vmem:[%s5303_s11 + $0x64] ss:$8 sps:$4 sm:$0xff]   ;;  %s1447_s9 = scalar_lea.vmem %s5693_s2, %s5703_s6  ;;  %s1452_s12 = scalar_lea.vmem %s5694_s3, %s5703_s6 }
 0x13b   : > { %v4153_v39 = vld [vmem:[%s5303_s11 + $0x170] ss:$8 sps:$4 sm:$0xff]   ;;  %3305 = vmatprep.subr.bf16.mxu1 %v4150_v37  ;;  %3265 = vmatpush1.bf16.msra.mxu0 %v4152_v38  ;;  %v4156_v41 = vld [vmem:[%s5303_s11 + $0x164] ss:$8 sps:$4 sm:$0xff]   ;;  %v4158_v42 = vld [vmem:[%s5303_s11 + $0x60] ss:$8 sps:$4 sm:$0xff]  }
 0x13c   : > { %3296 = vmatprep.mubr.bf16.mxu0 %v3798_v34  ;;  %3337 = vmatprep.mubr.bf16.mxu1 %v3800_v35  ;;  %v4159_v43 = vld [vmem:[%s5303_s11 + $0x160] ss:$8 sps:$4 sm:$0xff]   ;;  %v4160_v44 = vld [vmem:[%s5303_s11 + $0x54] ss:$8 sps:$4 sm:$0xff]   ;;  %v4164_v46 = vld [vmem:[%s5303_s11 + $0x50] ss:$8 sps:$4 sm:$0xff]  }
 0x13d   : > { %3306 = vmatpush1.bf16.msra.mxu1 %v4153_v39  ;;  %3266 = vmatprep.subr.bf16.mxu0 %v4154_v40  ;;  %v4162_v45 = vld [vmem:[%s5303_s11 + $0x154] ss:$8 sps:$4 sm:$0xff]   ;;  %v4165_v47 = vld [vmem:[%s5303_s11 + $0x150] ss:$8 sps:$4 sm:$0xff]   ;;  %v4166_v48 = vld [vmem:[%s5303_s11 + $0x44] ss:$8 sps:$4 sm:$0xff]  }
 0x13e   : > { %3307 = vmatprep.subr.bf16.mxu1 %v4156_v41  ;;  %v4168_v49 = vld [vmem:[%s5303_s11 + $0x144] ss:$8 sps:$4 sm:$0xff]   ;;  %v4170_v50 = vld [vmem:[%s5303_s11 + $0x40] ss:$8 sps:$4 sm:$0xff]   ;;  %v4172_v52 = vld [vmem:[%s5303_s11 + $0x34] ss:$8 sps:$4 sm:$0xff]   ;;  %v3797_v41 = vcombine.low %v5292_v32, %v5292_v32 }
 0x13f   : > { %3267 = vmatpush1.bf16.msra.mxu0 %v4158_v42  ;;  %v4171_v51 = vld [vmem:[%s5303_s11 + $0x140] ss:$8 sps:$4 sm:$0xff]   ;;  %v4174_v53 = vld [vmem:[%s5303_s11 + $0x134] ss:$8 sps:$4 sm:$0xff]   ;;  %v4176_v54 = vld [vmem:[%s5303_s11 + $0x30] ss:$8 sps:$4 sm:$0xff]   ;;  %v3799_v42 = vcombine.low %v5297_v33, %v5297_v33 }
 0x140   : > { %3268 = vmatprep.subr.bf16.mxu0 %v4160_v44  ;;  %v4177_v55 = vld [vmem:[%s5303_s11 + $0x130] ss:$8 sps:$4 sm:$0xff]   ;;  %v4178_v56 = vld [vmem:[%s5303_s11 + $0x24] ss:$8 sps:$4 sm:$0xff]   ;;  %v4182_v58 = vld [vmem:[%s5303_s11 + $0x20] ss:$8 sps:$4 sm:$0xff]  }
 0x141   : > { %3308 = vmatpush1.bf16.msra.mxu1 %v4159_v43  ;;  %v4180_v57 = vld [vmem:[%s5303_s11 + $0x124] ss:$8 sps:$4 sm:$0xff]   ;;  %v4183_v59 = vld [vmem:[%s5303_s11 + $0x120] ss:$8 sps:$4 sm:$0xff]   ;;  %v4184_v60 = vld [vmem:[%s5303_s11 + $0x14] ss:$8 sps:$4 sm:$0xff]  }
 0x142   : > { %3309 = vmatprep.subr.bf16.mxu1 %v4162_v45  ;;  %v4186_v61 = vld [vmem:[%s5303_s11 + $0x114] ss:$8 sps:$4 sm:$0xff]   ;;  %v4188_v62 = vld [vmem:[%s5303_s11 + $0x10] ss:$8 sps:$4 sm:$0xff]   ;;  %v4190_v0 = vld [vmem:[%s5303_s11 + $0x4] ss:$8 sps:$4 sm:$0xff]  }
 0x143   : > { %3269 = vmatpush1.bf16.msra.mxu0 %v4164_v46  ;;  %v4189_v63 = vld [vmem:[%s5303_s11 + $0x110] ss:$8 sps:$4 sm:$0xff]   ;;  %v4192_v1 = vld [vmem:[%s5303_s11 + $0x104] ss:$8 sps:$4 sm:$0xff]   ;;  %v4194_v2 = vld [vmem:[%s5303_s11] ss:$8 sps:$4 sm:$0xff]  }
 0x144   : > { %3270 = vmatprep.subr.bf16.mxu0 %v4166_v48  ;;  %v4195_v3 = vld [vmem:[%s5303_s11 + $0x100] ss:$8 sps:$4 sm:$0xff]   ;;  %v4196_v4 = vld [vmem:[%s5303_s11 + $0xf4] ss:$8 sps:$4 sm:$0xff]   ;;  %v4200_v6 = vld [vmem:[%s5303_s11 + $0xf0] ss:$8 sps:$4 sm:$0xff]  }
 0x145   : > { %3310 = vmatpush1.bf16.msra.mxu1 %v4165_v47  ;;  %v4198_v5 = vld [vmem:[%s5303_s11 + $0x1f4] ss:$8 sps:$4 sm:$0xff]   ;;  %v4201_v7 = vld [vmem:[%s5303_s11 + $0x1f0] ss:$8 sps:$4 sm:$0xff]   ;;  %v4202_v8 = vld [vmem:[%s5303_s11 + $0xe4] ss:$8 sps:$4 sm:$0xff]  }
 0x146   : > { %3311 = vmatprep.subr.bf16.mxu1 %v4168_v49  ;;  %v4204_v9 = vld [vmem:[%s5303_s11 + $0x1e4] ss:$8 sps:$4 sm:$0xff]   ;;  %v4206_v10 = vld [vmem:[%s5303_s11 + $0xe0] ss:$8 sps:$4 sm:$0xff]   ;;  %v4208_v12 = vld [vmem:[%s5303_s11 + $0xd4] ss:$8 sps:$4 sm:$0xff]  }
 0x147   : > { %3271 = vmatpush1.bf16.msra.mxu0 %v4170_v50  ;;  %v4207_v11 = vld [vmem:[%s5303_s11 + $0x1e0] ss:$8 sps:$4 sm:$0xff]   ;;  %v4210_v13 = vld [vmem:[%s5303_s11 + $0x1d4] ss:$8 sps:$4 sm:$0xff]   ;;  %v4212_v14 = vld [vmem:[%s5303_s11 + $0xd0] ss:$8 sps:$4 sm:$0xff]  }
 0x148   : > { %3272 = vmatprep.subr.bf16.mxu0 %v4172_v52  ;;  %v4213_v15 = vld [vmem:[%s5303_s11 + $0x1d0] ss:$8 sps:$4 sm:$0xff]   ;;  %v4214_v16 = vld [vmem:[%s5303_s11 + $0xc4] ss:$8 sps:$4 sm:$0xff]   ;;  %v4218_v18 = vld [vmem:[%s5303_s11 + $0xc0] ss:$8 sps:$4 sm:$0xff]  }
 0x149   : > { %3312 = vmatpush1.bf16.msra.mxu1 %v4171_v51  ;;  %v4216_v17 = vld [vmem:[%s5303_s11 + $0x1c4] ss:$8 sps:$4 sm:$0xff]   ;;  %v4219_v19 = vld [vmem:[%s5303_s11 + $0x1c0] ss:$8 sps:$4 sm:$0xff]   ;;  %v4220_v20 = vld [vmem:[%s5303_s11 + $0xb4] ss:$8 sps:$4 sm:$0xff]  }
 0x14a   : > { %3313 = vmatprep.subr.bf16.mxu1 %v4174_v53  ;;  %v4222_v21 = vld [vmem:[%s5303_s11 + $0x1b4] ss:$8 sps:$4 sm:$0xff]   ;;  %v4224_v22 = vld [vmem:[%s5303_s11 + $0xb0] ss:$8 sps:$4 sm:$0xff]   ;;  %v4226_v24 = vld [vmem:[%s5303_s11 + $0xa4] ss:$8 sps:$4 sm:$0xff]  }
 0x14b   : > { %3273 = vmatpush1.bf16.msra.mxu0 %v4176_v54  ;;  %v4225_v23 = vld [vmem:[%s5303_s11 + $0x1b0] ss:$8 sps:$4 sm:$0xff]   ;;  %v4228_v25 = vld [vmem:[%s5303_s11 + $0x1a4] ss:$8 sps:$4 sm:$0xff]   ;;  %v4230_v26 = vld [vmem:[%s5303_s11 + $0xa0] ss:$8 sps:$4 sm:$0xff]  }
 0x14c   : > { %3274 = vmatprep.subr.bf16.mxu0 %v4178_v56  ;;  %v4231_v27 = vld [vmem:[%s5303_s11 + $0x1a0] ss:$8 sps:$4 sm:$0xff]   ;;  %v4232_v28 = vld [vmem:[%s5303_s11 + $0x94] ss:$8 sps:$4 sm:$0xff]   ;;  %v4236_v30 = vld [vmem:[%s5303_s11 + $0x90] ss:$8 sps:$4 sm:$0xff]  }
 0x14d   : > { %3314 = vmatpush1.bf16.msra.mxu1 %v4177_v55  ;;  %v4234_v29 = vld [vmem:[%s5303_s11 + $0x194] ss:$8 sps:$4 sm:$0xff]   ;;  %v4237_v31 = vld [vmem:[%s5303_s11 + $0x190] ss:$8 sps:$4 sm:$0xff]   ;;  %v4238_v34 = vld [vmem:[%s5303_s11 + $0x84] ss:$8 sps:$4 sm:$0xff]  }
 0x14e   : > { %3315 = vmatprep.subr.bf16.mxu1 %v4180_v57  ;;  %v4240_v35 = vld [vmem:[%s5303_s11 + $0x184] ss:$8 sps:$4 sm:$0xff]   ;;  %v4242_v36 = vld [vmem:[%s5303_s11 + $0x80] ss:$8 sps:$4 sm:$0xff]   ;;  %v4250_v38 = vld [vmem:[%s5303_s11 + $0x274] ss:$8 sps:$4 sm:$0xff]  }
 0x14f   : > { %3275 = vmatpush1.bf16.msra.mxu0 %v4182_v58  ;;  %v4243_v37 = vld [vmem:[%s5303_s11 + $0x180] ss:$8 sps:$4 sm:$0xff]   ;;  %v4253_v39 = vld [vmem:[%s5303_s11 + $0x374] ss:$8 sps:$4 sm:$0xff]   ;;  %v4248_v43 = vld [vmem:[%s5303_s11 + $0x270] ss:$8 sps:$4 sm:$0xff]  }
 0x150   : > { %3276 = vmatprep.subr.bf16.mxu0 %v4184_v60  ;;  %v5374_v40 = vld [vmem:[%s5691_s0 + $0x10] sm:$0xff]  ;;  %v4256_v45 = vld [vmem:[%s5303_s11 + $0x264] ss:$8 sps:$4 sm:$0xff]   ;;  %v4254_v32 = vld [vmem:[%s5303_s11 + $0x260] ss:$8 sps:$4 sm:$0xff]   ;;  %s3796_s17 = sshll.u32 %s5703_s6, 3 }
 0x151   : > { %3316 = vmatpush1.bf16.msra.mxu1 %v4183_v59  ;;  %v4251_v44 = vld [vmem:[%s5303_s11 + $0x370] ss:$8 sps:$4 sm:$0xff]   ;;  %v4259_v46 = vld [vmem:[%s5303_s11 + $0x364] ss:$8 sps:$4 sm:$0xff]   ;;  %v3802_v47 = vcombine.high %v5374_v40, %v5374_v40  ;;  %v4257_v33 = vld [vmem:[%s5303_s11 + $0x360] ss:$8 sps:$4 sm:$0xff]   ;;  %s1462_s15 = scalar_lea.vmem %s5695_s4, %s3796_s17 }
 0x152   : > { %3317 = vmatprep.subr.bf16.mxu1 %v4186_v61  ;;  %v4262_v48 = vld [vmem:[%s5303_s11 + $0x254] ss:$8 sps:$4 sm:$0xff]   ;;  %v4260_v50 = vld [vmem:[%s5303_s11 + $0x250] ss:$8 sps:$4 sm:$0xff]   ;;  %v4268_v52 = vld [vmem:[%s5303_s11 + $0x244] ss:$8 sps:$4 sm:$0xff]  }
 0x153   : > { %3277 = vmatpush1.bf16.msra.mxu0 %v4188_v62  ;;  %v4265_v49 = vld [vmem:[%s5303_s11 + $0x354] ss:$8 sps:$4 sm:$0xff]   ;;  %v4263_v51 = vld [vmem:[%s5303_s11 + $0x350] ss:$8 sps:$4 sm:$0xff]   ;;  %v4271_v53 = vld [vmem:[%s5303_s11 + $0x344] ss:$8 sps:$4 sm:$0xff]  }
 0x154   : > { %3278 = vmatprep.subr.bf16.mxu0 %v4190_v0  ;;  %v4266_v54 = vld [vmem:[%s5303_s11 + $0x240] ss:$8 sps:$4 sm:$0xff]   ;;  %v4274_v56 = vld [vmem:[%s5303_s11 + $0x234] ss:$8 sps:$4 sm:$0xff]   ;;  %v4272_v58 = vld [vmem:[%s5303_s11 + $0x230] ss:$8 sps:$4 sm:$0xff]  }
 0x155   : > { %3318 = vmatpush1.bf16.msra.mxu1 %v4189_v63  ;;  %v4269_v55 = vld [vmem:[%s5303_s11 + $0x340] ss:$8 sps:$4 sm:$0xff]   ;;  %v4277_v57 = vld [vmem:[%s5303_s11 + $0x334] ss:$8 sps:$4 sm:$0xff]   ;;  %v4275_v59 = vld [vmem:[%s5303_s11 + $0x330] ss:$8 sps:$4 sm:$0xff]  }
 0x156   : > { %3319 = vmatprep.subr.bf16.mxu1 %v4192_v1  ;;  %v4280_v60 = vld [vmem:[%s5303_s11 + $0x224] ss:$8 sps:$4 sm:$0xff]   ;;  %v4278_v62 = vld [vmem:[%s5303_s11 + $0x220] ss:$8 sps:$4 sm:$0xff]   ;;  %v4286_v0 = vld [vmem:[%s5303_s11 + $0x214] ss:$8 sps:$4 sm:$0xff]  }
 0x157   : > { %3279 = vmatpush1.bf16.msra.mxu0 %v4194_v2  ;;  %v4283_v61 = vld [vmem:[%s5303_s11 + $0x324] ss:$8 sps:$4 sm:$0xff]   ;;  %v4281_v63 = vld [vmem:[%s5303_s11 + $0x320] ss:$8 sps:$4 sm:$0xff]   ;;  %v4289_v1 = vld [vmem:[%s5303_s11 + $0x314] ss:$8 sps:$4 sm:$0xff]  }
 0x158   : > { %3280 = vmatprep.subr.bf16.mxu0 %v4196_v4  ;;  %v5409_v2 = vld [vmem:[%s5691_s0 + $0x18] sm:$0xff] }
 0x159   : > { %3320 = vmatpush1.bf16.msra.mxu1 %v4195_v3  ;;  %v4284_v3 = vld [vmem:[%s5303_s11 + $0x210] ss:$8 sps:$4 sm:$0xff]   ;;  %v3804_v4 = vcombine.high %v5409_v2, %v5409_v2 }
 0x15a   : > { %3321 = vmatprep.subr.bf16.mxu1 %v4198_v5  ;;  %v4287_v5 = vld [vmem:[%s5303_s11 + $0x310] ss:$8 sps:$4 sm:$0xff]  }
 0x15b   : > { %3281 = vmatpush2.bf16.msra.mxu0 %v4200_v6  ;;  %v4292_v6 = vld [vmem:[%s5303_s11 + $0x204] ss:$8 sps:$4 sm:$0xff]  }
 0x15c   : > { %3282 = vmatprep.subr.bf16.mxu0 %v4202_v8  ;;  %v4290_v8 = vld [vmem:[%s5303_s11 + $0x200] ss:$8 sps:$4 sm:$0xff]  }
 0x15d   : > { %3322 = vmatpush2.bf16.msra.mxu1 %v4201_v7  ;;  %v4295_v7 = vld [vmem:[%s5303_s11 + $0x304] ss:$8 sps:$4 sm:$0xff]  }
 0x15e   : > { %3323 = vmatprep.subr.bf16.mxu1 %v4204_v9  ;;  %v4293_v9 = vld [vmem:[%s5303_s11 + $0x300] ss:$8 sps:$4 sm:$0xff]  }
 0x15f   : > { %3283 = vmatpush2.bf16.msra.mxu0 %v4206_v10  ;;  %v4298_v10 = vld [vmem:[%s5303_s11 + $0x2f4] ss:$8 sps:$4 sm:$0xff]  }
 0x160   : > { %3284 = vmatprep.subr.bf16.mxu0 %v4208_v12  ;;  %v4296_v12 = vld [vmem:[%s5303_s11 + $0x2f0] ss:$8 sps:$4 sm:$0xff]  }
 0x161   : > { %3324 = vmatpush2.bf16.msra.mxu1 %v4207_v11  ;;  %v4301_v11 = vld [vmem:[%s5303_s11 + $0x3f4] ss:$8 sps:$4 sm:$0xff]  }
 0x162   : > { %3325 = vmatprep.subr.bf16.mxu1 %v4210_v13  ;;  %v4299_v13 = vld [vmem:[%s5303_s11 + $0x3f0] ss:$8 sps:$4 sm:$0xff]  }
 0x163   : > { %3285 = vmatpush2.bf16.msra.mxu0 %v4212_v14  ;;  %v4304_v14 = vld [vmem:[%s5303_s11 + $0x2e4] ss:$8 sps:$4 sm:$0xff]  }
 0x164   : > { %3286 = vmatprep.subr.bf16.mxu0 %v4214_v16  ;;  %v4302_v16 = vld [vmem:[%s5303_s11 + $0x2e0] ss:$8 sps:$4 sm:$0xff]  }
 0x165   : > { %3326 = vmatpush2.bf16.msra.mxu1 %v4213_v15  ;;  %v4307_v15 = vld [vmem:[%s5303_s11 + $0x3e4] ss:$8 sps:$4 sm:$0xff]  }
 0x166   : > { %3327 = vmatprep.subr.bf16.mxu1 %v4216_v17  ;;  %v4305_v17 = vld [vmem:[%s5303_s11 + $0x3e0] ss:$8 sps:$4 sm:$0xff]  }
 0x167   : > { %3287 = vmatpush2.bf16.msra.mxu0 %v4218_v18  ;;  %v4310_v18 = vld [vmem:[%s5303_s11 + $0x2d4] ss:$8 sps:$4 sm:$0xff]  }
 0x168   : > { %3288 = vmatprep.subr.bf16.mxu0 %v4220_v20  ;;  %v4308_v20 = vld [vmem:[%s5303_s11 + $0x2d0] ss:$8 sps:$4 sm:$0xff]  }
 0x169   : > { %3328 = vmatpush2.bf16.msra.mxu1 %v4219_v19  ;;  %v4313_v19 = vld [vmem:[%s5303_s11 + $0x3d4] ss:$8 sps:$4 sm:$0xff]  }
 0x16a   : > { %3329 = vmatprep.subr.bf16.mxu1 %v4222_v21  ;;  %v4311_v21 = vld [vmem:[%s5303_s11 + $0x3d0] ss:$8 sps:$4 sm:$0xff]  }
 0x16b   : > { %3289 = vmatpush2.bf16.msra.mxu0 %v4224_v22  ;;  %v4316_v22 = vld [vmem:[%s5303_s11 + $0x2c4] ss:$8 sps:$4 sm:$0xff]  }
 0x16c   : > { %3290 = vmatprep.subr.bf16.mxu0 %v4226_v24  ;;  %v4314_v24 = vld [vmem:[%s5303_s11 + $0x2c0] ss:$8 sps:$4 sm:$0xff]  }
 0x16d   : > { %3330 = vmatpush2.bf16.msra.mxu1 %v4225_v23  ;;  %v4319_v23 = vld [vmem:[%s5303_s11 + $0x3c4] ss:$8 sps:$4 sm:$0xff]  }
 0x16e   : > { %3331 = vmatprep.subr.bf16.mxu1 %v4228_v25  ;;  %v4317_v25 = vld [vmem:[%s5303_s11 + $0x3c0] ss:$8 sps:$4 sm:$0xff]  }
 0x16f   : > { %3291 = vmatpush2.bf16.msra.mxu0 %v4230_v26  ;;  %v4322_v26 = vld [vmem:[%s5303_s11 + $0x2b4] ss:$8 sps:$4 sm:$0xff]  }
 0x170   : > { %3292 = vmatprep.subr.bf16.mxu0 %v4232_v28  ;;  %v4320_v28 = vld [vmem:[%s5303_s11 + $0x2b0] ss:$8 sps:$4 sm:$0xff]  }
 0x171   : > { %3332 = vmatpush2.bf16.msra.mxu1 %v4231_v27  ;;  %v4325_v27 = vld [vmem:[%s5303_s11 + $0x3b4] ss:$8 sps:$4 sm:$0xff]  }
 0x172   : > { %3333 = vmatprep.subr.bf16.mxu1 %v4234_v29  ;;  %v4323_v29 = vld [vmem:[%s5303_s11 + $0x3b0] ss:$8 sps:$4 sm:$0xff]  }
 0x173   : > { %3293 = vmatpush2.bf16.msra.mxu0 %v4236_v30  ;;  %v4328_v30 = vld [vmem:[%s5303_s11 + $0x2a4] ss:$8 sps:$4 sm:$0xff]  }
 0x174   : > { %3294 = vmatprep.subr.bf16.mxu0 %v4238_v34  ;;  %v4326_v34 = vld [vmem:[%s5303_s11 + $0x2a0] ss:$8 sps:$4 sm:$0xff]  }
 0x175   : > { %3334 = vmatpush2.bf16.msra.mxu1 %v4237_v31  ;;  %v4331_v31 = vld [vmem:[%s5303_s11 + $0x3a4] ss:$8 sps:$4 sm:$0xff]  }
 0x176   : > { %3335 = vmatprep.subr.bf16.mxu1 %v4240_v35  ;;  %v4329_v35 = vld [vmem:[%s5303_s11 + $0x3a0] ss:$8 sps:$4 sm:$0xff]  }
 0x177   : > { %3295 = vmatpush2.bf16.msra.mxu0 %v4242_v36  ;;  %v4334_v36 = vld [vmem:[%s5303_s11 + $0x294] ss:$8 sps:$4 sm:$0xff]  }
 0x178   : > { %3346 = vmatprep.subr.bf16.mxu0 %v4250_v38  ;;  %v4332_v38 = vld [vmem:[%s5303_s11 + $0x290] ss:$8 sps:$4 sm:$0xff]  }
 0x179   : > { %3336 = vmatpush2.bf16.msra.mxu1 %v4243_v37  ;;  %v4337_v37 = vld [vmem:[%s5303_s11 + $0x394] ss:$8 sps:$4 sm:$0xff]  }
 0x17a   : > { %3387 = vmatprep.subr.bf16.mxu1 %v4253_v39  ;;  %3297 = vmatmul.mubr.bf16.vlgmr.msra.gmra.mxu0 %v3797_v41  ;;  %v4335_v39 = vld [vmem:[%s5303_s11 + $0x390] ss:$8 sps:$4 sm:$0xff]   ;;  %v4340_v41 = vld [vmem:[%s5303_s11 + $0x284] ss:$8 sps:$4 sm:$0xff]  }
 0x17b   : > { %3347 = vmatpush1.bf16.msra.mxu0 %v4248_v43  ;;  %3378 = vmatprep.mubr.bf16.mxu0 %v3802_v47  ;;  %v4338_v43 = vld [vmem:[%s5303_s11 + $0x280] ss:$8 sps:$4 sm:$0xff]   ;;  %v3801_v47 = vcombine.low %v5374_v40, %v5374_v40 }
 0x17c   : > { %3338 = vmatmul.mubr.bf16.vlgmr.msra.gmra.mxu1 %v3799_v42  ;;  %3348 = vmatprep.subr.bf16.mxu0 %v4256_v45  ;;  %v4343_v42 = vld [vmem:[%s5303_s11 + $0x384] ss:$8 sps:$4 sm:$0xff]   ;;  %v4348_v45 = vld [vmem:[%s5303_s11 + $0x474] ss:$8 sps:$4 sm:$0xff]  }
 0x17d   : > { %3388 = vmatpush1.bf16.msra.mxu1 %v4251_v44  ;;  %3419 = vmatprep.mubr.bf16.mxu1 %v3804_v4  ;;  %v4341_v44 = vld [vmem:[%s5303_s11 + $0x380] ss:$8 sps:$4 sm:$0xff]   ;;  %v4380_v4 = vld [vmem:[%s5303_s11 + $0x424] ss:$8 sps:$4 sm:$0xff]  }
 0x17e   : > { %3389 = vmatprep.subr.bf16.mxu1 %v4259_v46  ;;  %v4353_v46 = vld [vmem:[%s5303_s11 + $0x574] ss:$8 sps:$4 sm:$0xff]  }
 0x17f   : > { %3349 = vmatpush1.bf16.msra.mxu0 %v4254_v32  ;;  %v4346_v32 = vld [vmem:[%s5303_s11 + $0x470] ss:$8 sps:$4 sm:$0xff]  }
 0x180   : > { %3350 = vmatprep.subr.bf16.mxu0 %v4262_v48  ;;  %v4351_v48 = vld [vmem:[%s5303_s11 + $0x570] ss:$8 sps:$4 sm:$0xff]  }
 0x181   : > { %3390 = vmatpush1.bf16.msra.mxu1 %v4257_v33  ;;  %v3803_v33 = vcombine.low %v5409_v2, %v5409_v2  ;;  %v4372_v2 = vld [vmem:[%s5303_s11 + $0x430] ss:$8 sps:$4 sm:$0xff]  }
 0x182   : > { %3391 = vmatprep.subr.bf16.mxu1 %v4265_v49  ;;  %v5462_v49 = vld [vmem:[%s5691_s0 + $0x20] sm:$0xff] }
 0x183   : > { %3351 = vmatpush1.bf16.msra.mxu0 %v4260_v50  ;;  %v4356_v50 = vld [vmem:[%s5303_s11 + $0x464] ss:$8 sps:$4 sm:$0xff]   ;;  %v3806_v40 = vcombine.high %v5462_v49, %v5462_v49 }
 0x184   : > { %3352 = vmatprep.subr.bf16.mxu0 %v4268_v52  ;;  %v5471_v52 = vld [vmem:[%s5691_s0 + $0x28] sm:$0xff] }
 0x185   : > { %3392 = vmatpush1.bf16.msra.mxu1 %v4263_v51  ;;  %v4359_v51 = vld [vmem:[%s5303_s11 + $0x564] ss:$8 sps:$4 sm:$0xff]  }
 0x186   : > { %3393 = vmatprep.subr.bf16.mxu1 %v4271_v53  ;;  %v4354_v53 = vld [vmem:[%s5303_s11 + $0x460] ss:$8 sps:$4 sm:$0xff]  }
 0x187   : > { %3353 = vmatpush1.bf16.msra.mxu0 %v4266_v54  ;;  %v3808_v54 = vcombine.high %v5471_v52, %v5471_v52 }
 0x188   : > { %3354 = vmatprep.subr.bf16.mxu0 %v4274_v56  ;;  %v4362_v56 = vld [vmem:[%s5303_s11 + $0x454] ss:$8 sps:$4 sm:$0xff]  }
 0x189   : > { %3394 = vmatpush1.bf16.msra.mxu1 %v4269_v55  ;;  %v4357_v55 = vld [vmem:[%s5303_s11 + $0x560] ss:$8 sps:$4 sm:$0xff]  }
 0x18a   : > { %3395 = vmatprep.subr.bf16.mxu1 %v4277_v57  ;;  %v4365_v57 = vld [vmem:[%s5303_s11 + $0x554] ss:$8 sps:$4 sm:$0xff]  }
 0x18b   : > { %3355 = vmatpush1.bf16.msra.mxu0 %v4272_v58  ;;  %v4360_v58 = vld [vmem:[%s5303_s11 + $0x450] ss:$8 sps:$4 sm:$0xff]  }
 0x18c   : > { %3356 = vmatprep.subr.bf16.mxu0 %v4280_v60  ;;  %v4368_v60 = vld [vmem:[%s5303_s11 + $0x444] ss:$8 sps:$4 sm:$0xff]  }
 0x18d   : > { %3396 = vmatpush1.bf16.msra.mxu1 %v4275_v59  ;;  %v4363_v59 = vld [vmem:[%s5303_s11 + $0x550] ss:$8 sps:$4 sm:$0xff]  }
 0x18e   : > { %3397 = vmatprep.subr.bf16.mxu1 %v4283_v61  ;;  %v4371_v61 = vld [vmem:[%s5303_s11 + $0x544] ss:$8 sps:$4 sm:$0xff]  }
 0x18f   : > { %3357 = vmatpush1.bf16.msra.mxu0 %v4278_v62  ;;  %v4366_v62 = vld [vmem:[%s5303_s11 + $0x440] ss:$8 sps:$4 sm:$0xff]  }
 0x190   : > { %3358 = vmatprep.subr.bf16.mxu0 %v4286_v0  ;;  %v4374_v0 = vld [vmem:[%s5303_s11 + $0x434] ss:$8 sps:$4 sm:$0xff]  }
 0x191   : > { %3398 = vmatpush1.bf16.msra.mxu1 %v4281_v63  ;;  %v4369_v63 = vld [vmem:[%s5303_s11 + $0x540] ss:$8 sps:$4 sm:$0xff]  }
 0x192   : > { %3399 = vmatprep.subr.bf16.mxu1 %v4289_v1  ;;  %v4377_v1 = vld [vmem:[%s5303_s11 + $0x534] ss:$8 sps:$4 sm:$0xff]  }
 0x193   : > { %3359 = vmatpush1.bf16.msra.mxu0 %v4284_v3  ;;  %v4375_v3 = vld [vmem:[%s5303_s11 + $0x530] ss:$8 sps:$4 sm:$0xff]  }
 0x194   : > { %3360 = vmatprep.subr.bf16.mxu0 %v4292_v6  ;;  %v4378_v6 = vld [vmem:[%s5303_s11 + $0x420] ss:$8 sps:$4 sm:$0xff]  }
 0x195   : > { %3400 = vmatpush1.bf16.msra.mxu1 %v4287_v5  ;;  %v4383_v5 = vld [vmem:[%s5303_s11 + $0x524] ss:$8 sps:$4 sm:$0xff]  }
 0x196   : > { %3401 = vmatprep.subr.bf16.mxu1 %v4295_v7  ;;  %v4381_v7 = vld [vmem:[%s5303_s11 + $0x520] ss:$8 sps:$4 sm:$0xff]  }
 0x197   : > { %3361 = vmatpush1.bf16.msra.mxu0 %v4290_v8  ;;  %v4386_v8 = vld [vmem:[%s5303_s11 + $0x414] ss:$8 sps:$4 sm:$0xff]  }
 0x198   : > { %3362 = vmatprep.subr.bf16.mxu0 %v4298_v10  ;;  %v4384_v10 = vld [vmem:[%s5303_s11 + $0x410] ss:$8 sps:$4 sm:$0xff]  }
 0x199   : > { %3402 = vmatpush1.bf16.msra.mxu1 %v4293_v9  ;;  %v4389_v9 = vld [vmem:[%s5303_s11 + $0x514] ss:$8 sps:$4 sm:$0xff]  }
 0x19a   : > { %3403 = vmatprep.subr.bf16.mxu1 %v4301_v11  ;;  %v4387_v11 = vld [vmem:[%s5303_s11 + $0x510] ss:$8 sps:$4 sm:$0xff]  }
 0x19b   : > { %3363 = vmatpush2.bf16.msra.mxu0 %v4296_v12  ;;  %v4392_v12 = vld [vmem:[%s5303_s11 + $0x404] ss:$8 sps:$4 sm:$0xff]  }
 0x19c   : > { %3364 = vmatprep.subr.bf16.mxu0 %v4304_v14  ;;  %v4390_v14 = vld [vmem:[%s5303_s11 + $0x400] ss:$8 sps:$4 sm:$0xff]  }
 0x19d   : > { %3404 = vmatpush2.bf16.msra.mxu1 %v4299_v13  ;;  %v4395_v13 = vld [vmem:[%s5303_s11 + $0x504] ss:$8 sps:$4 sm:$0xff]  }
 0x19e   : > { %3405 = vmatprep.subr.bf16.mxu1 %v4307_v15  ;;  %v4393_v15 = vld [vmem:[%s5303_s11 + $0x500] ss:$8 sps:$4 sm:$0xff]  }
 0x19f   : > { %3365 = vmatpush2.bf16.msra.mxu0 %v4302_v16  ;;  %v4398_v16 = vld [vmem:[%s5303_s11 + $0x4f4] ss:$8 sps:$4 sm:$0xff]  }
 0x1a0   : > { %3366 = vmatprep.subr.bf16.mxu0 %v4310_v18  ;;  %v4396_v18 = vld [vmem:[%s5303_s11 + $0x4f0] ss:$8 sps:$4 sm:$0xff]  }
 0x1a1   : > { %3406 = vmatpush2.bf16.msra.mxu1 %v4305_v17  ;;  %v4401_v17 = vld [vmem:[%s5303_s11 + $0x5f4] ss:$8 sps:$4 sm:$0xff]  }
 0x1a2   : > { %3407 = vmatprep.subr.bf16.mxu1 %v4313_v19  ;;  %v4399_v19 = vld [vmem:[%s5303_s11 + $0x5f0] ss:$8 sps:$4 sm:$0xff]  }
 0x1a3   : > { %3367 = vmatpush2.bf16.msra.mxu0 %v4308_v20  ;;  %v4404_v20 = vld [vmem:[%s5303_s11 + $0x4e4] ss:$8 sps:$4 sm:$0xff]  }
 0x1a4   : > { %3368 = vmatprep.subr.bf16.mxu0 %v4316_v22  ;;  %v4402_v22 = vld [vmem:[%s5303_s11 + $0x4e0] ss:$8 sps:$4 sm:$0xff]  }
 0x1a5   : > { %3408 = vmatpush2.bf16.msra.mxu1 %v4311_v21  ;;  %v4407_v21 = vld [vmem:[%s5303_s11 + $0x5e4] ss:$8 sps:$4 sm:$0xff]  }
 0x1a6   : > { %3409 = vmatprep.subr.bf16.mxu1 %v4319_v23  ;;  %v4405_v23 = vld [vmem:[%s5303_s11 + $0x5e0] ss:$8 sps:$4 sm:$0xff]  }
 0x1a7   : > { %3369 = vmatpush2.bf16.msra.mxu0 %v4314_v24  ;;  %v4410_v24 = vld [vmem:[%s5303_s11 + $0x4d4] ss:$8 sps:$4 sm:$0xff]  }
 0x1a8   : > { %3370 = vmatprep.subr.bf16.mxu0 %v4322_v26  ;;  %v4408_v26 = vld [vmem:[%s5303_s11 + $0x4d0] ss:$8 sps:$4 sm:$0xff]  }
 0x1a9   : > { %3410 = vmatpush2.bf16.msra.mxu1 %v4317_v25  ;;  %v4413_v25 = vld [vmem:[%s5303_s11 + $0x5d4] ss:$8 sps:$4 sm:$0xff]  }
 0x1aa   : > { %3411 = vmatprep.subr.bf16.mxu1 %v4325_v27  ;;  %v4411_v27 = vld [vmem:[%s5303_s11 + $0x5d0] ss:$8 sps:$4 sm:$0xff]  }
 0x1ab   : > { %3371 = vmatpush2.bf16.msra.mxu0 %v4320_v28  ;;  %v4416_v28 = vld [vmem:[%s5303_s11 + $0x4c4] ss:$8 sps:$4 sm:$0xff]  }
 0x1ac   : > { %3372 = vmatprep.subr.bf16.mxu0 %v4328_v30  ;;  %v4414_v30 = vld [vmem:[%s5303_s11 + $0x4c0] ss:$8 sps:$4 sm:$0xff]  }
 0x1ad   : > { %3412 = vmatpush2.bf16.msra.mxu1 %v4323_v29  ;;  %v4419_v29 = vld [vmem:[%s5303_s11 + $0x5c4] ss:$8 sps:$4 sm:$0xff]  }
 0x1ae   : > { %3413 = vmatprep.subr.bf16.mxu1 %v4331_v31  ;;  %v4417_v31 = vld [vmem:[%s5303_s11 + $0x5c0] ss:$8 sps:$4 sm:$0xff]  }
 0x1af   : > { %3373 = vmatpush2.bf16.msra.mxu0 %v4326_v34  ;;  %v4422_v34 = vld [vmem:[%s5303_s11 + $0x4b4] ss:$8 sps:$4 sm:$0xff]  }
 0x1b0   : > { %3374 = vmatprep.subr.bf16.mxu0 %v4334_v36  ;;  %v4420_v36 = vld [vmem:[%s5303_s11 + $0x4b0] ss:$8 sps:$4 sm:$0xff]  }
 0x1b1   : > { %3414 = vmatpush2.bf16.msra.mxu1 %v4329_v35  ;;  %v4425_v35 = vld [vmem:[%s5303_s11 + $0x5b4] ss:$8 sps:$4 sm:$0xff]  }
 0x1b2   : > { %3415 = vmatprep.subr.bf16.mxu1 %v4337_v37  ;;  %v4423_v37 = vld [vmem:[%s5303_s11 + $0x5b0] ss:$8 sps:$4 sm:$0xff]  }
 0x1b3   : > { %3375 = vmatpush2.bf16.msra.mxu0 %v4332_v38  ;;  %v4428_v38 = vld [vmem:[%s5303_s11 + $0x4a4] ss:$8 sps:$4 sm:$0xff]  }
 0x1b4   : > { %3376 = vmatprep.subr.bf16.mxu0 %v4340_v41  ;;  %v4426_v41 = vld [vmem:[%s5303_s11 + $0x4a0] ss:$8 sps:$4 sm:$0xff]  }
 0x1b5   : > { %3416 = vmatpush2.bf16.msra.mxu1 %v4335_v39  ;;  %v4431_v39 = vld [vmem:[%s5303_s11 + $0x5a4] ss:$8 sps:$4 sm:$0xff]  }
 0x1b6   : > { %3417 = vmatprep.subr.bf16.mxu1 %v4343_v42  ;;  %v4429_v42 = vld [vmem:[%s5303_s11 + $0x5a0] ss:$8 sps:$4 sm:$0xff]  }
 0x1b7   : > { %3377 = vmatpush2.bf16.msra.mxu0 %v4338_v43  ;;  %v4434_v43 = vld [vmem:[%s5303_s11 + $0x494] ss:$8 sps:$4 sm:$0xff]  }
 0x1b8   : > { %3428 = vmatprep.subr.bf16.mxu0 %v4348_v45  ;;  %v4432_v45 = vld [vmem:[%s5303_s11 + $0x490] ss:$8 sps:$4 sm:$0xff]  }
 0x1b9   : > { %3418 = vmatpush2.bf16.msra.mxu1 %v4341_v44  ;;  %v4437_v44 = vld [vmem:[%s5303_s11 + $0x594] ss:$8 sps:$4 sm:$0xff]  }
 0x1ba   : > { %3469 = vmatprep.subr.bf16.mxu1 %v4353_v46  ;;  %3379 = vmatmul.mubr.bf16.vlgmr.msra.gmra.mxu0 %v3801_v47  ;;  %v4435_v46 = vld [vmem:[%s5303_s11 + $0x590] ss:$8 sps:$4 sm:$0xff]   ;;  %v4440_v47 = vld [vmem:[%s5303_s11 + $0x484] ss:$8 sps:$4 sm:$0xff]  }
 0x1bb   : > { %3429 = vmatpush1.bf16.msra.mxu0 %v4346_v32  ;;  %3460 = vmatprep.mubr.bf16.mxu0 %v3806_v40  ;;  %v4443_v32 = vld [vmem:[%s5303_s11 + $0x584] ss:$8 sps:$4 sm:$0xff]   ;;  %v4446_v40 = vld [vmem:[%s5303_s11 + $0x670] ss:$8 sps:$4 sm:$0xff]  }
 0x1bc   : > { %3420 = vmatmul.mubr.bf16.vlgmr.msra.gmra.mxu1 %v3803_v33  ;;  %3430 = vmatprep.subr.bf16.mxu0 %v4356_v50  ;;  %v4438_v33 = vld [vmem:[%s5303_s11 + $0x480] ss:$8 sps:$4 sm:$0xff]   ;;  %v4448_v50 = vld [vmem:[%s5303_s11 + $0x674] ss:$8 sps:$4 sm:$0xff]  }
 0x1bd   : > { %3470 = vmatpush1.bf16.msra.mxu1 %v4351_v48  ;;  %3501 = vmatprep.mubr.bf16.mxu1 %v3808_v54  ;;  %v4441_v48 = vld [vmem:[%s5303_s11 + $0x580] ss:$8 sps:$4 sm:$0xff]   ;;  %v3805_v54 = vcombine.low %v5462_v49, %v5462_v49 }
 0x1be   : > { %3471 = vmatprep.subr.bf16.mxu1 %v4359_v51  ;;  %v4453_v51 = vld [vmem:[%s5303_s11 + $0x774] ss:$8 sps:$4 sm:$0xff]  }
 0x1bf   : > { %3431 = vmatpush1.bf16.msra.mxu0 %v4354_v53  ;;  %v5539_v53 = vld [vmem:[%s5691_s0 + $0x30] sm:$0xff] }
 0x1c0   : > { %3432 = vmatprep.subr.bf16.mxu0 %v4362_v56  ;;  %v5548_v56 = vld [vmem:[%s5691_s0 + $0x38] sm:$0xff]  ;;  %v3810_v49 = vcombine.high %v5539_v53, %v5539_v53 }
 0x1c1   : > { %3472 = vmatpush1.bf16.msra.mxu1 %v4357_v55  ;;  %v3807_v55 = vcombine.low %v5471_v52, %v5471_v52  ;;  %v3812_v52 = vcombine.high %v5548_v56, %v5548_v56 }
 0x1c2   : > { %3473 = vmatprep.subr.bf16.mxu1 %v4365_v57  ;;  %v4451_v57 = vld [vmem:[%s5303_s11 + $0x770] ss:$8 sps:$4 sm:$0xff]  }
 0x1c3   : > { %3433 = vmatpush1.bf16.msra.mxu0 %v4360_v58  ;;  %v4456_v58 = vld [vmem:[%s5303_s11 + $0x664] ss:$8 sps:$4 sm:$0xff]  }
 0x1c4   : > { %3434 = vmatprep.subr.bf16.mxu0 %v4368_v60  ;;  %v4454_v60 = vld [vmem:[%s5303_s11 + $0x660] ss:$8 sps:$4 sm:$0xff]  }
 0x1c5   : > { %3474 = vmatpush1.bf16.msra.mxu1 %v4363_v59  ;;  %v4459_v59 = vld [vmem:[%s5303_s11 + $0x764] ss:$8 sps:$4 sm:$0xff]  }
 0x1c6   : > { %3475 = vmatprep.subr.bf16.mxu1 %v4371_v61  ;;  %v4457_v61 = vld [vmem:[%s5303_s11 + $0x760] ss:$8 sps:$4 sm:$0xff]  }
 0x1c7   : > { %3435 = vmatpush1.bf16.msra.mxu0 %v4366_v62  ;;  %v4462_v62 = vld [vmem:[%s5303_s11 + $0x654] ss:$8 sps:$4 sm:$0xff]  }
 0x1c8   : > { %3436 = vmatprep.subr.bf16.mxu0 %v4374_v0  ;;  %v4460_v0 = vld [vmem:[%s5303_s11 + $0x650] ss:$8 sps:$4 sm:$0xff]  }
 0x1c9   : > { %3476 = vmatpush1.bf16.msra.mxu1 %v4369_v63  ;;  %v4465_v63 = vld [vmem:[%s5303_s11 + $0x754] ss:$8 sps:$4 sm:$0xff]  }
 0x1ca   : > { %3477 = vmatprep.subr.bf16.mxu1 %v4377_v1  ;;  %v4463_v1 = vld [vmem:[%s5303_s11 + $0x750] ss:$8 sps:$4 sm:$0xff]  }
 0x1cb   : > { %3437 = vmatpush1.bf16.msra.mxu0 %v4372_v2  ;;  %v4468_v2 = vld [vmem:[%s5303_s11 + $0x644] ss:$8 sps:$4 sm:$0xff]  }
 0x1cc   : > { %3438 = vmatprep.subr.bf16.mxu0 %v4380_v4  ;;  %v4466_v4 = vld [vmem:[%s5303_s11 + $0x640] ss:$8 sps:$4 sm:$0xff]  }
 0x1cd   : > { %3478 = vmatpush1.bf16.msra.mxu1 %v4375_v3  ;;  %v4471_v3 = vld [vmem:[%s5303_s11 + $0x744] ss:$8 sps:$4 sm:$0xff]  }
 0x1ce   : > { %3479 = vmatprep.subr.bf16.mxu1 %v4383_v5  ;;  %v4469_v5 = vld [vmem:[%s5303_s11 + $0x740] ss:$8 sps:$4 sm:$0xff]  }
 0x1cf   : > { %3439 = vmatpush1.bf16.msra.mxu0 %v4378_v6  ;;  %v4474_v6 = vld [vmem:[%s5303_s11 + $0x634] ss:$8 sps:$4 sm:$0xff]  }
 0x1d0   : > { %3440 = vmatprep.subr.bf16.mxu0 %v4386_v8  ;;  %v4472_v8 = vld [vmem:[%s5303_s11 + $0x630] ss:$8 sps:$4 sm:$0xff]  }
 0x1d1   : > { %3480 = vmatpush1.bf16.msra.mxu1 %v4381_v7  ;;  %v4477_v7 = vld [vmem:[%s5303_s11 + $0x734] ss:$8 sps:$4 sm:$0xff]  }
 0x1d2   : > { %3481 = vmatprep.subr.bf16.mxu1 %v4389_v9  ;;  %v4475_v9 = vld [vmem:[%s5303_s11 + $0x730] ss:$8 sps:$4 sm:$0xff]  }
 0x1d3   : > { %3441 = vmatpush1.bf16.msra.mxu0 %v4384_v10  ;;  %v4480_v10 = vld [vmem:[%s5303_s11 + $0x624] ss:$8 sps:$4 sm:$0xff]  }
 0x1d4   : > { %3442 = vmatprep.subr.bf16.mxu0 %v4392_v12  ;;  %v4478_v12 = vld [vmem:[%s5303_s11 + $0x620] ss:$8 sps:$4 sm:$0xff]  }
 0x1d5   : > { %3482 = vmatpush1.bf16.msra.mxu1 %v4387_v11  ;;  %v4483_v11 = vld [vmem:[%s5303_s11 + $0x724] ss:$8 sps:$4 sm:$0xff]  }
 0x1d6   : > { %3483 = vmatprep.subr.bf16.mxu1 %v4395_v13  ;;  %v4481_v13 = vld [vmem:[%s5303_s11 + $0x720] ss:$8 sps:$4 sm:$0xff]  }
 0x1d7   : > { %3443 = vmatpush1.bf16.msra.mxu0 %v4390_v14  ;;  %v4486_v14 = vld [vmem:[%s5303_s11 + $0x614] ss:$8 sps:$4 sm:$0xff]  }
 0x1d8   : > { %3444 = vmatprep.subr.bf16.mxu0 %v4398_v16  ;;  %v4484_v16 = vld [vmem:[%s5303_s11 + $0x610] ss:$8 sps:$4 sm:$0xff]  }
 0x1d9   : > { %3484 = vmatpush1.bf16.msra.mxu1 %v4393_v15  ;;  %v4489_v15 = vld [vmem:[%s5303_s11 + $0x714] ss:$8 sps:$4 sm:$0xff]  }
 0x1da   : > { %3485 = vmatprep.subr.bf16.mxu1 %v4401_v17  ;;  %v4487_v17 = vld [vmem:[%s5303_s11 + $0x710] ss:$8 sps:$4 sm:$0xff]  }
 0x1db   : > { %3445 = vmatpush2.bf16.msra.mxu0 %v4396_v18  ;;  %v4492_v18 = vld [vmem:[%s5303_s11 + $0x604] ss:$8 sps:$4 sm:$0xff]  }
 0x1dc   : > { %3446 = vmatprep.subr.bf16.mxu0 %v4404_v20  ;;  %v4490_v20 = vld [vmem:[%s5303_s11 + $0x600] ss:$8 sps:$4 sm:$0xff]  }
 0x1dd   : > { %3486 = vmatpush2.bf16.msra.mxu1 %v4399_v19  ;;  %v4495_v19 = vld [vmem:[%s5303_s11 + $0x704] ss:$8 sps:$4 sm:$0xff]  }
 0x1de   : > { %3487 = vmatprep.subr.bf16.mxu1 %v4407_v21  ;;  %v4493_v21 = vld [vmem:[%s5303_s11 + $0x700] ss:$8 sps:$4 sm:$0xff]  }
 0x1df   : > { %3447 = vmatpush2.bf16.msra.mxu0 %v4402_v22  ;;  %v4498_v22 = vld [vmem:[%s5303_s11 + $0x6f4] ss:$8 sps:$4 sm:$0xff]  }
 0x1e0   : > { %3448 = vmatprep.subr.bf16.mxu0 %v4410_v24  ;;  %v4496_v24 = vld [vmem:[%s5303_s11 + $0x6f0] ss:$8 sps:$4 sm:$0xff]  }
 0x1e1   : > { %3488 = vmatpush2.bf16.msra.mxu1 %v4405_v23  ;;  %v4501_v23 = vld [vmem:[%s5303_s11 + $0x7f4] ss:$8 sps:$4 sm:$0xff]  }
 0x1e2   : > { %3489 = vmatprep.subr.bf16.mxu1 %v4413_v25  ;;  %v4499_v25 = vld [vmem:[%s5303_s11 + $0x7f0] ss:$8 sps:$4 sm:$0xff]  }
 0x1e3   : > { %3449 = vmatpush2.bf16.msra.mxu0 %v4408_v26  ;;  %v4504_v26 = vld [vmem:[%s5303_s11 + $0x6e4] ss:$8 sps:$4 sm:$0xff]  }
 0x1e4   : > { %3450 = vmatprep.subr.bf16.mxu0 %v4416_v28  ;;  %v4502_v28 = vld [vmem:[%s5303_s11 + $0x6e0] ss:$8 sps:$4 sm:$0xff]  }
 0x1e5   : > { %3490 = vmatpush2.bf16.msra.mxu1 %v4411_v27  ;;  %v4507_v27 = vld [vmem:[%s5303_s11 + $0x7e4] ss:$8 sps:$4 sm:$0xff]  }
 0x1e6   : > { %3491 = vmatprep.subr.bf16.mxu1 %v4419_v29  ;;  %v4505_v29 = vld [vmem:[%s5303_s11 + $0x7e0] ss:$8 sps:$4 sm:$0xff]  }
 0x1e7   : > { %3451 = vmatpush2.bf16.msra.mxu0 %v4414_v30  ;;  %v4510_v30 = vld [vmem:[%s5303_s11 + $0x6d4] ss:$8 sps:$4 sm:$0xff]  }
 0x1e8   : > { %3452 = vmatprep.subr.bf16.mxu0 %v4422_v34  ;;  %v4508_v34 = vld [vmem:[%s5303_s11 + $0x6d0] ss:$8 sps:$4 sm:$0xff]  }
 0x1e9   : > { %3492 = vmatpush2.bf16.msra.mxu1 %v4417_v31  ;;  %v4513_v31 = vld [vmem:[%s5303_s11 + $0x7d4] ss:$8 sps:$4 sm:$0xff]  }
 0x1ea   : > { %3493 = vmatprep.subr.bf16.mxu1 %v4425_v35  ;;  %v4511_v35 = vld [vmem:[%s5303_s11 + $0x7d0] ss:$8 sps:$4 sm:$0xff]  }
 0x1eb   : > { %3453 = vmatpush2.bf16.msra.mxu0 %v4420_v36  ;;  %v4516_v36 = vld [vmem:[%s5303_s11 + $0x6c4] ss:$8 sps:$4 sm:$0xff]  }
 0x1ec   : > { %3454 = vmatprep.subr.bf16.mxu0 %v4428_v38  ;;  %v4514_v38 = vld [vmem:[%s5303_s11 + $0x6c0] ss:$8 sps:$4 sm:$0xff]  }
 0x1ed   : > { %3494 = vmatpush2.bf16.msra.mxu1 %v4423_v37  ;;  %v4519_v37 = vld [vmem:[%s5303_s11 + $0x7c4] ss:$8 sps:$4 sm:$0xff]  }
 0x1ee   : > { %3495 = vmatprep.subr.bf16.mxu1 %v4431_v39  ;;  %v4517_v39 = vld [vmem:[%s5303_s11 + $0x7c0] ss:$8 sps:$4 sm:$0xff]  }
 0x1ef   : > { %3455 = vmatpush2.bf16.msra.mxu0 %v4426_v41  ;;  %v4522_v41 = vld [vmem:[%s5303_s11 + $0x6b4] ss:$8 sps:$4 sm:$0xff]  }
 0x1f0   : > { %3456 = vmatprep.subr.bf16.mxu0 %v4434_v43  ;;  %v4520_v43 = vld [vmem:[%s5303_s11 + $0x6b0] ss:$8 sps:$4 sm:$0xff]  }
 0x1f1   : > { %3496 = vmatpush2.bf16.msra.mxu1 %v4429_v42  ;;  %v4525_v42 = vld [vmem:[%s5303_s11 + $0x7b4] ss:$8 sps:$4 sm:$0xff]  }
 0x1f2   : > { %3497 = vmatprep.subr.bf16.mxu1 %v4437_v44  ;;  %v4523_v44 = vld [vmem:[%s5303_s11 + $0x7b0] ss:$8 sps:$4 sm:$0xff]  }
 0x1f3   : > { %3457 = vmatpush2.bf16.msra.mxu0 %v4432_v45  ;;  %v4528_v45 = vld [vmem:[%s5303_s11 + $0x6a4] ss:$8 sps:$4 sm:$0xff]  }
 0x1f4   : > { %3458 = vmatprep.subr.bf16.mxu0 %v4440_v47  ;;  %v4526_v47 = vld [vmem:[%s5303_s11 + $0x6a0] ss:$8 sps:$4 sm:$0xff]  }
 0x1f5   : > { %3498 = vmatpush2.bf16.msra.mxu1 %v4435_v46  ;;  %v4531_v46 = vld [vmem:[%s5303_s11 + $0x7a4] ss:$8 sps:$4 sm:$0xff]  }
 0x1f6   : > { %3499 = vmatprep.subr.bf16.mxu1 %v4443_v32  ;;  %v4529_v32 = vld [vmem:[%s5303_s11 + $0x7a0] ss:$8 sps:$4 sm:$0xff]  }
 0x1f7   : > { %3459 = vmatpush2.bf16.msra.mxu0 %v4438_v33  ;;  %v4534_v33 = vld [vmem:[%s5303_s11 + $0x694] ss:$8 sps:$4 sm:$0xff]  }
 0x1f8   : > { %3510 = vmatprep.subr.bf16.mxu0 %v4448_v50  ;;  %v4532_v50 = vld [vmem:[%s5303_s11 + $0x690] ss:$8 sps:$4 sm:$0xff]  }
 0x1f9   : > { %3500 = vmatpush2.bf16.msra.mxu1 %v4441_v48  ;;  %v4537_v48 = vld [vmem:[%s5303_s11 + $0x794] ss:$8 sps:$4 sm:$0xff]  }
 0x1fa   : > { %3551 = vmatprep.subr.bf16.mxu1 %v4453_v51  ;;  %3461 = vmatmul.mubr.bf16.vlgmr.msra.gmra.mxu0 %v3805_v54  ;;  %v4535_v51 = vld [vmem:[%s5303_s11 + $0x790] ss:$8 sps:$4 sm:$0xff]   ;;  %v4543_v54 = vld [vmem:[%s5303_s11 + $0x784] ss:$8 sps:$4 sm:$0xff]  }
 0x1fb   : > { %3511 = vmatpush1.bf16.msra.mxu0 %v4446_v40  ;;  %3542 = vmatprep.mubr.bf16.mxu0 %v3810_v49  ;;  %v4540_v40 = vld [vmem:[%s5303_s11 + $0x684] ss:$8 sps:$4 sm:$0xff]   ;;  %v3809_v49 = vcombine.low %v5539_v53, %v5539_v53  ;;  %v4551_v53 = vld [vmem:[%s5303_s11 + $0x860] ss:$8 sps:$4 sm:$0xff]  }
 0x1fc   : > { %3502 = vmatmul.mubr.bf16.vlgmr.msra.gmra.mxu1 %v3807_v55  ;;  %3512 = vmatprep.subr.bf16.mxu0 %v4456_v58  ;;  %v4538_v55 = vld [vmem:[%s5303_s11 + $0x680] ss:$8 sps:$4 sm:$0xff]   ;;  %v4548_v58 = vld [vmem:[%s5303_s11 + $0x874] ss:$8 sps:$4 sm:$0xff]  }
 0x1fd   : > { %3552 = vmatpush1.bf16.msra.mxu1 %v4451_v57  ;;  %3583 = vmatprep.mubr.bf16.mxu1 %v3812_v52  ;;  %v4541_v57 = vld [vmem:[%s5303_s11 + $0x780] ss:$8 sps:$4 sm:$0xff]   ;;  %v3811_v52 = vcombine.low %v5548_v56, %v5548_v56 }
 0x1fe   : > { %3553 = vmatprep.subr.bf16.mxu1 %v4459_v59  ;;  %v5619_v59 = vld [vmem:[%s5691_s0 + $0x40] sm:$0xff] }
 0x1ff   : > { %3513 = vmatpush1.bf16.msra.mxu0 %v4454_v60  ;;  %v4546_v60 = vld [vmem:[%s5303_s11 + $0x870] ss:$8 sps:$4 sm:$0xff]  }
 0x200   : > { %3514 = vmatprep.subr.bf16.mxu0 %v4462_v62  ;;  %v4553_v62 = vld [vmem:[%s5303_s11 + $0x864] ss:$8 sps:$4 sm:$0xff]  }
 0x201   : > { %3554 = vmatpush1.bf16.msra.mxu1 %v4457_v61  ;;  %v3814_v61 = vcombine.high %v5619_v59, %v5619_v59 }
 0x202   : > { %3555 = vmatprep.subr.bf16.mxu1 %v4465_v63 }
 0x203   : > { %3515 = vmatpush1.bf16.msra.mxu0 %v4460_v0 }
 0x204   : > { %3516 = vmatprep.subr.bf16.mxu0 %v4468_v2 }
 0x205   : > { %3556 = vmatpush1.bf16.msra.mxu1 %v4463_v1 }
 0x206   : > { %3557 = vmatprep.subr.bf16.mxu1 %v4471_v3  ;;  %v4556_v3 = vld [vmem:[%s5303_s11 + $0x854] ss:$8 sps:$4 sm:$0xff]  }
 0x207   : > { %3517 = vmatpush1.bf16.msra.mxu0 %v4466_v4 }
 0x208   : > { %3518 = vmatprep.subr.bf16.mxu0 %v4474_v6 }
 0x209   : > { %3558 = vmatpush1.bf16.msra.mxu1 %v4469_v5 }
 0x20a   : > { %3559 = vmatprep.subr.bf16.mxu1 %v4477_v7  ;;  %v4554_v7 = vld [vmem:[%s5303_s11 + $0x850] ss:$8 sps:$4 sm:$0xff]  }
 0x20b   : > { %3519 = vmatpush1.bf16.msra.mxu0 %v4472_v8 }
 0x20c   : > { %3520 = vmatprep.subr.bf16.mxu0 %v4480_v10 }
 0x20d   : > { %3560 = vmatpush1.bf16.msra.mxu1 %v4475_v9  ;;  %v4559_v9 = vld [vmem:[%s5303_s11 + $0x844] ss:$8 sps:$4 sm:$0xff]  }
 0x20e   : > { %3561 = vmatprep.subr.bf16.mxu1 %v4483_v11  ;;  %v4557_v11 = vld [vmem:[%s5303_s11 + $0x840] ss:$8 sps:$4 sm:$0xff]  }
 0x20f   : > { %3521 = vmatpush1.bf16.msra.mxu0 %v4478_v12  ;;  %v4562_v12 = vld [vmem:[%s5303_s11 + $0x834] ss:$8 sps:$4 sm:$0xff]  }
 0x210   : > { %3522 = vmatprep.subr.bf16.mxu0 %v4486_v14  ;;  %v4565_v14 = vld [vmem:[%s5303_s11 + $0x824] ss:$8 sps:$4 sm:$0xff]  }
 0x211   : > { %3562 = vmatpush1.bf16.msra.mxu1 %v4481_v13  ;;  %v4560_v13 = vld [vmem:[%s5303_s11 + $0x830] ss:$8 sps:$4 sm:$0xff]  }
 0x212   : > { %3563 = vmatprep.subr.bf16.mxu1 %v4489_v15  ;;  %v4563_v15 = vld [vmem:[%s5303_s11 + $0x820] ss:$8 sps:$4 sm:$0xff]  }
 0x213   : > { %3523 = vmatpush1.bf16.msra.mxu0 %v4484_v16  ;;  %v4568_v16 = vld [vmem:[%s5303_s11 + $0x814] ss:$8 sps:$4 sm:$0xff]  }
 0x214   : > { %3524 = vmatprep.subr.bf16.mxu0 %v4492_v18  ;;  %v4571_v18 = vld [vmem:[%s5303_s11 + $0x804] ss:$8 sps:$4 sm:$0xff]  }
 0x215   : > { %3564 = vmatpush1.bf16.msra.mxu1 %v4487_v17  ;;  %v4566_v17 = vld [vmem:[%s5303_s11 + $0x810] ss:$8 sps:$4 sm:$0xff]  }
 0x216   : > { %3565 = vmatprep.subr.bf16.mxu1 %v4495_v19  ;;  %v4569_v19 = vld [vmem:[%s5303_s11 + $0x800] ss:$8 sps:$4 sm:$0xff]  }
 0x217   : > { %3525 = vmatpush1.bf16.msra.mxu0 %v4490_v20  ;;  %v4574_v20 = vld [vmem:[%s5303_s11 + $0x8f4] ss:$8 sps:$4 sm:$0xff]  }
 0x218   : > { %3526 = vmatprep.subr.bf16.mxu0 %v4498_v22  ;;  %v4577_v22 = vld [vmem:[%s5303_s11 + $0x8e4] ss:$8 sps:$4 sm:$0xff]  }
 0x219   : > { %3566 = vmatpush1.bf16.msra.mxu1 %v4493_v21  ;;  %v4572_v21 = vld [vmem:[%s5303_s11 + $0x8f0] ss:$8 sps:$4 sm:$0xff]  }
 0x21a   : > { %3567 = vmatprep.subr.bf16.mxu1 %v4501_v23  ;;  %v4575_v23 = vld [vmem:[%s5303_s11 + $0x8e0] ss:$8 sps:$4 sm:$0xff]  }
 0x21b   : > { %3527 = vmatpush2.bf16.msra.mxu0 %v4496_v24  ;;  %v4580_v24 = vld [vmem:[%s5303_s11 + $0x8d4] ss:$8 sps:$4 sm:$0xff]  }
 0x21c   : > { %3528 = vmatprep.subr.bf16.mxu0 %v4504_v26  ;;  %v4583_v26 = vld [vmem:[%s5303_s11 + $0x8c4] ss:$8 sps:$4 sm:$0xff]  }
 0x21d   : > { %3568 = vmatpush2.bf16.msra.mxu1 %v4499_v25  ;;  %v4578_v25 = vld [vmem:[%s5303_s11 + $0x8d0] ss:$8 sps:$4 sm:$0xff]  }
 0x21e   : > { %3569 = vmatprep.subr.bf16.mxu1 %v4507_v27  ;;  %v4581_v27 = vld [vmem:[%s5303_s11 + $0x8c0] ss:$8 sps:$4 sm:$0xff]  }
 0x21f   : > { %3529 = vmatpush2.bf16.msra.mxu0 %v4502_v28  ;;  %v4586_v28 = vld [vmem:[%s5303_s11 + $0x8b4] ss:$8 sps:$4 sm:$0xff]  }
 0x220   : > { %3530 = vmatprep.subr.bf16.mxu0 %v4510_v30  ;;  %v4589_v30 = vld [vmem:[%s5303_s11 + $0x8a4] ss:$8 sps:$4 sm:$0xff]  }
 0x221   : > { %3570 = vmatpush2.bf16.msra.mxu1 %v4505_v29  ;;  %v4584_v29 = vld [vmem:[%s5303_s11 + $0x8b0] ss:$8 sps:$4 sm:$0xff]  }
 0x222   : > { %3571 = vmatprep.subr.bf16.mxu1 %v4513_v31  ;;  %v4587_v31 = vld [vmem:[%s5303_s11 + $0x8a0] ss:$8 sps:$4 sm:$0xff]  }
 0x223   : > { %3531 = vmatpush2.bf16.msra.mxu0 %v4508_v34  ;;  %v4592_v34 = vld [vmem:[%s5303_s11 + $0x894] ss:$8 sps:$4 sm:$0xff]  }
 0x224   : > { %3532 = vmatprep.subr.bf16.mxu0 %v4516_v36  ;;  %v4595_v36 = vld [vmem:[%s5303_s11 + $0x884] ss:$8 sps:$4 sm:$0xff]  }
 0x225   : > { %3572 = vmatpush2.bf16.msra.mxu1 %v4511_v35  ;;  %v4590_v35 = vld [vmem:[%s5303_s11 + $0x890] ss:$8 sps:$4 sm:$0xff]  }
 0x226   : > { %3573 = vmatprep.subr.bf16.mxu1 %v4519_v37  ;;  %v4593_v37 = vld [vmem:[%s5303_s11 + $0x880] ss:$8 sps:$4 sm:$0xff]  }
 0x227   : > { %3533 = vmatpush2.bf16.msra.mxu0 %v4514_v38  ;;  %v3813_v38 = vcombine.low %v5619_v59, %v5619_v59 }
 0x228   : > { %3534 = vmatprep.subr.bf16.mxu0 %v4522_v41 }
 0x229   : > { %3574 = vmatpush2.bf16.msra.mxu1 %v4517_v39 }
 0x22a   : > { %3575 = vmatprep.subr.bf16.mxu1 %v4525_v42 }
 0x22b   : > { %3535 = vmatpush2.bf16.msra.mxu0 %v4520_v43 }
 0x22c   : > { %3536 = vmatprep.subr.bf16.mxu0 %v4528_v45 }
 0x22d   : > { %3576 = vmatpush2.bf16.msra.mxu1 %v4523_v44 }
 0x22e   : > { %3577 = vmatprep.subr.bf16.mxu1 %v4531_v46 }
 0x22f   : > { %3537 = vmatpush2.bf16.msra.mxu0 %v4526_v47 }
 0x230   : > { %3538 = vmatprep.subr.bf16.mxu0 %v4534_v33 }
 0x231   : > { %3578 = vmatpush2.bf16.msra.mxu1 %v4529_v32 }
 0x232   : > { %3579 = vmatprep.subr.bf16.mxu1 %v4537_v48 }
 0x233   : > { %3539 = vmatpush2.bf16.msra.mxu0 %v4532_v50 }
 0x234   : > { %3540 = vmatprep.subr.bf16.mxu0 %v4540_v40 }
 0x235   : > { %3580 = vmatpush2.bf16.msra.mxu1 %v4535_v51 }
 0x236   : > { %3581 = vmatprep.subr.bf16.mxu1 %v4543_v54 }
 0x237   : > { %3541 = vmatpush2.bf16.msra.mxu0 %v4538_v55 }
 0x238   : > { %3592 = vmatprep.subr.bf16.mxu0 %v4548_v58 }
 0x239   : > { %3582 = vmatpush2.bf16.msra.mxu1 %v4541_v57 }
 0x23a   : > { %v3298_v63 = vpop.f32.mrf.mxu0  ;;  %3543 = vmatmul.mubr.bf16.vlgmr.msra.gmra.mxu0 %v3809_v49 }
 0x23b   : > { %3593 = vmatpush1.bf16.msra.mxu0 %v4546_v60  ;;  %3624 = vmatprep.mubr.bf16.mxu0 %v3814_v61 }
 0x23c   : > { %v3339_v0 = vpop.f32.mrf.mxu1  ;;  %3584 = vmatmul.mubr.bf16.vlgmr.msra.gmra.mxu1 %v3811_v52  ;;  %v3300_v56 = vpop.f32.mrf.mxu0  ;;  %3594 = vmatprep.subr.bf16.mxu0 %v4553_v62 }
 0x23d   : > { %v5629_v1 = vadd.f32 %v3339_v0, %v3298_v63 }
 0x23e   : > { %v3341_v2 = vpop.f32.mrf.mxu1  ;;  %v3302_v5 = vpop.f32.mrf.mxu0 }
 0x23f   : > { %v5633_v4 = vadd.f32 %v3341_v2, %v3300_v56  ;;  %3595 = vmatpush1.bf16.msra.mxu0 %v4551_v53  ;;  %v3635_v5 = vlaneseq }
 0x240   : > { %v3343_v6 = vpop.f32.mrf.mxu1  ;;  %v3303_v8 = vpop.f32.mrf.mxu0  ;;  %3596 = vmatprep.subr.bf16.mxu0 %v4556_v3 }
 0x241   : > { %v3636_v6 = vshrl.u32 %v3635_v5, 7 }
 0x242   : > { %v3344_v10 = vpop.f32.mrf.mxu1 }
 0x243   : > { %3597 = vmatpush1.bf16.msra.mxu0 %v4554_v7  ;;  %v3637_v8 = vsub.s32 0, %v3636_v6 }
 0x244   : > { %3598 = vmatprep.subr.bf16.mxu0 %v4559_v9  ;;  %v3633_v9 = vld [vmem:[%s1447_s9] sm:$0x3] }
 0x247   : > { %3599 = vmatpush1.bf16.msra.mxu0 %v4557_v11  ;;  %v3641_v11 = vsub.s32 1, %v3636_v6 }
 0x248   : > { %3600 = vmatprep.subr.bf16.mxu0 %v4562_v12  ;;  %v3647_v12 = vld [vmem:[%s1452_s12] sm:$0x3] }
 0x24b   : > { %3601 = vmatpush1.bf16.msra.mxu0 %v4560_v13 }
 0x24c   : > { %3602 = vmatprep.subr.bf16.mxu0 %v4565_v14  ;;  %v3638_v14 = vrot.slane %v3633_v9, %v3637_v8 }
 0x24f   : > { %3603 = vmatpush1.bf16.msra.mxu0 %v4563_v15 }
 0x250   : > { %3604 = vmatprep.subr.bf16.mxu0 %v4568_v16 }
 0x253   : > { %3605 = vmatpush1.bf16.msra.mxu0 %v4566_v17 }
 0x254   : > { %3606 = vmatprep.subr.bf16.mxu0 %v4571_v18  ;;  %v3652_v18 = vrot.slane %v3647_v12, %v3637_v8 }
 0x257   : > { %3607 = vmatpush1.bf16.msra.mxu0 %v4569_v19  ;;  %v3642_v19 = vrot.slane %v3633_v9, %v3641_v11 }
 0x258   : > { %3608 = vmatprep.subr.bf16.mxu0 %v4574_v20 }
 0x25b   : > { %3609 = vmatpush2.bf16.msra.mxu0 %v4572_v21 }
 0x25c   : > { %3610 = vmatprep.subr.bf16.mxu0 %v4577_v22 }
 0x25f   : > { %3611 = vmatpush2.bf16.msra.mxu0 %v4575_v23  ;;  %v3656_v23 = vrot.slane %v3647_v12, %v3641_v11 }
 0x260   : > { %3612 = vmatprep.subr.bf16.mxu0 %v4580_v24 }
 0x263   : > { %3613 = vmatpush2.bf16.msra.mxu0 %v4578_v25 }
 0x264   : > { %3614 = vmatprep.subr.bf16.mxu0 %v4583_v26 }
 0x267   : > { %3615 = vmatpush2.bf16.msra.mxu0 %v4581_v27 }
 0x268   : > { %3616 = vmatprep.subr.bf16.mxu0 %v4586_v28 }
 0x26b   : > { %3617 = vmatpush2.bf16.msra.mxu0 %v4584_v29 }
 0x26c   : > { %3618 = vmatprep.subr.bf16.mxu0 %v4589_v30 }
 0x26f   : > { %3619 = vmatpush2.bf16.msra.mxu0 %v4587_v31 }
 0x270   : > { %3620 = vmatprep.subr.bf16.mxu0 %v4592_v34 }
 0x273   : > { %3621 = vmatpush2.bf16.msra.mxu0 %v4590_v35 }
 0x274   : > { %3622 = vmatprep.subr.bf16.mxu0 %v4595_v36 }
 0x277   : > { %3623 = vmatpush2.bf16.msra.mxu0 %v4593_v37 }
 0x27a   : > { %v3380_v39 = vpop.f32.mrf.mxu0  ;;  %3625 = vmatmul.mubr.bf16.vlgmr.msra.gmra.mxu0 %v3813_v38 }
 0x27b   : > { %v3381_v42 = vadd.f32 %v3380_v39, %v5629_v1 }
 0x27c   : > { %v3421_v41 = vpop.f32.mrf.mxu1  ;;  %v3382_v43 = vpop.f32.mrf.mxu0 }
 0x27d   : > { %v3383_v45 = vadd.f32 %v3382_v43, %v5633_v4  ;;  %v3422_v46 = vadd.f32 %v3421_v41, %v3381_v42 }
 0x27e   : > { %v3423_v44 = vpop.f32.mrf.mxu1  ;;  %v3384_v47 = vpop.f32.mrf.mxu0 }
 0x27f   : > { %v3424_v33 = vadd.f32 %v3423_v44, %v3383_v45 }
 0x280   : > { %v3425_v32 = vpop.f32.mrf.mxu1  ;;  %v3385_v48 = vpop.f32.mrf.mxu0 }
 0x282   : > { %v3426_v50 = vpop.f32.mrf.mxu1 }
 0x2ba   : > { %v3462_v51 = vpop.f32.mrf.mxu0 }
 0x2bb   : > { %v3463_v54 = vadd.f32 %v3462_v51, %v3422_v46 }
 0x2bc   : > { %v3503_v40 = vpop.f32.mrf.mxu1  ;;  %v3464_v55 = vpop.f32.mrf.mxu0 }
 0x2bd   : > { %v3465_v58 = vadd.f32 %v3464_v55, %v3424_v33  ;;  %v3504_v59 = vadd.f32 %v3503_v40, %v3463_v54 }
 0x2be   : > { %v3505_v57 = vpop.f32.mrf.mxu1  ;;  %v3466_v49 = vpop.f32.mrf.mxu0 }
 0x2bf   : > { %v3506_v60 = vadd.f32 %v3505_v57, %v3465_v58 }
 0x2c0   : > { %v3507_v52 = vpop.f32.mrf.mxu1  ;;  %v3467_v61 = vpop.f32.mrf.mxu0 }
 0x2c2   : > { %v3508_v62 = vpop.f32.mrf.mxu1 }
 0x2fa   : > { %v3544_v63 = vpop.f32.mrf.mxu0 }
 0x2fb   : > { %v3545_v7 = vadd.f32 %v3544_v63, %v3504_v59 }
 0x2fc   : > { %v3585_v0 = vpop.f32.mrf.mxu1  ;;  %v3546_v1 = vpop.f32.mrf.mxu0 }
 0x2fd   : > { %v3547_v10 = vadd.f32 %v3546_v1, %v3506_v60  ;;  %v3586_v13 = vadd.f32 %v3585_v0, %v3545_v7 }
 0x2fe   : > { %v3587_v53 = vpop.f32.mrf.mxu1  ;;  %v3548_v56 = vpop.f32.mrf.mxu0 }
 0x2ff   : > { %v3588_v16 = vadd.f32 %v3587_v53, %v3547_v10 }
 0x300   : > { %v3589_v2 = vpop.f32.mrf.mxu1  ;;  %v3549_v3 = vpop.f32.mrf.mxu0 }
 0x302   : > { %v3590_v4 = vpop.f32.mrf.mxu1 }
 0x33a   : > { %v3626_v15 = vpop.f32.mrf.mxu0 }
 0x33b   : > { %v3627_v17 = vadd.f32 %v3626_v15, %v3586_v13 }
 0x33c   : > { %v3628_v20 = vpop.f32.mrf.mxu0 }
 0x33d   : > { %v3645_v21 = vmul.f32 %v3638_v14, %v3627_v17  ;;  %v3629_v22 = vadd.f32 %v3628_v20, %v3588_v16 }
 0x33e   : > { %v3630_v24 = vpop.f32.mrf.mxu0 }
 0x33f   : > { %v3659_v25 = vadd.f32 %v3652_v18, %v3645_v21  ;;  %v3646_v26 = vmul.f32 %v3642_v19, %v3629_v22 }
 0x340   : > { %v3631_v27 = vpop.f32.mrf.mxu0 }
 0x341   : > { %v3661_v28 = vmax.f32 %v3659_v25, 0.0  ;;  %v3660_v29 = vadd.f32 %v3656_v23, %v3646_v26 }
 0x343   : > { %3663 = vst [vmem:[%s1462_s15] sm:$0xff] %v3661_v28  ;;  %v3662_v30 = vmax.f32 %v3660_v29, 0.0 }
 0x345   : > { %3664 = vst [vmem:[%s1462_s15 + $0x8] sm:$0xff] %v3662_v30 }
 0x346 PF: > { %s14_s19 = sadd.s32 1, %s4636_s19   ;;  %s5696_s15 = smov %s4624_s16 }
 0x347   : > { %p11_p10 = scmp.ge.s32.totalorder %s14_s19, 6   ;;  %s5697_s16 = smov %s4698_s23 }
 0x348   : > { %s5698_s17 = smov %s4632_s18  ;;  %s5699_s18 = smov %s5701_s20 }
 0x349   :  { %13 = sbr.rel (!%p11_p10) target bundleno = 3 (0x3), region = 118 }

</bundles_post_ra>
